<compile_context>
chip_gen: v7x
topology: tpu7x:2x2x1
jax: 0.10.0
libtpu: 0.0.40
codegen_flags: <defaults>
</compile_context>

<pallas_src>
import functools
import math

import jax
import jax.numpy as jnp
from jax.experimental import pallas as pl
from jax.experimental.pallas import tpu as pltpu


# -------------------- fused whole-model forward kernel --------------------

def _fused_forward_kernel(batch, num_enc, num_dec,
                          x_ref, emb_w_ref, gvec_ref,
                          enc_attn_w_ref, enc_vec_ref,
                          dec_sa_w_ref, ca_w_ref, ca_b_ref, dec_vec_ref,
                          fc_w_ref, b1_all_ref,
                          w1_hbm_ref, w2t_hbm_ref,
                          logits_ref, src_emb_ref,
                          w1_buf, w2t_buf, sems):
    f32 = jnp.float32
    d_model = emb_w_ref.shape[1]
    n_layers = num_enc + num_dec

    # ----- manual double-buffered prefetch of the per-layer FFN weights -----
    # (the FFN stacks are the only material bytes; everything else is resident)
    def start_fetch(layer, slot):
        pltpu.make_async_copy(w1_hbm_ref.at[layer], w1_buf.at[slot],
                              sems.at[0, slot]).start()
        pltpu.make_async_copy(w2t_hbm_ref.at[layer], w2t_buf.at[slot],
                              sems.at[1, slot]).start()

    def wait_fetch(slot):
        pltpu.make_async_copy(w1_hbm_ref.at[0], w1_buf.at[slot],
                              sems.at[0, slot]).wait()
        pltpu.make_async_copy(w2t_hbm_ref.at[0], w2t_buf.at[slot],
                              sems.at[1, slot]).wait()

    # Issue layer 0's FFN weight fetch first so it overlaps the embedding,
    # the fused attention matmuls and the LayerNorms below.
    start_fetch(0, 0)

    def linear(x, w, b):
        return jnp.dot(x.astype(w.dtype), w, preferred_element_type=f32) + b

    def layernorm(x, g, b, eps=1e-5):
        # var = E[x^2] - E[x]^2: both reductions issue from the same input.
        mean = jnp.mean(x, axis=-1, keepdims=True)
        mean_sq = jnp.mean(x * x, axis=-1, keepdims=True)
        var = mean_sq - mean * mean
        return (x - mean) * jax.lax.rsqrt(var + eps) * g + b

    def ffn(x, layer_idx, b2):
        slot = layer_idx & 1
        wait_fetch(slot)
        if layer_idx + 1 < n_layers:              # prefetch next layer's weights
            start_fetch(layer_idx + 1, 1 - slot)
        b1 = b1_all_ref[pl.ds(layer_idx, 1), :]   # (1, dim_ff)
        h = jnp.dot(x.astype(w1_buf.dtype), w1_buf[slot],
                    preferred_element_type=f32) + b1
        h = jnp.maximum(h, 0.0)
        # w2 kept transposed (out, in): its 2048-wide axis stays lane-dense.
        return jax.lax.dot_general(
            h.astype(w2t_buf.dtype), w2t_buf[slot],
            dimension_numbers=(((1,), (1,)), ((), ())),
            preferred_element_type=f32) + b2

    gvec = gvec_ref[...]      # packed global vectors: one (8,128)-padded tile

    # shared embedding for src and tgt (concatenated) -> one matmul.
    emb = linear(x_ref[...], emb_w_ref[...], gvec[0:1])
    src_emb = emb[:batch]
    tgt_emb = emb[batch:]
    src_emb_ref[...] = src_emb

    # ----- encoder stack (post-norm) + final encoder LayerNorm -----
    layer_idx = 0
    mem = src_emb
    for l in range(num_enc):
        vv = enc_vec_ref[l]                    # (6, d_model) packed per-layer vecs
        # seq_len == 1 -> MHA == out_proj(v_proj(x)); folded offline to one matmul.
        a = linear(mem, enc_attn_w_ref[l], vv[0:1])
        mem = layernorm(mem + a, vv[1:2], vv[2:3])
        ff = ffn(mem, layer_idx, vv[3:4])
        mem = layernorm(mem + ff, vv[4:5], vv[5:6])
        layer_idx += 1
    mem = layernorm(mem, gvec[1:2], gvec[2:3])

    # All decoder cross-attentions depend only on `mem` (seq_len == 1), not on
    # the decoder state: one wide batched matmul, sliced per layer below.
    ca_all = linear(mem, ca_w_ref[...], ca_b_ref[...])   # (B, num_dec * d_model)

    # ----- decoder stack (post-norm) + final decoder LayerNorm -----
    out = tgt_emb
    for l in range(num_dec):
        vv = dec_vec_ref[l]                    # (8, d_model)
        a = linear(out, dec_sa_w_ref[l], vv[0:1])
        out = layernorm(out + a, vv[1:2], vv[2:3])
        ca = ca_all[:, l * d_model:(l + 1) * d_model]
        out = layernorm(out + ca, vv[3:4], vv[4:5])
        ff = ffn(out, layer_idx, vv[5:6])
        out = layernorm(out + ff, vv[6:7], vv[7:8])
        layer_idx += 1
    out = layernorm(out, gvec[3:4], gvec[4:5])

    # fc(transformer_output[:, -1]) -- seq length is 1, so [-1] is the only step.
    num_classes = fc_w_ref.shape[1]
    logits_ref[...] = linear(out, fc_w_ref[...], gvec[5:6, :num_classes])
    # TODO(synk): nn.Dropout (inside nn.Transformer and the final self.dropout)
    # is identity here (eval-mode / inference semantics).


# -------------------- wrapper --------------------

@jax.jit
def forward(kp, src, tgt):
    B = src.shape[0]
    d_model = kp["emb_w"].shape[1]
    num_classes = kp["fc_w"].shape[1]
    num_enc = kp["enc_attn_w"].shape[0]
    num_dec = kp["dec_sa_w"].shape[0]
    dim_ff = kp["w1_all"].shape[2]
    ffn_dtype = kp["w1_all"].dtype

    x = jnp.concatenate([src, tgt], axis=0)     # one shared-embedding matmul

    vmem = pl.BlockSpec(memory_space=pltpu.MemorySpace.VMEM)
    hbm = pl.BlockSpec(memory_space=pl.ANY)     # raw HBM ref, manual DMA in-kernel
    kernel = functools.partial(_fused_forward_kernel, B, num_enc, num_dec)

    logits, src_emb = pl.pallas_call(
        kernel,
        out_shape=(jax.ShapeDtypeStruct((B, num_classes), jnp.float32),
                   jax.ShapeDtypeStruct((B, d_model), jnp.float32)),
        in_specs=[vmem] * 11 + [hbm, hbm],
        out_specs=(vmem, vmem),
        scratch_shapes=[
            pltpu.VMEM((2, d_model, dim_ff), ffn_dtype),   # w1 double buffer
            pltpu.VMEM((2, d_model, dim_ff), ffn_dtype),   # w2^T double buffer
            pltpu.SemaphoreType.DMA((2, 2)),
        ],
    )(x, kp["emb_w"], kp["gvec"], kp["enc_attn_w"], kp["enc_vec"],
      kp["dec_sa_w"], kp["ca_w"], kp["ca_b"], kp["dec_vec"],
      kp["fc_w"], kp["b1_all"], kp["w1_all"], kp["w2t_all"])
    # module returns (dropout(fc_out), src_emb.unsqueeze(1)); dropout = identity.
    return logits, src_emb.reshape(B, 1, d_model)


# -------------------- parameter init (torch-like layout) --------------------

def init_params(key, input_dim, d_model, num_enc, num_dec, num_classes, dim_ff):
    kit = iter(jax.random.split(key, 1024))

    def dense(fan_in, fan_out):
        bound = 1.0 / math.sqrt(fan_in)
        w = jax.random.uniform(next(kit), (fan_in, fan_out), jnp.float32, -bound, bound)
        b = jax.random.uniform(next(kit), (fan_out,), jnp.float32, -bound, bound)
        return w, b

    def mha_p(dm):
        wq, bq = dense(dm, dm)
        wk, bk = dense(dm, dm)
        wv, bv = dense(dm, dm)
        wo, bo = dense(dm, dm)
        return dict(wq=wq, bq=bq, wk=wk, bk=bk, wv=wv, bv=bv, wo=wo, bo=bo)

    def ln_p(dm):
        return jnp.ones((dm,), jnp.float32), jnp.zeros((dm,), jnp.float32)

    emb_w, emb_b = dense(input_dim, d_model)

    enc_layers = []
    for _ in range(num_enc):
        w1, b1 = dense(d_model, dim_ff)
        w2, b2 = dense(dim_ff, d_model)
        n1g, n1b = ln_p(d_model)
        n2g, n2b = ln_p(d_model)
        enc_layers.append(dict(self_attn=mha_p(d_model), w1=w1, b1=b1, w2=w2, b2=b2,
                               n1g=n1g, n1b=n1b, n2g=n2g, n2b=n2b))

    dec_layers = []
    for _ in range(num_dec):
        w1, b1 = dense(d_model, dim_ff)
        w2, b2 = dense(dim_ff, d_model)
        n1g, n1b = ln_p(d_model)
        n2g, n2b = ln_p(d_model)
        n3g, n3b = ln_p(d_model)
        dec_layers.append(dict(self_attn=mha_p(d_model), cross_attn=mha_p(d_model),
                               w1=w1, b1=b1, w2=w2, b2=b2,
                               n1g=n1g, n1b=n1b, n2g=n2g, n2b=n2b, n3g=n3g, n3b=n3b))

    enc_ng, enc_nb = ln_p(d_model)
    dec_ng, dec_nb = ln_p(d_model)
    fc_w, fc_b = dense(d_model, num_classes)

    return dict(emb_w=emb_w, emb_b=emb_b,
                enc_layers=enc_layers, dec_layers=dec_layers,
                enc_ng=enc_ng, enc_nb=enc_nb, dec_ng=dec_ng, dec_nb=dec_nb,
                fc_w=fc_w, fc_b=fc_b)


# -------------------- repack into the fused-kernel layout --------------------

def build_kernel_params(params, matmul_dtype=jnp.bfloat16):
    """Fold out_proj into v_proj, batch the cross-attn weights, pack all small
    vectors into a few slabs, stack FFN weights (w2 transposed, lane-dense)."""
    d_model = params["emb_w"].shape[1]
    num_classes = params["fc_w"].shape[1]
    assert num_classes <= d_model

    def fuse_attn(ap):
        # seq_len == 1: MHA(x) == out_proj(v_proj(x)); exact linear composition.
        w = ap["wv"] @ ap["wo"]
        b = ap["bv"] @ ap["wo"] + ap["bo"]
        return w, b

    enc_layers = params["enc_layers"]
    dec_layers = params["dec_layers"]

    enc_attn = [fuse_attn(lp["self_attn"]) for lp in enc_layers]
    dec_sa = [fuse_attn(lp["self_attn"]) for lp in dec_layers]
    dec_ca = [fuse_attn(lp["cross_attn"]) for lp in dec_layers]

    enc_attn_w = jnp.stack([w for w, _ in enc_attn]).astype(matmul_dtype)
    dec_sa_w = jnp.stack([w for w, _ in dec_sa]).astype(matmul_dtype)
    ca_w = jnp.concatenate([w for w, _ in dec_ca], axis=1).astype(matmul_dtype)
    ca_b = jnp.concatenate([b for _, b in dec_ca], axis=0).reshape(1, -1)

    enc_vec = jnp.stack([
        jnp.stack([ab, lp["n1g"], lp["n1b"], lp["b2"], lp["n2g"], lp["n2b"]])
        for (_, ab), lp in zip(enc_attn, enc_layers)])          # (num_enc, 6, d)
    dec_vec = jnp.stack([
        jnp.stack([ab, lp["n1g"], lp["n1b"], lp["n2g"], lp["n2b"],
                   lp["b2"], lp["n3g"], lp["n3b"]])
        for (_, ab), lp in zip(dec_sa, dec_layers)])            # (num_dec, 8, d)

    all_layers = enc_layers + dec_layers
    w1_all = jnp.stack([lp["w1"] for lp in all_layers]).astype(matmul_dtype)
    w2t_all = jnp.stack([lp["w2"].T for lp in all_layers]).astype(matmul_dtype)
    b1_all = jnp.stack([lp["b1"] for lp in all_layers])         # (L, dim_ff) f32

    fc_b_pad = jnp.zeros((d_model,), jnp.float32).at[:num_classes].set(params["fc_b"])
    gvec = jnp.stack([params["emb_b"], params["enc_ng"], params["enc_nb"],
                      params["dec_ng"], params["dec_nb"], fc_b_pad])   # (6, d)

    return dict(
        emb_w=params["emb_w"].astype(matmul_dtype), gvec=gvec,
        enc_attn_w=enc_attn_w, enc_vec=enc_vec,
        dec_sa_w=dec_sa_w, ca_w=ca_w, ca_b=ca_b, dec_vec=dec_vec,
        fc_w=params["fc_w"].astype(matmul_dtype),
        b1_all=b1_all, w1_all=w1_all, w2t_all=w2t_all)


# -------------------- pure-JAX reference (f32, full MHA) --------------------

def _reference_forward(params, src, tgt, nhead):
    hp = jax.lax.Precision.HIGHEST

    def linear(x, w, b):
        return jnp.dot(x, w, precision=hp) + b

    def ln(x, g, b, eps=1e-5):
        m = x.mean(-1, keepdims=True)
        v = ((x - m) ** 2).mean(-1, keepdims=True)
        return (x - m) / jnp.sqrt(v + eps) * g + b

    def mha(q_in, kv_in, p):
        B, d = q_in.shape
        hd = d // nhead
        q = linear(q_in, p["wq"], p["bq"]).reshape(B, nhead, hd)
        k = linear(kv_in, p["wk"], p["bk"]).reshape(B, nhead, hd)
        v = linear(kv_in, p["wv"], p["bv"]).reshape(B, nhead, hd)
        scores = jnp.einsum("bhd,bhd->bh", q, k, precision=hp) / math.sqrt(hd)
        attn = jax.nn.softmax(scores[..., None], axis=-1)       # seq 1 -> all ones
        o = (attn * v).reshape(B, d)
        return linear(o, p["wo"], p["bo"])

    src_emb = linear(src, params["emb_w"], params["emb_b"])
    tgt_emb = linear(tgt, params["emb_w"], params["emb_b"])

    mem = src_emb
    for lp in params["enc_layers"]:
        mem = ln(mem + mha(mem, mem, lp["self_attn"]), lp["n1g"], lp["n1b"])
        h = jnp.maximum(linear(mem, lp["w1"], lp["b1"]), 0.0)
        mem = ln(mem + linear(h, lp["w2"], lp["b2"]), lp["n2g"], lp["n2b"])
    mem = ln(mem, params["enc_ng"], params["enc_nb"])

    out = tgt_emb
    for lp in params["dec_layers"]:
        out = ln(out + mha(out, out, lp["self_attn"]), lp["n1g"], lp["n1b"])
        out = ln(out + mha(out, mem, lp["cross_attn"]), lp["n2g"], lp["n2b"])
        h = jnp.maximum(linear(out, lp["w1"], lp["b1"]), 0.0)
        out = ln(out + linear(h, lp["w2"], lp["b2"]), lp["n3g"], lp["n3b"])
    out = ln(out, params["dec_ng"], params["dec_nb"])

    logits = linear(out, params["fc_w"], params["fc_b"])
    return logits, src_emb.reshape(src.shape[0], 1, -1)


# -------------------- main --------------------

if __name__ == "__main__":
    INPUT_DIM = 16
    D_MODEL = 32
    NHEAD = 4                   # head split is a no-op for seq_len == 1
    NUM_ENCODER_LAYERS = 2
    NUM_DECODER_LAYERS = 6      # nn.Transformer default
    NUM_CLASSES = 8
    DIM_FF = 2048               # nn.Transformer default dim_feedforward
    B = 2

    key = jax.random.PRNGKey(0)
    pkey, skey, tkey = jax.random.split(key, 3)
    params = init_params(pkey, INPUT_DIM, D_MODEL, NUM_ENCODER_LAYERS,
                         NUM_DECODER_LAYERS, NUM_CLASSES, DIM_FF)

    src = jax.random.normal(skey, (B, INPUT_DIM), jnp.float32)
    tgt = jax.random.normal(tkey, (B, INPUT_DIM), jnp.float32)

    # default bf16 fast path
    kparams = build_kernel_params(params)
    logits, src_emb = forward(kparams, src, tgt)
    jax.block_until_ready((logits, src_emb))

    assert logits.shape == (B, NUM_CLASSES) and logits.dtype == jnp.float32
    assert src_emb.shape == (B, 1, D_MODEL) and src_emb.dtype == jnp.float32
    assert bool(jnp.all(jnp.isfinite(logits))) and bool(jnp.all(jnp.isfinite(src_emb)))

    # f32 parity path: verifies the seq_len==1 algebraic fusions (v/out-proj fold,
    # batched cross-attn) and the packed-parameter wiring against a full reference.
    kparams_f32 = build_kernel_params(params, matmul_dtype=jnp.float32)
    logits_f32, src_emb_f32 = forward(kparams_f32, src, tgt)
    ref_logits, ref_src_emb = _reference_forward(params, src, tgt, NHEAD)
    assert bool(jnp.allclose(logits_f32, ref_logits, rtol=2e-2, atol=2e-2))
    assert bool(jnp.allclose(src_emb_f32, ref_src_emb, rtol=2e-2, atol=2e-2))

    print("KERNEL_OK")
</pallas_src>

<mosaic_0001>
module attributes {stable_mosaic.version = 11 : i64} {
  func.func @_fused_forward_kernel(%arg0: memref<4x16xf32, #tpu.memory_space<vmem>>, %arg1: memref<16x32xbf16, #tpu.memory_space<vmem>>, %arg2: memref<6x32xf32, #tpu.memory_space<vmem>>, %arg3: memref<2x32x32xbf16, #tpu.memory_space<vmem>>, %arg4: memref<2x6x32xf32, #tpu.memory_space<vmem>>, %arg5: memref<6x32x32xbf16, #tpu.memory_space<vmem>>, %arg6: memref<32x192xbf16, #tpu.memory_space<vmem>>, %arg7: memref<1x192xf32, #tpu.memory_space<vmem>>, %arg8: memref<6x8x32xf32, #tpu.memory_space<vmem>>, %arg9: memref<32x8xbf16, #tpu.memory_space<vmem>>, %arg10: memref<8x2048xf32, #tpu.memory_space<vmem>>, %arg11: memref<8x32x2048xbf16, #tpu.memory_space<any>>, %arg12: memref<8x32x2048xbf16, #tpu.memory_space<any>>, %arg13: memref<2x8xf32, #tpu.memory_space<vmem>>, %arg14: memref<2x32xf32, #tpu.memory_space<vmem>>, %arg15: memref<2x32x2048xbf16, #tpu.memory_space<vmem>>, %arg16: memref<2x32x2048xbf16, #tpu.memory_space<vmem>>, %arg17: memref<2x2x!tpu.dma_semaphore, #tpu.memory_space<semaphore_mem>>) attributes {dimension_semantics = [], scalar_prefetch = 0 : i64, scratch_operands = 3 : i64, tpu.core_type = #tpu.core_type<tc>} {
    %c0_i32 = arith.constant 0 : i32
    %c0_i32_0 = arith.constant 0 : i32
    %c0_i32_1 = arith.constant 0 : i32
    %c0_i32_2 = arith.constant 0 : i32
    %c0_i32_3 = arith.constant 0 : i32
    %c0_i32_4 = arith.constant 0 : i32
    %0 = tpu.memref_slice %arg11[%c0_i32, %c0_i32_3, %c0_i32_4] : memref<8x32x2048xbf16, #tpu.memory_space<any>> -> memref<1x32x2048xbf16, #tpu.memory_space<any>>
    %1 = tpu.memref_squeeze %0 : memref<1x32x2048xbf16, #tpu.memory_space<any>> -> memref<32x2048xbf16, #tpu.memory_space<any>>
    %c0_i32_5 = arith.constant 0 : i32
    %c0_i32_6 = arith.constant 0 : i32
    %2 = tpu.memref_slice %arg15[%c0_i32_0, %c0_i32_5, %c0_i32_6] : memref<2x32x2048xbf16, #tpu.memory_space<vmem>> -> memref<1x32x2048xbf16, #tpu.memory_space<vmem>>
    %3 = tpu.memref_squeeze %2 : memref<1x32x2048xbf16, #tpu.memory_space<vmem>> -> memref<32x2048xbf16, #tpu.memory_space<vmem>>
    %4 = tpu.memref_slice %arg17[%c0_i32_1, %c0_i32_2] : memref<2x2x!tpu.dma_semaphore, #tpu.memory_space<semaphore_mem>> -> memref<1x1x!tpu.dma_semaphore, #tpu.memory_space<semaphore_mem>>
    %5 = tpu.memref_squeeze %4 : memref<1x1x!tpu.dma_semaphore, #tpu.memory_space<semaphore_mem>> -> memref<!tpu.dma_semaphore, #tpu.memory_space<semaphore_mem>>
    tpu.enqueue_dma source(%1 : memref<32x2048xbf16, #tpu.memory_space<any>>) target(%3 : memref<32x2048xbf16, #tpu.memory_space<vmem>>) target_semaphore(%5 : memref<!tpu.dma_semaphore, #tpu.memory_space<semaphore_mem>>)
    %c0_i32_7 = arith.constant 0 : i32
    %c0_i32_8 = arith.constant 0 : i32
    %c1_i32 = arith.constant 1 : i32
    %c0_i32_9 = arith.constant 0 : i32
    %c0_i32_10 = arith.constant 0 : i32
    %c0_i32_11 = arith.constant 0 : i32
    %6 = tpu.memref_slice %arg12[%c0_i32_7, %c0_i32_10, %c0_i32_11] : memref<8x32x2048xbf16, #tpu.memory_space<any>> -> memref<1x32x2048xbf16, #tpu.memory_space<any>>
    %7 = tpu.memref_squeeze %6 : memref<1x32x2048xbf16, #tpu.memory_space<any>> -> memref<32x2048xbf16, #tpu.memory_space<any>>
    %c0_i32_12 = arith.constant 0 : i32
    %c0_i32_13 = arith.constant 0 : i32
    %8 = tpu.memref_slice %arg16[%c0_i32_8, %c0_i32_12, %c0_i32_13] : memref<2x32x2048xbf16, #tpu.memory_space<vmem>> -> memref<1x32x2048xbf16, #tpu.memory_space<vmem>>
    %9 = tpu.memref_squeeze %8 : memref<1x32x2048xbf16, #tpu.memory_space<vmem>> -> memref<32x2048xbf16, #tpu.memory_space<vmem>>
    %10 = tpu.memref_slice %arg17[%c1_i32, %c0_i32_9] : memref<2x2x!tpu.dma_semaphore, #tpu.memory_space<semaphore_mem>> -> memref<1x1x!tpu.dma_semaphore, #tpu.memory_space<semaphore_mem>>
    %11 = tpu.memref_squeeze %10 : memref<1x1x!tpu.dma_semaphore, #tpu.memory_space<semaphore_mem>> -> memref<!tpu.dma_semaphore, #tpu.memory_space<semaphore_mem>>
    tpu.enqueue_dma source(%7 : memref<32x2048xbf16, #tpu.memory_space<any>>) target(%9 : memref<32x2048xbf16, #tpu.memory_space<vmem>>) target_semaphore(%11 : memref<!tpu.dma_semaphore, #tpu.memory_space<semaphore_mem>>)
    %c0 = arith.constant 0 : index
    %c0_14 = arith.constant 0 : index
    %12 = vector.load %arg2[%c0, %c0_14] : memref<6x32xf32, #tpu.memory_space<vmem>>, vector<6x32xf32>
    %c0_15 = arith.constant 0 : index
    %c0_16 = arith.constant 0 : index
    %13 = vector.load %arg0[%c0_15, %c0_16] : memref<4x16xf32, #tpu.memory_space<vmem>>, vector<4x16xf32>
    %c0_17 = arith.constant 0 : index
    %c0_18 = arith.constant 0 : index
    %14 = vector.load %arg1[%c0_17, %c0_18] : memref<16x32xbf16, #tpu.memory_space<vmem>>, vector<16x32xbf16>
    %15 = vector.extract_strided_slice %12 {offsets = [0, 0], sizes = [1, 32], strides = [1, 1]} : vector<6x32xf32> to vector<1x32xf32>
    %16 = arith.truncf %13 : vector<4x16xf32> to vector<4x16xbf16>
    %cst = arith.constant dense<0.000000e+00> : vector<4x32xf32>
    %17 = tpu.matmul %16, %14, %cst {dimension_numbers = #tpu.dot_dimension_numbers<[1], [0], [0], [1], [0, 0, 1, 1], [], []>} : vector<4x16xbf16>, vector<16x32xbf16>, vector<4x32xf32> -> vector<4x32xf32>
    %18 = vector.broadcast %15 : vector<1x32xf32> to vector<4x32xf32>
    %19 = arith.addf %17, %18 : vector<4x32xf32>
    %20 = vector.extract_strided_slice %19 {offsets = [0, 0], sizes = [2, 32], strides = [1, 1]} : vector<4x32xf32> to vector<2x32xf32>
    %21 = vector.extract_strided_slice %19 {offsets = [2, 0], sizes = [2, 32], strides = [1, 1]} : vector<4x32xf32> to vector<2x32xf32>
    %c0_19 = arith.constant 0 : index
    %c0_20 = arith.constant 0 : index
    %22 = vector.load %arg14[%c0_19, %c0_20] : memref<2x32xf32, #tpu.memory_space<vmem>>, vector<2x32xf32>
    tpu.vector_store %arg14[%c0_19, %c0_20], %20 {strides = array<i32>} : memref<2x32xf32, #tpu.memory_space<vmem>>, vector<2x32xf32>,
    %c0_21 = arith.constant 0 : index
    %c0_22 = arith.constant 0 : index
    %c0_23 = arith.constant 0 : index
    %23 = vector.load %arg4[%c0_21, %c0_22, %c0_23] : memref<2x6x32xf32, #tpu.memory_space<vmem>>, vector<1x6x32xf32>
    %24 = vector.shape_cast %23 : vector<1x6x32xf32> to vector<6x32xf32>
    %c0_24 = arith.constant 0 : index
    %c0_25 = arith.constant 0 : index
    %c0_26 = arith.constant 0 : index
    %25 = vector.load %arg3[%c0_24, %c0_25, %c0_26] : memref<2x32x32xbf16, #tpu.memory_space<vmem>>, vector<1x32x32xbf16>
    %26 = vector.shape_cast %25 : vector<1x32x32xbf16> to vector<32x32xbf16>
    %27 = vector.extract_strided_slice %24 {offsets = [0, 0], sizes = [1, 32], strides = [1, 1]} : vector<6x32xf32> to vector<1x32xf32>
    %28 = arith.truncf %20 : vector<2x32xf32> to vector<2x32xbf16>
    %cst_27 = arith.constant dense<0.000000e+00> : vector<2x32xf32>
    %29 = tpu.matmul %28, %26, %cst_27 {dimension_numbers = #tpu.dot_dimension_numbers<[1], [0], [0], [1], [0, 0, 1, 1], [], []>} : vector<2x32xbf16>, vector<32x32xbf16>, vector<2x32xf32> -> vector<2x32xf32>
    %30 = vector.broadcast %27 : vector<1x32xf32> to vector<2x32xf32>
    %31 = arith.addf %29, %30 : vector<2x32xf32>
    %32 = arith.addf %20, %31 : vector<2x32xf32>
    %33 = vector.extract_strided_slice %24 {offsets = [1, 0], sizes = [1, 32], strides = [1, 1]} : vector<6x32xf32> to vector<1x32xf32>
    %34 = vector.extract_strided_slice %24 {offsets = [2, 0], sizes = [1, 32], strides = [1, 1]} : vector<6x32xf32> to vector<1x32xf32>
    %cst_28 = arith.constant dense<0.000000e+00> : vector<2xf32>
    %35 = vector.multi_reduction <add>, %32, %cst_28 [1] : vector<2x32xf32> to vector<2xf32>
    %36 = vector.shape_cast %35 : vector<2xf32> to vector<2x1xf32>
    %cst_29 = arith.constant 3.200000e+01 : f32
    %37 = vector.broadcast %cst_29 : f32 to vector<2x1xf32>
    %38 = arith.divf %36, %37 : vector<2x1xf32>
    %39 = arith.mulf %32, %32 : vector<2x32xf32>
    %cst_30 = arith.constant dense<0.000000e+00> : vector<2xf32>
    %40 = vector.multi_reduction <add>, %39, %cst_30 [1] : vector<2x32xf32> to vector<2xf32>
    %41 = vector.shape_cast %40 : vector<2xf32> to vector<2x1xf32>
    %cst_31 = arith.constant 3.200000e+01 : f32
    %42 = vector.broadcast %cst_31 : f32 to vector<2x1xf32>
    %43 = arith.divf %41, %42 : vector<2x1xf32>
    %44 = arith.mulf %38, %38 : vector<2x1xf32>
    %45 = arith.subf %43, %44 : vector<2x1xf32>
    %46 = vector.broadcast %38 : vector<2x1xf32> to vector<2x32xf32>
    %47 = arith.subf %32, %46 : vector<2x32xf32>
    %cst_32 = arith.constant 9.99999974E-6 : f32
    %48 = vector.broadcast %cst_32 : f32 to vector<2x1xf32>
    %49 = arith.addf %45, %48 : vector<2x1xf32>
    %50 = math.rsqrt %49 : vector<2x1xf32>
    %51 = vector.broadcast %50 : vector<2x1xf32> to vector<2x32xf32>
    %52 = arith.mulf %47, %51 : vector<2x32xf32>
    %53 = vector.broadcast %33 : vector<1x32xf32> to vector<2x32xf32>
    %54 = arith.mulf %52, %53 : vector<2x32xf32>
    %55 = vector.broadcast %34 : vector<1x32xf32> to vector<2x32xf32>
    %56 = arith.addf %54, %55 : vector<2x32xf32>
    %57 = vector.extract_strided_slice %24 {offsets = [3, 0], sizes = [1, 32], strides = [1, 1]} : vector<6x32xf32> to vector<1x32xf32>
    %c0_i32_33 = arith.constant 0 : i32
    %c0_i32_34 = arith.constant 0 : i32
    %c0_i32_35 = arith.constant 0 : i32
    %c0_i32_36 = arith.constant 0 : i32
    %c0_i32_37 = arith.constant 0 : i32
    %c0_i32_38 = arith.constant 0 : i32
    %58 = tpu.memref_slice %arg11[%c0_i32_33, %c0_i32_37, %c0_i32_38] : memref<8x32x2048xbf16, #tpu.memory_space<any>> -> memref<1x32x2048xbf16, #tpu.memory_space<any>>
    %59 = tpu.memref_squeeze %58 : memref<1x32x2048xbf16, #tpu.memory_space<any>> -> memref<32x2048xbf16, #tpu.memory_space<any>>
    %c0_i32_39 = arith.constant 0 : i32
    %c0_i32_40 = arith.constant 0 : i32
    %60 = tpu.memref_slice %arg15[%c0_i32_34, %c0_i32_39, %c0_i32_40] : memref<2x32x2048xbf16, #tpu.memory_space<vmem>> -> memref<1x32x2048xbf16, #tpu.memory_space<vmem>>
    %61 = tpu.memref_squeeze %60 : memref<1x32x2048xbf16, #tpu.memory_space<vmem>> -> memref<32x2048xbf16, #tpu.memory_space<vmem>>
    %62 = tpu.memref_slice %arg17[%c0_i32_35, %c0_i32_36] : memref<2x2x!tpu.dma_semaphore, #tpu.memory_space<semaphore_mem>> -> memref<1x1x!tpu.dma_semaphore, #tpu.memory_space<semaphore_mem>>
    %63 = tpu.memref_squeeze %62 : memref<1x1x!tpu.dma_semaphore, #tpu.memory_space<semaphore_mem>> -> memref<!tpu.dma_semaphore, #tpu.memory_space<semaphore_mem>>
    tpu.wait_dma2 semaphore(%63 : memref<!tpu.dma_semaphore, #tpu.memory_space<semaphore_mem>>) src(%59 : memref<32x2048xbf16, #tpu.memory_space<any>>) dst(%61 : memref<32x2048xbf16, #tpu.memory_space<vmem>>)
    %c0_i32_41 = arith.constant 0 : i32
    %c0_i32_42 = arith.constant 0 : i32
    %c1_i32_43 = arith.constant 1 : i32
    %c0_i32_44 = arith.constant 0 : i32
    %c0_i32_45 = arith.constant 0 : i32
    %c0_i32_46 = arith.constant 0 : i32
    %64 = tpu.memref_slice %arg12[%c0_i32_41, %c0_i32_45, %c0_i32_46] : memref<8x32x2048xbf16, #tpu.memory_space<any>> -> memref<1x32x2048xbf16, #tpu.memory_space<any>>
    %65 = tpu.memref_squeeze %64 : memref<1x32x2048xbf16, #tpu.memory_space<any>> -> memref<32x2048xbf16, #tpu.memory_space<any>>
    %c0_i32_47 = arith.constant 0 : i32
    %c0_i32_48 = arith.constant 0 : i32
    %66 = tpu.memref_slice %arg16[%c0_i32_42, %c0_i32_47, %c0_i32_48] : memref<2x32x2048xbf16, #tpu.memory_space<vmem>> -> memref<1x32x2048xbf16, #tpu.memory_space<vmem>>
    %67 = tpu.memref_squeeze %66 : memref<1x32x2048xbf16, #tpu.memory_space<vmem>> -> memref<32x2048xbf16, #tpu.memory_space<vmem>>
    %68 = tpu.memref_slice %arg17[%c1_i32_43, %c0_i32_44] : memref<2x2x!tpu.dma_semaphore, #tpu.memory_space<semaphore_mem>> -> memref<1x1x!tpu.dma_semaphore, #tpu.memory_space<semaphore_mem>>
    %69 = tpu.memref_squeeze %68 : memref<1x1x!tpu.dma_semaphore, #tpu.memory_space<semaphore_mem>> -> memref<!tpu.dma_semaphore, #tpu.memory_space<semaphore_mem>>
    tpu.wait_dma2 semaphore(%69 : memref<!tpu.dma_semaphore, #tpu.memory_space<semaphore_mem>>) src(%65 : memref<32x2048xbf16, #tpu.memory_space<any>>) dst(%67 : memref<32x2048xbf16, #tpu.memory_space<vmem>>)
    %c1_i32_49 = arith.constant 1 : i32
    %c1_i32_50 = arith.constant 1 : i32
    %c0_i32_51 = arith.constant 0 : i32
    %c1_i32_52 = arith.constant 1 : i32
    %c0_i32_53 = arith.constant 0 : i32
    %c0_i32_54 = arith.constant 0 : i32
    %70 = tpu.memref_slice %arg11[%c1_i32_49, %c0_i32_53, %c0_i32_54] : memref<8x32x2048xbf16, #tpu.memory_space<any>> -> memref<1x32x2048xbf16, #tpu.memory_space<any>>
    %71 = tpu.memref_squeeze %70 : memref<1x32x2048xbf16, #tpu.memory_space<any>> -> memref<32x2048xbf16, #tpu.memory_space<any>>
    %c0_i32_55 = arith.constant 0 : i32
    %c0_i32_56 = arith.constant 0 : i32
    %72 = tpu.memref_slice %arg15[%c1_i32_50, %c0_i32_55, %c0_i32_56] : memref<2x32x2048xbf16, #tpu.memory_space<vmem>> -> memref<1x32x2048xbf16, #tpu.memory_space<vmem>>
    %73 = tpu.memref_squeeze %72 : memref<1x32x2048xbf16, #tpu.memory_space<vmem>> -> memref<32x2048xbf16, #tpu.memory_space<vmem>>
    %74 = tpu.memref_slice %arg17[%c0_i32_51, %c1_i32_52] : memref<2x2x!tpu.dma_semaphore, #tpu.memory_space<semaphore_mem>> -> memref<1x1x!tpu.dma_semaphore, #tpu.memory_space<semaphore_mem>>
    %75 = tpu.memref_squeeze %74 : memref<1x1x!tpu.dma_semaphore, #tpu.memory_space<semaphore_mem>> -> memref<!tpu.dma_semaphore, #tpu.memory_space<semaphore_mem>>
    tpu.enqueue_dma source(%71 : memref<32x2048xbf16, #tpu.memory_space<any>>) target(%73 : memref<32x2048xbf16, #tpu.memory_space<vmem>>) target_semaphore(%75 : memref<!tpu.dma_semaphore, #tpu.memory_space<semaphore_mem>>)
    %c1_i32_57 = arith.constant 1 : i32
    %c1_i32_58 = arith.constant 1 : i32
    %c1_i32_59 = arith.constant 1 : i32
    %c1_i32_60 = arith.constant 1 : i32
    %c0_i32_61 = arith.constant 0 : i32
    %c0_i32_62 = arith.constant 0 : i32
    %76 = tpu.memref_slice %arg12[%c1_i32_57, %c0_i32_61, %c0_i32_62] : memref<8x32x2048xbf16, #tpu.memory_space<any>> -> memref<1x32x2048xbf16, #tpu.memory_space<any>>
    %77 = tpu.memref_squeeze %76 : memref<1x32x2048xbf16, #tpu.memory_space<any>> -> memref<32x2048xbf16, #tpu.memory_space<any>>
    %c0_i32_63 = arith.constant 0 : i32
    %c0_i32_64 = arith.constant 0 : i32
    %78 = tpu.memref_slice %arg16[%c1_i32_58, %c0_i32_63, %c0_i32_64] : memref<2x32x2048xbf16, #tpu.memory_space<vmem>> -> memref<1x32x2048xbf16, #tpu.memory_space<vmem>>
    %79 = tpu.memref_squeeze %78 : memref<1x32x2048xbf16, #tpu.memory_space<vmem>> -> memref<32x2048xbf16, #tpu.memory_space<vmem>>
    %80 = tpu.memref_slice %arg17[%c1_i32_59, %c1_i32_60] : memref<2x2x!tpu.dma_semaphore, #tpu.memory_space<semaphore_mem>> -> memref<1x1x!tpu.dma_semaphore, #tpu.memory_space<semaphore_mem>>
    %81 = tpu.memref_squeeze %80 : memref<1x1x!tpu.dma_semaphore, #tpu.memory_space<semaphore_mem>> -> memref<!tpu.dma_semaphore, #tpu.memory_space<semaphore_mem>>
    tpu.enqueue_dma source(%77 : memref<32x2048xbf16, #tpu.memory_space<any>>) target(%79 : memref<32x2048xbf16, #tpu.memory_space<vmem>>) target_semaphore(%81 : memref<!tpu.dma_semaphore, #tpu.memory_space<semaphore_mem>>)
    %c0_65 = arith.constant 0 : index
    %c0_66 = arith.constant 0 : index
    %82 = vector.load %arg10[%c0_65, %c0_66] : memref<8x2048xf32, #tpu.memory_space<vmem>>, vector<1x2048xf32>
    %83 = arith.truncf %56 : vector<2x32xf32> to vector<2x32xbf16>
    %c0_67 = arith.constant 0 : index
    %c0_68 = arith.constant 0 : index
    %c0_69 = arith.constant 0 : index
    %84 = vector.load %arg15[%c0_67, %c0_68, %c0_69] : memref<2x32x2048xbf16, #tpu.memory_space<vmem>>, vector<1x32x2048xbf16>
    %85 = vector.shape_cast %84 : vector<1x32x2048xbf16> to vector<32x2048xbf16>
    %cst_70 = arith.constant dense<0.000000e+00> : vector<2x2048xf32>
    %86 = tpu.matmul %83, %85, %cst_70 {dimension_numbers = #tpu.dot_dimension_numbers<[1], [0], [0], [1], [0, 0, 1, 1], [], []>} : vector<2x32xbf16>, vector<32x2048xbf16>, vector<2x2048xf32> -> vector<2x2048xf32>
    %87 = vector.broadcast %82 : vector<1x2048xf32> to vector<2x2048xf32>
    %88 = arith.addf %86, %87 : vector<2x2048xf32>
    %cst_71 = arith.constant 0.000000e+00 : f32
    %89 = vector.broadcast %cst_71 : f32 to vector<2x2048xf32>
    %90 = arith.maximumf %88, %89 : vector<2x2048xf32>
    %91 = arith.truncf %90 : vector<2x2048xf32> to vector<2x2048xbf16>
    %c0_72 = arith.constant 0 : index
    %c0_73 = arith.constant 0 : index
    %c0_74 = arith.constant 0 : index
    %92 = vector.load %arg16[%c0_72, %c0_73, %c0_74] : memref<2x32x2048xbf16, #tpu.memory_space<vmem>>, vector<1x32x2048xbf16>
    %93 = vector.shape_cast %92 : vector<1x32x2048xbf16> to vector<32x2048xbf16>
    %cst_75 = arith.constant dense<0.000000e+00> : vector<2x32xf32>
    %94 = tpu.matmul %91, %93, %cst_75 {dimension_numbers = #tpu.dot_dimension_numbers<[1], [1], [0], [0], [0, 0, 1, 0], [], []>} : vector<2x2048xbf16>, vector<32x2048xbf16>, vector<2x32xf32> -> vector<2x32xf32>
    %95 = vector.broadcast %57 : vector<1x32xf32> to vector<2x32xf32>
    %96 = arith.addf %94, %95 : vector<2x32xf32>
    %97 = arith.addf %56, %96 : vector<2x32xf32>
    %98 = vector.extract_strided_slice %24 {offsets = [4, 0], sizes = [1, 32], strides = [1, 1]} : vector<6x32xf32> to vector<1x32xf32>
    %99 = vector.extract_strided_slice %24 {offsets = [5, 0], sizes = [1, 32], strides = [1, 1]} : vector<6x32xf32> to vector<1x32xf32>
    %cst_76 = arith.constant dense<0.000000e+00> : vector<2xf32>
    %100 = vector.multi_reduction <add>, %97, %cst_76 [1] : vector<2x32xf32> to vector<2xf32>
    %101 = vector.shape_cast %100 : vector<2xf32> to vector<2x1xf32>
    %cst_77 = arith.constant 3.200000e+01 : f32
    %102 = vector.broadcast %cst_77 : f32 to vector<2x1xf32>
    %103 = arith.divf %101, %102 : vector<2x1xf32>
    %104 = arith.mulf %97, %97 : vector<2x32xf32>
    %cst_78 = arith.constant dense<0.000000e+00> : vector<2xf32>
    %105 = vector.multi_reduction <add>, %104, %cst_78 [1] : vector<2x32xf32> to vector<2xf32>
    %106 = vector.shape_cast %105 : vector<2xf32> to vector<2x1xf32>
    %cst_79 = arith.constant 3.200000e+01 : f32
    %107 = vector.broadcast %cst_79 : f32 to vector<2x1xf32>
    %108 = arith.divf %106, %107 : vector<2x1xf32>
    %109 = arith.mulf %103, %103 : vector<2x1xf32>
    %110 = arith.subf %108, %109 : vector<2x1xf32>
    %111 = vector.broadcast %103 : vector<2x1xf32> to vector<2x32xf32>
    %112 = arith.subf %97, %111 : vector<2x32xf32>
    %cst_80 = arith.constant 9.99999974E-6 : f32
    %113 = vector.broadcast %cst_80 : f32 to vector<2x1xf32>
    %114 = arith.addf %110, %113 : vector<2x1xf32>
    %115 = math.rsqrt %114 : vector<2x1xf32>
    %116 = vector.broadcast %115 : vector<2x1xf32> to vector<2x32xf32>
    %117 = arith.mulf %112, %116 : vector<2x32xf32>
    %118 = vector.broadcast %98 : vector<1x32xf32> to vector<2x32xf32>
    %119 = arith.mulf %117, %118 : vector<2x32xf32>
    %120 = vector.broadcast %99 : vector<1x32xf32> to vector<2x32xf32>
    %121 = arith.addf %119, %120 : vector<2x32xf32>
    %c1 = arith.constant 1 : index
    %c0_81 = arith.constant 0 : index
    %c0_82 = arith.constant 0 : index
    %122 = vector.load %arg4[%c1, %c0_81, %c0_82] : memref<2x6x32xf32, #tpu.memory_space<vmem>>, vector<1x6x32xf32>
    %123 = vector.shape_cast %122 : vector<1x6x32xf32> to vector<6x32xf32>
    %c1_83 = arith.constant 1 : index
    %c0_84 = arith.constant 0 : index
    %c0_85 = arith.constant 0 : index
    %124 = vector.load %arg3[%c1_83, %c0_84, %c0_85] : memref<2x32x32xbf16, #tpu.memory_space<vmem>>, vector<1x32x32xbf16>
    %125 = vector.shape_cast %124 : vector<1x32x32xbf16> to vector<32x32xbf16>
    %126 = vector.extract_strided_slice %123 {offsets = [0, 0], sizes = [1, 32], strides = [1, 1]} : vector<6x32xf32> to vector<1x32xf32>
    %127 = arith.truncf %121 : vector<2x32xf32> to vector<2x32xbf16>
    %cst_86 = arith.constant dense<0.000000e+00> : vector<2x32xf32>
    %128 = tpu.matmul %127, %125, %cst_86 {dimension_numbers = #tpu.dot_dimension_numbers<[1], [0], [0], [1], [0, 0, 1, 1], [], []>} : vector<2x32xbf16>, vector<32x32xbf16>, vector<2x32xf32> -> vector<2x32xf32>
    %129 = vector.broadcast %126 : vector<1x32xf32> to vector<2x32xf32>
    %130 = arith.addf %128, %129 : vector<2x32xf32>
    %131 = arith.addf %121, %130 : vector<2x32xf32>
    %132 = vector.extract_strided_slice %123 {offsets = [1, 0], sizes = [1, 32], strides = [1, 1]} : vector<6x32xf32> to vector<1x32xf32>
    %133 = vector.extract_strided_slice %123 {offsets = [2, 0], sizes = [1, 32], strides = [1, 1]} : vector<6x32xf32> to vector<1x32xf32>
    %cst_87 = arith.constant dense<0.000000e+00> : vector<2xf32>
    %134 = vector.multi_reduction <add>, %131, %cst_87 [1] : vector<2x32xf32> to vector<2xf32>
    %135 = vector.shape_cast %134 : vector<2xf32> to vector<2x1xf32>
    %cst_88 = arith.constant 3.200000e+01 : f32
    %136 = vector.broadcast %cst_88 : f32 to vector<2x1xf32>
    %137 = arith.divf %135, %136 : vector<2x1xf32>
    %138 = arith.mulf %131, %131 : vector<2x32xf32>
    %cst_89 = arith.constant dense<0.000000e+00> : vector<2xf32>
    %139 = vector.multi_reduction <add>, %138, %cst_89 [1] : vector<2x32xf32> to vector<2xf32>
    %140 = vector.shape_cast %139 : vector<2xf32> to vector<2x1xf32>
    %cst_90 = arith.constant 3.200000e+01 : f32
    %141 = vector.broadcast %cst_90 : f32 to vector<2x1xf32>
    %142 = arith.divf %140, %141 : vector<2x1xf32>
    %143 = arith.mulf %137, %137 : vector<2x1xf32>
    %144 = arith.subf %142, %143 : vector<2x1xf32>
    %145 = vector.broadcast %137 : vector<2x1xf32> to vector<2x32xf32>
    %146 = arith.subf %131, %145 : vector<2x32xf32>
    %cst_91 = arith.constant 9.99999974E-6 : f32
    %147 = vector.broadcast %cst_91 : f32 to vector<2x1xf32>
    %148 = arith.addf %144, %147 : vector<2x1xf32>
    %149 = math.rsqrt %148 : vector<2x1xf32>
    %150 = vector.broadcast %149 : vector<2x1xf32> to vector<2x32xf32>
    %151 = arith.mulf %146, %150 : vector<2x32xf32>
    %152 = vector.broadcast %132 : vector<1x32xf32> to vector<2x32xf32>
    %153 = arith.mulf %151, %152 : vector<2x32xf32>
    %154 = vector.broadcast %133 : vector<1x32xf32> to vector<2x32xf32>
    %155 = arith.addf %153, %154 : vector<2x32xf32>
    %156 = vector.extract_strided_slice %123 {offsets = [3, 0], sizes = [1, 32], strides = [1, 1]} : vector<6x32xf32> to vector<1x32xf32>
    %c0_i32_92 = arith.constant 0 : i32
    %c1_i32_93 = arith.constant 1 : i32
    %c0_i32_94 = arith.constant 0 : i32
    %c1_i32_95 = arith.constant 1 : i32
    %c0_i32_96 = arith.constant 0 : i32
    %c0_i32_97 = arith.constant 0 : i32
    %157 = tpu.memref_slice %arg11[%c0_i32_92, %c0_i32_96, %c0_i32_97] : memref<8x32x2048xbf16, #tpu.memory_space<any>> -> memref<1x32x2048xbf16, #tpu.memory_space<any>>
    %158 = tpu.memref_squeeze %157 : memref<1x32x2048xbf16, #tpu.memory_space<any>> -> memref<32x2048xbf16, #tpu.memory_space<any>>
    %c0_i32_98 = arith.constant 0 : i32
    %c0_i32_99 = arith.constant 0 : i32
    %159 = tpu.memref_slice %arg15[%c1_i32_93, %c0_i32_98, %c0_i32_99] : memref<2x32x2048xbf16, #tpu.memory_space<vmem>> -> memref<1x32x2048xbf16, #tpu.memory_space<vmem>>
    %160 = tpu.memref_squeeze %159 : memref<1x32x2048xbf16, #tpu.memory_space<vmem>> -> memref<32x2048xbf16, #tpu.memory_space<vmem>>
    %161 = tpu.memref_slice %arg17[%c0_i32_94, %c1_i32_95] : memref<2x2x!tpu.dma_semaphore, #tpu.memory_space<semaphore_mem>> -> memref<1x1x!tpu.dma_semaphore, #tpu.memory_space<semaphore_mem>>
    %162 = tpu.memref_squeeze %161 : memref<1x1x!tpu.dma_semaphore, #tpu.memory_space<semaphore_mem>> -> memref<!tpu.dma_semaphore, #tpu.memory_space<semaphore_mem>>
    tpu.wait_dma2 semaphore(%162 : memref<!tpu.dma_semaphore, #tpu.memory_space<semaphore_mem>>) src(%158 : memref<32x2048xbf16, #tpu.memory_space<any>>) dst(%160 : memref<32x2048xbf16, #tpu.memory_space<vmem>>)
    %c0_i32_100 = arith.constant 0 : i32
    %c1_i32_101 = arith.constant 1 : i32
    %c1_i32_102 = arith.constant 1 : i32
    %c1_i32_103 = arith.constant 1 : i32
    %c0_i32_104 = arith.constant 0 : i32
    %c0_i32_105 = arith.constant 0 : i32
    %163 = tpu.memref_slice %arg12[%c0_i32_100, %c0_i32_104, %c0_i32_105] : memref<8x32x2048xbf16, #tpu.memory_space<any>> -> memref<1x32x2048xbf16, #tpu.memory_space<any>>
    %164 = tpu.memref_squeeze %163 : memref<1x32x2048xbf16, #tpu.memory_space<any>> -> memref<32x2048xbf16, #tpu.memory_space<any>>
    %c0_i32_106 = arith.constant 0 : i32
    %c0_i32_107 = arith.constant 0 : i32
    %165 = tpu.memref_slice %arg16[%c1_i32_101, %c0_i32_106, %c0_i32_107] : memref<2x32x2048xbf16, #tpu.memory_space<vmem>> -> memref<1x32x2048xbf16, #tpu.memory_space<vmem>>
    %166 = tpu.memref_squeeze %165 : memref<1x32x2048xbf16, #tpu.memory_space<vmem>> -> memref<32x2048xbf16, #tpu.memory_space<vmem>>
    %167 = tpu.memref_slice %arg17[%c1_i32_102, %c1_i32_103] : memref<2x2x!tpu.dma_semaphore, #tpu.memory_space<semaphore_mem>> -> memref<1x1x!tpu.dma_semaphore, #tpu.memory_space<semaphore_mem>>
    %168 = tpu.memref_squeeze %167 : memref<1x1x!tpu.dma_semaphore, #tpu.memory_space<semaphore_mem>> -> memref<!tpu.dma_semaphore, #tpu.memory_space<semaphore_mem>>
    tpu.wait_dma2 semaphore(%168 : memref<!tpu.dma_semaphore, #tpu.memory_space<semaphore_mem>>) src(%164 : memref<32x2048xbf16, #tpu.memory_space<any>>) dst(%166 : memref<32x2048xbf16, #tpu.memory_space<vmem>>)
    %c2_i32 = arith.constant 2 : i32
    %c0_i32_108 = arith.constant 0 : i32
    %c0_i32_109 = arith.constant 0 : i32
    %c0_i32_110 = arith.constant 0 : i32
    %c0_i32_111 = arith.constant 0 : i32
    %c0_i32_112 = arith.constant 0 : i32
    %169 = tpu.memref_slice %arg11[%c2_i32, %c0_i32_111, %c0_i32_112] : memref<8x32x2048xbf16, #tpu.memory_space<any>> -> memref<1x32x2048xbf16, #tpu.memory_space<any>>
    %170 = tpu.memref_squeeze %169 : memref<1x32x2048xbf16, #tpu.memory_space<any>> -> memref<32x2048xbf16, #tpu.memory_space<any>>
    %c0_i32_113 = arith.constant 0 : i32
    %c0_i32_114 = arith.constant 0 : i32
    %171 = tpu.memref_slice %arg15[%c0_i32_108, %c0_i32_113, %c0_i32_114] : memref<2x32x2048xbf16, #tpu.memory_space<vmem>> -> memref<1x32x2048xbf16, #tpu.memory_space<vmem>>
    %172 = tpu.memref_squeeze %171 : memref<1x32x2048xbf16, #tpu.memory_space<vmem>> -> memref<32x2048xbf16, #tpu.memory_space<vmem>>
    %173 = tpu.memref_slice %arg17[%c0_i32_109, %c0_i32_110] : memref<2x2x!tpu.dma_semaphore, #tpu.memory_space<semaphore_mem>> -> memref<1x1x!tpu.dma_semaphore, #tpu.memory_space<semaphore_mem>>
    %174 = tpu.memref_squeeze %173 : memref<1x1x!tpu.dma_semaphore, #tpu.memory_space<semaphore_mem>> -> memref<!tpu.dma_semaphore, #tpu.memory_space<semaphore_mem>>
    tpu.enqueue_dma source(%170 : memref<32x2048xbf16, #tpu.memory_space<any>>) target(%172 : memref<32x2048xbf16, #tpu.memory_space<vmem>>) target_semaphore(%174 : memref<!tpu.dma_semaphore, #tpu.memory_space<semaphore_mem>>)
    %c2_i32_115 = arith.constant 2 : i32
    %c0_i32_116 = arith.constant 0 : i32
    %c1_i32_117 = arith.constant 1 : i32
    %c0_i32_118 = arith.constant 0 : i32
    %c0_i32_119 = arith.constant 0 : i32
    %c0_i32_120 = arith.constant 0 : i32
    %175 = tpu.memref_slice %arg12[%c2_i32_115, %c0_i32_119, %c0_i32_120] : memref<8x32x2048xbf16, #tpu.memory_space<any>> -> memref<1x32x2048xbf16, #tpu.memory_space<any>>
    %176 = tpu.memref_squeeze %175 : memref<1x32x2048xbf16, #tpu.memory_space<any>> -> memref<32x2048xbf16, #tpu.memory_space<any>>
    %c0_i32_121 = arith.constant 0 : i32
    %c0_i32_122 = arith.constant 0 : i32
    %177 = tpu.memref_slice %arg16[%c0_i32_116, %c0_i32_121, %c0_i32_122] : memref<2x32x2048xbf16, #tpu.memory_space<vmem>> -> memref<1x32x2048xbf16, #tpu.memory_space<vmem>>
    %178 = tpu.memref_squeeze %177 : memref<1x32x2048xbf16, #tpu.memory_space<vmem>> -> memref<32x2048xbf16, #tpu.memory_space<vmem>>
    %179 = tpu.memref_slice %arg17[%c1_i32_117, %c0_i32_118] : memref<2x2x!tpu.dma_semaphore, #tpu.memory_space<semaphore_mem>> -> memref<1x1x!tpu.dma_semaphore, #tpu.memory_space<semaphore_mem>>
    %180 = tpu.memref_squeeze %179 : memref<1x1x!tpu.dma_semaphore, #tpu.memory_space<semaphore_mem>> -> memref<!tpu.dma_semaphore, #tpu.memory_space<semaphore_mem>>
    tpu.enqueue_dma source(%176 : memref<32x2048xbf16, #tpu.memory_space<any>>) target(%178 : memref<32x2048xbf16, #tpu.memory_space<vmem>>) target_semaphore(%180 : memref<!tpu.dma_semaphore, #tpu.memory_space<semaphore_mem>>)
    %c1_123 = arith.constant 1 : index
    %c0_124 = arith.constant 0 : index
    %181 = vector.load %arg10[%c1_123, %c0_124] : memref<8x2048xf32, #tpu.memory_space<vmem>>, vector<1x2048xf32>
    %182 = arith.truncf %155 : vector<2x32xf32> to vector<2x32xbf16>
    %c1_125 = arith.constant 1 : index
    %c0_126 = arith.constant 0 : index
    %c0_127 = arith.constant 0 : index
    %183 = vector.load %arg15[%c1_125, %c0_126, %c0_127] : memref<2x32x2048xbf16, #tpu.memory_space<vmem>>, vector<1x32x2048xbf16>
    %184 = vector.shape_cast %183 : vector<1x32x2048xbf16> to vector<32x2048xbf16>
    %cst_128 = arith.constant dense<0.000000e+00> : vector<2x2048xf32>
    %185 = tpu.matmul %182, %184, %cst_128 {dimension_numbers = #tpu.dot_dimension_numbers<[1], [0], [0], [1], [0, 0, 1, 1], [], []>} : vector<2x32xbf16>, vector<32x2048xbf16>, vector<2x2048xf32> -> vector<2x2048xf32>
    %186 = vector.broadcast %181 : vector<1x2048xf32> to vector<2x2048xf32>
    %187 = arith.addf %185, %186 : vector<2x2048xf32>
    %cst_129 = arith.constant 0.000000e+00 : f32
    %188 = vector.broadcast %cst_129 : f32 to vector<2x2048xf32>
    %189 = arith.maximumf %187, %188 : vector<2x2048xf32>
    %190 = arith.truncf %189 : vector<2x2048xf32> to vector<2x2048xbf16>
    %c1_130 = arith.constant 1 : index
    %c0_131 = arith.constant 0 : index
    %c0_132 = arith.constant 0 : index
    %191 = vector.load %arg16[%c1_130, %c0_131, %c0_132] : memref<2x32x2048xbf16, #tpu.memory_space<vmem>>, vector<1x32x2048xbf16>
    %192 = vector.shape_cast %191 : vector<1x32x2048xbf16> to vector<32x2048xbf16>
    %cst_133 = arith.constant dense<0.000000e+00> : vector<2x32xf32>
    %193 = tpu.matmul %190, %192, %cst_133 {dimension_numbers = #tpu.dot_dimension_numbers<[1], [1], [0], [0], [0, 0, 1, 0], [], []>} : vector<2x2048xbf16>, vector<32x2048xbf16>, vector<2x32xf32> -> vector<2x32xf32>
    %194 = vector.broadcast %156 : vector<1x32xf32> to vector<2x32xf32>
    %195 = arith.addf %193, %194 : vector<2x32xf32>
    %196 = arith.addf %155, %195 : vector<2x32xf32>
    %197 = vector.extract_strided_slice %123 {offsets = [4, 0], sizes = [1, 32], strides = [1, 1]} : vector<6x32xf32> to vector<1x32xf32>
    %198 = vector.extract_strided_slice %123 {offsets = [5, 0], sizes = [1, 32], strides = [1, 1]} : vector<6x32xf32> to vector<1x32xf32>
    %cst_134 = arith.constant dense<0.000000e+00> : vector<2xf32>
    %199 = vector.multi_reduction <add>, %196, %cst_134 [1] : vector<2x32xf32> to vector<2xf32>
    %200 = vector.shape_cast %199 : vector<2xf32> to vector<2x1xf32>
    %cst_135 = arith.constant 3.200000e+01 : f32
    %201 = vector.broadcast %cst_135 : f32 to vector<2x1xf32>
    %202 = arith.divf %200, %201 : vector<2x1xf32>
    %203 = arith.mulf %196, %196 : vector<2x32xf32>
    %cst_136 = arith.constant dense<0.000000e+00> : vector<2xf32>
    %204 = vector.multi_reduction <add>, %203, %cst_136 [1] : vector<2x32xf32> to vector<2xf32>
    %205 = vector.shape_cast %204 : vector<2xf32> to vector<2x1xf32>
    %cst_137 = arith.constant 3.200000e+01 : f32
    %206 = vector.broadcast %cst_137 : f32 to vector<2x1xf32>
    %207 = arith.divf %205, %206 : vector<2x1xf32>
    %208 = arith.mulf %202, %202 : vector<2x1xf32>
    %209 = arith.subf %207, %208 : vector<2x1xf32>
    %210 = vector.broadcast %202 : vector<2x1xf32> to vector<2x32xf32>
    %211 = arith.subf %196, %210 : vector<2x32xf32>
    %cst_138 = arith.constant 9.99999974E-6 : f32
    %212 = vector.broadcast %cst_138 : f32 to vector<2x1xf32>
    %213 = arith.addf %209, %212 : vector<2x1xf32>
    %214 = math.rsqrt %213 : vector<2x1xf32>
    %215 = vector.broadcast %214 : vector<2x1xf32> to vector<2x32xf32>
    %216 = arith.mulf %211, %215 : vector<2x32xf32>
    %217 = vector.broadcast %197 : vector<1x32xf32> to vector<2x32xf32>
    %218 = arith.mulf %216, %217 : vector<2x32xf32>
    %219 = vector.broadcast %198 : vector<1x32xf32> to vector<2x32xf32>
    %220 = arith.addf %218, %219 : vector<2x32xf32>
    %221 = vector.extract_strided_slice %12 {offsets = [1, 0], sizes = [1, 32], strides = [1, 1]} : vector<6x32xf32> to vector<1x32xf32>
    %222 = vector.extract_strided_slice %12 {offsets = [2, 0], sizes = [1, 32], strides = [1, 1]} : vector<6x32xf32> to vector<1x32xf32>
    %cst_139 = arith.constant dense<0.000000e+00> : vector<2xf32>
    %223 = vector.multi_reduction <add>, %220, %cst_139 [1] : vector<2x32xf32> to vector<2xf32>
    %224 = vector.shape_cast %223 : vector<2xf32> to vector<2x1xf32>
    %cst_140 = arith.constant 3.200000e+01 : f32
    %225 = vector.broadcast %cst_140 : f32 to vector<2x1xf32>
    %226 = arith.divf %224, %225 : vector<2x1xf32>
    %227 = arith.mulf %220, %220 : vector<2x32xf32>
    %cst_141 = arith.constant dense<0.000000e+00> : vector<2xf32>
    %228 = vector.multi_reduction <add>, %227, %cst_141 [1] : vector<2x32xf32> to vector<2xf32>
    %229 = vector.shape_cast %228 : vector<2xf32> to vector<2x1xf32>
    %cst_142 = arith.constant 3.200000e+01 : f32
    %230 = vector.broadcast %cst_142 : f32 to vector<2x1xf32>
    %231 = arith.divf %229, %230 : vector<2x1xf32>
    %232 = arith.mulf %226, %226 : vector<2x1xf32>
    %233 = arith.subf %231, %232 : vector<2x1xf32>
    %234 = vector.broadcast %226 : vector<2x1xf32> to vector<2x32xf32>
    %235 = arith.subf %220, %234 : vector<2x32xf32>
    %cst_143 = arith.constant 9.99999974E-6 : f32
    %236 = vector.broadcast %cst_143 : f32 to vector<2x1xf32>
    %237 = arith.addf %233, %236 : vector<2x1xf32>
    %238 = math.rsqrt %237 : vector<2x1xf32>
    %239 = vector.broadcast %238 : vector<2x1xf32> to vector<2x32xf32>
    %240 = arith.mulf %235, %239 : vector<2x32xf32>
    %241 = vector.broadcast %221 : vector<1x32xf32> to vector<2x32xf32>
    %242 = arith.mulf %240, %241 : vector<2x32xf32>
    %243 = vector.broadcast %222 : vector<1x32xf32> to vector<2x32xf32>
    %244 = arith.addf %242, %243 : vector<2x32xf32>
    %c0_144 = arith.constant 0 : index
    %c0_145 = arith.constant 0 : index
    %245 = vector.load %arg6[%c0_144, %c0_145] : memref<32x192xbf16, #tpu.memory_space<vmem>>, vector<32x192xbf16>
    %c0_146 = arith.constant 0 : index
    %c0_147 = arith.constant 0 : index
    %246 = vector.load %arg7[%c0_146, %c0_147] : memref<1x192xf32, #tpu.memory_space<vmem>>, vector<1x192xf32>
    %247 = arith.truncf %244 : vector<2x32xf32> to vector<2x32xbf16>
    %cst_148 = arith.constant dense<0.000000e+00> : vector<2x192xf32>
    %248 = tpu.matmul %247, %245, %cst_148 {dimension_numbers = #tpu.dot_dimension_numbers<[1], [0], [0], [1], [0, 0, 1, 1], [], []>} : vector<2x32xbf16>, vector<32x192xbf16>, vector<2x192xf32> -> vector<2x192xf32>
    %249 = vector.broadcast %246 : vector<1x192xf32> to vector<2x192xf32>
    %250 = arith.addf %248, %249 : vector<2x192xf32>
    %c0_149 = arith.constant 0 : index
    %c0_150 = arith.constant 0 : index
    %c0_151 = arith.constant 0 : index
    %251 = vector.load %arg8[%c0_149, %c0_150, %c0_151] : memref<6x8x32xf32, #tpu.memory_space<vmem>>, vector<1x8x32xf32>
    %252 = vector.shape_cast %251 : vector<1x8x32xf32> to vector<8x32xf32>
    %c0_152 = arith.constant 0 : index
    %c0_153 = arith.constant 0 : index
    %c0_154 = arith.constant 0 : index
    %253 = vector.load %arg5[%c0_152, %c0_153, %c0_154] : memref<6x32x32xbf16, #tpu.memory_space<vmem>>, vector<1x32x32xbf16>
    %254 = vector.shape_cast %253 : vector<1x32x32xbf16> to vector<32x32xbf16>
    %255 = vector.extract_strided_slice %252 {offsets = [0, 0], sizes = [1, 32], strides = [1, 1]} : vector<8x32xf32> to vector<1x32xf32>
    %256 = arith.truncf %21 : vector<2x32xf32> to vector<2x32xbf16>
    %cst_155 = arith.constant dense<0.000000e+00> : vector<2x32xf32>
    %257 = tpu.matmul %256, %254, %cst_155 {dimension_numbers = #tpu.dot_dimension_numbers<[1], [0], [0], [1], [0, 0, 1, 1], [], []>} : vector<2x32xbf16>, vector<32x32xbf16>, vector<2x32xf32> -> vector<2x32xf32>
    %258 = vector.broadcast %255 : vector<1x32xf32> to vector<2x32xf32>
    %259 = arith.addf %257, %258 : vector<2x32xf32>
    %260 = arith.addf %21, %259 : vector<2x32xf32>
    %261 = vector.extract_strided_slice %252 {offsets = [1, 0], sizes = [1, 32], strides = [1, 1]} : vector<8x32xf32> to vector<1x32xf32>
    %262 = vector.extract_strided_slice %252 {offsets = [2, 0], sizes = [1, 32], strides = [1, 1]} : vector<8x32xf32> to vector<1x32xf32>
    %cst_156 = arith.constant dense<0.000000e+00> : vector<2xf32>
    %263 = vector.multi_reduction <add>, %260, %cst_156 [1] : vector<2x32xf32> to vector<2xf32>
    %264 = vector.shape_cast %263 : vector<2xf32> to vector<2x1xf32>
    %cst_157 = arith.constant 3.200000e+01 : f32
    %265 = vector.broadcast %cst_157 : f32 to vector<2x1xf32>
    %266 = arith.divf %264, %265 : vector<2x1xf32>
    %267 = arith.mulf %260, %260 : vector<2x32xf32>
    %cst_158 = arith.constant dense<0.000000e+00> : vector<2xf32>
    %268 = vector.multi_reduction <add>, %267, %cst_158 [1] : vector<2x32xf32> to vector<2xf32>
    %269 = vector.shape_cast %268 : vector<2xf32> to vector<2x1xf32>
    %cst_159 = arith.constant 3.200000e+01 : f32
    %270 = vector.broadcast %cst_159 : f32 to vector<2x1xf32>
    %271 = arith.divf %269, %270 : vector<2x1xf32>
    %272 = arith.mulf %266, %266 : vector<2x1xf32>
    %273 = arith.subf %271, %272 : vector<2x1xf32>
    %274 = vector.broadcast %266 : vector<2x1xf32> to vector<2x32xf32>
    %275 = arith.subf %260, %274 : vector<2x32xf32>
    %cst_160 = arith.constant 9.99999974E-6 : f32
    %276 = vector.broadcast %cst_160 : f32 to vector<2x1xf32>
    %277 = arith.addf %273, %276 : vector<2x1xf32>
    %278 = math.rsqrt %277 : vector<2x1xf32>
    %279 = vector.broadcast %278 : vector<2x1xf32> to vector<2x32xf32>
    %280 = arith.mulf %275, %279 : vector<2x32xf32>
    %281 = vector.broadcast %261 : vector<1x32xf32> to vector<2x32xf32>
    %282 = arith.mulf %280, %281 : vector<2x32xf32>
    %283 = vector.broadcast %262 : vector<1x32xf32> to vector<2x32xf32>
    %284 = arith.addf %282, %283 : vector<2x32xf32>
    %285 = vector.extract_strided_slice %250 {offsets = [0, 0], sizes = [2, 32], strides = [1, 1]} : vector<2x192xf32> to vector<2x32xf32>
    %286 = arith.addf %284, %285 : vector<2x32xf32>
    %287 = vector.extract_strided_slice %252 {offsets = [3, 0], sizes = [1, 32], strides = [1, 1]} : vector<8x32xf32> to vector<1x32xf32>
    %288 = vector.extract_strided_slice %252 {offsets = [4, 0], sizes = [1, 32], strides = [1, 1]} : vector<8x32xf32> to vector<1x32xf32>
    %cst_161 = arith.constant dense<0.000000e+00> : vector<2xf32>
    %289 = vector.multi_reduction <add>, %286, %cst_161 [1] : vector<2x32xf32> to vector<2xf32>
    %290 = vector.shape_cast %289 : vector<2xf32> to vector<2x1xf32>
    %cst_162 = arith.constant 3.200000e+01 : f32
    %291 = vector.broadcast %cst_162 : f32 to vector<2x1xf32>
    %292 = arith.divf %290, %291 : vector<2x1xf32>
    %293 = arith.mulf %286, %286 : vector<2x32xf32>
    %cst_163 = arith.constant dense<0.000000e+00> : vector<2xf32>
    %294 = vector.multi_reduction <add>, %293, %cst_163 [1] : vector<2x32xf32> to vector<2xf32>
    %295 = vector.shape_cast %294 : vector<2xf32> to vector<2x1xf32>
    %cst_164 = arith.constant 3.200000e+01 : f32
    %296 = vector.broadcast %cst_164 : f32 to vector<2x1xf32>
    %297 = arith.divf %295, %296 : vector<2x1xf32>
    %298 = arith.mulf %292, %292 : vector<2x1xf32>
    %299 = arith.subf %297, %298 : vector<2x1xf32>
    %300 = vector.broadcast %292 : vector<2x1xf32> to vector<2x32xf32>
    %301 = arith.subf %286, %300 : vector<2x32xf32>
    %cst_165 = arith.constant 9.99999974E-6 : f32
    %302 = vector.broadcast %cst_165 : f32 to vector<2x1xf32>
    %303 = arith.addf %299, %302 : vector<2x1xf32>
    %304 = math.rsqrt %303 : vector<2x1xf32>
    %305 = vector.broadcast %304 : vector<2x1xf32> to vector<2x32xf32>
    %306 = arith.mulf %301, %305 : vector<2x32xf32>
    %307 = vector.broadcast %287 : vector<1x32xf32> to vector<2x32xf32>
    %308 = arith.mulf %306, %307 : vector<2x32xf32>
    %309 = vector.broadcast %288 : vector<1x32xf32> to vector<2x32xf32>
    %310 = arith.addf %308, %309 : vector<2x32xf32>
    %311 = vector.extract_strided_slice %252 {offsets = [5, 0], sizes = [1, 32], strides = [1, 1]} : vector<8x32xf32> to vector<1x32xf32>
    %c0_i32_166 = arith.constant 0 : i32
    %c0_i32_167 = arith.constant 0 : i32
    %c0_i32_168 = arith.constant 0 : i32
    %c0_i32_169 = arith.constant 0 : i32
    %c0_i32_170 = arith.constant 0 : i32
    %c0_i32_171 = arith.constant 0 : i32
    %312 = tpu.memref_slice %arg11[%c0_i32_166, %c0_i32_170, %c0_i32_171] : memref<8x32x2048xbf16, #tpu.memory_space<any>> -> memref<1x32x2048xbf16, #tpu.memory_space<any>>
    %313 = tpu.memref_squeeze %312 : memref<1x32x2048xbf16, #tpu.memory_space<any>> -> memref<32x2048xbf16, #tpu.memory_space<any>>
    %c0_i32_172 = arith.constant 0 : i32
    %c0_i32_173 = arith.constant 0 : i32
    %314 = tpu.memref_slice %arg15[%c0_i32_167, %c0_i32_172, %c0_i32_173] : memref<2x32x2048xbf16, #tpu.memory_space<vmem>> -> memref<1x32x2048xbf16, #tpu.memory_space<vmem>>
    %315 = tpu.memref_squeeze %314 : memref<1x32x2048xbf16, #tpu.memory_space<vmem>> -> memref<32x2048xbf16, #tpu.memory_space<vmem>>
    %316 = tpu.memref_slice %arg17[%c0_i32_168, %c0_i32_169] : memref<2x2x!tpu.dma_semaphore, #tpu.memory_space<semaphore_mem>> -> memref<1x1x!tpu.dma_semaphore, #tpu.memory_space<semaphore_mem>>
    %317 = tpu.memref_squeeze %316 : memref<1x1x!tpu.dma_semaphore, #tpu.memory_space<semaphore_mem>> -> memref<!tpu.dma_semaphore, #tpu.memory_space<semaphore_mem>>
    tpu.wait_dma2 semaphore(%317 : memref<!tpu.dma_semaphore, #tpu.memory_space<semaphore_mem>>) src(%313 : memref<32x2048xbf16, #tpu.memory_space<any>>) dst(%315 : memref<32x2048xbf16, #tpu.memory_space<vmem>>)
    %c0_i32_174 = arith.constant 0 : i32
    %c0_i32_175 = arith.constant 0 : i32
    %c1_i32_176 = arith.constant 1 : i32
    %c0_i32_177 = arith.constant 0 : i32
    %c0_i32_178 = arith.constant 0 : i32
    %c0_i32_179 = arith.constant 0 : i32
    %318 = tpu.memref_slice %arg12[%c0_i32_174, %c0_i32_178, %c0_i32_179] : memref<8x32x2048xbf16, #tpu.memory_space<any>> -> memref<1x32x2048xbf16, #tpu.memory_space<any>>
    %319 = tpu.memref_squeeze %318 : memref<1x32x2048xbf16, #tpu.memory_space<any>> -> memref<32x2048xbf16, #tpu.memory_space<any>>
    %c0_i32_180 = arith.constant 0 : i32
    %c0_i32_181 = arith.constant 0 : i32
    %320 = tpu.memref_slice %arg16[%c0_i32_175, %c0_i32_180, %c0_i32_181] : memref<2x32x2048xbf16, #tpu.memory_space<vmem>> -> memref<1x32x2048xbf16, #tpu.memory_space<vmem>>
    %321 = tpu.memref_squeeze %320 : memref<1x32x2048xbf16, #tpu.memory_space<vmem>> -> memref<32x2048xbf16, #tpu.memory_space<vmem>>
    %322 = tpu.memref_slice %arg17[%c1_i32_176, %c0_i32_177] : memref<2x2x!tpu.dma_semaphore, #tpu.memory_space<semaphore_mem>> -> memref<1x1x!tpu.dma_semaphore, #tpu.memory_space<semaphore_mem>>
    %323 = tpu.memref_squeeze %322 : memref<1x1x!tpu.dma_semaphore, #tpu.memory_space<semaphore_mem>> -> memref<!tpu.dma_semaphore, #tpu.memory_space<semaphore_mem>>
    tpu.wait_dma2 semaphore(%323 : memref<!tpu.dma_semaphore, #tpu.memory_space<semaphore_mem>>) src(%319 : memref<32x2048xbf16, #tpu.memory_space<any>>) dst(%321 : memref<32x2048xbf16, #tpu.memory_space<vmem>>)
    %c3_i32 = arith.constant 3 : i32
    %c1_i32_182 = arith.constant 1 : i32
    %c0_i32_183 = arith.constant 0 : i32
    %c1_i32_184 = arith.constant 1 : i32
    %c0_i32_185 = arith.constant 0 : i32
    %c0_i32_186 = arith.constant 0 : i32
    %324 = tpu.memref_slice %arg11[%c3_i32, %c0_i32_185, %c0_i32_186] : memref<8x32x2048xbf16, #tpu.memory_space<any>> -> memref<1x32x2048xbf16, #tpu.memory_space<any>>
    %325 = tpu.memref_squeeze %324 : memref<1x32x2048xbf16, #tpu.memory_space<any>> -> memref<32x2048xbf16, #tpu.memory_space<any>>
    %c0_i32_187 = arith.constant 0 : i32
    %c0_i32_188 = arith.constant 0 : i32
    %326 = tpu.memref_slice %arg15[%c1_i32_182, %c0_i32_187, %c0_i32_188] : memref<2x32x2048xbf16, #tpu.memory_space<vmem>> -> memref<1x32x2048xbf16, #tpu.memory_space<vmem>>
    %327 = tpu.memref_squeeze %326 : memref<1x32x2048xbf16, #tpu.memory_space<vmem>> -> memref<32x2048xbf16, #tpu.memory_space<vmem>>
    %328 = tpu.memref_slice %arg17[%c0_i32_183, %c1_i32_184] : memref<2x2x!tpu.dma_semaphore, #tpu.memory_space<semaphore_mem>> -> memref<1x1x!tpu.dma_semaphore, #tpu.memory_space<semaphore_mem>>
    %329 = tpu.memref_squeeze %328 : memref<1x1x!tpu.dma_semaphore, #tpu.memory_space<semaphore_mem>> -> memref<!tpu.dma_semaphore, #tpu.memory_space<semaphore_mem>>
    tpu.enqueue_dma source(%325 : memref<32x2048xbf16, #tpu.memory_space<any>>) target(%327 : memref<32x2048xbf16, #tpu.memory_space<vmem>>) target_semaphore(%329 : memref<!tpu.dma_semaphore, #tpu.memory_space<semaphore_mem>>)
    %c3_i32_189 = arith.constant 3 : i32
    %c1_i32_190 = arith.constant 1 : i32
    %c1_i32_191 = arith.constant 1 : i32
    %c1_i32_192 = arith.constant 1 : i32
    %c0_i32_193 = arith.constant 0 : i32
    %c0_i32_194 = arith.constant 0 : i32
    %330 = tpu.memref_slice %arg12[%c3_i32_189, %c0_i32_193, %c0_i32_194] : memref<8x32x2048xbf16, #tpu.memory_space<any>> -> memref<1x32x2048xbf16, #tpu.memory_space<any>>
    %331 = tpu.memref_squeeze %330 : memref<1x32x2048xbf16, #tpu.memory_space<any>> -> memref<32x2048xbf16, #tpu.memory_space<any>>
    %c0_i32_195 = arith.constant 0 : i32
    %c0_i32_196 = arith.constant 0 : i32
    %332 = tpu.memref_slice %arg16[%c1_i32_190, %c0_i32_195, %c0_i32_196] : memref<2x32x2048xbf16, #tpu.memory_space<vmem>> -> memref<1x32x2048xbf16, #tpu.memory_space<vmem>>
    %333 = tpu.memref_squeeze %332 : memref<1x32x2048xbf16, #tpu.memory_space<vmem>> -> memref<32x2048xbf16, #tpu.memory_space<vmem>>
    %334 = tpu.memref_slice %arg17[%c1_i32_191, %c1_i32_192] : memref<2x2x!tpu.dma_semaphore, #tpu.memory_space<semaphore_mem>> -> memref<1x1x!tpu.dma_semaphore, #tpu.memory_space<semaphore_mem>>
    %335 = tpu.memref_squeeze %334 : memref<1x1x!tpu.dma_semaphore, #tpu.memory_space<semaphore_mem>> -> memref<!tpu.dma_semaphore, #tpu.memory_space<semaphore_mem>>
    tpu.enqueue_dma source(%331 : memref<32x2048xbf16, #tpu.memory_space<any>>) target(%333 : memref<32x2048xbf16, #tpu.memory_space<vmem>>) target_semaphore(%335 : memref<!tpu.dma_semaphore, #tpu.memory_space<semaphore_mem>>)
    %c2 = arith.constant 2 : index
    %c0_197 = arith.constant 0 : index
    %336 = vector.load %arg10[%c2, %c0_197] : memref<8x2048xf32, #tpu.memory_space<vmem>>, vector<1x2048xf32>
    %337 = arith.truncf %310 : vector<2x32xf32> to vector<2x32xbf16>
    %c0_198 = arith.constant 0 : index
    %c0_199 = arith.constant 0 : index
    %c0_200 = arith.constant 0 : index
    %338 = vector.load %arg15[%c0_198, %c0_199, %c0_200] : memref<2x32x2048xbf16, #tpu.memory_space<vmem>>, vector<1x32x2048xbf16>
    %339 = vector.shape_cast %338 : vector<1x32x2048xbf16> to vector<32x2048xbf16>
    %cst_201 = arith.constant dense<0.000000e+00> : vector<2x2048xf32>
    %340 = tpu.matmul %337, %339, %cst_201 {dimension_numbers = #tpu.dot_dimension_numbers<[1], [0], [0], [1], [0, 0, 1, 1], [], []>} : vector<2x32xbf16>, vector<32x2048xbf16>, vector<2x2048xf32> -> vector<2x2048xf32>
    %341 = vector.broadcast %336 : vector<1x2048xf32> to vector<2x2048xf32>
    %342 = arith.addf %340, %341 : vector<2x2048xf32>
    %cst_202 = arith.constant 0.000000e+00 : f32
    %343 = vector.broadcast %cst_202 : f32 to vector<2x2048xf32>
    %344 = arith.maximumf %342, %343 : vector<2x2048xf32>
    %345 = arith.truncf %344 : vector<2x2048xf32> to vector<2x2048xbf16>
    %c0_203 = arith.constant 0 : index
    %c0_204 = arith.constant 0 : index
    %c0_205 = arith.constant 0 : index
    %346 = vector.load %arg16[%c0_203, %c0_204, %c0_205] : memref<2x32x2048xbf16, #tpu.memory_space<vmem>>, vector<1x32x2048xbf16>
    %347 = vector.shape_cast %346 : vector<1x32x2048xbf16> to vector<32x2048xbf16>
    %cst_206 = arith.constant dense<0.000000e+00> : vector<2x32xf32>
    %348 = tpu.matmul %345, %347, %cst_206 {dimension_numbers = #tpu.dot_dimension_numbers<[1], [1], [0], [0], [0, 0, 1, 0], [], []>} : vector<2x2048xbf16>, vector<32x2048xbf16>, vector<2x32xf32> -> vector<2x32xf32>
    %349 = vector.broadcast %311 : vector<1x32xf32> to vector<2x32xf32>
    %350 = arith.addf %348, %349 : vector<2x32xf32>
    %351 = arith.addf %310, %350 : vector<2x32xf32>
    %352 = vector.extract_strided_slice %252 {offsets = [6, 0], sizes = [1, 32], strides = [1, 1]} : vector<8x32xf32> to vector<1x32xf32>
    %353 = vector.extract_strided_slice %252 {offsets = [7, 0], sizes = [1, 32], strides = [1, 1]} : vector<8x32xf32> to vector<1x32xf32>
    %cst_207 = arith.constant dense<0.000000e+00> : vector<2xf32>
    %354 = vector.multi_reduction <add>, %351, %cst_207 [1] : vector<2x32xf32> to vector<2xf32>
    %355 = vector.shape_cast %354 : vector<2xf32> to vector<2x1xf32>
    %cst_208 = arith.constant 3.200000e+01 : f32
    %356 = vector.broadcast %cst_208 : f32 to vector<2x1xf32>
    %357 = arith.divf %355, %356 : vector<2x1xf32>
    %358 = arith.mulf %351, %351 : vector<2x32xf32>
    %cst_209 = arith.constant dense<0.000000e+00> : vector<2xf32>
    %359 = vector.multi_reduction <add>, %358, %cst_209 [1] : vector<2x32xf32> to vector<2xf32>
    %360 = vector.shape_cast %359 : vector<2xf32> to vector<2x1xf32>
    %cst_210 = arith.constant 3.200000e+01 : f32
    %361 = vector.broadcast %cst_210 : f32 to vector<2x1xf32>
    %362 = arith.divf %360, %361 : vector<2x1xf32>
    %363 = arith.mulf %357, %357 : vector<2x1xf32>
    %364 = arith.subf %362, %363 : vector<2x1xf32>
    %365 = vector.broadcast %357 : vector<2x1xf32> to vector<2x32xf32>
    %366 = arith.subf %351, %365 : vector<2x32xf32>
    %cst_211 = arith.constant 9.99999974E-6 : f32
    %367 = vector.broadcast %cst_211 : f32 to vector<2x1xf32>
    %368 = arith.addf %364, %367 : vector<2x1xf32>
    %369 = math.rsqrt %368 : vector<2x1xf32>
    %370 = vector.broadcast %369 : vector<2x1xf32> to vector<2x32xf32>
    %371 = arith.mulf %366, %370 : vector<2x32xf32>
    %372 = vector.broadcast %352 : vector<1x32xf32> to vector<2x32xf32>
    %373 = arith.mulf %371, %372 : vector<2x32xf32>
    %374 = vector.broadcast %353 : vector<1x32xf32> to vector<2x32xf32>
    %375 = arith.addf %373, %374 : vector<2x32xf32>
    %c1_212 = arith.constant 1 : index
    %c0_213 = arith.constant 0 : index
    %c0_214 = arith.constant 0 : index
    %376 = vector.load %arg8[%c1_212, %c0_213, %c0_214] : memref<6x8x32xf32, #tpu.memory_space<vmem>>, vector<1x8x32xf32>
    %377 = vector.shape_cast %376 : vector<1x8x32xf32> to vector<8x32xf32>
    %c1_215 = arith.constant 1 : index
    %c0_216 = arith.constant 0 : index
    %c0_217 = arith.constant 0 : index
    %378 = vector.load %arg5[%c1_215, %c0_216, %c0_217] : memref<6x32x32xbf16, #tpu.memory_space<vmem>>, vector<1x32x32xbf16>
    %379 = vector.shape_cast %378 : vector<1x32x32xbf16> to vector<32x32xbf16>
    %380 = vector.extract_strided_slice %377 {offsets = [0, 0], sizes = [1, 32], strides = [1, 1]} : vector<8x32xf32> to vector<1x32xf32>
    %381 = arith.truncf %375 : vector<2x32xf32> to vector<2x32xbf16>
    %cst_218 = arith.constant dense<0.000000e+00> : vector<2x32xf32>
    %382 = tpu.matmul %381, %379, %cst_218 {dimension_numbers = #tpu.dot_dimension_numbers<[1], [0], [0], [1], [0, 0, 1, 1], [], []>} : vector<2x32xbf16>, vector<32x32xbf16>, vector<2x32xf32> -> vector<2x32xf32>
    %383 = vector.broadcast %380 : vector<1x32xf32> to vector<2x32xf32>
    %384 = arith.addf %382, %383 : vector<2x32xf32>
    %385 = arith.addf %375, %384 : vector<2x32xf32>
    %386 = vector.extract_strided_slice %377 {offsets = [1, 0], sizes = [1, 32], strides = [1, 1]} : vector<8x32xf32> to vector<1x32xf32>
    %387 = vector.extract_strided_slice %377 {offsets = [2, 0], sizes = [1, 32], strides = [1, 1]} : vector<8x32xf32> to vector<1x32xf32>
    %cst_219 = arith.constant dense<0.000000e+00> : vector<2xf32>
    %388 = vector.multi_reduction <add>, %385, %cst_219 [1] : vector<2x32xf32> to vector<2xf32>
    %389 = vector.shape_cast %388 : vector<2xf32> to vector<2x1xf32>
    %cst_220 = arith.constant 3.200000e+01 : f32
    %390 = vector.broadcast %cst_220 : f32 to vector<2x1xf32>
    %391 = arith.divf %389, %390 : vector<2x1xf32>
    %392 = arith.mulf %385, %385 : vector<2x32xf32>
    %cst_221 = arith.constant dense<0.000000e+00> : vector<2xf32>
    %393 = vector.multi_reduction <add>, %392, %cst_221 [1] : vector<2x32xf32> to vector<2xf32>
    %394 = vector.shape_cast %393 : vector<2xf32> to vector<2x1xf32>
    %cst_222 = arith.constant 3.200000e+01 : f32
    %395 = vector.broadcast %cst_222 : f32 to vector<2x1xf32>
    %396 = arith.divf %394, %395 : vector<2x1xf32>
    %397 = arith.mulf %391, %391 : vector<2x1xf32>
    %398 = arith.subf %396, %397 : vector<2x1xf32>
    %399 = vector.broadcast %391 : vector<2x1xf32> to vector<2x32xf32>
    %400 = arith.subf %385, %399 : vector<2x32xf32>
    %cst_223 = arith.constant 9.99999974E-6 : f32
    %401 = vector.broadcast %cst_223 : f32 to vector<2x1xf32>
    %402 = arith.addf %398, %401 : vector<2x1xf32>
    %403 = math.rsqrt %402 : vector<2x1xf32>
    %404 = vector.broadcast %403 : vector<2x1xf32> to vector<2x32xf32>
    %405 = arith.mulf %400, %404 : vector<2x32xf32>
    %406 = vector.broadcast %386 : vector<1x32xf32> to vector<2x32xf32>
    %407 = arith.mulf %405, %406 : vector<2x32xf32>
    %408 = vector.broadcast %387 : vector<1x32xf32> to vector<2x32xf32>
    %409 = arith.addf %407, %408 : vector<2x32xf32>
    %410 = vector.extract_strided_slice %250 {offsets = [0, 32], sizes = [2, 32], strides = [1, 1]} : vector<2x192xf32> to vector<2x32xf32>
    %411 = arith.addf %409, %410 : vector<2x32xf32>
    %412 = vector.extract_strided_slice %377 {offsets = [3, 0], sizes = [1, 32], strides = [1, 1]} : vector<8x32xf32> to vector<1x32xf32>
    %413 = vector.extract_strided_slice %377 {offsets = [4, 0], sizes = [1, 32], strides = [1, 1]} : vector<8x32xf32> to vector<1x32xf32>
    %cst_224 = arith.constant dense<0.000000e+00> : vector<2xf32>
    %414 = vector.multi_reduction <add>, %411, %cst_224 [1] : vector<2x32xf32> to vector<2xf32>
    %415 = vector.shape_cast %414 : vector<2xf32> to vector<2x1xf32>
    %cst_225 = arith.constant 3.200000e+01 : f32
    %416 = vector.broadcast %cst_225 : f32 to vector<2x1xf32>
    %417 = arith.divf %415, %416 : vector<2x1xf32>
    %418 = arith.mulf %411, %411 : vector<2x32xf32>
    %cst_226 = arith.constant dense<0.000000e+00> : vector<2xf32>
    %419 = vector.multi_reduction <add>, %418, %cst_226 [1] : vector<2x32xf32> to vector<2xf32>
    %420 = vector.shape_cast %419 : vector<2xf32> to vector<2x1xf32>
    %cst_227 = arith.constant 3.200000e+01 : f32
    %421 = vector.broadcast %cst_227 : f32 to vector<2x1xf32>
    %422 = arith.divf %420, %421 : vector<2x1xf32>
    %423 = arith.mulf %417, %417 : vector<2x1xf32>
    %424 = arith.subf %422, %423 : vector<2x1xf32>
    %425 = vector.broadcast %417 : vector<2x1xf32> to vector<2x32xf32>
    %426 = arith.subf %411, %425 : vector<2x32xf32>
    %cst_228 = arith.constant 9.99999974E-6 : f32
    %427 = vector.broadcast %cst_228 : f32 to vector<2x1xf32>
    %428 = arith.addf %424, %427 : vector<2x1xf32>
    %429 = math.rsqrt %428 : vector<2x1xf32>
    %430 = vector.broadcast %429 : vector<2x1xf32> to vector<2x32xf32>
    %431 = arith.mulf %426, %430 : vector<2x32xf32>
    %432 = vector.broadcast %412 : vector<1x32xf32> to vector<2x32xf32>
    %433 = arith.mulf %431, %432 : vector<2x32xf32>
    %434 = vector.broadcast %413 : vector<1x32xf32> to vector<2x32xf32>
    %435 = arith.addf %433, %434 : vector<2x32xf32>
    %436 = vector.extract_strided_slice %377 {offsets = [5, 0], sizes = [1, 32], strides = [1, 1]} : vector<8x32xf32> to vector<1x32xf32>
    %c0_i32_229 = arith.constant 0 : i32
    %c1_i32_230 = arith.constant 1 : i32
    %c0_i32_231 = arith.constant 0 : i32
    %c1_i32_232 = arith.constant 1 : i32
    %c0_i32_233 = arith.constant 0 : i32
    %c0_i32_234 = arith.constant 0 : i32
    %437 = tpu.memref_slice %arg11[%c0_i32_229, %c0_i32_233, %c0_i32_234] : memref<8x32x2048xbf16, #tpu.memory_space<any>> -> memref<1x32x2048xbf16, #tpu.memory_space<any>>
    %438 = tpu.memref_squeeze %437 : memref<1x32x2048xbf16, #tpu.memory_space<any>> -> memref<32x2048xbf16, #tpu.memory_space<any>>
    %c0_i32_235 = arith.constant 0 : i32
    %c0_i32_236 = arith.constant 0 : i32
    %439 = tpu.memref_slice %arg15[%c1_i32_230, %c0_i32_235, %c0_i32_236] : memref<2x32x2048xbf16, #tpu.memory_space<vmem>> -> memref<1x32x2048xbf16, #tpu.memory_space<vmem>>
    %440 = tpu.memref_squeeze %439 : memref<1x32x2048xbf16, #tpu.memory_space<vmem>> -> memref<32x2048xbf16, #tpu.memory_space<vmem>>
    %441 = tpu.memref_slice %arg17[%c0_i32_231, %c1_i32_232] : memref<2x2x!tpu.dma_semaphore, #tpu.memory_space<semaphore_mem>> -> memref<1x1x!tpu.dma_semaphore, #tpu.memory_space<semaphore_mem>>
    %442 = tpu.memref_squeeze %441 : memref<1x1x!tpu.dma_semaphore, #tpu.memory_space<semaphore_mem>> -> memref<!tpu.dma_semaphore, #tpu.memory_space<semaphore_mem>>
    tpu.wait_dma2 semaphore(%442 : memref<!tpu.dma_semaphore, #tpu.memory_space<semaphore_mem>>) src(%438 : memref<32x2048xbf16, #tpu.memory_space<any>>) dst(%440 : memref<32x2048xbf16, #tpu.memory_space<vmem>>)
    %c0_i32_237 = arith.constant 0 : i32
    %c1_i32_238 = arith.constant 1 : i32
    %c1_i32_239 = arith.constant 1 : i32
    %c1_i32_240 = arith.constant 1 : i32
    %c0_i32_241 = arith.constant 0 : i32
    %c0_i32_242 = arith.constant 0 : i32
    %443 = tpu.memref_slice %arg12[%c0_i32_237, %c0_i32_241, %c0_i32_242] : memref<8x32x2048xbf16, #tpu.memory_space<any>> -> memref<1x32x2048xbf16, #tpu.memory_space<any>>
    %444 = tpu.memref_squeeze %443 : memref<1x32x2048xbf16, #tpu.memory_space<any>> -> memref<32x2048xbf16, #tpu.memory_space<any>>
    %c0_i32_243 = arith.constant 0 : i32
    %c0_i32_244 = arith.constant 0 : i32
    %445 = tpu.memref_slice %arg16[%c1_i32_238, %c0_i32_243, %c0_i32_244] : memref<2x32x2048xbf16, #tpu.memory_space<vmem>> -> memref<1x32x2048xbf16, #tpu.memory_space<vmem>>
    %446 = tpu.memref_squeeze %445 : memref<1x32x2048xbf16, #tpu.memory_space<vmem>> -> memref<32x2048xbf16, #tpu.memory_space<vmem>>
    %447 = tpu.memref_slice %arg17[%c1_i32_239, %c1_i32_240] : memref<2x2x!tpu.dma_semaphore, #tpu.memory_space<semaphore_mem>> -> memref<1x1x!tpu.dma_semaphore, #tpu.memory_space<semaphore_mem>>
    %448 = tpu.memref_squeeze %447 : memref<1x1x!tpu.dma_semaphore, #tpu.memory_space<semaphore_mem>> -> memref<!tpu.dma_semaphore, #tpu.memory_space<semaphore_mem>>
    tpu.wait_dma2 semaphore(%448 : memref<!tpu.dma_semaphore, #tpu.memory_space<semaphore_mem>>) src(%444 : memref<32x2048xbf16, #tpu.memory_space<any>>) dst(%446 : memref<32x2048xbf16, #tpu.memory_space<vmem>>)
    %c4_i32 = arith.constant 4 : i32
    %c0_i32_245 = arith.constant 0 : i32
    %c0_i32_246 = arith.constant 0 : i32
    %c0_i32_247 = arith.constant 0 : i32
    %c0_i32_248 = arith.constant 0 : i32
    %c0_i32_249 = arith.constant 0 : i32
    %449 = tpu.memref_slice %arg11[%c4_i32, %c0_i32_248, %c0_i32_249] : memref<8x32x2048xbf16, #tpu.memory_space<any>> -> memref<1x32x2048xbf16, #tpu.memory_space<any>>
    %450 = tpu.memref_squeeze %449 : memref<1x32x2048xbf16, #tpu.memory_space<any>> -> memref<32x2048xbf16, #tpu.memory_space<any>>
    %c0_i32_250 = arith.constant 0 : i32
    %c0_i32_251 = arith.constant 0 : i32
    %451 = tpu.memref_slice %arg15[%c0_i32_245, %c0_i32_250, %c0_i32_251] : memref<2x32x2048xbf16, #tpu.memory_space<vmem>> -> memref<1x32x2048xbf16, #tpu.memory_space<vmem>>
    %452 = tpu.memref_squeeze %451 : memref<1x32x2048xbf16, #tpu.memory_space<vmem>> -> memref<32x2048xbf16, #tpu.memory_space<vmem>>
    %453 = tpu.memref_slice %arg17[%c0_i32_246, %c0_i32_247] : memref<2x2x!tpu.dma_semaphore, #tpu.memory_space<semaphore_mem>> -> memref<1x1x!tpu.dma_semaphore, #tpu.memory_space<semaphore_mem>>
    %454 = tpu.memref_squeeze %453 : memref<1x1x!tpu.dma_semaphore, #tpu.memory_space<semaphore_mem>> -> memref<!tpu.dma_semaphore, #tpu.memory_space<semaphore_mem>>
    tpu.enqueue_dma source(%450 : memref<32x2048xbf16, #tpu.memory_space<any>>) target(%452 : memref<32x2048xbf16, #tpu.memory_space<vmem>>) target_semaphore(%454 : memref<!tpu.dma_semaphore, #tpu.memory_space<semaphore_mem>>)
    %c4_i32_252 = arith.constant 4 : i32
    %c0_i32_253 = arith.constant 0 : i32
    %c1_i32_254 = arith.constant 1 : i32
    %c0_i32_255 = arith.constant 0 : i32
    %c0_i32_256 = arith.constant 0 : i32
    %c0_i32_257 = arith.constant 0 : i32
    %455 = tpu.memref_slice %arg12[%c4_i32_252, %c0_i32_256, %c0_i32_257] : memref<8x32x2048xbf16, #tpu.memory_space<any>> -> memref<1x32x2048xbf16, #tpu.memory_space<any>>
    %456 = tpu.memref_squeeze %455 : memref<1x32x2048xbf16, #tpu.memory_space<any>> -> memref<32x2048xbf16, #tpu.memory_space<any>>
    %c0_i32_258 = arith.constant 0 : i32
    %c0_i32_259 = arith.constant 0 : i32
    %457 = tpu.memref_slice %arg16[%c0_i32_253, %c0_i32_258, %c0_i32_259] : memref<2x32x2048xbf16, #tpu.memory_space<vmem>> -> memref<1x32x2048xbf16, #tpu.memory_space<vmem>>
    %458 = tpu.memref_squeeze %457 : memref<1x32x2048xbf16, #tpu.memory_space<vmem>> -> memref<32x2048xbf16, #tpu.memory_space<vmem>>
    %459 = tpu.memref_slice %arg17[%c1_i32_254, %c0_i32_255] : memref<2x2x!tpu.dma_semaphore, #tpu.memory_space<semaphore_mem>> -> memref<1x1x!tpu.dma_semaphore, #tpu.memory_space<semaphore_mem>>
    %460 = tpu.memref_squeeze %459 : memref<1x1x!tpu.dma_semaphore, #tpu.memory_space<semaphore_mem>> -> memref<!tpu.dma_semaphore, #tpu.memory_space<semaphore_mem>>
    tpu.enqueue_dma source(%456 : memref<32x2048xbf16, #tpu.memory_space<any>>) target(%458 : memref<32x2048xbf16, #tpu.memory_space<vmem>>) target_semaphore(%460 : memref<!tpu.dma_semaphore, #tpu.memory_space<semaphore_mem>>)
    %c3 = arith.constant 3 : index
    %c0_260 = arith.constant 0 : index
    %461 = vector.load %arg10[%c3, %c0_260] : memref<8x2048xf32, #tpu.memory_space<vmem>>, vector<1x2048xf32>
    %462 = arith.truncf %435 : vector<2x32xf32> to vector<2x32xbf16>
    %c1_261 = arith.constant 1 : index
    %c0_262 = arith.constant 0 : index
    %c0_263 = arith.constant 0 : index
    %463 = vector.load %arg15[%c1_261, %c0_262, %c0_263] : memref<2x32x2048xbf16, #tpu.memory_space<vmem>>, vector<1x32x2048xbf16>
    %464 = vector.shape_cast %463 : vector<1x32x2048xbf16> to vector<32x2048xbf16>
    %cst_264 = arith.constant dense<0.000000e+00> : vector<2x2048xf32>
    %465 = tpu.matmul %462, %464, %cst_264 {dimension_numbers = #tpu.dot_dimension_numbers<[1], [0], [0], [1], [0, 0, 1, 1], [], []>} : vector<2x32xbf16>, vector<32x2048xbf16>, vector<2x2048xf32> -> vector<2x2048xf32>
    %466 = vector.broadcast %461 : vector<1x2048xf32> to vector<2x2048xf32>
    %467 = arith.addf %465, %466 : vector<2x2048xf32>
    %cst_265 = arith.constant 0.000000e+00 : f32
    %468 = vector.broadcast %cst_265 : f32 to vector<2x2048xf32>
    %469 = arith.maximumf %467, %468 : vector<2x2048xf32>
    %470 = arith.truncf %469 : vector<2x2048xf32> to vector<2x2048xbf16>
    %c1_266 = arith.constant 1 : index
    %c0_267 = arith.constant 0 : index
    %c0_268 = arith.constant 0 : index
    %471 = vector.load %arg16[%c1_266, %c0_267, %c0_268] : memref<2x32x2048xbf16, #tpu.memory_space<vmem>>, vector<1x32x2048xbf16>
    %472 = vector.shape_cast %471 : vector<1x32x2048xbf16> to vector<32x2048xbf16>
    %cst_269 = arith.constant dense<0.000000e+00> : vector<2x32xf32>
    %473 = tpu.matmul %470, %472, %cst_269 {dimension_numbers = #tpu.dot_dimension_numbers<[1], [1], [0], [0], [0, 0, 1, 0], [], []>} : vector<2x2048xbf16>, vector<32x2048xbf16>, vector<2x32xf32> -> vector<2x32xf32>
    %474 = vector.broadcast %436 : vector<1x32xf32> to vector<2x32xf32>
    %475 = arith.addf %473, %474 : vector<2x32xf32>
    %476 = arith.addf %435, %475 : vector<2x32xf32>
    %477 = vector.extract_strided_slice %377 {offsets = [6, 0], sizes = [1, 32], strides = [1, 1]} : vector<8x32xf32> to vector<1x32xf32>
    %478 = vector.extract_strided_slice %377 {offsets = [7, 0], sizes = [1, 32], strides = [1, 1]} : vector<8x32xf32> to vector<1x32xf32>
    %cst_270 = arith.constant dense<0.000000e+00> : vector<2xf32>
    %479 = vector.multi_reduction <add>, %476, %cst_270 [1] : vector<2x32xf32> to vector<2xf32>
    %480 = vector.shape_cast %479 : vector<2xf32> to vector<2x1xf32>
    %cst_271 = arith.constant 3.200000e+01 : f32
    %481 = vector.broadcast %cst_271 : f32 to vector<2x1xf32>
    %482 = arith.divf %480, %481 : vector<2x1xf32>
    %483 = arith.mulf %476, %476 : vector<2x32xf32>
    %cst_272 = arith.constant dense<0.000000e+00> : vector<2xf32>
    %484 = vector.multi_reduction <add>, %483, %cst_272 [1] : vector<2x32xf32> to vector<2xf32>
    %485 = vector.shape_cast %484 : vector<2xf32> to vector<2x1xf32>
    %cst_273 = arith.constant 3.200000e+01 : f32
    %486 = vector.broadcast %cst_273 : f32 to vector<2x1xf32>
    %487 = arith.divf %485, %486 : vector<2x1xf32>
    %488 = arith.mulf %482, %482 : vector<2x1xf32>
    %489 = arith.subf %487, %488 : vector<2x1xf32>
    %490 = vector.broadcast %482 : vector<2x1xf32> to vector<2x32xf32>
    %491 = arith.subf %476, %490 : vector<2x32xf32>
    %cst_274 = arith.constant 9.99999974E-6 : f32
    %492 = vector.broadcast %cst_274 : f32 to vector<2x1xf32>
    %493 = arith.addf %489, %492 : vector<2x1xf32>
    %494 = math.rsqrt %493 : vector<2x1xf32>
    %495 = vector.broadcast %494 : vector<2x1xf32> to vector<2x32xf32>
    %496 = arith.mulf %491, %495 : vector<2x32xf32>
    %497 = vector.broadcast %477 : vector<1x32xf32> to vector<2x32xf32>
    %498 = arith.mulf %496, %497 : vector<2x32xf32>
    %499 = vector.broadcast %478 : vector<1x32xf32> to vector<2x32xf32>
    %500 = arith.addf %498, %499 : vector<2x32xf32>
    %c2_275 = arith.constant 2 : index
    %c0_276 = arith.constant 0 : index
    %c0_277 = arith.constant 0 : index
    %501 = vector.load %arg8[%c2_275, %c0_276, %c0_277] : memref<6x8x32xf32, #tpu.memory_space<vmem>>, vector<1x8x32xf32>
    %502 = vector.shape_cast %501 : vector<1x8x32xf32> to vector<8x32xf32>
    %c2_278 = arith.constant 2 : index
    %c0_279 = arith.constant 0 : index
    %c0_280 = arith.constant 0 : index
    %503 = vector.load %arg5[%c2_278, %c0_279, %c0_280] : memref<6x32x32xbf16, #tpu.memory_space<vmem>>, vector<1x32x32xbf16>
    %504 = vector.shape_cast %503 : vector<1x32x32xbf16> to vector<32x32xbf16>
    %505 = vector.extract_strided_slice %502 {offsets = [0, 0], sizes = [1, 32], strides = [1, 1]} : vector<8x32xf32> to vector<1x32xf32>
    %506 = arith.truncf %500 : vector<2x32xf32> to vector<2x32xbf16>
    %cst_281 = arith.constant dense<0.000000e+00> : vector<2x32xf32>
    %507 = tpu.matmul %506, %504, %cst_281 {dimension_numbers = #tpu.dot_dimension_numbers<[1], [0], [0], [1], [0, 0, 1, 1], [], []>} : vector<2x32xbf16>, vector<32x32xbf16>, vector<2x32xf32> -> vector<2x32xf32>
    %508 = vector.broadcast %505 : vector<1x32xf32> to vector<2x32xf32>
    %509 = arith.addf %507, %508 : vector<2x32xf32>
    %510 = arith.addf %500, %509 : vector<2x32xf32>
    %511 = vector.extract_strided_slice %502 {offsets = [1, 0], sizes = [1, 32], strides = [1, 1]} : vector<8x32xf32> to vector<1x32xf32>
    %512 = vector.extract_strided_slice %502 {offsets = [2, 0], sizes = [1, 32], strides = [1, 1]} : vector<8x32xf32> to vector<1x32xf32>
    %cst_282 = arith.constant dense<0.000000e+00> : vector<2xf32>
    %513 = vector.multi_reduction <add>, %510, %cst_282 [1] : vector<2x32xf32> to vector<2xf32>
    %514 = vector.shape_cast %513 : vector<2xf32> to vector<2x1xf32>
    %cst_283 = arith.constant 3.200000e+01 : f32
    %515 = vector.broadcast %cst_283 : f32 to vector<2x1xf32>
    %516 = arith.divf %514, %515 : vector<2x1xf32>
    %517 = arith.mulf %510, %510 : vector<2x32xf32>
    %cst_284 = arith.constant dense<0.000000e+00> : vector<2xf32>
    %518 = vector.multi_reduction <add>, %517, %cst_284 [1] : vector<2x32xf32> to vector<2xf32>
    %519 = vector.shape_cast %518 : vector<2xf32> to vector<2x1xf32>
    %cst_285 = arith.constant 3.200000e+01 : f32
    %520 = vector.broadcast %cst_285 : f32 to vector<2x1xf32>
    %521 = arith.divf %519, %520 : vector<2x1xf32>
    %522 = arith.mulf %516, %516 : vector<2x1xf32>
    %523 = arith.subf %521, %522 : vector<2x1xf32>
    %524 = vector.broadcast %516 : vector<2x1xf32> to vector<2x32xf32>
    %525 = arith.subf %510, %524 : vector<2x32xf32>
    %cst_286 = arith.constant 9.99999974E-6 : f32
    %526 = vector.broadcast %cst_286 : f32 to vector<2x1xf32>
    %527 = arith.addf %523, %526 : vector<2x1xf32>
    %528 = math.rsqrt %527 : vector<2x1xf32>
    %529 = vector.broadcast %528 : vector<2x1xf32> to vector<2x32xf32>
    %530 = arith.mulf %525, %529 : vector<2x32xf32>
    %531 = vector.broadcast %511 : vector<1x32xf32> to vector<2x32xf32>
    %532 = arith.mulf %530, %531 : vector<2x32xf32>
    %533 = vector.broadcast %512 : vector<1x32xf32> to vector<2x32xf32>
    %534 = arith.addf %532, %533 : vector<2x32xf32>
    %535 = vector.extract_strided_slice %250 {offsets = [0, 64], sizes = [2, 32], strides = [1, 1]} : vector<2x192xf32> to vector<2x32xf32>
    %536 = arith.addf %534, %535 : vector<2x32xf32>
    %537 = vector.extract_strided_slice %502 {offsets = [3, 0], sizes = [1, 32], strides = [1, 1]} : vector<8x32xf32> to vector<1x32xf32>
    %538 = vector.extract_strided_slice %502 {offsets = [4, 0], sizes = [1, 32], strides = [1, 1]} : vector<8x32xf32> to vector<1x32xf32>
    %cst_287 = arith.constant dense<0.000000e+00> : vector<2xf32>
    %539 = vector.multi_reduction <add>, %536, %cst_287 [1] : vector<2x32xf32> to vector<2xf32>
    %540 = vector.shape_cast %539 : vector<2xf32> to vector<2x1xf32>
    %cst_288 = arith.constant 3.200000e+01 : f32
    %541 = vector.broadcast %cst_288 : f32 to vector<2x1xf32>
    %542 = arith.divf %540, %541 : vector<2x1xf32>
    %543 = arith.mulf %536, %536 : vector<2x32xf32>
    %cst_289 = arith.constant dense<0.000000e+00> : vector<2xf32>
    %544 = vector.multi_reduction <add>, %543, %cst_289 [1] : vector<2x32xf32> to vector<2xf32>
    %545 = vector.shape_cast %544 : vector<2xf32> to vector<2x1xf32>
    %cst_290 = arith.constant 3.200000e+01 : f32
    %546 = vector.broadcast %cst_290 : f32 to vector<2x1xf32>
    %547 = arith.divf %545, %546 : vector<2x1xf32>
    %548 = arith.mulf %542, %542 : vector<2x1xf32>
    %549 = arith.subf %547, %548 : vector<2x1xf32>
    %550 = vector.broadcast %542 : vector<2x1xf32> to vector<2x32xf32>
    %551 = arith.subf %536, %550 : vector<2x32xf32>
    %cst_291 = arith.constant 9.99999974E-6 : f32
    %552 = vector.broadcast %cst_291 : f32 to vector<2x1xf32>
    %553 = arith.addf %549, %552 : vector<2x1xf32>
    %554 = math.rsqrt %553 : vector<2x1xf32>
    %555 = vector.broadcast %554 : vector<2x1xf32> to vector<2x32xf32>
    %556 = arith.mulf %551, %555 : vector<2x32xf32>
    %557 = vector.broadcast %537 : vector<1x32xf32> to vector<2x32xf32>
    %558 = arith.mulf %556, %557 : vector<2x32xf32>
    %559 = vector.broadcast %538 : vector<1x32xf32> to vector<2x32xf32>
    %560 = arith.addf %558, %559 : vector<2x32xf32>
    %561 = vector.extract_strided_slice %502 {offsets = [5, 0], sizes = [1, 32], strides = [1, 1]} : vector<8x32xf32> to vector<1x32xf32>
    %c0_i32_292 = arith.constant 0 : i32
    %c0_i32_293 = arith.constant 0 : i32
    %c0_i32_294 = arith.constant 0 : i32
    %c0_i32_295 = arith.constant 0 : i32
    %c0_i32_296 = arith.constant 0 : i32
    %c0_i32_297 = arith.constant 0 : i32
    %562 = tpu.memref_slice %arg11[%c0_i32_292, %c0_i32_296, %c0_i32_297] : memref<8x32x2048xbf16, #tpu.memory_space<any>> -> memref<1x32x2048xbf16, #tpu.memory_space<any>>
    %563 = tpu.memref_squeeze %562 : memref<1x32x2048xbf16, #tpu.memory_space<any>> -> memref<32x2048xbf16, #tpu.memory_space<any>>
    %c0_i32_298 = arith.constant 0 : i32
    %c0_i32_299 = arith.constant 0 : i32
    %564 = tpu.memref_slice %arg15[%c0_i32_293, %c0_i32_298, %c0_i32_299] : memref<2x32x2048xbf16, #tpu.memory_space<vmem>> -> memref<1x32x2048xbf16, #tpu.memory_space<vmem>>
    %565 = tpu.memref_squeeze %564 : memref<1x32x2048xbf16, #tpu.memory_space<vmem>> -> memref<32x2048xbf16, #tpu.memory_space<vmem>>
    %566 = tpu.memref_slice %arg17[%c0_i32_294, %c0_i32_295] : memref<2x2x!tpu.dma_semaphore, #tpu.memory_space<semaphore_mem>> -> memref<1x1x!tpu.dma_semaphore, #tpu.memory_space<semaphore_mem>>
    %567 = tpu.memref_squeeze %566 : memref<1x1x!tpu.dma_semaphore, #tpu.memory_space<semaphore_mem>> -> memref<!tpu.dma_semaphore, #tpu.memory_space<semaphore_mem>>
    tpu.wait_dma2 semaphore(%567 : memref<!tpu.dma_semaphore, #tpu.memory_space<semaphore_mem>>) src(%563 : memref<32x2048xbf16, #tpu.memory_space<any>>) dst(%565 : memref<32x2048xbf16, #tpu.memory_space<vmem>>)
    %c0_i32_300 = arith.constant 0 : i32
    %c0_i32_301 = arith.constant 0 : i32
    %c1_i32_302 = arith.constant 1 : i32
    %c0_i32_303 = arith.constant 0 : i32
    %c0_i32_304 = arith.constant 0 : i32
    %c0_i32_305 = arith.constant 0 : i32
    %568 = tpu.memref_slice %arg12[%c0_i32_300, %c0_i32_304, %c0_i32_305] : memref<8x32x2048xbf16, #tpu.memory_space<any>> -> memref<1x32x2048xbf16, #tpu.memory_space<any>>
    %569 = tpu.memref_squeeze %568 : memref<1x32x2048xbf16, #tpu.memory_space<any>> -> memref<32x2048xbf16, #tpu.memory_space<any>>
    %c0_i32_306 = arith.constant 0 : i32
    %c0_i32_307 = arith.constant 0 : i32
    %570 = tpu.memref_slice %arg16[%c0_i32_301, %c0_i32_306, %c0_i32_307] : memref<2x32x2048xbf16, #tpu.memory_space<vmem>> -> memref<1x32x2048xbf16, #tpu.memory_space<vmem>>
    %571 = tpu.memref_squeeze %570 : memref<1x32x2048xbf16, #tpu.memory_space<vmem>> -> memref<32x2048xbf16, #tpu.memory_space<vmem>>
    %572 = tpu.memref_slice %arg17[%c1_i32_302, %c0_i32_303] : memref<2x2x!tpu.dma_semaphore, #tpu.memory_space<semaphore_mem>> -> memref<1x1x!tpu.dma_semaphore, #tpu.memory_space<semaphore_mem>>
    %573 = tpu.memref_squeeze %572 : memref<1x1x!tpu.dma_semaphore, #tpu.memory_space<semaphore_mem>> -> memref<!tpu.dma_semaphore, #tpu.memory_space<semaphore_mem>>
    tpu.wait_dma2 semaphore(%573 : memref<!tpu.dma_semaphore, #tpu.memory_space<semaphore_mem>>) src(%569 : memref<32x2048xbf16, #tpu.memory_space<any>>) dst(%571 : memref<32x2048xbf16, #tpu.memory_space<vmem>>)
    %c5_i32 = arith.constant 5 : i32
    %c1_i32_308 = arith.constant 1 : i32
    %c0_i32_309 = arith.constant 0 : i32
    %c1_i32_310 = arith.constant 1 : i32
    %c0_i32_311 = arith.constant 0 : i32
    %c0_i32_312 = arith.constant 0 : i32
    %574 = tpu.memref_slice %arg11[%c5_i32, %c0_i32_311, %c0_i32_312] : memref<8x32x2048xbf16, #tpu.memory_space<any>> -> memref<1x32x2048xbf16, #tpu.memory_space<any>>
    %575 = tpu.memref_squeeze %574 : memref<1x32x2048xbf16, #tpu.memory_space<any>> -> memref<32x2048xbf16, #tpu.memory_space<any>>
    %c0_i32_313 = arith.constant 0 : i32
    %c0_i32_314 = arith.constant 0 : i32
    %576 = tpu.memref_slice %arg15[%c1_i32_308, %c0_i32_313, %c0_i32_314] : memref<2x32x2048xbf16, #tpu.memory_space<vmem>> -> memref<1x32x2048xbf16, #tpu.memory_space<vmem>>
    %577 = tpu.memref_squeeze %576 : memref<1x32x2048xbf16, #tpu.memory_space<vmem>> -> memref<32x2048xbf16, #tpu.memory_space<vmem>>
    %578 = tpu.memref_slice %arg17[%c0_i32_309, %c1_i32_310] : memref<2x2x!tpu.dma_semaphore, #tpu.memory_space<semaphore_mem>> -> memref<1x1x!tpu.dma_semaphore, #tpu.memory_space<semaphore_mem>>
    %579 = tpu.memref_squeeze %578 : memref<1x1x!tpu.dma_semaphore, #tpu.memory_space<semaphore_mem>> -> memref<!tpu.dma_semaphore, #tpu.memory_space<semaphore_mem>>
    tpu.enqueue_dma source(%575 : memref<32x2048xbf16, #tpu.memory_space<any>>) target(%577 : memref<32x2048xbf16, #tpu.memory_space<vmem>>) target_semaphore(%579 : memref<!tpu.dma_semaphore, #tpu.memory_space<semaphore_mem>>)
    %c5_i32_315 = arith.constant 5 : i32
    %c1_i32_316 = arith.constant 1 : i32
    %c1_i32_317 = arith.constant 1 : i32
    %c1_i32_318 = arith.constant 1 : i32
    %c0_i32_319 = arith.constant 0 : i32
    %c0_i32_320 = arith.constant 0 : i32
    %580 = tpu.memref_slice %arg12[%c5_i32_315, %c0_i32_319, %c0_i32_320] : memref<8x32x2048xbf16, #tpu.memory_space<any>> -> memref<1x32x2048xbf16, #tpu.memory_space<any>>
    %581 = tpu.memref_squeeze %580 : memref<1x32x2048xbf16, #tpu.memory_space<any>> -> memref<32x2048xbf16, #tpu.memory_space<any>>
    %c0_i32_321 = arith.constant 0 : i32
    %c0_i32_322 = arith.constant 0 : i32
    %582 = tpu.memref_slice %arg16[%c1_i32_316, %c0_i32_321, %c0_i32_322] : memref<2x32x2048xbf16, #tpu.memory_space<vmem>> -> memref<1x32x2048xbf16, #tpu.memory_space<vmem>>
    %583 = tpu.memref_squeeze %582 : memref<1x32x2048xbf16, #tpu.memory_space<vmem>> -> memref<32x2048xbf16, #tpu.memory_space<vmem>>
    %584 = tpu.memref_slice %arg17[%c1_i32_317, %c1_i32_318] : memref<2x2x!tpu.dma_semaphore, #tpu.memory_space<semaphore_mem>> -> memref<1x1x!tpu.dma_semaphore, #tpu.memory_space<semaphore_mem>>
    %585 = tpu.memref_squeeze %584 : memref<1x1x!tpu.dma_semaphore, #tpu.memory_space<semaphore_mem>> -> memref<!tpu.dma_semaphore, #tpu.memory_space<semaphore_mem>>
    tpu.enqueue_dma source(%581 : memref<32x2048xbf16, #tpu.memory_space<any>>) target(%583 : memref<32x2048xbf16, #tpu.memory_space<vmem>>) target_semaphore(%585 : memref<!tpu.dma_semaphore, #tpu.memory_space<semaphore_mem>>)
    %c4 = arith.constant 4 : index
    %c0_323 = arith.constant 0 : index
    %586 = vector.load %arg10[%c4, %c0_323] : memref<8x2048xf32, #tpu.memory_space<vmem>>, vector<1x2048xf32>
    %587 = arith.truncf %560 : vector<2x32xf32> to vector<2x32xbf16>
    %c0_324 = arith.constant 0 : index
    %c0_325 = arith.constant 0 : index
    %c0_326 = arith.constant 0 : index
    %588 = vector.load %arg15[%c0_324, %c0_325, %c0_326] : memref<2x32x2048xbf16, #tpu.memory_space<vmem>>, vector<1x32x2048xbf16>
    %589 = vector.shape_cast %588 : vector<1x32x2048xbf16> to vector<32x2048xbf16>
    %cst_327 = arith.constant dense<0.000000e+00> : vector<2x2048xf32>
    %590 = tpu.matmul %587, %589, %cst_327 {dimension_numbers = #tpu.dot_dimension_numbers<[1], [0], [0], [1], [0, 0, 1, 1], [], []>} : vector<2x32xbf16>, vector<32x2048xbf16>, vector<2x2048xf32> -> vector<2x2048xf32>
    %591 = vector.broadcast %586 : vector<1x2048xf32> to vector<2x2048xf32>
    %592 = arith.addf %590, %591 : vector<2x2048xf32>
    %cst_328 = arith.constant 0.000000e+00 : f32
    %593 = vector.broadcast %cst_328 : f32 to vector<2x2048xf32>
    %594 = arith.maximumf %592, %593 : vector<2x2048xf32>
    %595 = arith.truncf %594 : vector<2x2048xf32> to vector<2x2048xbf16>
    %c0_329 = arith.constant 0 : index
    %c0_330 = arith.constant 0 : index
    %c0_331 = arith.constant 0 : index
    %596 = vector.load %arg16[%c0_329, %c0_330, %c0_331] : memref<2x32x2048xbf16, #tpu.memory_space<vmem>>, vector<1x32x2048xbf16>
    %597 = vector.shape_cast %596 : vector<1x32x2048xbf16> to vector<32x2048xbf16>
    %cst_332 = arith.constant dense<0.000000e+00> : vector<2x32xf32>
    %598 = tpu.matmul %595, %597, %cst_332 {dimension_numbers = #tpu.dot_dimension_numbers<[1], [1], [0], [0], [0, 0, 1, 0], [], []>} : vector<2x2048xbf16>, vector<32x2048xbf16>, vector<2x32xf32> -> vector<2x32xf32>
    %599 = vector.broadcast %561 : vector<1x32xf32> to vector<2x32xf32>
    %600 = arith.addf %598, %599 : vector<2x32xf32>
    %601 = arith.addf %560, %600 : vector<2x32xf32>
    %602 = vector.extract_strided_slice %502 {offsets = [6, 0], sizes = [1, 32], strides = [1, 1]} : vector<8x32xf32> to vector<1x32xf32>
    %603 = vector.extract_strided_slice %502 {offsets = [7, 0], sizes = [1, 32], strides = [1, 1]} : vector<8x32xf32> to vector<1x32xf32>
    %cst_333 = arith.constant dense<0.000000e+00> : vector<2xf32>
    %604 = vector.multi_reduction <add>, %601, %cst_333 [1] : vector<2x32xf32> to vector<2xf32>
    %605 = vector.shape_cast %604 : vector<2xf32> to vector<2x1xf32>
    %cst_334 = arith.constant 3.200000e+01 : f32
    %606 = vector.broadcast %cst_334 : f32 to vector<2x1xf32>
    %607 = arith.divf %605, %606 : vector<2x1xf32>
    %608 = arith.mulf %601, %601 : vector<2x32xf32>
    %cst_335 = arith.constant dense<0.000000e+00> : vector<2xf32>
    %609 = vector.multi_reduction <add>, %608, %cst_335 [1] : vector<2x32xf32> to vector<2xf32>
    %610 = vector.shape_cast %609 : vector<2xf32> to vector<2x1xf32>
    %cst_336 = arith.constant 3.200000e+01 : f32
    %611 = vector.broadcast %cst_336 : f32 to vector<2x1xf32>
    %612 = arith.divf %610, %611 : vector<2x1xf32>
    %613 = arith.mulf %607, %607 : vector<2x1xf32>
    %614 = arith.subf %612, %613 : vector<2x1xf32>
    %615 = vector.broadcast %607 : vector<2x1xf32> to vector<2x32xf32>
    %616 = arith.subf %601, %615 : vector<2x32xf32>
    %cst_337 = arith.constant 9.99999974E-6 : f32
    %617 = vector.broadcast %cst_337 : f32 to vector<2x1xf32>
    %618 = arith.addf %614, %617 : vector<2x1xf32>
    %619 = math.rsqrt %618 : vector<2x1xf32>
    %620 = vector.broadcast %619 : vector<2x1xf32> to vector<2x32xf32>
    %621 = arith.mulf %616, %620 : vector<2x32xf32>
    %622 = vector.broadcast %602 : vector<1x32xf32> to vector<2x32xf32>
    %623 = arith.mulf %621, %622 : vector<2x32xf32>
    %624 = vector.broadcast %603 : vector<1x32xf32> to vector<2x32xf32>
    %625 = arith.addf %623, %624 : vector<2x32xf32>
    %c3_338 = arith.constant 3 : index
    %c0_339 = arith.constant 0 : index
    %c0_340 = arith.constant 0 : index
    %626 = vector.load %arg8[%c3_338, %c0_339, %c0_340] : memref<6x8x32xf32, #tpu.memory_space<vmem>>, vector<1x8x32xf32>
    %627 = vector.shape_cast %626 : vector<1x8x32xf32> to vector<8x32xf32>
    %c3_341 = arith.constant 3 : index
    %c0_342 = arith.constant 0 : index
    %c0_343 = arith.constant 0 : index
    %628 = vector.load %arg5[%c3_341, %c0_342, %c0_343] : memref<6x32x32xbf16, #tpu.memory_space<vmem>>, vector<1x32x32xbf16>
    %629 = vector.shape_cast %628 : vector<1x32x32xbf16> to vector<32x32xbf16>
    %630 = vector.extract_strided_slice %627 {offsets = [0, 0], sizes = [1, 32], strides = [1, 1]} : vector<8x32xf32> to vector<1x32xf32>
    %631 = arith.truncf %625 : vector<2x32xf32> to vector<2x32xbf16>
    %cst_344 = arith.constant dense<0.000000e+00> : vector<2x32xf32>
    %632 = tpu.matmul %631, %629, %cst_344 {dimension_numbers = #tpu.dot_dimension_numbers<[1], [0], [0], [1], [0, 0, 1, 1], [], []>} : vector<2x32xbf16>, vector<32x32xbf16>, vector<2x32xf32> -> vector<2x32xf32>
    %633 = vector.broadcast %630 : vector<1x32xf32> to vector<2x32xf32>
    %634 = arith.addf %632, %633 : vector<2x32xf32>
    %635 = arith.addf %625, %634 : vector<2x32xf32>
    %636 = vector.extract_strided_slice %627 {offsets = [1, 0], sizes = [1, 32], strides = [1, 1]} : vector<8x32xf32> to vector<1x32xf32>
    %637 = vector.extract_strided_slice %627 {offsets = [2, 0], sizes = [1, 32], strides = [1, 1]} : vector<8x32xf32> to vector<1x32xf32>
    %cst_345 = arith.constant dense<0.000000e+00> : vector<2xf32>
    %638 = vector.multi_reduction <add>, %635, %cst_345 [1] : vector<2x32xf32> to vector<2xf32>
    %639 = vector.shape_cast %638 : vector<2xf32> to vector<2x1xf32>
    %cst_346 = arith.constant 3.200000e+01 : f32
    %640 = vector.broadcast %cst_346 : f32 to vector<2x1xf32>
    %641 = arith.divf %639, %640 : vector<2x1xf32>
    %642 = arith.mulf %635, %635 : vector<2x32xf32>
    %cst_347 = arith.constant dense<0.000000e+00> : vector<2xf32>
    %643 = vector.multi_reduction <add>, %642, %cst_347 [1] : vector<2x32xf32> to vector<2xf32>
    %644 = vector.shape_cast %643 : vector<2xf32> to vector<2x1xf32>
    %cst_348 = arith.constant 3.200000e+01 : f32
    %645 = vector.broadcast %cst_348 : f32 to vector<2x1xf32>
    %646 = arith.divf %644, %645 : vector<2x1xf32>
    %647 = arith.mulf %641, %641 : vector<2x1xf32>
    %648 = arith.subf %646, %647 : vector<2x1xf32>
    %649 = vector.broadcast %641 : vector<2x1xf32> to vector<2x32xf32>
    %650 = arith.subf %635, %649 : vector<2x32xf32>
    %cst_349 = arith.constant 9.99999974E-6 : f32
    %651 = vector.broadcast %cst_349 : f32 to vector<2x1xf32>
    %652 = arith.addf %648, %651 : vector<2x1xf32>
    %653 = math.rsqrt %652 : vector<2x1xf32>
    %654 = vector.broadcast %653 : vector<2x1xf32> to vector<2x32xf32>
    %655 = arith.mulf %650, %654 : vector<2x32xf32>
    %656 = vector.broadcast %636 : vector<1x32xf32> to vector<2x32xf32>
    %657 = arith.mulf %655, %656 : vector<2x32xf32>
    %658 = vector.broadcast %637 : vector<1x32xf32> to vector<2x32xf32>
    %659 = arith.addf %657, %658 : vector<2x32xf32>
    %660 = vector.extract_strided_slice %250 {offsets = [0, 96], sizes = [2, 32], strides = [1, 1]} : vector<2x192xf32> to vector<2x32xf32>
    %661 = arith.addf %659, %660 : vector<2x32xf32>
    %662 = vector.extract_strided_slice %627 {offsets = [3, 0], sizes = [1, 32], strides = [1, 1]} : vector<8x32xf32> to vector<1x32xf32>
    %663 = vector.extract_strided_slice %627 {offsets = [4, 0], sizes = [1, 32], strides = [1, 1]} : vector<8x32xf32> to vector<1x32xf32>
    %cst_350 = arith.constant dense<0.000000e+00> : vector<2xf32>
    %664 = vector.multi_reduction <add>, %661, %cst_350 [1] : vector<2x32xf32> to vector<2xf32>
    %665 = vector.shape_cast %664 : vector<2xf32> to vector<2x1xf32>
    %cst_351 = arith.constant 3.200000e+01 : f32
    %666 = vector.broadcast %cst_351 : f32 to vector<2x1xf32>
    %667 = arith.divf %665, %666 : vector<2x1xf32>
    %668 = arith.mulf %661, %661 : vector<2x32xf32>
    %cst_352 = arith.constant dense<0.000000e+00> : vector<2xf32>
    %669 = vector.multi_reduction <add>, %668, %cst_352 [1] : vector<2x32xf32> to vector<2xf32>
    %670 = vector.shape_cast %669 : vector<2xf32> to vector<2x1xf32>
    %cst_353 = arith.constant 3.200000e+01 : f32
    %671 = vector.broadcast %cst_353 : f32 to vector<2x1xf32>
    %672 = arith.divf %670, %671 : vector<2x1xf32>
    %673 = arith.mulf %667, %667 : vector<2x1xf32>
    %674 = arith.subf %672, %673 : vector<2x1xf32>
    %675 = vector.broadcast %667 : vector<2x1xf32> to vector<2x32xf32>
    %676 = arith.subf %661, %675 : vector<2x32xf32>
    %cst_354 = arith.constant 9.99999974E-6 : f32
    %677 = vector.broadcast %cst_354 : f32 to vector<2x1xf32>
    %678 = arith.addf %674, %677 : vector<2x1xf32>
    %679 = math.rsqrt %678 : vector<2x1xf32>
    %680 = vector.broadcast %679 : vector<2x1xf32> to vector<2x32xf32>
    %681 = arith.mulf %676, %680 : vector<2x32xf32>
    %682 = vector.broadcast %662 : vector<1x32xf32> to vector<2x32xf32>
    %683 = arith.mulf %681, %682 : vector<2x32xf32>
    %684 = vector.broadcast %663 : vector<1x32xf32> to vector<2x32xf32>
    %685 = arith.addf %683, %684 : vector<2x32xf32>
    %686 = vector.extract_strided_slice %627 {offsets = [5, 0], sizes = [1, 32], strides = [1, 1]} : vector<8x32xf32> to vector<1x32xf32>
    %c0_i32_355 = arith.constant 0 : i32
    %c1_i32_356 = arith.constant 1 : i32
    %c0_i32_357 = arith.constant 0 : i32
    %c1_i32_358 = arith.constant 1 : i32
    %c0_i32_359 = arith.constant 0 : i32
    %c0_i32_360 = arith.constant 0 : i32
    %687 = tpu.memref_slice %arg11[%c0_i32_355, %c0_i32_359, %c0_i32_360] : memref<8x32x2048xbf16, #tpu.memory_space<any>> -> memref<1x32x2048xbf16, #tpu.memory_space<any>>
    %688 = tpu.memref_squeeze %687 : memref<1x32x2048xbf16, #tpu.memory_space<any>> -> memref<32x2048xbf16, #tpu.memory_space<any>>
    %c0_i32_361 = arith.constant 0 : i32
    %c0_i32_362 = arith.constant 0 : i32
    %689 = tpu.memref_slice %arg15[%c1_i32_356, %c0_i32_361, %c0_i32_362] : memref<2x32x2048xbf16, #tpu.memory_space<vmem>> -> memref<1x32x2048xbf16, #tpu.memory_space<vmem>>
    %690 = tpu.memref_squeeze %689 : memref<1x32x2048xbf16, #tpu.memory_space<vmem>> -> memref<32x2048xbf16, #tpu.memory_space<vmem>>
    %691 = tpu.memref_slice %arg17[%c0_i32_357, %c1_i32_358] : memref<2x2x!tpu.dma_semaphore, #tpu.memory_space<semaphore_mem>> -> memref<1x1x!tpu.dma_semaphore, #tpu.memory_space<semaphore_mem>>
    %692 = tpu.memref_squeeze %691 : memref<1x1x!tpu.dma_semaphore, #tpu.memory_space<semaphore_mem>> -> memref<!tpu.dma_semaphore, #tpu.memory_space<semaphore_mem>>
    tpu.wait_dma2 semaphore(%692 : memref<!tpu.dma_semaphore, #tpu.memory_space<semaphore_mem>>) src(%688 : memref<32x2048xbf16, #tpu.memory_space<any>>) dst(%690 : memref<32x2048xbf16, #tpu.memory_space<vmem>>)
    %c0_i32_363 = arith.constant 0 : i32
    %c1_i32_364 = arith.constant 1 : i32
    %c1_i32_365 = arith.constant 1 : i32
    %c1_i32_366 = arith.constant 1 : i32
    %c0_i32_367 = arith.constant 0 : i32
    %c0_i32_368 = arith.constant 0 : i32
    %693 = tpu.memref_slice %arg12[%c0_i32_363, %c0_i32_367, %c0_i32_368] : memref<8x32x2048xbf16, #tpu.memory_space<any>> -> memref<1x32x2048xbf16, #tpu.memory_space<any>>
    %694 = tpu.memref_squeeze %693 : memref<1x32x2048xbf16, #tpu.memory_space<any>> -> memref<32x2048xbf16, #tpu.memory_space<any>>
    %c0_i32_369 = arith.constant 0 : i32
    %c0_i32_370 = arith.constant 0 : i32
    %695 = tpu.memref_slice %arg16[%c1_i32_364, %c0_i32_369, %c0_i32_370] : memref<2x32x2048xbf16, #tpu.memory_space<vmem>> -> memref<1x32x2048xbf16, #tpu.memory_space<vmem>>
    %696 = tpu.memref_squeeze %695 : memref<1x32x2048xbf16, #tpu.memory_space<vmem>> -> memref<32x2048xbf16, #tpu.memory_space<vmem>>
    %697 = tpu.memref_slice %arg17[%c1_i32_365, %c1_i32_366] : memref<2x2x!tpu.dma_semaphore, #tpu.memory_space<semaphore_mem>> -> memref<1x1x!tpu.dma_semaphore, #tpu.memory_space<semaphore_mem>>
    %698 = tpu.memref_squeeze %697 : memref<1x1x!tpu.dma_semaphore, #tpu.memory_space<semaphore_mem>> -> memref<!tpu.dma_semaphore, #tpu.memory_space<semaphore_mem>>
    tpu.wait_dma2 semaphore(%698 : memref<!tpu.dma_semaphore, #tpu.memory_space<semaphore_mem>>) src(%694 : memref<32x2048xbf16, #tpu.memory_space<any>>) dst(%696 : memref<32x2048xbf16, #tpu.memory_space<vmem>>)
    %c6_i32 = arith.constant 6 : i32
    %c0_i32_371 = arith.constant 0 : i32
    %c0_i32_372 = arith.constant 0 : i32
    %c0_i32_373 = arith.constant 0 : i32
    %c0_i32_374 = arith.constant 0 : i32
    %c0_i32_375 = arith.constant 0 : i32
    %699 = tpu.memref_slice %arg11[%c6_i32, %c0_i32_374, %c0_i32_375] : memref<8x32x2048xbf16, #tpu.memory_space<any>> -> memref<1x32x2048xbf16, #tpu.memory_space<any>>
    %700 = tpu.memref_squeeze %699 : memref<1x32x2048xbf16, #tpu.memory_space<any>> -> memref<32x2048xbf16, #tpu.memory_space<any>>
    %c0_i32_376 = arith.constant 0 : i32
    %c0_i32_377 = arith.constant 0 : i32
    %701 = tpu.memref_slice %arg15[%c0_i32_371, %c0_i32_376, %c0_i32_377] : memref<2x32x2048xbf16, #tpu.memory_space<vmem>> -> memref<1x32x2048xbf16, #tpu.memory_space<vmem>>
    %702 = tpu.memref_squeeze %701 : memref<1x32x2048xbf16, #tpu.memory_space<vmem>> -> memref<32x2048xbf16, #tpu.memory_space<vmem>>
    %703 = tpu.memref_slice %arg17[%c0_i32_372, %c0_i32_373] : memref<2x2x!tpu.dma_semaphore, #tpu.memory_space<semaphore_mem>> -> memref<1x1x!tpu.dma_semaphore, #tpu.memory_space<semaphore_mem>>
    %704 = tpu.memref_squeeze %703 : memref<1x1x!tpu.dma_semaphore, #tpu.memory_space<semaphore_mem>> -> memref<!tpu.dma_semaphore, #tpu.memory_space<semaphore_mem>>
    tpu.enqueue_dma source(%700 : memref<32x2048xbf16, #tpu.memory_space<any>>) target(%702 : memref<32x2048xbf16, #tpu.memory_space<vmem>>) target_semaphore(%704 : memref<!tpu.dma_semaphore, #tpu.memory_space<semaphore_mem>>)
    %c6_i32_378 = arith.constant 6 : i32
    %c0_i32_379 = arith.constant 0 : i32
    %c1_i32_380 = arith.constant 1 : i32
    %c0_i32_381 = arith.constant 0 : i32
    %c0_i32_382 = arith.constant 0 : i32
    %c0_i32_383 = arith.constant 0 : i32
    %705 = tpu.memref_slice %arg12[%c6_i32_378, %c0_i32_382, %c0_i32_383] : memref<8x32x2048xbf16, #tpu.memory_space<any>> -> memref<1x32x2048xbf16, #tpu.memory_space<any>>
    %706 = tpu.memref_squeeze %705 : memref<1x32x2048xbf16, #tpu.memory_space<any>> -> memref<32x2048xbf16, #tpu.memory_space<any>>
    %c0_i32_384 = arith.constant 0 : i32
    %c0_i32_385 = arith.constant 0 : i32
    %707 = tpu.memref_slice %arg16[%c0_i32_379, %c0_i32_384, %c0_i32_385] : memref<2x32x2048xbf16, #tpu.memory_space<vmem>> -> memref<1x32x2048xbf16, #tpu.memory_space<vmem>>
    %708 = tpu.memref_squeeze %707 : memref<1x32x2048xbf16, #tpu.memory_space<vmem>> -> memref<32x2048xbf16, #tpu.memory_space<vmem>>
    %709 = tpu.memref_slice %arg17[%c1_i32_380, %c0_i32_381] : memref<2x2x!tpu.dma_semaphore, #tpu.memory_space<semaphore_mem>> -> memref<1x1x!tpu.dma_semaphore, #tpu.memory_space<semaphore_mem>>
    %710 = tpu.memref_squeeze %709 : memref<1x1x!tpu.dma_semaphore, #tpu.memory_space<semaphore_mem>> -> memref<!tpu.dma_semaphore, #tpu.memory_space<semaphore_mem>>
    tpu.enqueue_dma source(%706 : memref<32x2048xbf16, #tpu.memory_space<any>>) target(%708 : memref<32x2048xbf16, #tpu.memory_space<vmem>>) target_semaphore(%710 : memref<!tpu.dma_semaphore, #tpu.memory_space<semaphore_mem>>)
    %c5 = arith.constant 5 : index
    %c0_386 = arith.constant 0 : index
    %711 = vector.load %arg10[%c5, %c0_386] : memref<8x2048xf32, #tpu.memory_space<vmem>>, vector<1x2048xf32>
    %712 = arith.truncf %685 : vector<2x32xf32> to vector<2x32xbf16>
    %c1_387 = arith.constant 1 : index
    %c0_388 = arith.constant 0 : index
    %c0_389 = arith.constant 0 : index
    %713 = vector.load %arg15[%c1_387, %c0_388, %c0_389] : memref<2x32x2048xbf16, #tpu.memory_space<vmem>>, vector<1x32x2048xbf16>
    %714 = vector.shape_cast %713 : vector<1x32x2048xbf16> to vector<32x2048xbf16>
    %cst_390 = arith.constant dense<0.000000e+00> : vector<2x2048xf32>
    %715 = tpu.matmul %712, %714, %cst_390 {dimension_numbers = #tpu.dot_dimension_numbers<[1], [0], [0], [1], [0, 0, 1, 1], [], []>} : vector<2x32xbf16>, vector<32x2048xbf16>, vector<2x2048xf32> -> vector<2x2048xf32>
    %716 = vector.broadcast %711 : vector<1x2048xf32> to vector<2x2048xf32>
    %717 = arith.addf %715, %716 : vector<2x2048xf32>
    %cst_391 = arith.constant 0.000000e+00 : f32
    %718 = vector.broadcast %cst_391 : f32 to vector<2x2048xf32>
    %719 = arith.maximumf %717, %718 : vector<2x2048xf32>
    %720 = arith.truncf %719 : vector<2x2048xf32> to vector<2x2048xbf16>
    %c1_392 = arith.constant 1 : index
    %c0_393 = arith.constant 0 : index
    %c0_394 = arith.constant 0 : index
    %721 = vector.load %arg16[%c1_392, %c0_393, %c0_394] : memref<2x32x2048xbf16, #tpu.memory_space<vmem>>, vector<1x32x2048xbf16>
    %722 = vector.shape_cast %721 : vector<1x32x2048xbf16> to vector<32x2048xbf16>
    %cst_395 = arith.constant dense<0.000000e+00> : vector<2x32xf32>
    %723 = tpu.matmul %720, %722, %cst_395 {dimension_numbers = #tpu.dot_dimension_numbers<[1], [1], [0], [0], [0, 0, 1, 0], [], []>} : vector<2x2048xbf16>, vector<32x2048xbf16>, vector<2x32xf32> -> vector<2x32xf32>
    %724 = vector.broadcast %686 : vector<1x32xf32> to vector<2x32xf32>
    %725 = arith.addf %723, %724 : vector<2x32xf32>
    %726 = arith.addf %685, %725 : vector<2x32xf32>
    %727 = vector.extract_strided_slice %627 {offsets = [6, 0], sizes = [1, 32], strides = [1, 1]} : vector<8x32xf32> to vector<1x32xf32>
    %728 = vector.extract_strided_slice %627 {offsets = [7, 0], sizes = [1, 32], strides = [1, 1]} : vector<8x32xf32> to vector<1x32xf32>
    %cst_396 = arith.constant dense<0.000000e+00> : vector<2xf32>
    %729 = vector.multi_reduction <add>, %726, %cst_396 [1] : vector<2x32xf32> to vector<2xf32>
    %730 = vector.shape_cast %729 : vector<2xf32> to vector<2x1xf32>
    %cst_397 = arith.constant 3.200000e+01 : f32
    %731 = vector.broadcast %cst_397 : f32 to vector<2x1xf32>
    %732 = arith.divf %730, %731 : vector<2x1xf32>
    %733 = arith.mulf %726, %726 : vector<2x32xf32>
    %cst_398 = arith.constant dense<0.000000e+00> : vector<2xf32>
    %734 = vector.multi_reduction <add>, %733, %cst_398 [1] : vector<2x32xf32> to vector<2xf32>
    %735 = vector.shape_cast %734 : vector<2xf32> to vector<2x1xf32>
    %cst_399 = arith.constant 3.200000e+01 : f32
    %736 = vector.broadcast %cst_399 : f32 to vector<2x1xf32>
    %737 = arith.divf %735, %736 : vector<2x1xf32>
    %738 = arith.mulf %732, %732 : vector<2x1xf32>
    %739 = arith.subf %737, %738 : vector<2x1xf32>
    %740 = vector.broadcast %732 : vector<2x1xf32> to vector<2x32xf32>
    %741 = arith.subf %726, %740 : vector<2x32xf32>
    %cst_400 = arith.constant 9.99999974E-6 : f32
    %742 = vector.broadcast %cst_400 : f32 to vector<2x1xf32>
    %743 = arith.addf %739, %742 : vector<2x1xf32>
    %744 = math.rsqrt %743 : vector<2x1xf32>
    %745 = vector.broadcast %744 : vector<2x1xf32> to vector<2x32xf32>
    %746 = arith.mulf %741, %745 : vector<2x32xf32>
    %747 = vector.broadcast %727 : vector<1x32xf32> to vector<2x32xf32>
    %748 = arith.mulf %746, %747 : vector<2x32xf32>
    %749 = vector.broadcast %728 : vector<1x32xf32> to vector<2x32xf32>
    %750 = arith.addf %748, %749 : vector<2x32xf32>
    %c4_401 = arith.constant 4 : index
    %c0_402 = arith.constant 0 : index
    %c0_403 = arith.constant 0 : index
    %751 = vector.load %arg8[%c4_401, %c0_402, %c0_403] : memref<6x8x32xf32, #tpu.memory_space<vmem>>, vector<1x8x32xf32>
    %752 = vector.shape_cast %751 : vector<1x8x32xf32> to vector<8x32xf32>
    %c4_404 = arith.constant 4 : index
    %c0_405 = arith.constant 0 : index
    %c0_406 = arith.constant 0 : index
    %753 = vector.load %arg5[%c4_404, %c0_405, %c0_406] : memref<6x32x32xbf16, #tpu.memory_space<vmem>>, vector<1x32x32xbf16>
    %754 = vector.shape_cast %753 : vector<1x32x32xbf16> to vector<32x32xbf16>
    %755 = vector.extract_strided_slice %752 {offsets = [0, 0], sizes = [1, 32], strides = [1, 1]} : vector<8x32xf32> to vector<1x32xf32>
    %756 = arith.truncf %750 : vector<2x32xf32> to vector<2x32xbf16>
    %cst_407 = arith.constant dense<0.000000e+00> : vector<2x32xf32>
    %757 = tpu.matmul %756, %754, %cst_407 {dimension_numbers = #tpu.dot_dimension_numbers<[1], [0], [0], [1], [0, 0, 1, 1], [], []>} : vector<2x32xbf16>, vector<32x32xbf16>, vector<2x32xf32> -> vector<2x32xf32>
    %758 = vector.broadcast %755 : vector<1x32xf32> to vector<2x32xf32>
    %759 = arith.addf %757, %758 : vector<2x32xf32>
    %760 = arith.addf %750, %759 : vector<2x32xf32>
    %761 = vector.extract_strided_slice %752 {offsets = [1, 0], sizes = [1, 32], strides = [1, 1]} : vector<8x32xf32> to vector<1x32xf32>
    %762 = vector.extract_strided_slice %752 {offsets = [2, 0], sizes = [1, 32], strides = [1, 1]} : vector<8x32xf32> to vector<1x32xf32>
    %cst_408 = arith.constant dense<0.000000e+00> : vector<2xf32>
    %763 = vector.multi_reduction <add>, %760, %cst_408 [1] : vector<2x32xf32> to vector<2xf32>
    %764 = vector.shape_cast %763 : vector<2xf32> to vector<2x1xf32>
    %cst_409 = arith.constant 3.200000e+01 : f32
    %765 = vector.broadcast %cst_409 : f32 to vector<2x1xf32>
    %766 = arith.divf %764, %765 : vector<2x1xf32>
    %767 = arith.mulf %760, %760 : vector<2x32xf32>
    %cst_410 = arith.constant dense<0.000000e+00> : vector<2xf32>
    %768 = vector.multi_reduction <add>, %767, %cst_410 [1] : vector<2x32xf32> to vector<2xf32>
    %769 = vector.shape_cast %768 : vector<2xf32> to vector<2x1xf32>
    %cst_411 = arith.constant 3.200000e+01 : f32
    %770 = vector.broadcast %cst_411 : f32 to vector<2x1xf32>
    %771 = arith.divf %769, %770 : vector<2x1xf32>
    %772 = arith.mulf %766, %766 : vector<2x1xf32>
    %773 = arith.subf %771, %772 : vector<2x1xf32>
    %774 = vector.broadcast %766 : vector<2x1xf32> to vector<2x32xf32>
    %775 = arith.subf %760, %774 : vector<2x32xf32>
    %cst_412 = arith.constant 9.99999974E-6 : f32
    %776 = vector.broadcast %cst_412 : f32 to vector<2x1xf32>
    %777 = arith.addf %773, %776 : vector<2x1xf32>
    %778 = math.rsqrt %777 : vector<2x1xf32>
    %779 = vector.broadcast %778 : vector<2x1xf32> to vector<2x32xf32>
    %780 = arith.mulf %775, %779 : vector<2x32xf32>
    %781 = vector.broadcast %761 : vector<1x32xf32> to vector<2x32xf32>
    %782 = arith.mulf %780, %781 : vector<2x32xf32>
    %783 = vector.broadcast %762 : vector<1x32xf32> to vector<2x32xf32>
    %784 = arith.addf %782, %783 : vector<2x32xf32>
    %785 = vector.extract_strided_slice %250 {offsets = [0, 128], sizes = [2, 32], strides = [1, 1]} : vector<2x192xf32> to vector<2x32xf32>
    %786 = arith.addf %784, %785 : vector<2x32xf32>
    %787 = vector.extract_strided_slice %752 {offsets = [3, 0], sizes = [1, 32], strides = [1, 1]} : vector<8x32xf32> to vector<1x32xf32>
    %788 = vector.extract_strided_slice %752 {offsets = [4, 0], sizes = [1, 32], strides = [1, 1]} : vector<8x32xf32> to vector<1x32xf32>
    %cst_413 = arith.constant dense<0.000000e+00> : vector<2xf32>
    %789 = vector.multi_reduction <add>, %786, %cst_413 [1] : vector<2x32xf32> to vector<2xf32>
    %790 = vector.shape_cast %789 : vector<2xf32> to vector<2x1xf32>
    %cst_414 = arith.constant 3.200000e+01 : f32
    %791 = vector.broadcast %cst_414 : f32 to vector<2x1xf32>
    %792 = arith.divf %790, %791 : vector<2x1xf32>
    %793 = arith.mulf %786, %786 : vector<2x32xf32>
    %cst_415 = arith.constant dense<0.000000e+00> : vector<2xf32>
    %794 = vector.multi_reduction <add>, %793, %cst_415 [1] : vector<2x32xf32> to vector<2xf32>
    %795 = vector.shape_cast %794 : vector<2xf32> to vector<2x1xf32>
    %cst_416 = arith.constant 3.200000e+01 : f32
    %796 = vector.broadcast %cst_416 : f32 to vector<2x1xf32>
    %797 = arith.divf %795, %796 : vector<2x1xf32>
    %798 = arith.mulf %792, %792 : vector<2x1xf32>
    %799 = arith.subf %797, %798 : vector<2x1xf32>
    %800 = vector.broadcast %792 : vector<2x1xf32> to vector<2x32xf32>
    %801 = arith.subf %786, %800 : vector<2x32xf32>
    %cst_417 = arith.constant 9.99999974E-6 : f32
    %802 = vector.broadcast %cst_417 : f32 to vector<2x1xf32>
    %803 = arith.addf %799, %802 : vector<2x1xf32>
    %804 = math.rsqrt %803 : vector<2x1xf32>
    %805 = vector.broadcast %804 : vector<2x1xf32> to vector<2x32xf32>
    %806 = arith.mulf %801, %805 : vector<2x32xf32>
    %807 = vector.broadcast %787 : vector<1x32xf32> to vector<2x32xf32>
    %808 = arith.mulf %806, %807 : vector<2x32xf32>
    %809 = vector.broadcast %788 : vector<1x32xf32> to vector<2x32xf32>
    %810 = arith.addf %808, %809 : vector<2x32xf32>
    %811 = vector.extract_strided_slice %752 {offsets = [5, 0], sizes = [1, 32], strides = [1, 1]} : vector<8x32xf32> to vector<1x32xf32>
    %c0_i32_418 = arith.constant 0 : i32
    %c0_i32_419 = arith.constant 0 : i32
    %c0_i32_420 = arith.constant 0 : i32
    %c0_i32_421 = arith.constant 0 : i32
    %c0_i32_422 = arith.constant 0 : i32
    %c0_i32_423 = arith.constant 0 : i32
    %812 = tpu.memref_slice %arg11[%c0_i32_418, %c0_i32_422, %c0_i32_423] : memref<8x32x2048xbf16, #tpu.memory_space<any>> -> memref<1x32x2048xbf16, #tpu.memory_space<any>>
    %813 = tpu.memref_squeeze %812 : memref<1x32x2048xbf16, #tpu.memory_space<any>> -> memref<32x2048xbf16, #tpu.memory_space<any>>
    %c0_i32_424 = arith.constant 0 : i32
    %c0_i32_425 = arith.constant 0 : i32
    %814 = tpu.memref_slice %arg15[%c0_i32_419, %c0_i32_424, %c0_i32_425] : memref<2x32x2048xbf16, #tpu.memory_space<vmem>> -> memref<1x32x2048xbf16, #tpu.memory_space<vmem>>
    %815 = tpu.memref_squeeze %814 : memref<1x32x2048xbf16, #tpu.memory_space<vmem>> -> memref<32x2048xbf16, #tpu.memory_space<vmem>>
    %816 = tpu.memref_slice %arg17[%c0_i32_420, %c0_i32_421] : memref<2x2x!tpu.dma_semaphore, #tpu.memory_space<semaphore_mem>> -> memref<1x1x!tpu.dma_semaphore, #tpu.memory_space<semaphore_mem>>
    %817 = tpu.memref_squeeze %816 : memref<1x1x!tpu.dma_semaphore, #tpu.memory_space<semaphore_mem>> -> memref<!tpu.dma_semaphore, #tpu.memory_space<semaphore_mem>>
    tpu.wait_dma2 semaphore(%817 : memref<!tpu.dma_semaphore, #tpu.memory_space<semaphore_mem>>) src(%813 : memref<32x2048xbf16, #tpu.memory_space<any>>) dst(%815 : memref<32x2048xbf16, #tpu.memory_space<vmem>>)
    %c0_i32_426 = arith.constant 0 : i32
    %c0_i32_427 = arith.constant 0 : i32
    %c1_i32_428 = arith.constant 1 : i32
    %c0_i32_429 = arith.constant 0 : i32
    %c0_i32_430 = arith.constant 0 : i32
    %c0_i32_431 = arith.constant 0 : i32
    %818 = tpu.memref_slice %arg12[%c0_i32_426, %c0_i32_430, %c0_i32_431] : memref<8x32x2048xbf16, #tpu.memory_space<any>> -> memref<1x32x2048xbf16, #tpu.memory_space<any>>
    %819 = tpu.memref_squeeze %818 : memref<1x32x2048xbf16, #tpu.memory_space<any>> -> memref<32x2048xbf16, #tpu.memory_space<any>>
    %c0_i32_432 = arith.constant 0 : i32
    %c0_i32_433 = arith.constant 0 : i32
    %820 = tpu.memref_slice %arg16[%c0_i32_427, %c0_i32_432, %c0_i32_433] : memref<2x32x2048xbf16, #tpu.memory_space<vmem>> -> memref<1x32x2048xbf16, #tpu.memory_space<vmem>>
    %821 = tpu.memref_squeeze %820 : memref<1x32x2048xbf16, #tpu.memory_space<vmem>> -> memref<32x2048xbf16, #tpu.memory_space<vmem>>
    %822 = tpu.memref_slice %arg17[%c1_i32_428, %c0_i32_429] : memref<2x2x!tpu.dma_semaphore, #tpu.memory_space<semaphore_mem>> -> memref<1x1x!tpu.dma_semaphore, #tpu.memory_space<semaphore_mem>>
    %823 = tpu.memref_squeeze %822 : memref<1x1x!tpu.dma_semaphore, #tpu.memory_space<semaphore_mem>> -> memref<!tpu.dma_semaphore, #tpu.memory_space<semaphore_mem>>
    tpu.wait_dma2 semaphore(%823 : memref<!tpu.dma_semaphore, #tpu.memory_space<semaphore_mem>>) src(%819 : memref<32x2048xbf16, #tpu.memory_space<any>>) dst(%821 : memref<32x2048xbf16, #tpu.memory_space<vmem>>)
    %c7_i32 = arith.constant 7 : i32
    %c1_i32_434 = arith.constant 1 : i32
    %c0_i32_435 = arith.constant 0 : i32
    %c1_i32_436 = arith.constant 1 : i32
    %c0_i32_437 = arith.constant 0 : i32
    %c0_i32_438 = arith.constant 0 : i32
    %824 = tpu.memref_slice %arg11[%c7_i32, %c0_i32_437, %c0_i32_438] : memref<8x32x2048xbf16, #tpu.memory_space<any>> -> memref<1x32x2048xbf16, #tpu.memory_space<any>>
    %825 = tpu.memref_squeeze %824 : memref<1x32x2048xbf16, #tpu.memory_space<any>> -> memref<32x2048xbf16, #tpu.memory_space<any>>
    %c0_i32_439 = arith.constant 0 : i32
    %c0_i32_440 = arith.constant 0 : i32
    %826 = tpu.memref_slice %arg15[%c1_i32_434, %c0_i32_439, %c0_i32_440] : memref<2x32x2048xbf16, #tpu.memory_space<vmem>> -> memref<1x32x2048xbf16, #tpu.memory_space<vmem>>
    %827 = tpu.memref_squeeze %826 : memref<1x32x2048xbf16, #tpu.memory_space<vmem>> -> memref<32x2048xbf16, #tpu.memory_space<vmem>>
    %828 = tpu.memref_slice %arg17[%c0_i32_435, %c1_i32_436] : memref<2x2x!tpu.dma_semaphore, #tpu.memory_space<semaphore_mem>> -> memref<1x1x!tpu.dma_semaphore, #tpu.memory_space<semaphore_mem>>
    %829 = tpu.memref_squeeze %828 : memref<1x1x!tpu.dma_semaphore, #tpu.memory_space<semaphore_mem>> -> memref<!tpu.dma_semaphore, #tpu.memory_space<semaphore_mem>>
    tpu.enqueue_dma source(%825 : memref<32x2048xbf16, #tpu.memory_space<any>>) target(%827 : memref<32x2048xbf16, #tpu.memory_space<vmem>>) target_semaphore(%829 : memref<!tpu.dma_semaphore, #tpu.memory_space<semaphore_mem>>)
    %c7_i32_441 = arith.constant 7 : i32
    %c1_i32_442 = arith.constant 1 : i32
    %c1_i32_443 = arith.constant 1 : i32
    %c1_i32_444 = arith.constant 1 : i32
    %c0_i32_445 = arith.constant 0 : i32
    %c0_i32_446 = arith.constant 0 : i32
    %830 = tpu.memref_slice %arg12[%c7_i32_441, %c0_i32_445, %c0_i32_446] : memref<8x32x2048xbf16, #tpu.memory_space<any>> -> memref<1x32x2048xbf16, #tpu.memory_space<any>>
    %831 = tpu.memref_squeeze %830 : memref<1x32x2048xbf16, #tpu.memory_space<any>> -> memref<32x2048xbf16, #tpu.memory_space<any>>
    %c0_i32_447 = arith.constant 0 : i32
    %c0_i32_448 = arith.constant 0 : i32
    %832 = tpu.memref_slice %arg16[%c1_i32_442, %c0_i32_447, %c0_i32_448] : memref<2x32x2048xbf16, #tpu.memory_space<vmem>> -> memref<1x32x2048xbf16, #tpu.memory_space<vmem>>
    %833 = tpu.memref_squeeze %832 : memref<1x32x2048xbf16, #tpu.memory_space<vmem>> -> memref<32x2048xbf16, #tpu.memory_space<vmem>>
    %834 = tpu.memref_slice %arg17[%c1_i32_443, %c1_i32_444] : memref<2x2x!tpu.dma_semaphore, #tpu.memory_space<semaphore_mem>> -> memref<1x1x!tpu.dma_semaphore, #tpu.memory_space<semaphore_mem>>
    %835 = tpu.memref_squeeze %834 : memref<1x1x!tpu.dma_semaphore, #tpu.memory_space<semaphore_mem>> -> memref<!tpu.dma_semaphore, #tpu.memory_space<semaphore_mem>>
    tpu.enqueue_dma source(%831 : memref<32x2048xbf16, #tpu.memory_space<any>>) target(%833 : memref<32x2048xbf16, #tpu.memory_space<vmem>>) target_semaphore(%835 : memref<!tpu.dma_semaphore, #tpu.memory_space<semaphore_mem>>)
    %c6 = arith.constant 6 : index
    %c0_449 = arith.constant 0 : index
    %836 = vector.load %arg10[%c6, %c0_449] : memref<8x2048xf32, #tpu.memory_space<vmem>>, vector<1x2048xf32>
    %837 = arith.truncf %810 : vector<2x32xf32> to vector<2x32xbf16>
    %c0_450 = arith.constant 0 : index
    %c0_451 = arith.constant 0 : index
    %c0_452 = arith.constant 0 : index
    %838 = vector.load %arg15[%c0_450, %c0_451, %c0_452] : memref<2x32x2048xbf16, #tpu.memory_space<vmem>>, vector<1x32x2048xbf16>
    %839 = vector.shape_cast %838 : vector<1x32x2048xbf16> to vector<32x2048xbf16>
    %cst_453 = arith.constant dense<0.000000e+00> : vector<2x2048xf32>
    %840 = tpu.matmul %837, %839, %cst_453 {dimension_numbers = #tpu.dot_dimension_numbers<[1], [0], [0], [1], [0, 0, 1, 1], [], []>} : vector<2x32xbf16>, vector<32x2048xbf16>, vector<2x2048xf32> -> vector<2x2048xf32>
    %841 = vector.broadcast %836 : vector<1x2048xf32> to vector<2x2048xf32>
    %842 = arith.addf %840, %841 : vector<2x2048xf32>
    %cst_454 = arith.constant 0.000000e+00 : f32
    %843 = vector.broadcast %cst_454 : f32 to vector<2x2048xf32>
    %844 = arith.maximumf %842, %843 : vector<2x2048xf32>
    %845 = arith.truncf %844 : vector<2x2048xf32> to vector<2x2048xbf16>
    %c0_455 = arith.constant 0 : index
    %c0_456 = arith.constant 0 : index
    %c0_457 = arith.constant 0 : index
    %846 = vector.load %arg16[%c0_455, %c0_456, %c0_457] : memref<2x32x2048xbf16, #tpu.memory_space<vmem>>, vector<1x32x2048xbf16>
    %847 = vector.shape_cast %846 : vector<1x32x2048xbf16> to vector<32x2048xbf16>
    %cst_458 = arith.constant dense<0.000000e+00> : vector<2x32xf32>
    %848 = tpu.matmul %845, %847, %cst_458 {dimension_numbers = #tpu.dot_dimension_numbers<[1], [1], [0], [0], [0, 0, 1, 0], [], []>} : vector<2x2048xbf16>, vector<32x2048xbf16>, vector<2x32xf32> -> vector<2x32xf32>
    %849 = vector.broadcast %811 : vector<1x32xf32> to vector<2x32xf32>
    %850 = arith.addf %848, %849 : vector<2x32xf32>
    %851 = arith.addf %810, %850 : vector<2x32xf32>
    %852 = vector.extract_strided_slice %752 {offsets = [6, 0], sizes = [1, 32], strides = [1, 1]} : vector<8x32xf32> to vector<1x32xf32>
    %853 = vector.extract_strided_slice %752 {offsets = [7, 0], sizes = [1, 32], strides = [1, 1]} : vector<8x32xf32> to vector<1x32xf32>
    %cst_459 = arith.constant dense<0.000000e+00> : vector<2xf32>
    %854 = vector.multi_reduction <add>, %851, %cst_459 [1] : vector<2x32xf32> to vector<2xf32>
    %855 = vector.shape_cast %854 : vector<2xf32> to vector<2x1xf32>
    %cst_460 = arith.constant 3.200000e+01 : f32
    %856 = vector.broadcast %cst_460 : f32 to vector<2x1xf32>
    %857 = arith.divf %855, %856 : vector<2x1xf32>
    %858 = arith.mulf %851, %851 : vector<2x32xf32>
    %cst_461 = arith.constant dense<0.000000e+00> : vector<2xf32>
    %859 = vector.multi_reduction <add>, %858, %cst_461 [1] : vector<2x32xf32> to vector<2xf32>
    %860 = vector.shape_cast %859 : vector<2xf32> to vector<2x1xf32>
    %cst_462 = arith.constant 3.200000e+01 : f32
    %861 = vector.broadcast %cst_462 : f32 to vector<2x1xf32>
    %862 = arith.divf %860, %861 : vector<2x1xf32>
    %863 = arith.mulf %857, %857 : vector<2x1xf32>
    %864 = arith.subf %862, %863 : vector<2x1xf32>
    %865 = vector.broadcast %857 : vector<2x1xf32> to vector<2x32xf32>
    %866 = arith.subf %851, %865 : vector<2x32xf32>
    %cst_463 = arith.constant 9.99999974E-6 : f32
    %867 = vector.broadcast %cst_463 : f32 to vector<2x1xf32>
    %868 = arith.addf %864, %867 : vector<2x1xf32>
    %869 = math.rsqrt %868 : vector<2x1xf32>
    %870 = vector.broadcast %869 : vector<2x1xf32> to vector<2x32xf32>
    %871 = arith.mulf %866, %870 : vector<2x32xf32>
    %872 = vector.broadcast %852 : vector<1x32xf32> to vector<2x32xf32>
    %873 = arith.mulf %871, %872 : vector<2x32xf32>
    %874 = vector.broadcast %853 : vector<1x32xf32> to vector<2x32xf32>
    %875 = arith.addf %873, %874 : vector<2x32xf32>
    %c5_464 = arith.constant 5 : index
    %c0_465 = arith.constant 0 : index
    %c0_466 = arith.constant 0 : index
    %876 = vector.load %arg8[%c5_464, %c0_465, %c0_466] : memref<6x8x32xf32, #tpu.memory_space<vmem>>, vector<1x8x32xf32>
    %877 = vector.shape_cast %876 : vector<1x8x32xf32> to vector<8x32xf32>
    %c5_467 = arith.constant 5 : index
    %c0_468 = arith.constant 0 : index
    %c0_469 = arith.constant 0 : index
    %878 = vector.load %arg5[%c5_467, %c0_468, %c0_469] : memref<6x32x32xbf16, #tpu.memory_space<vmem>>, vector<1x32x32xbf16>
    %879 = vector.shape_cast %878 : vector<1x32x32xbf16> to vector<32x32xbf16>
    %880 = vector.extract_strided_slice %877 {offsets = [0, 0], sizes = [1, 32], strides = [1, 1]} : vector<8x32xf32> to vector<1x32xf32>
    %881 = arith.truncf %875 : vector<2x32xf32> to vector<2x32xbf16>
    %cst_470 = arith.constant dense<0.000000e+00> : vector<2x32xf32>
    %882 = tpu.matmul %881, %879, %cst_470 {dimension_numbers = #tpu.dot_dimension_numbers<[1], [0], [0], [1], [0, 0, 1, 1], [], []>} : vector<2x32xbf16>, vector<32x32xbf16>, vector<2x32xf32> -> vector<2x32xf32>
    %883 = vector.broadcast %880 : vector<1x32xf32> to vector<2x32xf32>
    %884 = arith.addf %882, %883 : vector<2x32xf32>
    %885 = arith.addf %875, %884 : vector<2x32xf32>
    %886 = vector.extract_strided_slice %877 {offsets = [1, 0], sizes = [1, 32], strides = [1, 1]} : vector<8x32xf32> to vector<1x32xf32>
    %887 = vector.extract_strided_slice %877 {offsets = [2, 0], sizes = [1, 32], strides = [1, 1]} : vector<8x32xf32> to vector<1x32xf32>
    %cst_471 = arith.constant dense<0.000000e+00> : vector<2xf32>
    %888 = vector.multi_reduction <add>, %885, %cst_471 [1] : vector<2x32xf32> to vector<2xf32>
    %889 = vector.shape_cast %888 : vector<2xf32> to vector<2x1xf32>
    %cst_472 = arith.constant 3.200000e+01 : f32
    %890 = vector.broadcast %cst_472 : f32 to vector<2x1xf32>
    %891 = arith.divf %889, %890 : vector<2x1xf32>
    %892 = arith.mulf %885, %885 : vector<2x32xf32>
    %cst_473 = arith.constant dense<0.000000e+00> : vector<2xf32>
    %893 = vector.multi_reduction <add>, %892, %cst_473 [1] : vector<2x32xf32> to vector<2xf32>
    %894 = vector.shape_cast %893 : vector<2xf32> to vector<2x1xf32>
    %cst_474 = arith.constant 3.200000e+01 : f32
    %895 = vector.broadcast %cst_474 : f32 to vector<2x1xf32>
    %896 = arith.divf %894, %895 : vector<2x1xf32>
    %897 = arith.mulf %891, %891 : vector<2x1xf32>
    %898 = arith.subf %896, %897 : vector<2x1xf32>
    %899 = vector.broadcast %891 : vector<2x1xf32> to vector<2x32xf32>
    %900 = arith.subf %885, %899 : vector<2x32xf32>
    %cst_475 = arith.constant 9.99999974E-6 : f32
    %901 = vector.broadcast %cst_475 : f32 to vector<2x1xf32>
    %902 = arith.addf %898, %901 : vector<2x1xf32>
    %903 = math.rsqrt %902 : vector<2x1xf32>
    %904 = vector.broadcast %903 : vector<2x1xf32> to vector<2x32xf32>
    %905 = arith.mulf %900, %904 : vector<2x32xf32>
    %906 = vector.broadcast %886 : vector<1x32xf32> to vector<2x32xf32>
    %907 = arith.mulf %905, %906 : vector<2x32xf32>
    %908 = vector.broadcast %887 : vector<1x32xf32> to vector<2x32xf32>
    %909 = arith.addf %907, %908 : vector<2x32xf32>
    %910 = vector.extract_strided_slice %250 {offsets = [0, 160], sizes = [2, 32], strides = [1, 1]} : vector<2x192xf32> to vector<2x32xf32>
    %911 = arith.addf %909, %910 : vector<2x32xf32>
    %912 = vector.extract_strided_slice %877 {offsets = [3, 0], sizes = [1, 32], strides = [1, 1]} : vector<8x32xf32> to vector<1x32xf32>
    %913 = vector.extract_strided_slice %877 {offsets = [4, 0], sizes = [1, 32], strides = [1, 1]} : vector<8x32xf32> to vector<1x32xf32>
    %cst_476 = arith.constant dense<0.000000e+00> : vector<2xf32>
    %914 = vector.multi_reduction <add>, %911, %cst_476 [1] : vector<2x32xf32> to vector<2xf32>
    %915 = vector.shape_cast %914 : vector<2xf32> to vector<2x1xf32>
    %cst_477 = arith.constant 3.200000e+01 : f32
    %916 = vector.broadcast %cst_477 : f32 to vector<2x1xf32>
    %917 = arith.divf %915, %916 : vector<2x1xf32>
    %918 = arith.mulf %911, %911 : vector<2x32xf32>
    %cst_478 = arith.constant dense<0.000000e+00> : vector<2xf32>
    %919 = vector.multi_reduction <add>, %918, %cst_478 [1] : vector<2x32xf32> to vector<2xf32>
    %920 = vector.shape_cast %919 : vector<2xf32> to vector<2x1xf32>
    %cst_479 = arith.constant 3.200000e+01 : f32
    %921 = vector.broadcast %cst_479 : f32 to vector<2x1xf32>
    %922 = arith.divf %920, %921 : vector<2x1xf32>
    %923 = arith.mulf %917, %917 : vector<2x1xf32>
    %924 = arith.subf %922, %923 : vector<2x1xf32>
    %925 = vector.broadcast %917 : vector<2x1xf32> to vector<2x32xf32>
    %926 = arith.subf %911, %925 : vector<2x32xf32>
    %cst_480 = arith.constant 9.99999974E-6 : f32
    %927 = vector.broadcast %cst_480 : f32 to vector<2x1xf32>
    %928 = arith.addf %924, %927 : vector<2x1xf32>
    %929 = math.rsqrt %928 : vector<2x1xf32>
    %930 = vector.broadcast %929 : vector<2x1xf32> to vector<2x32xf32>
    %931 = arith.mulf %926, %930 : vector<2x32xf32>
    %932 = vector.broadcast %912 : vector<1x32xf32> to vector<2x32xf32>
    %933 = arith.mulf %931, %932 : vector<2x32xf32>
    %934 = vector.broadcast %913 : vector<1x32xf32> to vector<2x32xf32>
    %935 = arith.addf %933, %934 : vector<2x32xf32>
    %936 = vector.extract_strided_slice %877 {offsets = [5, 0], sizes = [1, 32], strides = [1, 1]} : vector<8x32xf32> to vector<1x32xf32>
    %c0_i32_481 = arith.constant 0 : i32
    %c1_i32_482 = arith.constant 1 : i32
    %c0_i32_483 = arith.constant 0 : i32
    %c1_i32_484 = arith.constant 1 : i32
    %c0_i32_485 = arith.constant 0 : i32
    %c0_i32_486 = arith.constant 0 : i32
    %937 = tpu.memref_slice %arg11[%c0_i32_481, %c0_i32_485, %c0_i32_486] : memref<8x32x2048xbf16, #tpu.memory_space<any>> -> memref<1x32x2048xbf16, #tpu.memory_space<any>>
    %938 = tpu.memref_squeeze %937 : memref<1x32x2048xbf16, #tpu.memory_space<any>> -> memref<32x2048xbf16, #tpu.memory_space<any>>
    %c0_i32_487 = arith.constant 0 : i32
    %c0_i32_488 = arith.constant 0 : i32
    %939 = tpu.memref_slice %arg15[%c1_i32_482, %c0_i32_487, %c0_i32_488] : memref<2x32x2048xbf16, #tpu.memory_space<vmem>> -> memref<1x32x2048xbf16, #tpu.memory_space<vmem>>
    %940 = tpu.memref_squeeze %939 : memref<1x32x2048xbf16, #tpu.memory_space<vmem>> -> memref<32x2048xbf16, #tpu.memory_space<vmem>>
    %941 = tpu.memref_slice %arg17[%c0_i32_483, %c1_i32_484] : memref<2x2x!tpu.dma_semaphore, #tpu.memory_space<semaphore_mem>> -> memref<1x1x!tpu.dma_semaphore, #tpu.memory_space<semaphore_mem>>
    %942 = tpu.memref_squeeze %941 : memref<1x1x!tpu.dma_semaphore, #tpu.memory_space<semaphore_mem>> -> memref<!tpu.dma_semaphore, #tpu.memory_space<semaphore_mem>>
    tpu.wait_dma2 semaphore(%942 : memref<!tpu.dma_semaphore, #tpu.memory_space<semaphore_mem>>) src(%938 : memref<32x2048xbf16, #tpu.memory_space<any>>) dst(%940 : memref<32x2048xbf16, #tpu.memory_space<vmem>>)
    %c0_i32_489 = arith.constant 0 : i32
    %c1_i32_490 = arith.constant 1 : i32
    %c1_i32_491 = arith.constant 1 : i32
    %c1_i32_492 = arith.constant 1 : i32
    %c0_i32_493 = arith.constant 0 : i32
    %c0_i32_494 = arith.constant 0 : i32
    %943 = tpu.memref_slice %arg12[%c0_i32_489, %c0_i32_493, %c0_i32_494] : memref<8x32x2048xbf16, #tpu.memory_space<any>> -> memref<1x32x2048xbf16, #tpu.memory_space<any>>
    %944 = tpu.memref_squeeze %943 : memref<1x32x2048xbf16, #tpu.memory_space<any>> -> memref<32x2048xbf16, #tpu.memory_space<any>>
    %c0_i32_495 = arith.constant 0 : i32
    %c0_i32_496 = arith.constant 0 : i32
    %945 = tpu.memref_slice %arg16[%c1_i32_490, %c0_i32_495, %c0_i32_496] : memref<2x32x2048xbf16, #tpu.memory_space<vmem>> -> memref<1x32x2048xbf16, #tpu.memory_space<vmem>>
    %946 = tpu.memref_squeeze %945 : memref<1x32x2048xbf16, #tpu.memory_space<vmem>> -> memref<32x2048xbf16, #tpu.memory_space<vmem>>
    %947 = tpu.memref_slice %arg17[%c1_i32_491, %c1_i32_492] : memref<2x2x!tpu.dma_semaphore, #tpu.memory_space<semaphore_mem>> -> memref<1x1x!tpu.dma_semaphore, #tpu.memory_space<semaphore_mem>>
    %948 = tpu.memref_squeeze %947 : memref<1x1x!tpu.dma_semaphore, #tpu.memory_space<semaphore_mem>> -> memref<!tpu.dma_semaphore, #tpu.memory_space<semaphore_mem>>
    tpu.wait_dma2 semaphore(%948 : memref<!tpu.dma_semaphore, #tpu.memory_space<semaphore_mem>>) src(%944 : memref<32x2048xbf16, #tpu.memory_space<any>>) dst(%946 : memref<32x2048xbf16, #tpu.memory_space<vmem>>)
    %c7 = arith.constant 7 : index
    %c0_497 = arith.constant 0 : index
    %949 = vector.load %arg10[%c7, %c0_497] : memref<8x2048xf32, #tpu.memory_space<vmem>>, vector<1x2048xf32>
    %950 = arith.truncf %935 : vector<2x32xf32> to vector<2x32xbf16>
    %c1_498 = arith.constant 1 : index
    %c0_499 = arith.constant 0 : index
    %c0_500 = arith.constant 0 : index
    %951 = vector.load %arg15[%c1_498, %c0_499, %c0_500] : memref<2x32x2048xbf16, #tpu.memory_space<vmem>>, vector<1x32x2048xbf16>
    %952 = vector.shape_cast %951 : vector<1x32x2048xbf16> to vector<32x2048xbf16>
    %cst_501 = arith.constant dense<0.000000e+00> : vector<2x2048xf32>
    %953 = tpu.matmul %950, %952, %cst_501 {dimension_numbers = #tpu.dot_dimension_numbers<[1], [0], [0], [1], [0, 0, 1, 1], [], []>} : vector<2x32xbf16>, vector<32x2048xbf16>, vector<2x2048xf32> -> vector<2x2048xf32>
    %954 = vector.broadcast %949 : vector<1x2048xf32> to vector<2x2048xf32>
    %955 = arith.addf %953, %954 : vector<2x2048xf32>
    %cst_502 = arith.constant 0.000000e+00 : f32
    %956 = vector.broadcast %cst_502 : f32 to vector<2x2048xf32>
    %957 = arith.maximumf %955, %956 : vector<2x2048xf32>
    %958 = arith.truncf %957 : vector<2x2048xf32> to vector<2x2048xbf16>
    %c1_503 = arith.constant 1 : index
    %c0_504 = arith.constant 0 : index
    %c0_505 = arith.constant 0 : index
    %959 = vector.load %arg16[%c1_503, %c0_504, %c0_505] : memref<2x32x2048xbf16, #tpu.memory_space<vmem>>, vector<1x32x2048xbf16>
    %960 = vector.shape_cast %959 : vector<1x32x2048xbf16> to vector<32x2048xbf16>
    %cst_506 = arith.constant dense<0.000000e+00> : vector<2x32xf32>
    %961 = tpu.matmul %958, %960, %cst_506 {dimension_numbers = #tpu.dot_dimension_numbers<[1], [1], [0], [0], [0, 0, 1, 0], [], []>} : vector<2x2048xbf16>, vector<32x2048xbf16>, vector<2x32xf32> -> vector<2x32xf32>
    %962 = vector.broadcast %936 : vector<1x32xf32> to vector<2x32xf32>
    %963 = arith.addf %961, %962 : vector<2x32xf32>
    %964 = arith.addf %935, %963 : vector<2x32xf32>
    %965 = vector.extract_strided_slice %877 {offsets = [6, 0], sizes = [1, 32], strides = [1, 1]} : vector<8x32xf32> to vector<1x32xf32>
    %966 = vector.extract_strided_slice %877 {offsets = [7, 0], sizes = [1, 32], strides = [1, 1]} : vector<8x32xf32> to vector<1x32xf32>
    %cst_507 = arith.constant dense<0.000000e+00> : vector<2xf32>
    %967 = vector.multi_reduction <add>, %964, %cst_507 [1] : vector<2x32xf32> to vector<2xf32>
    %968 = vector.shape_cast %967 : vector<2xf32> to vector<2x1xf32>
    %cst_508 = arith.constant 3.200000e+01 : f32
    %969 = vector.broadcast %cst_508 : f32 to vector<2x1xf32>
    %970 = arith.divf %968, %969 : vector<2x1xf32>
    %971 = arith.mulf %964, %964 : vector<2x32xf32>
    %cst_509 = arith.constant dense<0.000000e+00> : vector<2xf32>
    %972 = vector.multi_reduction <add>, %971, %cst_509 [1] : vector<2x32xf32> to vector<2xf32>
    %973 = vector.shape_cast %972 : vector<2xf32> to vector<2x1xf32>
    %cst_510 = arith.constant 3.200000e+01 : f32
    %974 = vector.broadcast %cst_510 : f32 to vector<2x1xf32>
    %975 = arith.divf %973, %974 : vector<2x1xf32>
    %976 = arith.mulf %970, %970 : vector<2x1xf32>
    %977 = arith.subf %975, %976 : vector<2x1xf32>
    %978 = vector.broadcast %970 : vector<2x1xf32> to vector<2x32xf32>
    %979 = arith.subf %964, %978 : vector<2x32xf32>
    %cst_511 = arith.constant 9.99999974E-6 : f32
    %980 = vector.broadcast %cst_511 : f32 to vector<2x1xf32>
    %981 = arith.addf %977, %980 : vector<2x1xf32>
    %982 = math.rsqrt %981 : vector<2x1xf32>
    %983 = vector.broadcast %982 : vector<2x1xf32> to vector<2x32xf32>
    %984 = arith.mulf %979, %983 : vector<2x32xf32>
    %985 = vector.broadcast %965 : vector<1x32xf32> to vector<2x32xf32>
    %986 = arith.mulf %984, %985 : vector<2x32xf32>
    %987 = vector.broadcast %966 : vector<1x32xf32> to vector<2x32xf32>
    %988 = arith.addf %986, %987 : vector<2x32xf32>
    %989 = vector.extract_strided_slice %12 {offsets = [3, 0], sizes = [1, 32], strides = [1, 1]} : vector<6x32xf32> to vector<1x32xf32>
    %990 = vector.extract_strided_slice %12 {offsets = [4, 0], sizes = [1, 32], strides = [1, 1]} : vector<6x32xf32> to vector<1x32xf32>
    %cst_512 = arith.constant dense<0.000000e+00> : vector<2xf32>
    %991 = vector.multi_reduction <add>, %988, %cst_512 [1] : vector<2x32xf32> to vector<2xf32>
    %992 = vector.shape_cast %991 : vector<2xf32> to vector<2x1xf32>
    %cst_513 = arith.constant 3.200000e+01 : f32
    %993 = vector.broadcast %cst_513 : f32 to vector<2x1xf32>
    %994 = arith.divf %992, %993 : vector<2x1xf32>
    %995 = arith.mulf %988, %988 : vector<2x32xf32>
    %cst_514 = arith.constant dense<0.000000e+00> : vector<2xf32>
    %996 = vector.multi_reduction <add>, %995, %cst_514 [1] : vector<2x32xf32> to vector<2xf32>
    %997 = vector.shape_cast %996 : vector<2xf32> to vector<2x1xf32>
    %cst_515 = arith.constant 3.200000e+01 : f32
    %998 = vector.broadcast %cst_515 : f32 to vector<2x1xf32>
    %999 = arith.divf %997, %998 : vector<2x1xf32>
    %1000 = arith.mulf %994, %994 : vector<2x1xf32>
    %1001 = arith.subf %999, %1000 : vector<2x1xf32>
    %1002 = vector.broadcast %994 : vector<2x1xf32> to vector<2x32xf32>
    %1003 = arith.subf %988, %1002 : vector<2x32xf32>
    %cst_516 = arith.constant 9.99999974E-6 : f32
    %1004 = vector.broadcast %cst_516 : f32 to vector<2x1xf32>
    %1005 = arith.addf %1001, %1004 : vector<2x1xf32>
    %1006 = math.rsqrt %1005 : vector<2x1xf32>
    %1007 = vector.broadcast %1006 : vector<2x1xf32> to vector<2x32xf32>
    %1008 = arith.mulf %1003, %1007 : vector<2x32xf32>
    %1009 = vector.broadcast %989 : vector<1x32xf32> to vector<2x32xf32>
    %1010 = arith.mulf %1008, %1009 : vector<2x32xf32>
    %1011 = vector.broadcast %990 : vector<1x32xf32> to vector<2x32xf32>
    %1012 = arith.addf %1010, %1011 : vector<2x32xf32>
    %c0_517 = arith.constant 0 : index
    %c0_518 = arith.constant 0 : index
    %1013 = vector.load %arg9[%c0_517, %c0_518] : memref<32x8xbf16, #tpu.memory_space<vmem>>, vector<32x8xbf16>
    %1014 = vector.extract_strided_slice %12 {offsets = [5, 0], sizes = [1, 8], strides = [1, 1]} : vector<6x32xf32> to vector<1x8xf32>
    %1015 = arith.truncf %1012 : vector<2x32xf32> to vector<2x32xbf16>
    %cst_519 = arith.constant dense<0.000000e+00> : vector<2x8xf32>
    %1016 = tpu.matmul %1015, %1013, %cst_519 {dimension_numbers = #tpu.dot_dimension_numbers<[1], [0], [0], [1], [0, 0, 1, 1], [], []>} : vector<2x32xbf16>, vector<32x8xbf16>, vector<2x8xf32> -> vector<2x8xf32>
    %1017 = vector.broadcast %1014 : vector<1x8xf32> to vector<2x8xf32>
    %1018 = arith.addf %1016, %1017 : vector<2x8xf32>
    %c0_520 = arith.constant 0 : index
    %c0_521 = arith.constant 0 : index
    %1019 = vector.load %arg13[%c0_520, %c0_521] : memref<2x8xf32, #tpu.memory_space<vmem>>, vector<2x8xf32>
    tpu.vector_store %arg13[%c0_520, %c0_521], %1018 {strides = array<i32>} : memref<2x8xf32, #tpu.memory_space<vmem>>, vector<2x8xf32>,
    return
  }
}

</mosaic_0001>

<bundles_post_ra>
// kernel: forward.1
= control target key start
LH: loop header
LB: loop body
LE: loop exit
PB: predicated region body
PF: predicated region fallthrough
CT: control target
= control target key end

     0   :  { %20 = vsyncpa [#allocation6], 0  ;;  %s11028_s0 = inlined_call_operand.vmem [shape: f32[4,16], index: 0, kind: input, shape index: {}]   ;;  %s11029_s1 = inlined_call_operand.vmem [shape: bf16[16,32], index: 1, kind: input, shape index: {}]   ;;  %s11030_s2 = inlined_call_operand.vmem [shape: f32[6,32], index: 2, kind: input, shape index: {}]   ;;  %s11031_s3 = inlined_call_operand.hbm [shape: bf16[2,32,32], index: 3, kind: input, shape index: {}]   ;;  %s11032_s4 = inlined_call_operand.vmem [shape: f32[2,6,32], index: 4, kind: input, shape index: {}]   ;;  %s11033_s5 = inlined_call_operand.hbm [shape: bf16[6,32,32], index: 5, kind: input, shape index: {}]   ;;  %s11034_s6 = inlined_call_operand.hbm [shape: bf16[32,192], index: 6, kind: input, shape index: {}]   ;;  %s11035_s7 = inlined_call_operand.vmem [shape: f32[1,192], index: 7, kind: input, shape index: {}]   ;;  %s11036_s8 = inlined_call_operand.vmem [shape: f32[6,8,32], index: 8, kind: input, shape index: {}]   ;;  %s11037_s9 = inlined_call_operand.vmem [shape: bf16[32,8], index: 9, kind: input, shape index: {}]   ;;  %s11038_s10 = inlined_call_operand.hbm [shape: f32[8,2048], index: 10, kind: input, shape index: {}]   ;;  %s11039_s11 = inlined_call_operand.hbm [shape: bf16[8,32,2048], index: 11, kind: input, shape index: {}]   ;;  %s11040_s12 = inlined_call_operand.hbm [shape: bf16[8,32,2048], index: 12, kind: input, shape index: {}]   ;;  %s11041_s13 = inlined_call_operand.hbm [shape: f32[2,8], index: 13, kind: output, shape index: {0}]   ;;  %s11042_s14 = inlined_call_operand.hbm [shape: f32[2,32], index: 14, kind: output, shape index: {1}]  }
   0x1   :  { %21 = vsyncpa [#allocation9], 0 }
   0x2   :  { %22 = vsyncpa [#allocation12], 0 }
   0x3   :  { %23 = vsyncpa [#allocation7], 0 }
   0x4   :  { %24 = vsyncpa [#allocation15], 0  ;;  %s9644_s29 = smov [#allocation8]   ;;  %s9645_s15 = smov [#allocation5]  }
   0x5   :  { %s50_s30 = sshll.u32 %s9644_s29, 4  ;;  %s36_s16 = sshll.u32 %s9645_s15, 4  ;;  %s51_s30 = int_to_ptr.vmem [resolvable:$true] %s50_s30  ;;  %s9762_s16 = int_to_ptr.vmem [resolvable:$true] %s36_s16 }
   0x6   :  { %s9470_s19 = scalar_lea.hbm %s11033_s5, 1536 }
   0x7   :  { %p9471_p0 = scmp.ne.s32.totalorder %s11033_s5, %s9470_s19  ;;  %p9474_p1 = scmp.lt.u32.totalorder %s9470_s19, %s11033_s5 }
   0x9   :  { %p9476_p2 = pnand %p9474_p1, %p9471_p0 }
   0xb   :  { %9479 = shalt.err (!%p9476_p2)
}
   0xc   :  { %s9480_s24 = scalar_lea.vmem %s51_s30, 1536  ;;  %p9485_p4 = scmp.lt.s32.totalorder %s51_s30, %s51_s30 }
   0xd   :  { %p9481_p3 = scmp.ne.s32.totalorder %s51_s30, %s9480_s24  ;;  %p9486_p5 = scmp.lt.s32.totalorder %s9480_s24, %s9480_s24 }
   0xf   :  { %p9487_p6 = por %p9486_p5, %p9485_p4 }
  0x11   :  { %p9488_p7 = pnand %p9487_p6, %p9481_p3 }
  0x13   :  { %9491 = shalt.err (!%p9488_p7)
}
  0x14   :  { %s9646_s25 = smov 64   ;;  %s9647_s26 = smov 4  }
  0x15   :  { %56 = dma.hbm_to_vmem [thread:$0]  %s11033_s5, 1536, %s51_s30, [#allocation9], %s9646_s25, %s9646_s25, %s9647_s26  }
  0x16   :  { %s9492_s17 = scalar_lea.hbm %s11031_s3, 512 }
  0x17   :  { %p9493_p8 = scmp.ne.s32.totalorder %s11031_s3, %s9492_s17  ;;  %p9496_p9 = scmp.lt.u32.totalorder %s9492_s17, %s11031_s3 }
  0x19   :  { %p9498_p10 = pnand %p9496_p9, %p9493_p8 }
  0x1b   :  { %9501 = shalt.err (!%p9498_p10)
}
  0x1c   :  { %s9502_s22 = scalar_lea.vmem %s9762_s16, 512  ;;  %p9507_p12 = scmp.lt.s32.totalorder %s9762_s16, %s9762_s16 }
  0x1d   :  { %p9503_p11 = scmp.ne.s32.totalorder %s9762_s16, %s9502_s22  ;;  %p9508_p13 = scmp.lt.s32.totalorder %s9502_s22, %s9502_s22 }
  0x1f   :  { %p9509_p0 = por %p9508_p13, %p9507_p12 }
  0x21   :  { %p9510_p1 = pnand %p9509_p0, %p9503_p11 }
  0x23   :  { %9513 = shalt.err (!%p9510_p1)
}
  0x24   :  { %42 = dma.hbm_to_vmem [thread:$0]  %s11031_s3, 512, %s9762_s16, [#allocation6], %s9646_s25, %s9646_s25, %s9647_s26  }
  0x25   :  { %s9648_s23 = smov [#allocation10]   ;;  %s9514_s29 = scalar_lea.hbm %s11034_s6, 512 }
  0x26   :  { %s62_s24 = sshll.u32 %s9648_s23, 4  ;;  %p9515_p2 = scmp.ne.s32.totalorder %s11034_s6, %s9514_s29  ;;  %s63_s24 = int_to_ptr.vmem [resolvable:$true] %s62_s24 }
  0x27   :  { %p9518_p3 = scmp.lt.u32.totalorder %s9514_s29, %s11034_s6 }
  0x29   :  { %p9520_p4 = pnand %p9518_p3, %p9515_p2 }
  0x2b   :  { %9523 = shalt.err (!%p9520_p4)
}
  0x2c   :  { %s9524_s20 = scalar_lea.vmem %s63_s24, 512  ;;  %p9529_p6 = scmp.lt.s32.totalorder %s63_s24, %s63_s24 }
  0x2d   :  { %p9525_p5 = scmp.ne.s32.totalorder %s63_s24, %s9524_s20  ;;  %p9530_p7 = scmp.lt.s32.totalorder %s9524_s20, %s9524_s20 }
  0x2f   :  { %p9531_p8 = por %p9530_p7, %p9529_p6 }
  0x31   :  { %p9532_p9 = pnand %p9531_p8, %p9525_p5 }
  0x33   :  { %9535 = shalt.err (!%p9532_p9)
}
  0x34   :  { %s9649_s3 = smov 128   ;;  %s9650_s16 = smov 8  }
  0x35   :  { %68 = dma.hbm_to_vmem [thread:$0]  %s11034_s6, 512, %s63_s24, [#allocation9], %s9649_s3, %s9649_s3, %s9650_s16  }
  0x36   :  { %s9651_s5 = smov [#allocation11]   ;;  %s9536_s28 = scalar_lea.hbm %s11038_s10, 2048 }
  0x37   :  { %s81_s30 = sshll.u32 %s9651_s5, 4  ;;  %p9537_p10 = scmp.ne.s32.totalorder %s11038_s10, %s9536_s28  ;;  %s82_s30 = int_to_ptr.vmem [resolvable:$true] %s81_s30 }
  0x38   :  { %p9540_p11 = scmp.lt.u32.totalorder %s9536_s28, %s11038_s10 }
  0x3a   :  { %p9542_p12 = pnand %p9540_p11, %p9537_p10 }
  0x3c   :  { %9545 = shalt.err (!%p9542_p12)
}
  0x3d   :  { %s9546_s19 = scalar_lea.vmem %s82_s30, 2048  ;;  %p9551_p0 = scmp.lt.s32.totalorder %s82_s30, %s82_s30 }
  0x3e   :  { %p9547_p13 = scmp.ne.s32.totalorder %s82_s30, %s9546_s19  ;;  %p9552_p1 = scmp.lt.s32.totalorder %s9546_s19, %s9546_s19 }
  0x40   :  { %p9553_p2 = por %p9552_p1, %p9551_p0 }
  0x42   :  { %p9554_p3 = pnand %p9553_p2, %p9547_p13 }
  0x44   :  { %9557 = shalt.err (!%p9554_p3)
}
  0x45   :  { %84 = dma.hbm_to_vmem [thread:$0]  %s11038_s10, 2048, %s82_s30, [#allocation12]  }
  0x46   :  { %9602 = dma.done.wait [#allocation6], 512  }
  0x47   :  { %9603 = vsyncadd [#allocation6], 4294966784 }
  0x48   :  { %9604 = dma.done.wait [#allocation9], 2048  }
  0x49   :  { %9605 = vsyncadd [#allocation9], 4294965248 }
  0x4a   :  { %9606 = dma.done.wait [#allocation12], 2048  }
  0x4b   :  { %9607 = vsyncadd [#allocation12], 4294965248  ;;  %s102_s20 = sld [smem:[#allocation0]]   ;;  %120 = sst [smem:[#allocation17 + $0x3]] %s9646_s25  ;;  %v9652_v0 = vmov 0.0   ;;  %vm9653_vm0 = vmmov 0   ;;  %v173_v6 = vlaneseq }
  0x4c   :  { %9102 = vmatprep.subr.bf16.mxu0 %v9652_v0  ;;  %9104 = vmatprep.mubr.msk.bf16.mxu0 %vm9653_vm0, %v9652_v0  ;;  %122 = sst [smem:[#allocation17 + $0x4]] %s9649_s3  ;;  %s9654_s16 = smov [#allocation2]   ;;  %vm183_vm1 = vcmask 130048   ;;  %vm227_vm2 = vcmask 254976   ;;  %vm251_vm3 = vcmask 261120  }
  0x4d   :  { %s110_s10 = sshll.u32 %s9654_s16, 4  ;;  %9108 = vmatprep.subr.bf16.mxu1 %v9652_v0  ;;  %9112 = vmatprep.mubr.msk.bf16.mxu1 %vm9653_vm0, %v9652_v0  ;;  %128 = sst [smem:[#allocation17 + $0x7]] %s9646_s25  ;;  %v9874_v7 = vshrl.u32 %v173_v6, 7  ;;  %s9834_s10 = int_to_ptr.vmem [resolvable:$true] %s110_s10 }
  0x4e   :  { %130 = sst [smem:[#allocation17 + $0x8]] %s9647_s26  ;;  %s9655_s21 = smov 2048  }
  0x4f   :  { %114 = sst [smem:[#allocation17]] %s9655_s21  ;;  %s9656_s5 = smov 16   ;;  %v9877_v8 = vsub.s32 0, %v9874_v7  ;;  %v9907_v35 = vsub.s32 1, %v9874_v7  ;;  %v9910_v36 = vsub.s32 2, %v9874_v7 }
  0x50   :  { %116 = sst [smem:[#allocation17 + $0x1]] %s9655_s21  ;;  %s9657_s23 = smov 2  }
  0x51   :  { %s8933_s22 = sshll.u32 %s102_s20, 26  ;;  %118 = sst [smem:[#allocation17 + $0x2]] %s9656_s5 }
  0x52   :  { %s9840_s30 = sadd.s32 134217728, %s8933_s22  ;;  %124 = sst [smem:[#allocation17 + $0x5]] %s9657_s23 }
  0x53   :  { %s9658_s27 = smov 1024   ;;  %s9659_s28 = smov [#allocation4]  }
  0x54   :  { %126 = sst [smem:[#allocation17 + $0x6]] %s9658_s27  ;;  %s9660_s29 = smov [#allocation16]  }
  0x55   :  { %132 = dma.general %s11039_s11, 4096, %s9834_s10, %s9659_s28, %s9660_s29, [#allocation17], %s9840_s30, 0  }
  0x56   :  { %149 = sst [smem:[#allocation19]] %s9655_s21  ;;  %s9661_s18 = smov [#allocation3]  }
  0x57   :  { %151 = sst [smem:[#allocation19 + $0x1]] %s9655_s21  ;;  %s145_s19 = sshll.u32 %s9661_s18, 4  ;;  %s9855_s19 = int_to_ptr.vmem [resolvable:$true] %s145_s19 }
  0x58   :  { %153 = sst [smem:[#allocation19 + $0x2]] %s9656_s5  ;;  %s9662_s6 = smov [#allocation4 + $0x2]  }
  0x59   :  { %155 = sst [smem:[#allocation19 + $0x3]] %s9646_s25  ;;  %s9663_s24 = smov [#allocation18]  }
  0x5a   :  { %157 = sst [smem:[#allocation19 + $0x4]] %s9649_s3 }
  0x5b   :  { %159 = sst [smem:[#allocation19 + $0x5]] %s9657_s23 }
  0x5c   :  { %161 = sst [smem:[#allocation19 + $0x6]] %s9658_s27 }
  0x5d   :  { %163 = sst [smem:[#allocation19 + $0x7]] %s9646_s25 }
  0x5e   :  { %165 = sst [smem:[#allocation19 + $0x8]] %s9647_s26 }
  0x5f   :  { %167 = dma.general %s11040_s12, 4096, %s9855_s19, %s9662_s6, %s9663_s24, [#allocation19], %s9840_s30, 0  }
  0x60   :  { %v9397_v1 = vld [vmem:[%s11029_s1] sm:$0xff]   ;;  %v9399_v5 = vld [vmem:[#allocation5 + $0x8] sm:$0xff]  }
  0x61   :  { %v169_v2 = vld [vmem:[%s11028_s0] sm:$0xf]  ;;  %9103 = vmatpush3.bf16.msra.mxu0 %v9397_v1 }
  0x62   :  { %v172_v3 = vpack.c.bf16 %v169_v2, %v169_v2  ;;  %v9398_v4 = vld [vmem:[#allocation5] sm:$0xff]  }
  0x63   :  { %9109 = vmatpush3.bf16.msra.mxu1 %v9398_v4  ;;  %v9882_v9 = vld [vmem:[%s11030_s2] sm:$0x3f] }
  0x64   :  { %9105 = vmatmul.mubr.msk.bf16.vlgmr.msra.gmra.mrb[0].mxu0 %vm183_vm1, %v172_v3  ;;  %9110 = vmatprep.subr.bf16.mxu1 %v9652_v0  ;;  %v176_v10 = vrot.slane %v9882_v9, %v9877_v8  ;;  %v9899_v17 = vld [vmem:[%s11032_s4] sm:$0x3f] }
  0x65   :  { %v238_v18 = vrot.slane %v9899_v17, %v9877_v8  ;;  %v315_v37 = vrot.slane %v9899_v17, %v9907_v35  ;;  %v320_v40 = vrot.slane %v9899_v17, %v9910_v36 }
  0x67   :  { %9111 = vmatpush3.bf16.msra.mxu1 %v9399_v5 }
 0x137   :  { %v221_v11 = vpop.f32.mrb[0].mxu0 }
 0x138   :  { %v9886_v12 = vadd.f32 %v221_v11, %v176_v10  ;;  %v9106_v13 = vpop.f32.mrb[1].mxu0 }
 0x139   :  { %v224_v14 = vpop.f32.mrb[2].mxu0 }
 0x13a   :  { %v9890_v15 = vpack.c.bf16 %v9886_v12, %v9886_v12  ;;  %v9107_v16 = vpop.f32.mrb[3].mxu0  ;;  %228 = vst.msk [vmem:[#allocation14] sm:$0x3] %vm227_vm2, %v9886_v12 }
 0x13c   :  { %9113 = vmatmul.mubr.msk.bf16.vlgmr.msra.gmra.mrb[0].mxu1 %vm251_vm3, %v9890_v15 }
 0x20f   :  { %v289_v19 = vpop.f32.mrb[0].mxu1 }
 0x210   :  { %v290_v20 = vadd.f32 %v289_v19, %v238_v18  ;;  %v9114_v21 = vpop.f32.mrb[1].mxu1 }
 0x211   :  { %v292_v22 = vpop.f32.mrb[2].mxu1 }
 0x212   :  { %v295_v23 = vadd.f32 %v290_v20, %v9886_v12  ;;  %v9115_v24 = vpop.f32.mrb[3].mxu1 }
 0x214   :  { %v296_v25 = vsel %vm227_vm2, %v295_v23, 0.0  ;;  %v301_v26 = vmul.f32 %v295_v23, %v295_v23 }
 0x215   :  { %297 = vadd.xlane.f32.xlu0 %v296_v25 }
 0x216   :  { %v302_v27 = vsel %vm227_vm2, %v301_v26, 0.0 }
 0x219   :  { %303 = vadd.xlane.f32.xlu0 %v302_v27 }
 0x2a2   :  { %v298_v28 = vpop.xlane.xlu0 %297 }
 0x2a3   :  { %v300_v29 = vmul.f32 0.03125, %v298_v28 }
 0x2a5   :  { %v306_v31 = vmul.f32 %v300_v29, %v300_v29  ;;  %v308_v38 = vsub.f32 %v295_v23, %v300_v29 }
 0x2a6   :  { %v304_v30 = vpop.xlane.xlu0 %303 }
 0x2a7   :  { %v305_v32 = vmul.f32 0.03125, %v304_v30 }
 0x2a9   :  { %v307_v33 = vsub.f32 %v305_v32, %v306_v31 }
 0x2ab   :  { %v309_v34 = vadd.f32 1e-05, %v307_v33 }
 0x2ad   :  { %9400 = vrsqrt.f32 %v309_v34 }
 0x2b7   :  { %v9401_v39 = vpop.eup %9400 }
 0x2b8   :  { %v311_v41 = vmul.f32 %v9401_v39, %v308_v38 }
 0x2ba   :  { %v316_v42 = vmul.f32 %v315_v37, %v311_v41 }
 0x2bc   :  { %v9916_v43 = vadd.f32 %v320_v40, %v316_v42 }
 0x2bd   :  { %9608 = dma.done.wait [#allocation4], 4096 }
 0x2be   :  { %9609 = vsyncadd [#allocation4], 4294963200 }
 0x2bf   :  { %9610 = dma.done.wait [#allocation4 + $0x2], 4096 }
 0x2c0   :  { %9611 = vsyncadd [#allocation4 + $0x2], 4294963200  ;;  %346 = sst [smem:[#allocation21]] %s9655_s21  ;;  %v9664_v44 = vmov 0   ;;  %s9665_s24 = smov [#allocation2 + $0x100]   ;;  %v9956_v54 = vpack.c.bf16 %v9916_v43, %v9916_v43  ;;  %v9983_v34 = vsub.s32 3, %v9874_v7 }
 0x2c1   :  { %559 = vmatprep.mubr.bf16.mxu0 %v9664_v44  ;;  %600 = vmatprep.mubr.bf16.mxu1 %v9664_v44  ;;  %348 = sst [smem:[#allocation21 + $0x1]] %s9655_s21  ;;  %s342_s20 = sshll.u32 %s9665_s24, 4  ;;  %s9928_s20 = int_to_ptr.vmem [resolvable:$true] %s342_s20 }
 0x2c2   :  { %350 = sst [smem:[#allocation21 + $0x2]] %s9656_s5  ;;  %s328_s29 = scalar_lea.hbm %s11039_s11, 4096 }
 0x2c3   :  { %352 = sst [smem:[#allocation21 + $0x3]] %s9646_s25  ;;  %s9666_s15 = smov [#allocation4 + $0x1]  }
 0x2c4   :  { %354 = sst [smem:[#allocation21 + $0x4]] %s9649_s3  ;;  %s9667_s17 = smov [#allocation20]  }
 0x2c5   :  { %356 = sst [smem:[#allocation21 + $0x5]] %s9657_s23  ;;  %s9668_s1 = smov [#allocation3 + $0x100]  }
 0x2c6   :  { %358 = sst [smem:[#allocation21 + $0x6]] %s9658_s27  ;;  %s379_s18 = sshll.u32 %s9668_s1, 4  ;;  %s9945_s18 = int_to_ptr.vmem [resolvable:$true] %s379_s18 }
 0x2c7   :  { %360 = sst [smem:[#allocation21 + $0x7]] %s9646_s25  ;;  %s365_s24 = scalar_lea.hbm %s11040_s12, 4096 }
 0x2c8   :  { %362 = sst [smem:[#allocation21 + $0x8]] %s9647_s26  ;;  %s9669_s16 = smov [#allocation4 + $0x3]  }
 0x2c9   :  { %364 = dma.general %s328_s29, 4096, %s9928_s20, %s9666_s15, %s9667_s17, [#allocation21], %s9840_s30, 0  }
 0x2ca   :  { %383 = sst [smem:[#allocation23]] %s9655_s21  ;;  %s9670_s22 = smov [#allocation22]  }
 0x2cb   :  { %385 = sst [smem:[#allocation23 + $0x1]] %s9655_s21 }
 0x2cc   :  { %387 = sst [smem:[#allocation23 + $0x2]] %s9656_s5 }
 0x2cd   :  { %389 = sst [smem:[#allocation23 + $0x3]] %s9646_s25 }
 0x2ce   :  { %391 = sst [smem:[#allocation23 + $0x4]] %s9649_s3 }
 0x2cf   :  { %393 = sst [smem:[#allocation23 + $0x5]] %s9657_s23 }
 0x2d0   :  { %395 = sst [smem:[#allocation23 + $0x6]] %s9658_s27 }
 0x2d1   :  { %397 = sst [smem:[#allocation23 + $0x7]] %s9646_s25 }
 0x2d2   :  { %399 = sst [smem:[#allocation23 + $0x8]] %s9647_s26 }
 0x2d3   :  { %401 = dma.general %s365_s24, 4096, %s9945_s18, %s9669_s16, %s9670_s22, [#allocation23], %s9840_s30, 0  }
 0x2d4   :  { %v411_v45 = vld [vmem:[#allocation2 + $0x8] sm:$0xff]  ;;  %v410_v46 = vld [vmem:[#allocation2] sm:$0xff]  ;;  %v413_v48 = vld [vmem:[#allocation2 + $0x18] sm:$0xff] }
 0x2d5   :  { %v427_v47 = vld [vmem:[#allocation2 + $0x88] sm:$0xff]  ;;  %527 = vmatprep.subr.bf16.mxu0 %v411_v45  ;;  %v412_v49 = vld [vmem:[#allocation2 + $0x10] sm:$0xff]  ;;  %568 = vmatprep.subr.bf16.mxu1 %v413_v48  ;;  %v429_v50 = vld [vmem:[#allocation2 + $0x98] sm:$0xff] }
 0x2d6   :  { %528 = vmatpush1.bf16.msra.mxu0 %v410_v46  ;;  %v426_v51 = vld [vmem:[#allocation2 + $0x80] sm:$0xff]  ;;  %569 = vmatpush1.bf16.msra.mxu1 %v412_v49  ;;  %v428_v52 = vld [vmem:[#allocation2 + $0x90] sm:$0xff]  ;;  %v415_v53 = vld [vmem:[#allocation2 + $0x28] sm:$0xff] }
 0x2d7   :  { %529 = vmatprep.subr.bf16.mxu0 %v427_v47  ;;  %570 = vmatprep.subr.bf16.mxu1 %v429_v50  ;;  %v417_v55 = vld [vmem:[#allocation2 + $0x38] sm:$0xff]  ;;  %v414_v56 = vld [vmem:[#allocation2 + $0x20] sm:$0xff]  ;;  %v431_v57 = vld [vmem:[#allocation2 + $0xa8] sm:$0xff] }
 0x2d8   :  { %v416_v58 = vld [vmem:[#allocation2 + $0x30] sm:$0xff]  ;;  %v433_v59 = vld [vmem:[#allocation2 + $0xb8] sm:$0xff]  ;;  %v430_v60 = vld [vmem:[#allocation2 + $0xa0] sm:$0xff] }
 0x2d9   :  { %v419_v61 = vld [vmem:[#allocation2 + $0x48] sm:$0xff]  ;;  %v432_v62 = vld [vmem:[#allocation2 + $0xb0] sm:$0xff]  ;;  %v421_v63 = vld [vmem:[#allocation2 + $0x58] sm:$0xff] }
 0x2da   :  { %530 = vmatpush1.bf16.msra.mxu0 %v426_v51  ;;  %571 = vmatpush1.bf16.msra.mxu1 %v428_v52  ;;  %v418_v1 = vld [vmem:[#allocation2 + $0x40] sm:$0xff]  ;;  %v435_v2 = vld [vmem:[#allocation2 + $0xc8] sm:$0xff]  ;;  %v420_v3 = vld [vmem:[#allocation2 + $0x50] sm:$0xff] }
 0x2db   :  { %609 = vmatprep.subr.bf16.mxu0 %v415_v53  ;;  %650 = vmatprep.subr.bf16.mxu1 %v417_v55  ;;  %v437_v4 = vld [vmem:[#allocation2 + $0xd8] sm:$0xff]  ;;  %v434_v5 = vld [vmem:[#allocation2 + $0xc0] sm:$0xff]  ;;  %v423_v6 = vld [vmem:[#allocation2 + $0x68] sm:$0xff] }
 0x2dc   :  { %v436_v10 = vld [vmem:[#allocation2 + $0xd0] sm:$0xff]  ;;  %v425_v11 = vld [vmem:[#allocation2 + $0x78] sm:$0xff]  ;;  %v422_v13 = vld [vmem:[#allocation2 + $0x60] sm:$0xff] }
 0x2dd   :  { %8946 = vmatmul.mubr.msk.bf16.vlgmr.msra.gmra.mrb[4].mxu0 %vm251_vm3, %v9956_v54  ;;  %8947 = vmatmul.mubr.msk.bf16.vlgmr.msra.gmra.mrb[4].mxu1 %vm251_vm3, %v9956_v54  ;;  %v439_v14 = vld [vmem:[#allocation2 + $0xe8] sm:$0xff]  ;;  %v424_v16 = vld [vmem:[#allocation2 + $0x70] sm:$0xff]  ;;  %v441_v18 = vld [vmem:[#allocation2 + $0xf8] sm:$0xff] }
 0x2de   :  { %610 = vmatpush1.bf16.msra.mxu0 %v414_v56  ;;  %641 = vmatprep.mubr.bf16.mxu0 %v9664_v44  ;;  %v438_v19 = vld [vmem:[#allocation2 + $0xe0] sm:$0xff]  ;;  %v440_v20 = vld [vmem:[#allocation2 + $0xf0] sm:$0xff]  ;;  %v888_v21 = vld [vmem:[#allocation3 + $0x8] sm:$0xff]  ;;  %v9992_v56 = vsub.s32 5, %v9874_v7 }
 0x2df   :  { %611 = vmatprep.subr.bf16.mxu0 %v431_v57  ;;  %651 = vmatpush1.bf16.msra.mxu1 %v416_v58  ;;  %v887_v22 = vld [vmem:[#allocation3] sm:$0xff]  ;;  %v904_v23 = vld [vmem:[#allocation3 + $0x88] sm:$0xff]  ;;  %v890_v25 = vld [vmem:[#allocation3 + $0x18] sm:$0xff] }
 0x2e0   :  { %682 = vmatprep.mubr.bf16.mxu1 %v9664_v44  ;;  %652 = vmatprep.subr.bf16.mxu1 %v433_v59  ;;  %v903_v24 = vld [vmem:[#allocation3 + $0x80] sm:$0xff]  ;;  %v896_v26 = vld [vmem:[#allocation3 + $0x48] sm:$0xff] }
 0x2e1   :  { %v895_v27 = vld [vmem:[#allocation3 + $0x40] sm:$0xff]  ;;  %v912_v28 = vld [vmem:[#allocation3 + $0xc8] sm:$0xff] }
 0x2e2   :  { %612 = vmatpush1.bf16.msra.mxu0 %v430_v60  ;;  %v911_v29 = vld [vmem:[#allocation3 + $0xc0] sm:$0xff]  ;;  %v900_v30 = vld [vmem:[#allocation3 + $0x68] sm:$0xff] }
 0x2e3   :  { %691 = vmatprep.subr.bf16.mxu0 %v419_v61  ;;  %653 = vmatpush1.bf16.msra.mxu1 %v432_v62  ;;  %v402_v31 = vld [vmem:[#allocation11] ss:$8 sm:$0xf] }
 0x2e4   :  { %732 = vmatprep.subr.bf16.mxu1 %v421_v63  ;;  %v403_v32 = vld [vmem:[#allocation11] ss:$8 sm:$0xf0] }
 0x2e5   :  { %8948 = vmatmul.mubr.msk.bf16.vlgmr.msra.gmra.mrb[8].mxu0 %vm251_vm3, %v9956_v54  ;;  %v9980_v33 = vor.u32 %v403_v32, %v402_v31  ;;  %v406_v58 = vld [vmem:[#allocation11 + $0x40] ss:$8 sm:$0xf] }
 0x2e6   :  { %692 = vmatpush1.bf16.msra.mxu0 %v418_v1  ;;  %723 = vmatprep.mubr.bf16.mxu0 %v9664_v44  ;;  %v407_v59 = vld [vmem:[#allocation11 + $0x40] ss:$8 sm:$0xf0] }
 0x2e7   :  { %8949 = vmatmul.mubr.msk.bf16.vlgmr.msra.gmra.mrb[8].mxu1 %vm251_vm3, %v9956_v54  ;;  %693 = vmatprep.subr.bf16.mxu0 %v435_v2  ;;  %v447_v37 = vrot.slane %v9980_v33, %v9877_v8  ;;  %v451_v38 = vrot.slane %v9980_v33, %v9907_v35  ;;  %v459_v39 = vrot.slane %v9980_v33, %v9983_v34  ;;  %v889_v61 = vld [vmem:[#allocation3 + $0x10] sm:$0xff]  ;;  %v906_v63 = vld [vmem:[#allocation3 + $0x98] sm:$0xff] }
 0x2e8   :  { %733 = vmatpush1.bf16.msra.mxu1 %v420_v3  ;;  %764 = vmatprep.mubr.bf16.mxu1 %v9664_v44  ;;  %v455_v2 = vrot.slane %v9980_v33, %v9910_v36 }
 0x2e9   :  { %734 = vmatprep.subr.bf16.mxu1 %v437_v4  ;;  %v9998_v4 = vor.u32 %v407_v59, %v406_v58 }
 0x2ea   :  { %694 = vmatpush1.bf16.msra.mxu0 %v434_v5  ;;  %v467_v5 = vrot.slane %v9980_v33, %v9992_v56 }
 0x2eb   :  { %773 = vmatprep.subr.bf16.mxu0 %v423_v6 }
 0x2ec   :  { %735 = vmatpush1.bf16.msra.mxu1 %v436_v10 }
 0x2ed   :  { %8950 = vmatmul.mubr.msk.bf16.vlgmr.msra.gmra.mrb[12].mxu0 %vm251_vm3, %v9956_v54  ;;  %814 = vmatprep.subr.bf16.mxu1 %v425_v11 }
 0x2ee   :  { %774 = vmatpush1.bf16.msra.mxu0 %v422_v13  ;;  %805 = vmatprep.mubr.bf16.mxu0 %v9664_v44 }
 0x2ef   :  { %8951 = vmatmul.mubr.msk.bf16.vlgmr.msra.gmra.mrb[12].mxu1 %vm251_vm3, %v9956_v54  ;;  %775 = vmatprep.subr.bf16.mxu0 %v439_v14 }
 0x2f0   :  { %815 = vmatpush1.bf16.msra.mxu1 %v424_v16  ;;  %846 = vmatprep.mubr.bf16.mxu1 %v9664_v44 }
 0x2f1   :  { %816 = vmatprep.subr.bf16.mxu1 %v441_v18 }
 0x2f2   :  { %776 = vmatpush1.bf16.msra.mxu0 %v438_v19  ;;  %v479_v19 = vrot.slane %v9998_v4, %v9877_v8 }
 0x2f3   :  { %1083 = vmatprep.subr.bf16.mxu0 %v896_v26 }
 0x2f4   :  { %817 = vmatpush1.bf16.msra.mxu1 %v440_v20 }
 0x2f5   :  { %8952 = vmatmul.mubr.msk.bf16.vlgmr.msra.gmra.mrb[16].mxu0 %vm251_vm3, %v9956_v54  ;;  %923 = vmatprep.subr.bf16.mxu1 %v888_v21  ;;  %v483_v21 = vrot.slane %v9998_v4, %v9907_v35 }
 0x2f7   :  { %8953 = vmatmul.mubr.msk.bf16.vlgmr.msra.gmra.mrb[16].mxu1 %vm251_vm3, %v9956_v54 }
 0x2fb   :  { %1084 = vmatpush1.bf16.xpose.msra.mxu0 %v895_v27 }
 0x2fc   :  { %1085 = vmatprep.subr.bf16.mxu0 %v912_v28 }
 0x2fd   :  { %924 = vmatpush1.bf16.xpose.msra.mxu1 %v887_v22  ;;  %v905_v22 = vld [vmem:[#allocation3 + $0x90] sm:$0xff] }
 0x2fe   :  { %925 = vmatprep.subr.bf16.mxu1 %v904_v23  ;;  %v892_v23 = vld [vmem:[#allocation3 + $0x28] sm:$0xff] }
 0x303   :  { %1086 = vmatpush1.bf16.xpose.msra.mxu0 %v911_v29 }
 0x304   :  { %1163 = vmatprep.subr.bf16.mxu0 %v900_v30 }
 0x305   :  { %926 = vmatpush1.bf16.xpose.msra.mxu1 %v903_v24 }
 0x306   :  { %963 = vmatprep.subr.bf16.mxu1 %v890_v25 }
 0x3b0   :  { %v561_v40 = vpop.f32.mrb[4].mxu0  ;;  %v602_v45 = vpop.f32.mrb[4].mxu1 }
 0x3b1   :  { %v562_v41 = vadd.f32 %v561_v40, %v447_v37  ;;  %v563_v42 = vpop.f32.mrb[5].mxu0  ;;  %v604_v48 = vpop.f32.mrb[5].mxu1  ;;  %v603_v16 = vadd.f32 %v602_v45, %v455_v2  ;;  %v10016_v45 = vsub.s32 6, %v9874_v7 }
 0x3b2   :  { %v564_v46 = vadd.f32 %v563_v42, %v451_v38  ;;  %v565_v47 = vpop.f32.mrb[6].mxu0  ;;  %v605_v51 = vadd.f32 %v604_v48, %v459_v39  ;;  %v606_v52 = vpop.f32.mrb[6].mxu1  ;;  %v10013_v42 = vsub.s32 4, %v9874_v7 }
 0x3b3   :  { %v855_v49 = vmax.f32 %v562_v41, 0.0  ;;  %v566_v50 = vpop.f32.mrb[7].mxu0  ;;  %v607_v54 = vpop.f32.mrb[7].mxu1  ;;  %v857_v25 = vmax.f32 %v603_v16, 0.0  ;;  %v891_v52 = vld [vmem:[#allocation3 + $0x20] sm:$0xff] }
 0x3b4   :  { %v856_v53 = vmax.f32 %v564_v46, 0.0  ;;  %v858_v55 = vmax.f32 %v605_v51, 0.0  ;;  %v499_v51 = vrot.slane %v9998_v4, %v9992_v56  ;;  %v908_v54 = vld [vmem:[#allocation3 + $0xa8] sm:$0xff]  ;;  %v463_v58 = vrot.slane %v9980_v33, %v10013_v42 }
 0x3b5   :  { %v871_v60 = vpack.c.bf16 %v855_v49, %v855_v49  ;;  %v873_v41 = vpack.c.bf16 %v857_v25, %v857_v25  ;;  %v10019_v49 = vsub.s32 7, %v9874_v7  ;;  %v916_v7 = vld [vmem:[#allocation3 + $0xe8] sm:$0xff]  ;;  %v495_v2 = vrot.slane %v9998_v4, %v10013_v42 }
 0x3b6   :  { %v872_v57 = vpack.c.bf16 %v856_v53, %v856_v53  ;;  %v874_v62 = vpack.c.bf16 %v858_v55, %v858_v55  ;;  %v503_v53 = vrot.slane %v9998_v4, %v10016_v45  ;;  %v899_v55 = vld [vmem:[#allocation3 + $0x60] sm:$0xff] }
 0x3b8   :  { %955 = vmatprep.mubr.bf16.mxu1 %v872_v57  ;;  %v9994_v1 = vpop.f32.mrb[8].mxu0 }
 0x3b9   :  { %956 = vmatmul.mubr.bf16.vlgmr.msra.gmra.mrb[20].mxu1 %v871_v60  ;;  %v645_v3 = vpop.f32.mrb[9].mxu0  ;;  %v475_v60 = vrot.slane %v9980_v33, %v10019_v49  ;;  %v644_v16 = vadd.f32 %v9994_v1, %v463_v58 }
 0x3ba   :  { %964 = vmatpush1.bf16.xpose.msra.mxu1 %v889_v61  ;;  %995 = vmatprep.mubr.bf16.mxu1 %v874_v62  ;;  %v647_v6 = vpop.f32.mrb[10].mxu0  ;;  %v10002_v10 = vpop.f32.mrb[8].mxu1  ;;  %v646_v20 = vadd.f32 %v645_v3, %v467_v5 }
 0x3bb   :  { %965 = vmatprep.subr.bf16.mxu1 %v906_v63  ;;  %v648_v11 = vpop.f32.mrb[11].mxu0  ;;  %v686_v13 = vpop.f32.mrb[9].mxu1  ;;  %v859_v25 = vmax.f32 %v644_v16, 0.0 }
 0x3bc   :  { %v688_v14 = vpop.f32.mrb[10].mxu1  ;;  %v860_v28 = vmax.f32 %v646_v20, 0.0 }
 0x3bd   :  { %v689_v18 = vpop.f32.mrb[11].mxu1 }
 0x3be   :  { %v876_v48 = vpack.c.bf16 %v860_v28, %v860_v28  ;;  %v875_v28 = vpack.c.bf16 %v859_v25, %v859_v25 }
 0x3c0   :  { %v725_v24 = vpop.f32.mrb[12].mxu0 }
 0x3c1   :  { %v726_v26 = vadd.f32 %v725_v24, %v479_v19  ;;  %v727_v27 = vpop.f32.mrb[13].mxu0  ;;  %v687_v19 = vadd.f32 %v686_v13, %v475_v60  ;;  %v915_v24 = vld [vmem:[#allocation3 + $0xe0] sm:$0xff]  ;;  %v471_v13 = vrot.slane %v9980_v33, %v10016_v45 }
 0x3c2   :  { %966 = vmatpush1.bf16.xpose.msra.mxu1 %v905_v22  ;;  %v728_v29 = vadd.f32 %v727_v27, %v483_v21  ;;  %v729_v30 = vpop.f32.mrb[14].mxu0  ;;  %v10008_v31 = vpop.f32.mrb[12].mxu1  ;;  %v907_v21 = vld [vmem:[#allocation3 + $0xa0] sm:$0xff] }
 0x3c3   :  { %1003 = vmatprep.subr.bf16.mxu1 %v892_v23  ;;  %v863_v32 = vmax.f32 %v726_v26, 0.0  ;;  %v730_v37 = vpop.f32.mrb[15].mxu0  ;;  %v10010_v38 = vpop.f32.mrb[13].mxu1  ;;  %v894_v23 = vld [vmem:[#allocation3 + $0x38] sm:$0xff]  ;;  %v862_v26 = vmax.f32 %v687_v19, 0.0  ;;  %v893_v30 = vld [vmem:[#allocation3 + $0x30] sm:$0xff] }
 0x3c4   :  { %v864_v39 = vmax.f32 %v728_v29, 0.0  ;;  %v770_v40 = vpop.f32.mrb[14].mxu1  ;;  %v491_v37 = vrot.slane %v9998_v4, %v9983_v34 }
 0x3c5   :  { %v879_v46 = vpack.c.bf16 %v863_v32, %v863_v32  ;;  %v771_v47 = vpop.f32.mrb[15].mxu1  ;;  %v878_v29 = vpack.c.bf16 %v862_v26, %v862_v26  ;;  %v910_v32 = vld [vmem:[#allocation3 + $0xb8] sm:$0xff] }
 0x3c6   :  { %v880_v50 = vpack.c.bf16 %v864_v39, %v864_v39  ;;  %v685_v39 = vadd.f32 %v10002_v10, %v471_v13  ;;  %v769_v40 = vadd.f32 %v10010_v38, %v491_v37  ;;  %v507_v10 = vrot.slane %v9998_v4, %v10019_v49 }
 0x3c8   :  { %1115 = vmatprep.mubr.bf16.mxu0 %v880_v50  ;;  %v807_v57 = vpop.f32.mrb[16].mxu0  ;;  %v861_v47 = vmax.f32 %v685_v39, 0.0 }
 0x3c9   :  { %996 = vmatmul.mubr.bf16.vlgmr.msra.gmra.mrb[24].mxu1 %v873_v41  ;;  %1116 = vmatmul.mubr.bf16.vlgmr.msra.gmra.mrb[20].mxu0 %v879_v46  ;;  %v809_v59 = vpop.f32.mrb[17].mxu0  ;;  %v808_v22 = vadd.f32 %v807_v57, %v495_v2  ;;  %v909_v41 = vld [vmem:[#allocation3 + $0xb0] sm:$0xff]  ;;  %v898_v46 = vld [vmem:[#allocation3 + $0x58] sm:$0xff] }
 0x3ca   :  { %1004 = vmatpush1.bf16.xpose.msra.mxu1 %v891_v52  ;;  %1035 = vmatprep.mubr.bf16.mxu1 %v876_v48  ;;  %v810_v61 = vadd.f32 %v809_v59, %v499_v51  ;;  %v811_v62 = vpop.f32.mrb[18].mxu0  ;;  %v848_v63 = vpop.f32.mrb[16].mxu1  ;;  %v866_v48 = vmax.f32 %v769_v40, 0.0  ;;  %v877_v33 = vpack.c.bf16 %v861_v47, %v861_v47  ;;  %v897_v51 = vld [vmem:[#allocation3 + $0x50] sm:$0xff]  ;;  %v914_v52 = vld [vmem:[#allocation3 + $0xd8] sm:$0xff] }
 0x3cb   :  { %1005 = vmatprep.subr.bf16.mxu1 %v908_v54  ;;  %1164 = vmatpush1.bf16.xpose.msra.mxu0 %v899_v55  ;;  %v10031_v3 = vadd.f32 %v848_v63, %v503_v53  ;;  %v812_v5 = vpop.f32.mrb[19].mxu0  ;;  %v850_v6 = vpop.f32.mrb[17].mxu1  ;;  %v867_v27 = vmax.f32 %v808_v22, 0.0  ;;  %v487_v53 = vrot.slane %v9998_v4, %v9910_v36  ;;  %v913_v55 = vld [vmem:[#allocation3 + $0xd0] sm:$0xff]  ;;  %v902_v57 = vld [vmem:[#allocation3 + $0x78] sm:$0xff] }
 0x3cc   :  { %v868_v11 = vmax.f32 %v810_v61, 0.0  ;;  %1165 = vmatprep.subr.bf16.mxu0 %v916_v7  ;;  %v852_v14 = vpop.f32.mrb[18].mxu1  ;;  %v882_v50 = vpack.c.bf16 %v866_v48, %v866_v48  ;;  %v851_v54 = vadd.f32 %v850_v6, %v507_v10  ;;  %v901_v61 = vld [vmem:[#allocation3 + $0x70] sm:$0xff]  ;;  %v918_v62 = vld [vmem:[#allocation3 + $0xf8] sm:$0xff] }
 0x3cd   :  { %v853_v18 = vpop.f32.mrb[19].mxu1  ;;  %v883_v1 = vpack.c.bf16 %v867_v27, %v867_v27  ;;  %v767_v38 = vadd.f32 %v10008_v31, %v487_v53  ;;  %v917_v63 = vld [vmem:[#allocation3 + $0xf0] sm:$0xff]  ;;  %v869_v4 = vmax.f32 %v10031_v3, 0.0  ;;  %v922_v14 = vrot.slane %v9899_v17, %v9983_v34 }
 0x3ce   :  { %v884_v20 = vpack.c.bf16 %v868_v11, %v868_v11  ;;  %v870_v59 = vmax.f32 %v851_v54, 0.0 }
 0x3cf   :  { %v865_v58 = vmax.f32 %v767_v38, 0.0  ;;  %v885_v31 = vpack.c.bf16 %v869_v4, %v869_v4 }
 0x3d0   :  { %1195 = vmatprep.mubr.bf16.mxu0 %v884_v20  ;;  %v886_v60 = vpack.c.bf16 %v870_v59, %v870_v59 }
 0x3d1   :  { %v881_v7 = vpack.c.bf16 %v865_v58, %v865_v58 }
 0x3d2   :  { %1006 = vmatpush1.bf16.xpose.msra.mxu1 %v907_v21 }
 0x3d3   :  { %1043 = vmatprep.subr.bf16.mxu1 %v894_v23  ;;  %1166 = vmatpush1.bf16.xpose.msra.mxu0 %v915_v24 }
 0x3d4   :  { %9116 = vmatprep.subr.bf16.mxu0 %v9652_v0 }
 0x3d9   :  { %1036 = vmatmul.mubr.bf16.vlgmr.msra.gmra.mrb[28].mxu1 %v875_v28 }
 0x3da   :  { %1044 = vmatpush1.bf16.xpose.msra.mxu1 %v893_v30  ;;  %1075 = vmatprep.mubr.bf16.mxu1 %v878_v29 }
 0x3db   :  { %1045 = vmatprep.subr.bf16.mxu1 %v910_v32  ;;  %1196 = vmatmul.mubr.bf16.vlgmr.msra.gmra.mrb[24].mxu0 %v883_v1 }
 0x3dc   :  { %9120 = vmatprep.mubr.msk.bf16.mxu0 %vm9653_vm0, %v9652_v0 }
 0x3e2   :  { %1046 = vmatpush1.bf16.xpose.msra.mxu1 %v909_v41 }
 0x3e3   :  { %1123 = vmatprep.subr.bf16.mxu1 %v898_v46 }
 0x3e9   :  { %1076 = vmatmul.mubr.bf16.vlgmr.msra.gmra.mrb[32].mxu1 %v877_v33 }
 0x3ea   :  { %1124 = vmatpush1.bf16.xpose.msra.mxu1 %v897_v51  ;;  %1155 = vmatprep.mubr.bf16.mxu1 %v882_v50 }
 0x3eb   :  { %1125 = vmatprep.subr.bf16.mxu1 %v914_v52 }
 0x3f2   :  { %1126 = vmatpush1.bf16.xpose.msra.mxu1 %v913_v55 }
 0x3f3   :  { %1203 = vmatprep.subr.bf16.mxu1 %v902_v57 }
 0x3f9   :  { %1156 = vmatmul.mubr.bf16.vlgmr.msra.gmra.mrb[36].mxu1 %v881_v7 }
 0x3fa   :  { %1204 = vmatpush1.bf16.xpose.msra.mxu1 %v901_v61  ;;  %1235 = vmatprep.mubr.bf16.mxu1 %v886_v60 }
 0x3fb   :  { %1205 = vmatprep.subr.bf16.mxu1 %v918_v62  ;;  %v9402_v62 = vld [vmem:[#allocation5 + $0x10] sm:$0xff]  }
 0x3fc   :  { %9117 = vmatpush3.bf16.msra.mxu0 %v9402_v62 }
 0x3fd   :  { %9118 = vmatprep.subr.bf16.mxu0 %v9652_v0 }
 0x402   :  { %1206 = vmatpush1.bf16.xpose.msra.mxu1 %v917_v63  ;;  %v9403_v63 = vld [vmem:[#allocation5 + $0x18] sm:$0xff]  }
 0x403   :  { %9119 = vmatpush3.bf16.msra.mxu0 %v9403_v63 }
 0x409   :  { %1236 = vmatmul.mubr.bf16.vlgmr.msra.gmra.mrb[40].mxu1 %v885_v31 }
 0x48c   :  { %v957_v2 = vpop.f32.mrb[20].mxu1 }
 0x48d   :  { %v959_v5 = vpop.f32.mrb[21].mxu1  ;;  %v958_v16 = vadd.f32 %v957_v2, %v922_v14  ;;  %v1262_v14 = vrot.slane %v9899_v17, %v10013_v42 }
 0x48e   :  { %v960_v6 = vpop.f32.mrb[22].mxu1 }
 0x48f   :  { %v961_v11 = vpop.f32.mrb[23].mxu1 }
 0x49c   :  { %v997_v18 = vpop.f32.mrb[24].mxu1  ;;  %v1117_v19 = vpop.f32.mrb[20].mxu0 }
 0x49d   :  { %v998_v20 = vadd.f32 %v997_v18, %v958_v16  ;;  %v999_v21 = vpop.f32.mrb[25].mxu1  ;;  %v1119_v22 = vpop.f32.mrb[21].mxu0 }
 0x49e   :  { %v1000_v23 = vpop.f32.mrb[26].mxu1  ;;  %v1120_v24 = vpop.f32.mrb[22].mxu0 }
 0x49f   :  { %v1001_v25 = vpop.f32.mrb[27].mxu1  ;;  %v1121_v26 = vpop.f32.mrb[23].mxu0  ;;  %v10063_v24 = vld [vmem:[%s11032_s4 + $0x8] sm:$0x3f] }
 0x4a0   :  { %v1280_v25 = vrot.slane %v10063_v24, %v9877_v8 }
 0x4ac   :  { %v1037_v3 = vpop.f32.mrb[28].mxu1 }
 0x4ad   :  { %v1038_v27 = vadd.f32 %v1037_v3, %v998_v20  ;;  %v1039_v28 = vpop.f32.mrb[29].mxu1  ;;  %v1267_v20 = vrot.slane %v9899_v17, %v9992_v56 }
 0x4ae   :  { %v1040_v29 = vpop.f32.mrb[30].mxu1  ;;  %v1197_v30 = vpop.f32.mrb[24].mxu0 }
 0x4af   :  { %v1041_v1 = vpop.f32.mrb[31].mxu1  ;;  %v1199_v32 = vpop.f32.mrb[25].mxu0 }
 0x4b0   :  { %v1200_v13 = vpop.f32.mrb[26].mxu0 }
 0x4b1   :  { %v1201_v37 = vpop.f32.mrb[27].mxu0 }
 0x4bc   :  { %v1077_v39 = vpop.f32.mrb[32].mxu1 }
 0x4bd   :  { %v1078_v40 = vadd.f32 %v1077_v39, %v1038_v27  ;;  %v1079_v41 = vpop.f32.mrb[33].mxu1 }
 0x4be   :  { %v1080_v46 = vpop.f32.mrb[34].mxu1 }
 0x4bf   :  { %v1118_v47 = vadd.f32 %v1117_v19, %v1078_v40  ;;  %v1081_v48 = vpop.f32.mrb[35].mxu1 }
 0x4c0   :  { %v1355_v48 = vrot.slane %v10063_v24, %v9907_v35 }
 0x4cc   :  { %v1157_v33 = vpop.f32.mrb[36].mxu1 }
 0x4cd   :  { %v1158_v50 = vadd.f32 %v1157_v33, %v1118_v47  ;;  %v1159_v51 = vpop.f32.mrb[37].mxu1 }
 0x4ce   :  { %v1160_v52 = vpop.f32.mrb[38].mxu1  ;;  %v1360_v51 = vrot.slane %v10063_v24, %v9910_v36 }
 0x4cf   :  { %v1198_v53 = vadd.f32 %v1197_v30, %v1158_v50  ;;  %v1161_v10 = vpop.f32.mrb[39].mxu1 }
 0x4dc   :  { %v1237_v38 = vpop.f32.mrb[40].mxu1 }
 0x4dd   :  { %v1238_v54 = vadd.f32 %v1237_v38, %v1198_v53  ;;  %v1239_v55 = vpop.f32.mrb[41].mxu1 }
 0x4de   :  { %v1240_v57 = vpop.f32.mrb[42].mxu1 }
 0x4df   :  { %v1243_v58 = vadd.f32 %v1238_v54, %v9916_v43  ;;  %v1241_v59 = vpop.f32.mrb[43].mxu1 }
 0x4e1   :  { %v1244_v7 = vsel %vm227_vm2, %v1243_v58, 0.0  ;;  %v1248_v60 = vmul.f32 %v1243_v58, %v1243_v58 }
 0x4e2   :  { %1245 = vadd.xlane.f32.xlu0 %v1244_v7 }
 0x4e3   :  { %v1249_v61 = vsel %vm227_vm2, %v1248_v60, 0.0 }
 0x4e6   :  { %1250 = vadd.xlane.f32.xlu0 %v1249_v61 }
 0x56f   :  { %v1246_v4 = vpop.xlane.xlu0 %1245 }
 0x570   :  { %v1247_v31 = vmul.f32 0.03125, %v1246_v4 }
 0x572   :  { %v1253_v5 = vmul.f32 %v1247_v31, %v1247_v31  ;;  %v1255_v16 = vsub.f32 %v1243_v58, %v1247_v31 }
 0x573   :  { %v1251_v2 = vpop.xlane.xlu0 %1250 }
 0x574   :  { %v1252_v6 = vmul.f32 0.03125, %v1251_v2 }
 0x576   :  { %v1254_v43 = vsub.f32 %v1252_v6, %v1253_v5 }
 0x578   :  { %v1256_v11 = vadd.f32 1e-05, %v1254_v43 }
 0x57a   :  { %9404 = vrsqrt.f32 %v1256_v11 }
 0x584   :  { %v9405_v18 = vpop.eup %9404 }
 0x585   :  { %v1258_v19 = vmul.f32 %v9405_v18, %v1255_v16 }
 0x587   :  { %v1263_v21 = vmul.f32 %v1262_v14, %v1258_v19 }
 0x589   :  { %v1268_v22 = vadd.f32 %v1267_v20, %v1263_v21 }
 0x58b   :  { %v1276_v23 = vpack.c.bf16 %v1268_v22, %v1268_v22 }
 0x58d   :  { %9121 = vmatmul.mubr.msk.bf16.vlgmr.msra.gmra.mrb[28].mxu0 %vm251_vm3, %v1276_v23 }
 0x660   :  { %v1330_v26 = vpop.f32.mrb[28].mxu0 }
 0x661   :  { %v1331_v3 = vadd.f32 %v1330_v26, %v1280_v25  ;;  %v9122_v27 = vpop.f32.mrb[29].mxu0 }
 0x662   :  { %v1333_v28 = vpop.f32.mrb[30].mxu0 }
 0x663   :  { %v1336_v29 = vadd.f32 %v1331_v3, %v1268_v22  ;;  %v9123_v30 = vpop.f32.mrb[31].mxu0 }
 0x665   :  { %v1337_v17 = vsel %vm227_vm2, %v1336_v29, 0.0  ;;  %v1341_v1 = vmul.f32 %v1336_v29, %v1336_v29 }
 0x666   :  { %1338 = vadd.xlane.f32.xlu1 %v1337_v17 }
 0x667   :  { %v1342_v32 = vsel %vm227_vm2, %v1341_v1, 0.0 }
 0x66a   :  { %1343 = vadd.xlane.f32.xlu1 %v1342_v32 }
 0x6f3   :  { %v1339_v13 = vpop.xlane.xlu1 %1338 }
 0x6f4   :  { %v1340_v37 = vmul.f32 0.03125, %v1339_v13 }
 0x6f6   :  { %v1346_v40 = vmul.f32 %v1340_v37, %v1340_v37  ;;  %v1348_v33 = vsub.f32 %v1336_v29, %v1340_v37 }
 0x6f7   :  { %v1344_v39 = vpop.xlane.xlu1 %1343 }
 0x6f8   :  { %v1345_v41 = vmul.f32 0.03125, %v1344_v39 }
 0x6fa   :  { %v1347_v46 = vsub.f32 %v1345_v41, %v1346_v40 }
 0x6fc   :  { %v1349_v47 = vadd.f32 1e-05, %v1347_v46 }
 0x6fe   :  { %9406 = vrsqrt.f32 %v1349_v47 }
 0x708   :  { %v9407_v50 = vpop.eup %9406 }
 0x709   :  { %v1351_v52 = vmul.f32 %v9407_v50, %v1348_v33 }
 0x70b   :  { %v1356_v53 = vmul.f32 %v1355_v48, %v1351_v52 }
 0x70d   :  { %v10073_v10 = vadd.f32 %v1360_v51, %v1356_v53 }
 0x70e   :  { %9612 = dma.done.wait [#allocation4 + $0x1], 4096 }
 0x70f   :  { %9613 = vsyncadd [#allocation4 + $0x1], 4294963200 }
 0x710   :  { %9614 = dma.done.wait [#allocation4 + $0x3], 4096 }
 0x711   :  { %9615 = vsyncadd [#allocation4 + $0x3], 4294963200  ;;  %1594 = vmatprep.mubr.bf16.mxu1 %v9664_v44  ;;  %1635 = vmatprep.mubr.bf16.mxu0 %v9664_v44  ;;  %1382 = sst [smem:[#allocation25]] %s9655_s21  ;;  %s1366_s0 = scalar_lea.hbm %s11039_s11, 8192  ;;  %v10109_v63 = vpack.c.bf16 %v10073_v10, %v10073_v10  ;;  %vm2480_vm4 = vcmask 257026  }
 0x712   :  { %1384 = sst [smem:[#allocation25 + $0x1]] %s9655_s21  ;;  %s9671_s2 = smov [#allocation24]  }
 0x713   :  { %1386 = sst [smem:[#allocation25 + $0x2]] %s9656_s5  ;;  %s1401_s29 = scalar_lea.hbm %s11040_s12, 8192 }
 0x714   :  { %1388 = sst [smem:[#allocation25 + $0x3]] %s9646_s25  ;;  %s9672_s17 = smov [#allocation26]  }
 0x715   :  { %1390 = sst [smem:[#allocation25 + $0x4]] %s9649_s3 }
 0x716   :  { %1392 = sst [smem:[#allocation25 + $0x5]] %s9657_s23 }
 0x717   :  { %1394 = sst [smem:[#allocation25 + $0x6]] %s9658_s27 }
 0x718   :  { %1396 = sst [smem:[#allocation25 + $0x7]] %s9646_s25 }
 0x719   :  { %1398 = sst [smem:[#allocation25 + $0x8]] %s9647_s26 }
 0x71a   :  { %1400 = dma.general %s1366_s0, 4096, %s9834_s10, %s9659_s28, %s9671_s2, [#allocation25], %s9840_s30, 0  }
 0x71b   :  { %1417 = sst [smem:[#allocation27]] %s9655_s21 }
 0x71c   :  { %1419 = sst [smem:[#allocation27 + $0x1]] %s9655_s21 }
 0x71d   :  { %1421 = sst [smem:[#allocation27 + $0x2]] %s9656_s5 }
 0x71e   :  { %1423 = sst [smem:[#allocation27 + $0x3]] %s9646_s25 }
 0x71f   :  { %1425 = sst [smem:[#allocation27 + $0x4]] %s9649_s3 }
 0x720   :  { %1427 = sst [smem:[#allocation27 + $0x5]] %s9657_s23 }
 0x721   :  { %1429 = sst [smem:[#allocation27 + $0x6]] %s9658_s27 }
 0x722   :  { %1431 = sst [smem:[#allocation27 + $0x7]] %s9646_s25 }
 0x723   :  { %1433 = sst [smem:[#allocation27 + $0x8]] %s9647_s26 }
 0x724   :  { %1435 = dma.general %s1401_s29, 4096, %s9855_s19, %s9662_s6, %s9672_s17, [#allocation27], %s9840_s30, 0  }
 0x725   :  { %v1446_v38 = vld [vmem:[#allocation2 + $0x108] sm:$0xff]  ;;  %v1448_v54 = vld [vmem:[#allocation2 + $0x118] sm:$0xff]  ;;  %v1445_v55 = vld [vmem:[#allocation2 + $0x100] sm:$0xff] }
 0x726   :  { %1562 = vmatprep.subr.bf16.mxu1 %v1446_v38  ;;  %1603 = vmatprep.subr.bf16.mxu0 %v1448_v54  ;;  %v1447_v57 = vld [vmem:[#allocation2 + $0x110] sm:$0xff]  ;;  %v1462_v58 = vld [vmem:[#allocation2 + $0x188] sm:$0xff]  ;;  %v1464_v59 = vld [vmem:[#allocation2 + $0x198] sm:$0xff] }
 0x727   :  { %1563 = vmatpush1.bf16.msra.mxu1 %v1445_v55  ;;  %1604 = vmatpush1.bf16.msra.mxu0 %v1447_v57  ;;  %v1461_v7 = vld [vmem:[#allocation2 + $0x180] sm:$0xff]  ;;  %v1463_v60 = vld [vmem:[#allocation2 + $0x190] sm:$0xff]  ;;  %v1450_v61 = vld [vmem:[#allocation2 + $0x128] sm:$0xff] }
 0x728   :  { %1564 = vmatprep.subr.bf16.mxu1 %v1462_v58  ;;  %1605 = vmatprep.subr.bf16.mxu0 %v1464_v59  ;;  %v1452_v62 = vld [vmem:[#allocation2 + $0x138] sm:$0xff]  ;;  %v1449_v4 = vld [vmem:[#allocation2 + $0x120] sm:$0xff]  ;;  %v1451_v31 = vld [vmem:[#allocation2 + $0x130] sm:$0xff] }
 0x729   :  { %v1466_v2 = vld [vmem:[#allocation2 + $0x1a8] sm:$0xff]  ;;  %v1468_v5 = vld [vmem:[#allocation2 + $0x1b8] sm:$0xff]  ;;  %v1465_v6 = vld [vmem:[#allocation2 + $0x1a0] sm:$0xff] }
 0x72a   :  { %v1467_v43 = vld [vmem:[#allocation2 + $0x1b0] sm:$0xff]  ;;  %v1454_v11 = vld [vmem:[#allocation2 + $0x148] sm:$0xff]  ;;  %v1456_v14 = vld [vmem:[#allocation2 + $0x158] sm:$0xff] }
 0x72b   :  { %1565 = vmatpush1.bf16.msra.mxu1 %v1461_v7  ;;  %1606 = vmatpush1.bf16.msra.mxu0 %v1463_v60  ;;  %v1453_v16 = vld [vmem:[#allocation2 + $0x140] sm:$0xff]  ;;  %v1455_v18 = vld [vmem:[#allocation2 + $0x150] sm:$0xff]  ;;  %v1470_v19 = vld [vmem:[#allocation2 + $0x1c8] sm:$0xff] }
 0x72c   :  { %1644 = vmatprep.subr.bf16.mxu1 %v1450_v61  ;;  %1685 = vmatprep.subr.bf16.mxu0 %v1452_v62  ;;  %v1472_v20 = vld [vmem:[#allocation2 + $0x1d8] sm:$0xff]  ;;  %v1469_v21 = vld [vmem:[#allocation2 + $0x1c0] sm:$0xff]  ;;  %v1471_v22 = vld [vmem:[#allocation2 + $0x1d0] sm:$0xff] }
 0x72d   :  { %v1458_v23 = vld [vmem:[#allocation2 + $0x168] sm:$0xff]  ;;  %v1460_v25 = vld [vmem:[#allocation2 + $0x178] sm:$0xff]  ;;  %v1457_v26 = vld [vmem:[#allocation2 + $0x160] sm:$0xff] }
 0x72e   :  { %8962 = vmatmul.mubr.msk.bf16.vlgmr.msra.gmra.mrb[44].mxu1 %vm251_vm3, %v10109_v63  ;;  %8963 = vmatmul.mubr.msk.bf16.vlgmr.msra.gmra.mrb[32].mxu0 %vm251_vm3, %v10109_v63  ;;  %v1459_v3 = vld [vmem:[#allocation2 + $0x170] sm:$0xff]  ;;  %v1474_v27 = vld [vmem:[#allocation2 + $0x1e8] sm:$0xff]  ;;  %v1476_v28 = vld [vmem:[#allocation2 + $0x1f8] sm:$0xff] }
 0x72f   :  { %1645 = vmatpush1.bf16.msra.mxu1 %v1449_v4  ;;  %1686 = vmatpush1.bf16.msra.mxu0 %v1451_v31  ;;  %v1473_v29 = vld [vmem:[#allocation2 + $0x1e0] sm:$0xff]  ;;  %v1475_v30 = vld [vmem:[#allocation2 + $0x1f0] sm:$0xff]  ;;  %v1923_v17 = vld [vmem:[#allocation3 + $0x108] sm:$0xff] }
 0x730   :  { %1646 = vmatprep.subr.bf16.mxu1 %v1466_v2  ;;  %1687 = vmatprep.subr.bf16.mxu0 %v1468_v5  ;;  %v1925_v1 = vld [vmem:[#allocation3 + $0x118] sm:$0xff]  ;;  %v1922_v32 = vld [vmem:[#allocation3 + $0x100] sm:$0xff]  ;;  %v1924_v13 = vld [vmem:[#allocation3 + $0x110] sm:$0xff] }
 0x731   :  { %1676 = vmatprep.mubr.bf16.mxu1 %v9664_v44  ;;  %1717 = vmatprep.mubr.bf16.mxu0 %v9664_v44  ;;  %v1939_v37 = vld [vmem:[#allocation3 + $0x188] sm:$0xff]  ;;  %v1941_v39 = vld [vmem:[#allocation3 + $0x198] sm:$0xff]  ;;  %v1938_v40 = vld [vmem:[#allocation3 + $0x180] sm:$0xff] }
 0x732   :  { %v1940_v41 = vld [vmem:[#allocation3 + $0x190] sm:$0xff]  ;;  %v1927_v46 = vld [vmem:[#allocation3 + $0x128] sm:$0xff]  ;;  %v1929_v47 = vld [vmem:[#allocation3 + $0x138] sm:$0xff] }
 0x733   :  { %1647 = vmatpush1.bf16.msra.mxu1 %v1465_v6  ;;  %1688 = vmatpush1.bf16.msra.mxu0 %v1467_v43  ;;  %v1437_v48 = vld [vmem:[#allocation11 + $0x1] ss:$8 sm:$0xf] }
 0x734   :  { %1726 = vmatprep.subr.bf16.mxu1 %v1454_v11  ;;  %1767 = vmatprep.subr.bf16.mxu0 %v1456_v14  ;;  %v1438_v33 = vld [vmem:[#allocation11 + $0x1] ss:$8 sm:$0xf0] }
 0x735   :  { %v1439_v50 = vor.u32 %v1438_v33, %v1437_v48 }
 0x736   :  { %8964 = vmatmul.mubr.msk.bf16.vlgmr.msra.gmra.mrb[48].mxu1 %vm251_vm3, %v10109_v63  ;;  %8965 = vmatmul.mubr.msk.bf16.vlgmr.msra.gmra.mrb[36].mxu0 %vm251_vm3, %v10109_v63 }
 0x737   :  { %1727 = vmatpush1.bf16.msra.mxu1 %v1453_v16  ;;  %1768 = vmatpush1.bf16.msra.mxu0 %v1455_v18  ;;  %v1482_v51 = vrot.slane %v1439_v50, %v9877_v8  ;;  %v1490_v52 = vrot.slane %v1439_v50, %v9910_v36  ;;  %v1486_v53 = vrot.slane %v1439_v50, %v9907_v35  ;;  %v1926_v18 = vld [vmem:[#allocation3 + $0x120] sm:$0xff] }
 0x738   :  { %1728 = vmatprep.subr.bf16.mxu1 %v1470_v19  ;;  %1769 = vmatprep.subr.bf16.mxu0 %v1472_v20  ;;  %v1494_v38 = vrot.slane %v1439_v50, %v9983_v34  ;;  %v1928_v19 = vld [vmem:[#allocation3 + $0x130] sm:$0xff]  ;;  %v1502_v20 = vrot.slane %v1439_v50, %v9992_v56 }
 0x739   :  { %1758 = vmatprep.mubr.bf16.mxu1 %v9664_v44  ;;  %1799 = vmatprep.mubr.bf16.mxu0 %v9664_v44 }
 0x73b   :  { %1729 = vmatpush1.bf16.msra.mxu1 %v1469_v21  ;;  %1770 = vmatpush1.bf16.msra.mxu0 %v1471_v22  ;;  %v1510_v21 = vrot.slane %v1439_v50, %v10019_v49 }
 0x73c   :  { %1808 = vmatprep.subr.bf16.mxu1 %v1458_v23  ;;  %1849 = vmatprep.subr.bf16.mxu0 %v1460_v25  ;;  %v1441_v23 = vld [vmem:[#allocation11 + $0x41] ss:$8 sm:$0xf] }
 0x73d   :  { %v1442_v25 = vld [vmem:[#allocation11 + $0x41] ss:$8 sm:$0xf0] }
 0x73e   :  { %8966 = vmatmul.mubr.msk.bf16.vlgmr.msra.gmra.mrb[52].mxu1 %vm251_vm3, %v10109_v63  ;;  %8967 = vmatmul.mubr.msk.bf16.vlgmr.msra.gmra.mrb[40].mxu0 %vm251_vm3, %v10109_v63 }
 0x73f   :  { %1809 = vmatpush1.bf16.msra.mxu1 %v1457_v26  ;;  %1850 = vmatpush1.bf16.msra.mxu0 %v1459_v3 }
 0x740   :  { %1810 = vmatprep.subr.bf16.mxu1 %v1474_v27  ;;  %1851 = vmatprep.subr.bf16.mxu0 %v1476_v28  ;;  %v1943_v27 = vld [vmem:[#allocation3 + $0x1a8] sm:$0xff]  ;;  %v1945_v28 = vld [vmem:[#allocation3 + $0x1b8] sm:$0xff] }
 0x741   :  { %1840 = vmatprep.mubr.bf16.mxu1 %v9664_v44  ;;  %1881 = vmatprep.mubr.bf16.mxu0 %v9664_v44 }
 0x743   :  { %1811 = vmatpush1.bf16.msra.mxu1 %v1473_v29  ;;  %1852 = vmatpush1.bf16.msra.mxu0 %v1475_v30  ;;  %v1498_v29 = vrot.slane %v1439_v50, %v10013_v42 }
 0x744   :  { %1958 = vmatprep.subr.bf16.mxu1 %v1923_v17  ;;  %1998 = vmatprep.subr.bf16.mxu0 %v1925_v1  ;;  %v1506_v17 = vrot.slane %v1439_v50, %v10016_v45 }
 0x746   :  { %8968 = vmatmul.mubr.msk.bf16.vlgmr.msra.gmra.mrb[56].mxu1 %vm251_vm3, %v10109_v63  ;;  %8969 = vmatmul.mubr.msk.bf16.vlgmr.msra.gmra.mrb[44].mxu0 %vm251_vm3, %v10109_v63 }
 0x74c   :  { %1959 = vmatpush1.bf16.xpose.msra.mxu1 %v1922_v32  ;;  %1999 = vmatpush1.bf16.xpose.msra.mxu0 %v1924_v13 }
 0x74d   :  { %1960 = vmatprep.subr.bf16.mxu1 %v1939_v37  ;;  %2000 = vmatprep.subr.bf16.mxu0 %v1941_v39 }
 0x754   :  { %1961 = vmatpush1.bf16.xpose.msra.mxu1 %v1938_v40  ;;  %2001 = vmatpush1.bf16.xpose.msra.mxu0 %v1940_v41  ;;  %v10141_v40 = vor.u32 %v1442_v25, %v1441_v23  ;;  %v1947_v23 = vld [vmem:[#allocation3 + $0x1c8] sm:$0xff]  ;;  %v1949_v25 = vld [vmem:[#allocation3 + $0x1d8] sm:$0xff] }
 0x755   :  { %2038 = vmatprep.subr.bf16.mxu1 %v1927_v46  ;;  %2078 = vmatprep.subr.bf16.mxu0 %v1929_v47 }
 0x756   :  { %v1518_v50 = vrot.slane %v10141_v40, %v9907_v35 }
 0x801   :  { %v1596_v54 = vpop.f32.mrb[44].mxu1  ;;  %v1637_v55 = vpop.f32.mrb[32].mxu0 }
 0x802   :  { %v1597_v57 = vadd.f32 %v1596_v54, %v1482_v51  ;;  %v1638_v58 = vadd.f32 %v1637_v55, %v1490_v52  ;;  %v1598_v59 = vpop.f32.mrb[45].mxu1  ;;  %v1639_v7 = vpop.f32.mrb[33].mxu0  ;;  %v1942_v54 = vld [vmem:[#allocation3 + $0x1a0] sm:$0xff]  ;;  %v1944_v55 = vld [vmem:[#allocation3 + $0x1b0] sm:$0xff] }
 0x803   :  { %v1599_v60 = vadd.f32 %v1598_v59, %v1486_v53  ;;  %v1640_v61 = vadd.f32 %v1639_v7, %v1494_v38  ;;  %v1600_v62 = vpop.f32.mrb[46].mxu1  ;;  %v1641_v63 = vpop.f32.mrb[34].mxu0  ;;  %v1526_v38 = vrot.slane %v10141_v40, %v9983_v34 }
 0x804   :  { %v1890_v4 = vmax.f32 %v1597_v57, 0.0  ;;  %v1892_v31 = vmax.f32 %v1638_v58, 0.0  ;;  %v1601_v2 = vpop.f32.mrb[47].mxu1  ;;  %v1642_v5 = vpop.f32.mrb[35].mxu0  ;;  %v1931_v57 = vld [vmem:[#allocation3 + $0x148] sm:$0xff]  ;;  %v1933_v58 = vld [vmem:[#allocation3 + $0x158] sm:$0xff] }
 0x805   :  { %v1891_v6 = vmax.f32 %v1599_v60, 0.0  ;;  %v1893_v43 = vmax.f32 %v1640_v61, 0.0 }
 0x806   :  { %v1908_v11 = vpack.c.bf16 %v1892_v31, %v1892_v31  ;;  %v1906_v22 = vpack.c.bf16 %v1890_v4, %v1890_v4 }
 0x807   :  { %v1907_v14 = vpack.c.bf16 %v1891_v6, %v1891_v6  ;;  %v1909_v16 = vpack.c.bf16 %v1893_v43, %v1893_v43 }
 0x809   :  { %1990 = vmatprep.mubr.bf16.mxu1 %v1907_v14  ;;  %2030 = vmatprep.mubr.bf16.mxu0 %v1909_v16  ;;  %v1678_v26 = vpop.f32.mrb[48].mxu1  ;;  %v1719_v3 = vpop.f32.mrb[36].mxu0 }
 0x80a   :  { %1991 = vmatmul.mubr.bf16.vlgmr.msra.gmra.mrb[60].mxu1 %v1906_v22  ;;  %2031 = vmatmul.mubr.bf16.vlgmr.msra.gmra.mrb[48].mxu0 %v1908_v11  ;;  %v1680_v30 = vpop.f32.mrb[49].mxu1  ;;  %v1721_v1 = vpop.f32.mrb[37].mxu0  ;;  %v1679_v33 = vadd.f32 %v1678_v26, %v1498_v29  ;;  %v1720_v51 = vadd.f32 %v1719_v3, %v1506_v17 }
 0x80b   :  { %2039 = vmatpush1.bf16.xpose.msra.mxu1 %v1926_v18  ;;  %2079 = vmatpush1.bf16.xpose.msra.mxu0 %v1928_v19  ;;  %v1681_v32 = vadd.f32 %v1680_v30, %v1502_v20  ;;  %v1682_v13 = vpop.f32.mrb[50].mxu1  ;;  %v1722_v37 = vadd.f32 %v1721_v1, %v1510_v21  ;;  %v1723_v39 = vpop.f32.mrb[38].mxu0  ;;  %v1930_v19 = vld [vmem:[#allocation3 + $0x140] sm:$0xff]  ;;  %v1932_v20 = vld [vmem:[#allocation3 + $0x150] sm:$0xff] }
 0x80c   :  { %v1683_v41 = vpop.f32.mrb[51].mxu1  ;;  %2040 = vmatprep.subr.bf16.mxu1 %v1943_v27  ;;  %2080 = vmatprep.subr.bf16.mxu0 %v1945_v28  ;;  %v1724_v46 = vpop.f32.mrb[39].mxu0  ;;  %v1894_v60 = vmax.f32 %v1679_v33, 0.0  ;;  %v1896_v61 = vmax.f32 %v1720_v51, 0.0  ;;  %v1514_v27 = vrot.slane %v10141_v40, %v9877_v8  ;;  %v1522_v28 = vrot.slane %v10141_v40, %v9910_v36  ;;  %v1935_v33 = vld [vmem:[#allocation3 + $0x168] sm:$0xff]  ;;  %v1937_v51 = vld [vmem:[#allocation3 + $0x178] sm:$0xff] }
 0x80d   :  { %v1895_v47 = vmax.f32 %v1681_v32, 0.0  ;;  %v1897_v48 = vmax.f32 %v1722_v37, 0.0  ;;  %v1534_v37 = vrot.slane %v10141_v40, %v9992_v56  ;;  %v1542_v39 = vrot.slane %v10141_v40, %v10019_v49 }
 0x80e   :  { %v1910_v16 = vpack.c.bf16 %v1894_v60, %v1894_v60  ;;  %v1912_v18 = vpack.c.bf16 %v1896_v61, %v1896_v61  ;;  %v1934_v60 = vld [vmem:[#allocation3 + $0x160] sm:$0xff]  ;;  %v1936_v61 = vld [vmem:[#allocation3 + $0x170] sm:$0xff] }
 0x80f   :  { %v1911_v52 = vpack.c.bf16 %v1895_v47, %v1895_v47  ;;  %v1913_v53 = vpack.c.bf16 %v1897_v48, %v1897_v48  ;;  %v1946_v47 = vld [vmem:[#allocation3 + $0x1c0] sm:$0xff]  ;;  %v1948_v48 = vld [vmem:[#allocation3 + $0x1d0] sm:$0xff] }
 0x811   :  { %2070 = vmatprep.mubr.bf16.mxu1 %v1911_v52  ;;  %2110 = vmatprep.mubr.bf16.mxu0 %v1913_v53  ;;  %v1760_v59 = vpop.f32.mrb[52].mxu1  ;;  %v1801_v7 = vpop.f32.mrb[40].mxu0 }
 0x812   :  { %v1762_v62 = vpop.f32.mrb[53].mxu1  ;;  %v1803_v63 = vpop.f32.mrb[41].mxu0  ;;  %v1761_v41 = vadd.f32 %v1760_v59, %v1514_v27  ;;  %v1802_v46 = vadd.f32 %v1801_v7, %v1522_v28 }
 0x813   :  { %2041 = vmatpush1.bf16.xpose.msra.mxu1 %v1942_v54  ;;  %2081 = vmatpush1.bf16.xpose.msra.mxu0 %v1944_v55  ;;  %v1763_v4 = vadd.f32 %v1762_v62, %v1518_v50  ;;  %v1764_v31 = vpop.f32.mrb[54].mxu1  ;;  %v1804_v2 = vadd.f32 %v1803_v63, %v1526_v38  ;;  %v1805_v5 = vpop.f32.mrb[42].mxu0  ;;  %v1951_v62 = vld [vmem:[#allocation3 + $0x1e8] sm:$0xff]  ;;  %v1953_v63 = vld [vmem:[#allocation3 + $0x1f8] sm:$0xff] }
 0x814   :  { %2118 = vmatprep.subr.bf16.mxu1 %v1931_v57  ;;  %2158 = vmatprep.subr.bf16.mxu0 %v1933_v58  ;;  %v1765_v6 = vpop.f32.mrb[55].mxu1  ;;  %v1806_v43 = vpop.f32.mrb[43].mxu0  ;;  %v1898_v50 = vmax.f32 %v1761_v41, 0.0  ;;  %v1900_v38 = vmax.f32 %v1802_v46, 0.0  ;;  %v1530_v31 = vrot.slane %v10141_v40, %v10013_v42 }
 0x815   :  { %v1899_v11 = vmax.f32 %v1763_v4, 0.0  ;;  %v1901_v14 = vmax.f32 %v1804_v2, 0.0  ;;  %v1538_v4 = vrot.slane %v10141_v40, %v10016_v45  ;;  %v1950_v6 = vld [vmem:[#allocation3 + $0x1e0] sm:$0xff]  ;;  %v1952_v43 = vld [vmem:[#allocation3 + $0x1f0] sm:$0xff] }
 0x816   :  { %v1914_v57 = vpack.c.bf16 %v1898_v50, %v1898_v50  ;;  %v1916_v58 = vpack.c.bf16 %v1900_v38, %v1900_v38  ;;  %v9408_v40 = vld [vmem:[#allocation8] sm:$0xff]  }
 0x817   :  { %v1915_v21 = vpack.c.bf16 %v1899_v11, %v1899_v11  ;;  %v1917_v22 = vpack.c.bf16 %v1901_v14, %v1901_v14 }
 0x819   :  { %v1842_v26 = vpop.f32.mrb[56].mxu1  ;;  %v1883_v3 = vpop.f32.mrb[44].mxu0 }
 0x81a   :  { %2071 = vmatmul.mubr.bf16.vlgmr.msra.gmra.mrb[64].mxu1 %v1910_v16  ;;  %2111 = vmatmul.mubr.bf16.vlgmr.msra.gmra.mrb[52].mxu0 %v1912_v18  ;;  %v1844_v29 = vpop.f32.mrb[57].mxu1  ;;  %v1885_v30 = vpop.f32.mrb[45].mxu0  ;;  %v1884_v2 = vadd.f32 %v1883_v3, %v1538_v4  ;;  %v1843_v5 = vadd.f32 %v1842_v26, %v1530_v31 }
 0x81b   :  { %2119 = vmatpush1.bf16.xpose.msra.mxu1 %v1930_v19  ;;  %2159 = vmatpush1.bf16.xpose.msra.mxu0 %v1932_v20  ;;  %v1846_v17 = vpop.f32.mrb[58].mxu1  ;;  %v1887_v1 = vpop.f32.mrb[46].mxu0  ;;  %v1845_v52 = vadd.f32 %v1844_v29, %v1534_v37  ;;  %v1886_v53 = vadd.f32 %v1885_v30, %v1542_v39  ;;  %v9409_v19 = vld [vmem:[#allocation8 + $0x8] sm:$0xff]   ;;  %v2420_v20 = vrot.slane %v9890_v15, 1 }
 0x81c   :  { %2120 = vmatprep.subr.bf16.mxu1 %v1947_v23  ;;  %2160 = vmatprep.subr.bf16.mxu0 %v1949_v25  ;;  %v1847_v32 = vpop.f32.mrb[59].mxu1  ;;  %v1888_v13 = vpop.f32.mrb[47].mxu0  ;;  %v1904_v11 = vmax.f32 %v1884_v2, 0.0  ;;  %v1902_v14 = vmax.f32 %v1843_v5, 0.0 }
 0x81d   :  { %2150 = vmatprep.mubr.bf16.mxu1 %v1915_v21  ;;  %2190 = vmatprep.mubr.bf16.mxu0 %v1917_v22  ;;  %v1903_v54 = vmax.f32 %v1845_v52, 0.0  ;;  %v1905_v55 = vmax.f32 %v1886_v53, 0.0  ;;  %v1957_v21 = vrot.slane %v10063_v24, %v9983_v34 }
 0x81e   :  { %v1920_v16 = vpack.c.bf16 %v1904_v11, %v1904_v11  ;;  %v1918_v18 = vpack.c.bf16 %v1902_v14, %v1902_v14 }
 0x81f   :  { %v1919_v59 = vpack.c.bf16 %v1903_v54, %v1903_v54  ;;  %v1921_v7 = vpack.c.bf16 %v1905_v55, %v1905_v55 }
 0x823   :  { %2121 = vmatpush1.bf16.xpose.msra.mxu1 %v1946_v47  ;;  %2161 = vmatpush1.bf16.xpose.msra.mxu0 %v1948_v48 }
 0x824   :  { %2198 = vmatprep.subr.bf16.mxu1 %v1935_v33  ;;  %2238 = vmatprep.subr.bf16.mxu0 %v1937_v51 }
 0x82a   :  { %2151 = vmatmul.mubr.bf16.vlgmr.msra.gmra.mrb[68].mxu1 %v1914_v57  ;;  %2191 = vmatmul.mubr.bf16.vlgmr.msra.gmra.mrb[56].mxu0 %v1916_v58 }
 0x82b   :  { %2199 = vmatpush1.bf16.xpose.msra.mxu1 %v1934_v60  ;;  %2239 = vmatpush1.bf16.xpose.msra.mxu0 %v1936_v61 }
 0x82c   :  { %2200 = vmatprep.subr.bf16.mxu1 %v1951_v62  ;;  %2240 = vmatprep.subr.bf16.mxu0 %v1953_v63 }
 0x82d   :  { %2230 = vmatprep.mubr.bf16.mxu1 %v1919_v59  ;;  %2270 = vmatprep.mubr.bf16.mxu0 %v1921_v7 }
 0x833   :  { %2201 = vmatpush1.bf16.xpose.msra.mxu1 %v1950_v6  ;;  %2241 = vmatpush1.bf16.xpose.msra.mxu0 %v1952_v43 }
 0x834   :  { %9124 = vmatprep.subr.bf16.mxu0 %v9652_v0 }
 0x83a   :  { %2231 = vmatmul.mubr.bf16.vlgmr.msra.gmra.mrb[72].mxu1 %v1918_v18  ;;  %2271 = vmatmul.mubr.bf16.vlgmr.msra.gmra.mrb[60].mxu0 %v1920_v16  ;;  %v10174_v16 = vld [vmem:[%s11036_s8] sm:$0xff] }
 0x83b   :  { %9128 = vmatprep.mubr.msk.bf16.mxu0 %vm9653_vm0, %v9652_v0  ;;  %2401 = vmatprep.mubr.bf16.mxu1 %v9664_v44  ;;  %v2418_v18 = vrot.slane %v10174_v16, %v9877_v8 }
 0x83c   :  { %9125 = vmatpush3.bf16.msra.mxu0 %v9408_v40 }
 0x83d   :  { %9126 = vmatprep.subr.bf16.mxu0 %v9652_v0 }
 0x840   :  { %9127 = vmatpush3.bf16.msra.mxu0 %v9409_v19 }
 0x843   :  { %9129 = vmatmul.mubr.msk.bf16.vlgmr.msra.gmra.mrb[64].mxu0 %vm251_vm3, %v2420_v20 }
 0x8dd   :  { %v1992_v22 = vpop.f32.mrb[60].mxu1  ;;  %v2032_v23 = vpop.f32.mrb[48].mxu0 }
 0x8de   :  { %v1993_v25 = vadd.f32 %v1992_v22, %v1957_v21  ;;  %v1994_v26 = vpop.f32.mrb[61].mxu1  ;;  %v2034_v3 = vpop.f32.mrb[49].mxu0 }
 0x8df   :  { %v1995_v27 = vpop.f32.mrb[62].mxu1  ;;  %v2035_v28 = vpop.f32.mrb[50].mxu0 }
 0x8e0   :  { %v2033_v29 = vadd.f32 %v2032_v23, %v1993_v25  ;;  %v1996_v30 = vpop.f32.mrb[63].mxu1  ;;  %v2036_v17 = vpop.f32.mrb[51].mxu0 }
 0x8ed   :  { %v2072_v1 = vpop.f32.mrb[64].mxu1  ;;  %v2112_v32 = vpop.f32.mrb[52].mxu0 }
 0x8ee   :  { %v2073_v13 = vadd.f32 %v2072_v1, %v2033_v29  ;;  %v2074_v15 = vpop.f32.mrb[65].mxu1  ;;  %v2114_v37 = vpop.f32.mrb[53].mxu0 }
 0x8ef   :  { %v2075_v39 = vpop.f32.mrb[66].mxu1  ;;  %v2115_v41 = vpop.f32.mrb[54].mxu0 }
 0x8f0   :  { %v2113_v46 = vadd.f32 %v2112_v32, %v2073_v13  ;;  %v2076_v47 = vpop.f32.mrb[67].mxu1  ;;  %v2116_v48 = vpop.f32.mrb[55].mxu0  ;;  %v2297_v32 = vrot.slane %v10063_v24, %v10013_v42 }
 0x8fd   :  { %v2152_v33 = vpop.f32.mrb[68].mxu1  ;;  %v2192_v51 = vpop.f32.mrb[56].mxu0 }
 0x8fe   :  { %v2153_v52 = vadd.f32 %v2152_v33, %v2113_v46  ;;  %v2154_v53 = vpop.f32.mrb[69].mxu1  ;;  %v2194_v50 = vpop.f32.mrb[57].mxu0 }
 0x8ff   :  { %v2155_v38 = vpop.f32.mrb[70].mxu1  ;;  %v2195_v54 = vpop.f32.mrb[58].mxu0  ;;  %v9415_v53 = vld [vmem:[#allocation10 + $0x14] ss:$8 sps:$4 sm:$0xff]  }
 0x900   :  { %v2193_v55 = vadd.f32 %v2192_v51, %v2153_v52  ;;  %v2156_v57 = vpop.f32.mrb[71].mxu1  ;;  %v2196_v58 = vpop.f32.mrb[59].mxu0  ;;  %v9410_v51 = vld [vmem:[#allocation10] ss:$8 sps:$4 sm:$0xff]   ;;  %v9412_v52 = vld [vmem:[#allocation10 + $0x4] ss:$8 sps:$4 sm:$0xff]  }
 0x901   :  { %2369 = vmatprep.subr.bf16.mxu1 %v9412_v52 }
 0x902   :  { %2370 = vmatpush1.bf16.msra.mxu1 %v9410_v51 }
 0x903   :  { %2371 = vmatprep.subr.bf16.mxu1 %v9415_v53  ;;  %v2528_v53 = vrot.slane %v10174_v16, %v9983_v34 }
 0x90d   :  { %v2232_v60 = vpop.f32.mrb[72].mxu1  ;;  %v2272_v61 = vpop.f32.mrb[60].mxu0 }
 0x90e   :  { %v2233_v59 = vadd.f32 %v2232_v60, %v2193_v55  ;;  %v2234_v7 = vpop.f32.mrb[73].mxu1  ;;  %v2274_v62 = vpop.f32.mrb[61].mxu0 }
 0x90f   :  { %v2235_v63 = vpop.f32.mrb[74].mxu1  ;;  %v2275_v4 = vpop.f32.mrb[62].mxu0 }
 0x910   :  { %v2273_v31 = vadd.f32 %v2272_v61, %v2233_v59  ;;  %v2236_v2 = vpop.f32.mrb[75].mxu1  ;;  %v2276_v5 = vpop.f32.mrb[63].mxu0  ;;  %v2322_v59 = vrot.slane %v9882_v9, %v9907_v35  ;;  %v2327_v63 = vrot.slane %v9882_v9, %v9910_v36 }
 0x912   :  { %v2278_v6 = vadd.f32 %v2273_v31, %v10073_v10 }
 0x914   :  { %v2279_v43 = vsel %vm227_vm2, %v2278_v6, 0.0  ;;  %v2283_v11 = vmul.f32 %v2278_v6, %v2278_v6 }
 0x915   :  { %2280 = vadd.xlane.f32.xlu0 %v2279_v43 }
 0x916   :  { %v2284_v14 = vsel %vm227_vm2, %v2283_v11, 0.0  ;;  %v2470_v40 = vpop.f32.mrb[64].mxu0 }
 0x917   :  { %v2471_v19 = vadd.f32 %v2470_v40, %v2418_v18  ;;  %v9130_v20 = vpop.f32.mrb[65].mxu0 }
 0x918   :  { %v2473_v21 = vpop.f32.mrb[66].mxu0 }
 0x919   :  { %2285 = vadd.xlane.f32.xlu0 %v2284_v14  ;;  %v2477_v10 = vrot.slane %v2471_v19, 6  ;;  %v9131_v22 = vpop.f32.mrb[67].mxu0  ;;  %v2333_v21 = vld [vmem:[%s11035_s7] sm:$0x3] }
 0x91a   :  { %v2499_v22 = vrot.slane %v10174_v16, %v9907_v35 }
 0x91b   :  { %v10179_v23 = vadd.f32 %v2477_v10, %v9886_v12  ;;  %v2302_v12 = vrot.slane %v10063_v24, %v9992_v56  ;;  %v9413_v24 = vld [vmem:[#allocation10 + $0x10] ss:$8 sps:$4 sm:$0xff]  }
 0x91c   :  { %2372 = vmatpush1.bf16.msra.mxu1 %v9413_v24 }
 0x91d   :  { %v2481_v25 = vsel %vm2480_vm4, %v10179_v23, 0.0  ;;  %v2485_v47 = vmul.f32 %v10179_v23, %v10179_v23 }
 0x91e   :  { %2482 = vadd.xlane.f32.xlu0 %v2481_v25  ;;  %v2339_v25 = vrot.slane %v2333_v21, %v9877_v8 }
 0x91f   :  { %v2486_v33 = vsel %vm2480_vm4, %v2485_v47, 0.0 }
 0x9a2   :  { %v2281_v26 = vpop.xlane.xlu0 %2280 }
 0x9a3   :  { %v2282_v3 = vmul.f32 0.03125, %v2281_v26  ;;  %v2343_v26 = vrot.slane %v2333_v21, %v9907_v35 }
 0x9a5   :  { %v2288_v28 = vmul.f32 %v2282_v3, %v2282_v3  ;;  %v2290_v1 = vsub.f32 %v2278_v6, %v2282_v3 }
 0x9a6   :  { %v2286_v27 = vpop.xlane.xlu0 %2285 }
 0x9a7   :  { %v2287_v29 = vmul.f32 0.03125, %v2286_v27  ;;  %v2504_v27 = vrot.slane %v10174_v16, %v9910_v36 }
 0x9a9   :  { %v2289_v30 = vsub.f32 %v2287_v29, %v2288_v28 }
 0x9ab   :  { %v2291_v17 = vadd.f32 1e-05, %v2289_v30  ;;  %v2483_v5 = vpop.xlane.xlu0 %2482 }
 0x9ac   :  { %v2484_v6 = vmul.f32 0.03125, %v2483_v5 }
 0x9ad   :  { %9416 = vrsqrt.f32 %v2291_v17 }
 0x9ae   :  { %v2490_v11 = vmul.f32 %v2484_v6, %v2484_v6  ;;  %v2492_v19 = vsub.f32 %v10179_v23, %v2484_v6 }
 0x9b7   :  { %v9417_v13 = vpop.eup %9416 }
 0x9b8   :  { %v2293_v15 = vmul.f32 %v9417_v13, %v2290_v1 }
 0x9ba   :  { %v2298_v37 = vmul.f32 %v2297_v32, %v2293_v15 }
 0x9bc   :  { %v2303_v39 = vadd.f32 %v2302_v12, %v2298_v37 }
 0x9be   :  { %v2304_v41 = vsel %vm227_vm2, %v2303_v39, 0.0  ;;  %v2308_v46 = vmul.f32 %v2303_v39, %v2303_v39 }
 0x9bf   :  { %2305 = vadd.xlane.f32.xlu1 %v2304_v41 }
 0x9c0   :  { %v2309_v48 = vsel %vm227_vm2, %v2308_v46, 0.0 }
 0x9c3   :  { %2310 = vadd.xlane.f32.xlu1 %v2309_v48 }
 0x9c7   :  { %2487 = vadd.xlane.f32.xlu1 %v2486_v33 }
 0xa4c   :  { %v2306_v50 = vpop.xlane.xlu1 %2305 }
 0xa4d   :  { %v2307_v38 = vmul.f32 0.03125, %v2306_v50 }
 0xa4f   :  { %v2313_v55 = vmul.f32 %v2307_v38, %v2307_v38  ;;  %v2315_v61 = vsub.f32 %v2303_v39, %v2307_v38  ;;  %v2533_v38 = vrot.slane %v10174_v16, %v10013_v42 }
 0xa50   :  { %v2311_v54 = vpop.xlane.xlu1 %2310 }
 0xa51   :  { %v2312_v57 = vmul.f32 0.03125, %v2311_v54 }
 0xa53   :  { %v2314_v58 = vsub.f32 %v2312_v57, %v2313_v55 }
 0xa54   :  { %v2488_v43 = vpop.xlane.xlu1 %2487 }
 0xa55   :  { %v2316_v60 = vadd.f32 1e-05, %v2314_v58  ;;  %v2489_v14 = vmul.f32 0.03125, %v2488_v43 }
 0xa57   :  { %9418 = vrsqrt.f32 %v2316_v60  ;;  %v2491_v18 = vsub.f32 %v2489_v14, %v2490_v11 }
 0xa59   :  { %v2493_v40 = vadd.f32 1e-05, %v2491_v18 }
 0xa5b   :  { %9420 = vrsqrt.f32 %v2493_v40 }
 0xa61   :  { %v9419_v7 = vpop.eup %9418 }
 0xa62   :  { %v2318_v62 = vmul.f32 %v9419_v7, %v2315_v61 }
 0xa64   :  { %v2323_v4 = vmul.f32 %v2322_v59, %v2318_v62 }
 0xa65   :  { %v9421_v20 = vpop.eup %9420 }
 0xa66   :  { %v2328_v31 = vadd.f32 %v2327_v63, %v2323_v4  ;;  %v2495_v10 = vmul.f32 %v9421_v20, %v2492_v19 }
 0xa68   :  { %v2334_v2 = vpack.c.bf16 %v2328_v31, %v2328_v31  ;;  %v2500_v3 = vmul.f32 %v2499_v22, %v2495_v10 }
 0xa6a   :  { %8974 = vmatmul.mubr.msk.bf16.vlgmr.msra.gmra.mrb[76].mxu1 %vm251_vm3, %v2334_v2  ;;  %v2505_v1 = vadd.f32 %v2504_v27, %v2500_v3 }
 0xb3d   :  { %v2403_v28 = vpop.f32.mrb[76].mxu1 }
 0xb3e   :  { %v2404_v29 = vadd.f32 %v2403_v28, %v2339_v25  ;;  %v2405_v23 = vpop.f32.mrb[77].mxu1 }
 0xb3f   :  { %v10207_v30 = vadd.f32 %v2405_v23, %v2343_v26  ;;  %v2407_v17 = vpop.f32.mrb[78].mxu1 }
 0xb40   :  { %v10209_v32 = vrot.slane %v2404_v29, 6  ;;  %v2408_v13 = vpop.f32.mrb[79].mxu1 }
 0xb42   :  { %v2509_v15 = vadd.f32 %v10209_v32, %v2505_v1 }
 0xb44   :  { %v2510_v12 = vsel %vm2480_vm4, %v2509_v15, 0.0  ;;  %v2514_v37 = vmul.f32 %v2509_v15, %v2509_v15 }
 0xb45   :  { %2511 = vadd.xlane.f32.xlu0 %v2510_v12 }
 0xb46   :  { %v2515_v39 = vsel %vm2480_vm4, %v2514_v37, 0.0 }
 0xb47   :  { %2516 = vadd.xlane.f32.xlu1 %v2515_v39 }
 0xbd2   :  { %v2512_v41 = vpop.xlane.xlu0 %2511 }
 0xbd3   :  { %v2513_v46 = vmul.f32 0.03125, %v2512_v41 }
 0xbd4   :  { %v2517_v47 = vpop.xlane.xlu1 %2516 }
 0xbd5   :  { %v2519_v48 = vmul.f32 %v2513_v46, %v2513_v46  ;;  %v2518_v33 = vmul.f32 0.03125, %v2517_v47  ;;  %v2521_v24 = vsub.f32 %v2509_v15, %v2513_v46 }
 0xbd7   :  { %v2520_v51 = vsub.f32 %v2518_v33, %v2519_v48 }
 0xbd9   :  { %v2522_v52 = vadd.f32 1e-05, %v2520_v51 }
 0xbdb   :  { %9422 = vrsqrt.f32 %v2522_v52 }
 0xbe5   :  { %v9423_v50 = vpop.eup %9422 }
 0xbe6   :  { %v2524_v54 = vmul.f32 %v9423_v50, %v2521_v24 }
 0xbe8   :  { %v2529_v55 = vmul.f32 %v2528_v53, %v2524_v54 }
 0xbea   :  { %v10218_v57 = vadd.f32 %v2533_v38, %v2529_v55 }
 0xbeb   :  { %9616 = dma.done.wait [#allocation4], 4096 }
 0xbec   :  { %9617 = vsyncadd [#allocation4], 4294963200 }
 0xbed   :  { %9618 = dma.done.wait [#allocation4 + $0x2], 4096 }
 0xbee   :  { %9619 = vsyncadd [#allocation4 + $0x2], 4294963200  ;;  %2769 = vmatprep.mubr.bf16.mxu1 %v9664_v44  ;;  %2810 = vmatprep.mubr.bf16.mxu0 %v9664_v44  ;;  %2555 = sst [smem:[#allocation29]] %s9655_s21  ;;  %s2539_s22 = scalar_lea.hbm %s11039_s11, 12288  ;;  %v2617_v59 = vpack.c.bf16 %v10218_v57, %v10218_v57 }
 0xbef   :  { %2557 = sst [smem:[#allocation29 + $0x1]] %s9655_s21  ;;  %s9673_s29 = smov [#allocation28]  }
 0xbf0   :  { %2559 = sst [smem:[#allocation29 + $0x2]] %s9656_s5  ;;  %s2574_s1 = scalar_lea.hbm %s11040_s12, 12288  ;;  %v10254_v5 = vrot.slane %v2617_v59, 1 }
 0xbf1   :  { %2561 = sst [smem:[#allocation29 + $0x3]] %s9646_s25  ;;  %s9674_s0 = smov [#allocation30]  }
 0xbf2   :  { %2563 = sst [smem:[#allocation29 + $0x4]] %s9649_s3  ;;  %s9675_s2 = smov 96  }
 0xbf3   :  { %2565 = sst [smem:[#allocation29 + $0x5]] %s9657_s23 }
 0xbf4   :  { %2567 = sst [smem:[#allocation29 + $0x6]] %s9658_s27 }
 0xbf5   :  { %2569 = sst [smem:[#allocation29 + $0x7]] %s9646_s25 }
 0xbf6   :  { %2571 = sst [smem:[#allocation29 + $0x8]] %s9647_s26 }
 0xbf7   :  { %2573 = dma.general %s2539_s22, 4096, %s9928_s20, %s9666_s15, %s9673_s29, [#allocation29], %s9840_s30, 0  }
 0xbf8   :  { %2590 = sst [smem:[#allocation31]] %s9655_s21 }
 0xbf9   :  { %2592 = sst [smem:[#allocation31 + $0x1]] %s9655_s21 }
 0xbfa   :  { %2594 = sst [smem:[#allocation31 + $0x2]] %s9656_s5 }
 0xbfb   :  { %2596 = sst [smem:[#allocation31 + $0x3]] %s9646_s25 }
 0xbfc   :  { %2598 = sst [smem:[#allocation31 + $0x4]] %s9649_s3 }
 0xbfd   :  { %2600 = sst [smem:[#allocation31 + $0x5]] %s9657_s23 }
 0xbfe   :  { %2602 = sst [smem:[#allocation31 + $0x6]] %s9658_s27 }
 0xbff   :  { %2604 = sst [smem:[#allocation31 + $0x7]] %s9646_s25 }
 0xc00   :  { %2606 = sst [smem:[#allocation31 + $0x8]] %s9647_s26 }
 0xc01   :  { %2608 = dma.general %s2574_s1, 4096, %s9945_s18, %s9669_s16, %s9674_s0, [#allocation31], %s9840_s30, 0  }
 0xc02   :  { %v2619_v58 = vld [vmem:[#allocation2 + $0x8] sm:$0xff]  ;;  %v2618_v60 = vld [vmem:[#allocation2] sm:$0xff]  ;;  %v2621_v7 = vld [vmem:[#allocation2 + $0x18] sm:$0xff] }
 0xc03   :  { %v2635_v61 = vld [vmem:[#allocation2 + $0x88] sm:$0xff]  ;;  %2737 = vmatprep.subr.bf16.mxu1 %v2619_v58  ;;  %v2620_v62 = vld [vmem:[#allocation2 + $0x10] sm:$0xff]  ;;  %2778 = vmatprep.subr.bf16.mxu0 %v2621_v7  ;;  %v2637_v63 = vld [vmem:[#allocation2 + $0x98] sm:$0xff] }
 0xc04   :  { %2738 = vmatpush1.bf16.msra.mxu1 %v2618_v60  ;;  %v2634_v4 = vld [vmem:[#allocation2 + $0x80] sm:$0xff]  ;;  %2779 = vmatpush1.bf16.msra.mxu0 %v2620_v62  ;;  %v2636_v31 = vld [vmem:[#allocation2 + $0x90] sm:$0xff]  ;;  %v2623_v2 = vld [vmem:[#allocation2 + $0x28] sm:$0xff] }
 0xc05   :  { %2739 = vmatprep.subr.bf16.mxu1 %v2635_v61  ;;  %2780 = vmatprep.subr.bf16.mxu0 %v2637_v63  ;;  %v2625_v6 = vld [vmem:[#allocation2 + $0x38] sm:$0xff]  ;;  %v2622_v43 = vld [vmem:[#allocation2 + $0x20] sm:$0xff]  ;;  %v2639_v11 = vld [vmem:[#allocation2 + $0xa8] sm:$0xff] }
 0xc06   :  { %v2624_v14 = vld [vmem:[#allocation2 + $0x30] sm:$0xff]  ;;  %v2641_v18 = vld [vmem:[#allocation2 + $0xb8] sm:$0xff]  ;;  %v2638_v40 = vld [vmem:[#allocation2 + $0xa0] sm:$0xff] }
 0xc07   :  { %v2627_v19 = vld [vmem:[#allocation2 + $0x48] sm:$0xff]  ;;  %v2640_v20 = vld [vmem:[#allocation2 + $0xb0] sm:$0xff]  ;;  %v2629_v21 = vld [vmem:[#allocation2 + $0x58] sm:$0xff] }
 0xc08   :  { %2740 = vmatpush1.bf16.msra.mxu1 %v2634_v4  ;;  %2781 = vmatpush1.bf16.msra.mxu0 %v2636_v31  ;;  %v2626_v10 = vld [vmem:[#allocation2 + $0x40] sm:$0xff]  ;;  %v2643_v22 = vld [vmem:[#allocation2 + $0xc8] sm:$0xff]  ;;  %v2628_v25 = vld [vmem:[#allocation2 + $0x50] sm:$0xff] }
 0xc09   :  { %2819 = vmatprep.subr.bf16.mxu1 %v2623_v2  ;;  %2860 = vmatprep.subr.bf16.mxu0 %v2625_v6  ;;  %v2645_v26 = vld [vmem:[#allocation2 + $0xd8] sm:$0xff]  ;;  %v2642_v3 = vld [vmem:[#allocation2 + $0xc0] sm:$0xff]  ;;  %v2631_v27 = vld [vmem:[#allocation2 + $0x68] sm:$0xff] }
 0xc0a   :  { %v2644_v28 = vld [vmem:[#allocation2 + $0xd0] sm:$0xff]  ;;  %v2633_v29 = vld [vmem:[#allocation2 + $0x78] sm:$0xff]  ;;  %v2630_v23 = vld [vmem:[#allocation2 + $0x60] sm:$0xff] }
 0xc0b   :  { %8982 = vmatmul.mubr.msk.bf16.vlgmr.msra.gmra.mrb[80].mxu1 %vm251_vm3, %v10254_v5  ;;  %8983 = vmatmul.mubr.msk.bf16.vlgmr.msra.gmra.mrb[68].mxu0 %vm251_vm3, %v10254_v5  ;;  %v2647_v17 = vld [vmem:[#allocation2 + $0xe8] sm:$0xff]  ;;  %v2632_v1 = vld [vmem:[#allocation2 + $0x70] sm:$0xff]  ;;  %v2649_v13 = vld [vmem:[#allocation2 + $0xf8] sm:$0xff] }
 0xc0c   :  { %2820 = vmatpush1.bf16.msra.mxu1 %v2622_v43  ;;  %2851 = vmatprep.mubr.bf16.mxu1 %v9664_v44  ;;  %v2646_v15 = vld [vmem:[#allocation2 + $0xe0] sm:$0xff]  ;;  %v3098_v12 = vld [vmem:[#allocation3 + $0x8] sm:$0xff]  ;;  %v2648_v37 = vld [vmem:[#allocation2 + $0xf0] sm:$0xff] }
 0xc0d   :  { %2821 = vmatprep.subr.bf16.mxu1 %v2639_v11  ;;  %2861 = vmatpush1.bf16.msra.mxu0 %v2624_v14  ;;  %v3097_v39 = vld [vmem:[#allocation3] sm:$0xff]  ;;  %v3114_v41 = vld [vmem:[#allocation3 + $0x88] sm:$0xff]  ;;  %v3100_v47 = vld [vmem:[#allocation3 + $0x18] sm:$0xff] }
 0xc0e   :  { %2892 = vmatprep.mubr.bf16.mxu0 %v9664_v44  ;;  %2862 = vmatprep.subr.bf16.mxu0 %v2641_v18  ;;  %v3113_v46 = vld [vmem:[#allocation3 + $0x80] sm:$0xff]  ;;  %v3099_v43 = vld [vmem:[#allocation3 + $0x10] sm:$0xff]  ;;  %v3116_v14 = vld [vmem:[#allocation3 + $0x98] sm:$0xff] }
 0xc0f   :  { %v2610_v48 = vld [vmem:[#allocation11 + $0x2] ss:$8 sm:$0xf] }
 0xc10   :  { %2822 = vmatpush1.bf16.msra.mxu1 %v2638_v40  ;;  %v2611_v33 = vld [vmem:[#allocation11 + $0x2] ss:$8 sm:$0xf0] }
 0xc11   :  { %2901 = vmatprep.subr.bf16.mxu1 %v2627_v19  ;;  %2863 = vmatpush1.bf16.msra.mxu0 %v2640_v20  ;;  %v10281_v51 = vor.u32 %v2611_v33, %v2610_v48 }
 0xc12   :  { %2942 = vmatprep.subr.bf16.mxu0 %v2629_v21 }
 0xc13   :  { %8984 = vmatmul.mubr.msk.bf16.vlgmr.msra.gmra.mrb[84].mxu1 %vm251_vm3, %v10254_v5  ;;  %v2655_v52 = vrot.slane %v10281_v51, %v9877_v8  ;;  %v2659_v53 = vrot.slane %v10281_v51, %v9907_v35  ;;  %v2667_v24 = vrot.slane %v10281_v51, %v9983_v34  ;;  %v2663_v40 = vrot.slane %v10281_v51, %v9910_v36 }
 0xc14   :  { %2902 = vmatpush1.bf16.msra.mxu1 %v2626_v10  ;;  %2933 = vmatprep.mubr.bf16.mxu1 %v9664_v44  ;;  %v2675_v20 = vrot.slane %v10281_v51, %v9992_v56 }
 0xc15   :  { %8985 = vmatmul.mubr.msk.bf16.vlgmr.msra.gmra.mrb[72].mxu0 %vm251_vm3, %v10254_v5  ;;  %2903 = vmatprep.subr.bf16.mxu1 %v2643_v22 }
 0xc16   :  { %2943 = vmatpush1.bf16.msra.mxu0 %v2628_v25  ;;  %2974 = vmatprep.mubr.bf16.mxu0 %v9664_v44 }
 0xc17   :  { %2944 = vmatprep.subr.bf16.mxu0 %v2645_v26 }
 0xc18   :  { %2904 = vmatpush1.bf16.msra.mxu1 %v2642_v3 }
 0xc19   :  { %2983 = vmatprep.subr.bf16.mxu1 %v2631_v27 }
 0xc1a   :  { %2945 = vmatpush1.bf16.msra.mxu0 %v2644_v28 }
 0xc1b   :  { %8986 = vmatmul.mubr.msk.bf16.vlgmr.msra.gmra.mrb[88].mxu1 %vm251_vm3, %v10254_v5  ;;  %3024 = vmatprep.subr.bf16.mxu0 %v2633_v29  ;;  %v3115_v29 = vld [vmem:[#allocation3 + $0x90] sm:$0xff] }
 0xc1c   :  { %2984 = vmatpush1.bf16.msra.mxu1 %v2630_v23  ;;  %3015 = vmatprep.mubr.bf16.mxu1 %v9664_v44  ;;  %v3102_v23 = vld [vmem:[#allocation3 + $0x28] sm:$0xff] }
 0xc1d   :  { %8987 = vmatmul.mubr.msk.bf16.vlgmr.msra.gmra.mrb[76].mxu0 %vm251_vm3, %v10254_v5  ;;  %2985 = vmatprep.subr.bf16.mxu1 %v2647_v17 }
 0xc1e   :  { %3025 = vmatpush1.bf16.msra.mxu0 %v2632_v1  ;;  %3056 = vmatprep.mubr.bf16.mxu0 %v9664_v44 }
 0xc1f   :  { %3026 = vmatprep.subr.bf16.mxu0 %v2649_v13  ;;  %v2614_v13 = vld [vmem:[#allocation11 + $0x42] ss:$8 sm:$0xf] }
 0xc20   :  { %2986 = vmatpush1.bf16.msra.mxu1 %v2646_v15 }
 0xc21   :  { %3133 = vmatprep.subr.bf16.mxu1 %v3098_v12 }
 0xc22   :  { %3027 = vmatpush1.bf16.msra.mxu0 %v2648_v37  ;;  %v2615_v37 = vld [vmem:[#allocation11 + $0x42] ss:$8 sm:$0xf0] }
 0xc23   :  { %8988 = vmatmul.mubr.msk.bf16.vlgmr.msra.gmra.mrb[92].mxu1 %vm251_vm3, %v10254_v5  ;;  %9132 = vmatprep.subr.bf16.mxu0 %v9652_v0 }
 0xc25   :  { %8989 = vmatmul.mubr.msk.bf16.vlgmr.msra.gmra.mrb[80].mxu0 %vm251_vm3, %v10254_v5 }
 0xc26   :  { %9136 = vmatprep.mubr.msk.bf16.mxu0 %vm9653_vm0, %v9652_v0 }
 0xc29   :  { %3134 = vmatpush1.bf16.xpose.msra.mxu1 %v3097_v39 }
 0xc2a   :  { %3135 = vmatprep.subr.bf16.mxu1 %v3114_v41 }
 0xc31   :  { %3136 = vmatpush1.bf16.xpose.msra.mxu1 %v3113_v46 }
 0xc32   :  { %3173 = vmatprep.subr.bf16.mxu1 %v3100_v47 }
 0xcde   :  { %v2771_v50 = vpop.f32.mrb[80].mxu1  ;;  %v2812_v55 = vpop.f32.mrb[68].mxu0 }
 0xcdf   :  { %v2772_v38 = vadd.f32 %v2771_v50, %v2655_v52  ;;  %v2773_v54 = vpop.f32.mrb[81].mxu1  ;;  %v2814_v61 = vpop.f32.mrb[69].mxu0  ;;  %v2813_v3 = vadd.f32 %v2812_v55, %v2663_v40  ;;  %v10299_v52 = vor.u32 %v2615_v37, %v2614_v13  ;;  %v3101_v50 = vld [vmem:[#allocation3 + $0x20] sm:$0xff]  ;;  %v3122_v37 = vld [vmem:[#allocation3 + $0xc8] sm:$0xff] }
 0xce0   :  { %v2774_v58 = vadd.f32 %v2773_v54, %v2659_v53  ;;  %v2775_v60 = vpop.f32.mrb[82].mxu1  ;;  %v2815_v62 = vadd.f32 %v2814_v61, %v2667_v24  ;;  %v2816_v63 = vpop.f32.mrb[70].mxu0  ;;  %v3118_v54 = vld [vmem:[#allocation3 + $0xa8] sm:$0xff]  ;;  %v2683_v61 = vrot.slane %v10281_v51, %v10019_v49 }
 0xce1   :  { %v3065_v59 = vmax.f32 %v2772_v38, 0.0  ;;  %v2776_v7 = vpop.f32.mrb[83].mxu1  ;;  %v2817_v31 = vpop.f32.mrb[71].mxu0  ;;  %v3067_v1 = vmax.f32 %v2813_v3, 0.0  ;;  %v2711_v38 = vrot.slane %v10299_v52, %v10016_v45 }
 0xce2   :  { %v3066_v4 = vmax.f32 %v2774_v58, 0.0  ;;  %v3068_v2 = vmax.f32 %v2815_v62, 0.0  ;;  %v2671_v58 = vrot.slane %v10281_v51, %v10013_v42 }
 0xce3   :  { %v3081_v6 = vpack.c.bf16 %v3065_v59, %v3065_v59  ;;  %v3083_v33 = vpack.c.bf16 %v3067_v1, %v3067_v1 }
 0xce4   :  { %v3082_v5 = vpack.c.bf16 %v3066_v4, %v3066_v4  ;;  %v3084_v11 = vpack.c.bf16 %v3068_v2, %v3068_v2 }
 0xce6   :  { %3165 = vmatprep.mubr.bf16.mxu1 %v3082_v5  ;;  %v2853_v18 = vpop.f32.mrb[84].mxu1 }
 0xce7   :  { %3166 = vmatmul.mubr.bf16.vlgmr.msra.gmra.mrb[96].mxu1 %v3081_v6  ;;  %v2855_v19 = vpop.f32.mrb[85].mxu1  ;;  %v2854_v2 = vadd.f32 %v2853_v18, %v2671_v58  ;;  %v2691_v18 = vrot.slane %v10299_v52, %v9907_v35  ;;  %v2695_v58 = vrot.slane %v10299_v52, %v9910_v36 }
 0xce8   :  { %3174 = vmatpush1.bf16.xpose.msra.mxu1 %v3099_v43  ;;  %3205 = vmatprep.mubr.bf16.mxu1 %v3084_v11  ;;  %v2857_v21 = vpop.f32.mrb[86].mxu1  ;;  %v10293_v10 = vpop.f32.mrb[72].mxu0  ;;  %v2856_v28 = vadd.f32 %v2855_v19, %v2675_v20  ;;  %v3117_v43 = vld [vmem:[#allocation3 + $0xa0] sm:$0xff]  ;;  %v3104_v11 = vld [vmem:[#allocation3 + $0x38] sm:$0xff] }
 0xce9   :  { %3175 = vmatprep.subr.bf16.mxu1 %v3116_v14  ;;  %v2858_v22 = vpop.f32.mrb[87].mxu1  ;;  %v2896_v25 = vpop.f32.mrb[73].mxu0  ;;  %v3069_v14 = vmax.f32 %v2854_v2, 0.0  ;;  %v3103_v21 = vld [vmem:[#allocation3 + $0x30] sm:$0xff] }
 0xcea   :  { %v2898_v26 = vpop.f32.mrb[74].mxu0  ;;  %v3070_v12 = vmax.f32 %v2856_v28, 0.0  ;;  %v2897_v6 = vadd.f32 %v2896_v25, %v2683_v61  ;;  %v3120_v22 = vld [vmem:[#allocation3 + $0xb8] sm:$0xff]  ;;  %v3106_v28 = vld [vmem:[#allocation3 + $0x48] sm:$0xff] }
 0xceb   :  { %v2899_v27 = vpop.f32.mrb[75].mxu0  ;;  %v3085_v19 = vpack.c.bf16 %v3069_v14, %v3069_v14  ;;  %v2679_v26 = vrot.slane %v10281_v51, %v10016_v45  ;;  %v2687_v51 = vrot.slane %v10299_v52, %v9877_v8 }
 0xcec   :  { %v3086_v24 = vpack.c.bf16 %v3070_v12, %v3070_v12  ;;  %v3072_v40 = vmax.f32 %v2897_v6, 0.0  ;;  %v3119_v27 = vld [vmem:[#allocation3 + $0xb0] sm:$0xff]  ;;  %v3105_v12 = vld [vmem:[#allocation3 + $0x40] sm:$0xff] }
 0xced   :  { %v2895_v25 = vadd.f32 %v10293_v10, %v2679_v26  ;;  %v2699_v10 = vrot.slane %v10299_v52, %v9983_v34  ;;  %v3109_v6 = vld [vmem:[#allocation3 + $0x60] sm:$0xff] }
 0xcee   :  { %v10295_v17 = vpop.f32.mrb[88].mxu1  ;;  %v3088_v20 = vpack.c.bf16 %v3072_v40, %v3072_v40  ;;  %v3125_v40 = vld [vmem:[#allocation3 + $0xe0] sm:$0xff] }
 0xcef   :  { %v2937_v15 = vpop.f32.mrb[89].mxu1 }
 0xcf0   :  { %3176 = vmatpush1.bf16.xpose.msra.mxu1 %v3115_v29  ;;  %v2939_v39 = vpop.f32.mrb[90].mxu1  ;;  %v10297_v41 = vpop.f32.mrb[76].mxu0  ;;  %v2938_v3 = vadd.f32 %v2937_v15, %v2691_v18  ;;  %v3071_v29 = vmax.f32 %v2895_v25, 0.0  ;;  %v2936_v15 = vadd.f32 %v10295_v17, %v2687_v51  ;;  %v2707_v17 = vrot.slane %v10299_v52, %v9992_v56  ;;  %v3111_v18 = vld [vmem:[#allocation3 + $0x70] sm:$0xff]  ;;  %v3128_v25 = vld [vmem:[#allocation3 + $0xf8] sm:$0xff] }
 0xcf1   :  { %3213 = vmatprep.subr.bf16.mxu1 %v3102_v23  ;;  %v2940_v46 = vpop.f32.mrb[91].mxu1  ;;  %v2978_v47 = vpop.f32.mrb[77].mxu0 }
 0xcf2   :  { %v2980_v48 = vpop.f32.mrb[78].mxu0  ;;  %v3074_v23 = vmax.f32 %v2938_v3, 0.0  ;;  %v3087_v1 = vpack.c.bf16 %v3071_v29, %v3071_v29  ;;  %v2979_v39 = vadd.f32 %v2978_v47, %v2699_v10  ;;  %v3121_v46 = vld [vmem:[#allocation3 + $0xc0] sm:$0xff]  ;;  %v2977_v47 = vadd.f32 %v10297_v41, %v2695_v58 }
 0xcf3   :  { %v2981_v53 = vpop.f32.mrb[79].mxu0  ;;  %v3108_v48 = vld [vmem:[#allocation3 + $0x58] sm:$0xff]  ;;  %v2715_v41 = vrot.slane %v10299_v52, %v10019_v49 }
 0xcf4   :  { %v3090_v13 = vpack.c.bf16 %v3074_v23, %v3074_v23  ;;  %v3076_v53 = vmax.f32 %v2979_v39, 0.0 }
 0xcf6   :  { %v10303_v55 = vpop.f32.mrb[92].mxu1 }
 0xcf7   :  { %3206 = vmatmul.mubr.bf16.vlgmr.msra.gmra.mrb[96].mxu1 %v3083_v33  ;;  %v10307_v60 = vpop.f32.mrb[93].mxu1  ;;  %v3073_v33 = vmax.f32 %v2936_v15, 0.0  ;;  %v9425_v15 = vld [vmem:[#allocation8 + $0x18] sm:$0xff]  }
 0xcf8   :  { %3214 = vmatpush1.bf16.xpose.msra.mxu1 %v3101_v50  ;;  %3245 = vmatprep.mubr.bf16.mxu1 %v3086_v24  ;;  %v3021_v59 = vpop.f32.mrb[94].mxu1  ;;  %v3058_v7 = vpop.f32.mrb[80].mxu0  ;;  %v3092_v50 = vpack.c.bf16 %v3076_v53, %v3076_v53  ;;  %v3020_v61 = vadd.f32 %v10307_v60, %v2707_v17  ;;  %v3480_v17 = vrot.slane %v10174_v16, %v10019_v49 }
 0xcf9   :  { %3215 = vmatprep.subr.bf16.mxu1 %v3118_v54  ;;  %v3022_v62 = vpop.f32.mrb[95].mxu1  ;;  %v10311_v63 = vadd.f32 %v3058_v7, %v2711_v38  ;;  %v10313_v4 = vpop.f32.mrb[81].mxu0  ;;  %v3089_v24 = vpack.c.bf16 %v3073_v33, %v3073_v33  ;;  %v3107_v38 = vld [vmem:[#allocation3 + $0x50] sm:$0xff]  ;;  %v3124_v54 = vld [vmem:[#allocation3 + $0xd8] sm:$0xff]  ;;  %v3110_v7 = vld [vmem:[#allocation3 + $0x68] sm:$0xff] }
 0xcfa   :  { %v3062_v31 = vpop.f32.mrb[82].mxu0  ;;  %v3123_v59 = vld [vmem:[#allocation3 + $0xd0] sm:$0xff]  ;;  %v3075_v62 = vmax.f32 %v2977_v47, 0.0  ;;  %v3061_v14 = vadd.f32 %v10313_v4, %v2715_v41  ;;  %v3132_v4 = vrot.slane %v10174_v16, %v9992_v56 }
 0xcfb   :  { %v3063_v5 = vpop.f32.mrb[83].mxu0  ;;  %v3078_v31 = vmax.f32 %v3020_v61, 0.0 }
 0xcfc   :  { %v3091_v2 = vpack.c.bf16 %v3075_v62, %v3075_v62  ;;  %v10354_v62 = vld [vmem:[%s11036_s8 + $0x8] sm:$0xff] }
 0xcfd   :  { %v3094_v5 = vpack.c.bf16 %v3078_v31, %v3078_v31  ;;  %v3493_v31 = vrot.slane %v10354_v62, %v9877_v8 }
 0xd00   :  { %3216 = vmatpush1.bf16.xpose.msra.mxu1 %v3117_v43  ;;  %v3126_v43 = vld [vmem:[#allocation3 + $0xe8] sm:$0xff] }
 0xd01   :  { %3253 = vmatprep.subr.bf16.mxu1 %v3104_v11  ;;  %v2703_v11 = vrot.slane %v10299_v52, %v10013_v42  ;;  %v3127_v52 = vld [vmem:[#allocation3 + $0xf0] sm:$0xff] }
 0xd03   :  { %v3018_v60 = vadd.f32 %v10303_v55, %v2703_v11  ;;  %v3079_v55 = vmax.f32 %v10311_v63, 0.0  ;;  %v9424_v63 = vld [vmem:[#allocation8 + $0x10] sm:$0xff]  }
 0xd04   :  { %9133 = vmatpush3.bf16.msra.mxu0 %v9424_v63 }
 0xd05   :  { %v3095_v3 = vpack.c.bf16 %v3079_v55, %v3079_v55  ;;  %9134 = vmatprep.subr.bf16.mxu0 %v9652_v0  ;;  %v3573_v55 = vrot.slane %v10354_v62, %v9907_v35 }
 0xd07   :  { %3246 = vmatmul.mubr.bf16.vlgmr.msra.gmra.mrb[96].mxu1 %v3085_v19  ;;  %v3112_v19 = vld [vmem:[#allocation3 + $0x78] sm:$0xff] }
 0xd08   :  { %3254 = vmatpush1.bf16.xpose.msra.mxu1 %v3103_v21  ;;  %3285 = vmatprep.mubr.bf16.mxu1 %v3088_v20  ;;  %v3077_v20 = vmax.f32 %v3018_v60, 0.0  ;;  %v3080_v21 = vmax.f32 %v3061_v14, 0.0 }
 0xd09   :  { %3255 = vmatprep.subr.bf16.mxu1 %v3120_v22  ;;  %9135 = vmatpush3.bf16.msra.mxu0 %v9425_v15 }
 0xd0a   :  { %v3093_v22 = vpack.c.bf16 %v3077_v20, %v3077_v20  ;;  %v3096_v26 = vpack.c.bf16 %v3080_v21, %v3080_v21 }
 0xd10   :  { %3256 = vmatpush1.bf16.xpose.msra.mxu1 %v3119_v27 }
 0xd11   :  { %3293 = vmatprep.subr.bf16.mxu1 %v3106_v28 }
 0xd17   :  { %3286 = vmatmul.mubr.bf16.vlgmr.msra.gmra.mrb[96].mxu1 %v3087_v1 }
 0xd18   :  { %3294 = vmatpush1.bf16.xpose.msra.mxu1 %v3105_v12  ;;  %3325 = vmatprep.mubr.bf16.mxu1 %v3090_v13 }
 0xd19   :  { %3295 = vmatprep.subr.bf16.mxu1 %v3122_v37 }
 0xd20   :  { %3296 = vmatpush1.bf16.xpose.msra.mxu1 %v3121_v46 }
 0xd21   :  { %3333 = vmatprep.subr.bf16.mxu1 %v3108_v48 }
 0xd27   :  { %3326 = vmatmul.mubr.bf16.vlgmr.msra.gmra.mrb[96].mxu1 %v3089_v24 }
 0xd28   :  { %3334 = vmatpush1.bf16.xpose.msra.mxu1 %v3107_v38  ;;  %3365 = vmatprep.mubr.bf16.mxu1 %v3092_v50  ;;  %v3475_v38 = vrot.slane %v10174_v16, %v10016_v45 }
 0xd29   :  { %3335 = vmatprep.subr.bf16.mxu1 %v3124_v54 }
 0xd30   :  { %3336 = vmatpush1.bf16.xpose.msra.mxu1 %v3123_v59 }
 0xd31   :  { %3373 = vmatprep.subr.bf16.mxu1 %v3110_v7 }
 0xd37   :  { %3366 = vmatmul.mubr.bf16.vlgmr.msra.gmra.mrb[96].mxu1 %v3091_v2 }
 0xd38   :  { %3374 = vmatpush1.bf16.xpose.msra.mxu1 %v3109_v6  ;;  %3405 = vmatprep.mubr.bf16.mxu1 %v3094_v5 }
 0xd39   :  { %3375 = vmatprep.subr.bf16.mxu1 %v3126_v43 }
 0xd40   :  { %3376 = vmatpush1.bf16.xpose.msra.mxu1 %v3125_v40 }
 0xd41   :  { %3413 = vmatprep.subr.bf16.mxu1 %v3112_v19 }
 0xd47   :  { %3406 = vmatmul.mubr.bf16.vlgmr.msra.gmra.mrb[96].mxu1 %v3093_v22 }
 0xd48   :  { %3414 = vmatpush1.bf16.xpose.msra.mxu1 %v3111_v18  ;;  %3445 = vmatprep.mubr.bf16.mxu1 %v3096_v26 }
 0xd49   :  { %3415 = vmatprep.subr.bf16.mxu1 %v3128_v25 }
 0xd50   :  { %3416 = vmatpush1.bf16.xpose.msra.mxu1 %v3127_v52 }
 0xd57   :  { %3446 = vmatmul.mubr.bf16.vlgmr.msra.gmra.mrb[96].mxu1 %v3095_v3 }
 0xe2a   :  { %v3447_v27 = vpop.f32.mrb[96].mxu1 }
 0xe2b   :  { %v9180_v28 = vadd.f32 %v3447_v27, %v3132_v4  ;;  %v3449_v29 = vpop.f32.mrb[97].mxu1  ;;  %v3578_v27 = vrot.slane %v10354_v62, %v9910_v36 }
 0xe2c   :  { %v3450_v23 = vpop.f32.mrb[98].mxu1 }
 0xe2d   :  { %v3454_v1 = vrot.slane %v9180_v28, 6  ;;  %v3451_v13 = vpop.f32.mrb[99].mxu1 }
 0xe2f   :  { %v3456_v12 = vadd.f32 %v3454_v1, %v10218_v57 }
 0xe31   :  { %v3457_v37 = vsel %vm2480_vm4, %v3456_v12, 0.0  ;;  %v3461_v51 = vmul.f32 %v3456_v12, %v3456_v12 }
 0xe32   :  { %3458 = vadd.xlane.f32.xlu0 %v3457_v37 }
 0xe33   :  { %v3462_v10 = vsel %vm2480_vm4, %v3461_v51, 0.0 }
 0xe36   :  { %3463 = vadd.xlane.f32.xlu0 %v3462_v10 }
 0xe4c   :  { %3580 = vrot.lane.b32.xlu0 %v10209_v32, %s9675_s2 }
 0xebf   :  { %v3459_v39 = vpop.xlane.xlu0 %3458 }
 0xec0   :  { %v3460_v46 = vmul.f32 0.03125, %v3459_v39 }
 0xec2   :  { %v3466_v33 = vmul.f32 %v3460_v46, %v3460_v46  ;;  %v3468_v50 = vsub.f32 %v3456_v12, %v3460_v46 }
 0xec3   :  { %v3464_v48 = vpop.xlane.xlu0 %3463 }
 0xec4   :  { %v3465_v53 = vmul.f32 0.03125, %v3464_v48 }
 0xec6   :  { %v3467_v24 = vsub.f32 %v3465_v53, %v3466_v33  ;;  %v3602_v33 = vrot.slane %v10354_v62, %v9983_v34 }
 0xec7   :  { %v3581_v29 = vpop.permute.xlu0 %3580 }
 0xec8   :  { %v3469_v57 = vadd.f32 1e-05, %v3467_v24 }
 0xeca   :  { %9426 = vrsqrt.f32 %v3469_v57  ;;  %v3607_v57 = vrot.slane %v10354_v62, %v10013_v42 }
 0xed4   :  { %v9427_v54 = vpop.eup %9426 }
 0xed5   :  { %v3471_v58 = vmul.f32 %v9427_v54, %v3468_v50 }
 0xed7   :  { %v3476_v47 = vmul.f32 %v3475_v38, %v3471_v58 }
 0xed9   :  { %v3481_v61 = vadd.f32 %v3480_v17, %v3476_v47 }
 0xedb   :  { %v3489_v59 = vpack.c.bf16 %v3481_v61, %v3481_v61 }
 0xedd   :  { %v3495_v7 = vrot.slane %v3489_v59, 1 }
 0xedf   :  { %9137 = vmatmul.mubr.msk.bf16.vlgmr.msra.gmra.mrb[84].mxu0 %vm251_vm3, %v3495_v7 }
 0xfb2   :  { %v3545_v2 = vpop.f32.mrb[84].mxu0 }
 0xfb3   :  { %v3546_v16 = vadd.f32 %v3545_v2, %v3493_v31  ;;  %v9138_v5 = vpop.f32.mrb[85].mxu0 }
 0xfb4   :  { %v3548_v6 = vpop.f32.mrb[86].mxu0 }
 0xfb5   :  { %v3552_v43 = vrot.slane %v3546_v16, 6  ;;  %v9139_v11 = vpop.f32.mrb[87].mxu0 }
 0xfb7   :  { %v3554_v41 = vadd.f32 %v3552_v43, %v3481_v61 }
 0xfb9   :  { %v3555_v60 = vsel %vm2480_vm4, %v3554_v41, 0.0  ;;  %v3559_v14 = vmul.f32 %v3554_v41, %v3554_v41 }
 0xfba   :  { %3556 = vadd.xlane.f32.xlu1 %v3555_v60 }
 0xfbb   :  { %v3560_v40 = vsel %vm2480_vm4, %v3559_v14, 0.0 }
 0xfbe   :  { %3561 = vadd.xlane.f32.xlu1 %v3560_v40 }
0x1047   :  { %v3557_v19 = vpop.xlane.xlu1 %3556 }
0x1048   :  { %v3558_v20 = vmul.f32 0.03125, %v3557_v19 }
0x104a   :  { %v3564_v22 = vmul.f32 %v3558_v20, %v3558_v20  ;;  %v3566_v52 = vsub.f32 %v3554_v41, %v3558_v20 }
0x104b   :  { %v3562_v21 = vpop.xlane.xlu1 %3561 }
0x104c   :  { %v3563_v26 = vmul.f32 0.03125, %v3562_v21 }
0x104e   :  { %v3565_v18 = vsub.f32 %v3563_v26, %v3564_v22 }
0x1050   :  { %v3567_v25 = vadd.f32 1e-05, %v3565_v18 }
0x1052   :  { %9428 = vrsqrt.f32 %v3567_v25 }
0x105c   :  { %v9429_v3 = vpop.eup %9428 }
0x105d   :  { %v3569_v4 = vmul.f32 %v9429_v3, %v3566_v52 }
0x105f   :  { %v3574_v28 = vmul.f32 %v3573_v55, %v3569_v4 }
0x1061   :  { %v3579_v23 = vadd.f32 %v3578_v27, %v3574_v28 }
0x1063   :  { %v3583_v1 = vadd.f32 %v3581_v29, %v3579_v23 }
0x1065   :  { %v3584_v13 = vsel %vm2480_vm4, %v3583_v1, 0.0  ;;  %v3588_v12 = vmul.f32 %v3583_v1, %v3583_v1 }
0x1066   :  { %3585 = vadd.xlane.f32.xlu1 %v3584_v13 }
0x1067   :  { %v3589_v37 = vsel %vm2480_vm4, %v3588_v12, 0.0 }
0x106a   :  { %3590 = vadd.xlane.f32.xlu1 %v3589_v37 }
0x10f3   :  { %v3586_v51 = vpop.xlane.xlu1 %3585 }
0x10f4   :  { %v3587_v10 = vmul.f32 0.03125, %v3586_v51 }
0x10f6   :  { %v3593_v15 = vmul.f32 %v3587_v10, %v3587_v10  ;;  %v3595_v53 = vsub.f32 %v3583_v1, %v3587_v10 }
0x10f7   :  { %v3591_v63 = vpop.xlane.xlu1 %3590 }
0x10f8   :  { %v3592_v39 = vmul.f32 0.03125, %v3591_v63 }
0x10fa   :  { %v3594_v46 = vsub.f32 %v3592_v39, %v3593_v15 }
0x10fc   :  { %v3596_v48 = vadd.f32 1e-05, %v3594_v46 }
0x10fe   :  { %9430 = vrsqrt.f32 %v3596_v48 }
0x1108   :  { %v9431_v24 = vpop.eup %9430 }
0x1109   :  { %v3598_v50 = vmul.f32 %v9431_v24, %v3595_v53 }
0x110b   :  { %v3603_v38 = vmul.f32 %v3602_v33, %v3598_v50 }
0x110d   :  { %v10370_v54 = vadd.f32 %v3607_v57, %v3603_v38 }
0x110e   :  { %9620 = dma.done.wait [#allocation4 + $0x1], 4096 }
0x110f   :  { %9621 = vsyncadd [#allocation4 + $0x1], 4294963200 }
0x1110   :  { %9622 = dma.done.wait [#allocation4 + $0x3], 4096 }
0x1111   :  { %9623 = vsyncadd [#allocation4 + $0x3], 4294963200  ;;  %3843 = vmatprep.mubr.bf16.mxu0 %v9664_v44  ;;  %9140 = vmatprep.subr.bf16.mxu1 %v9652_v0  ;;  %3629 = sst [smem:[#allocation33]] %s9655_s21  ;;  %s3613_s17 = scalar_lea.hbm %s11039_s11, 16384  ;;  %v3691_v61 = vpack.c.bf16 %v10370_v54, %v10370_v54 }
0x1112   :  { %9144 = vmatprep.mubr.msk.bf16.mxu1 %vm9653_vm0, %v9652_v0  ;;  %3631 = sst [smem:[#allocation33 + $0x1]] %s9655_s21  ;;  %s9676_s4 = smov [#allocation32]  }
0x1113   :  { %3633 = sst [smem:[#allocation33 + $0x2]] %s9656_s5  ;;  %s3648_s7 = scalar_lea.hbm %s11040_s12, 16384  ;;  %v10408_v31 = vrot.slane %v3691_v61, 1 }
0x1114   :  { %3635 = sst [smem:[#allocation33 + $0x3]] %s9646_s25  ;;  %s9677_s24 = smov [#allocation34]  }
0x1115   :  { %3637 = sst [smem:[#allocation33 + $0x4]] %s9649_s3 }
0x1116   :  { %3639 = sst [smem:[#allocation33 + $0x5]] %s9657_s23 }
0x1117   :  { %3641 = sst [smem:[#allocation33 + $0x6]] %s9658_s27 }
0x1118   :  { %3643 = sst [smem:[#allocation33 + $0x7]] %s9646_s25 }
0x1119   :  { %3645 = sst [smem:[#allocation33 + $0x8]] %s9647_s26 }
0x111a   :  { %3647 = dma.general %s3613_s17, 4096, %s9834_s10, %s9659_s28, %s9676_s4, [#allocation33], %s9840_s30, 0  }
0x111b   :  { %3664 = sst [smem:[#allocation35]] %s9655_s21 }
0x111c   :  { %3666 = sst [smem:[#allocation35 + $0x1]] %s9655_s21 }
0x111d   :  { %3668 = sst [smem:[#allocation35 + $0x2]] %s9656_s5 }
0x111e   :  { %3670 = sst [smem:[#allocation35 + $0x3]] %s9646_s25 }
0x111f   :  { %3672 = sst [smem:[#allocation35 + $0x4]] %s9649_s3 }
0x1120   :  { %3674 = sst [smem:[#allocation35 + $0x5]] %s9657_s23 }
0x1121   :  { %3676 = sst [smem:[#allocation35 + $0x6]] %s9658_s27 }
0x1122   :  { %3678 = sst [smem:[#allocation35 + $0x7]] %s9646_s25 }
0x1123   :  { %3680 = sst [smem:[#allocation35 + $0x8]] %s9647_s26 }
0x1124   :  { %3682 = dma.general %s3648_s7, 4096, %s9855_s19, %s9662_s6, %s9677_s24, [#allocation35], %s9840_s30, 0  }
0x1125   :  { %v3693_v58 = vld [vmem:[#allocation2 + $0x108] sm:$0xff]  ;;  %v3692_v17 = vld [vmem:[#allocation2 + $0x100] sm:$0xff]  ;;  %v3695_v7 = vld [vmem:[#allocation2 + $0x118] sm:$0xff] }
0x1126   :  { %v3709_v47 = vld [vmem:[#allocation2 + $0x188] sm:$0xff]  ;;  %3811 = vmatprep.subr.bf16.mxu0 %v3693_v58  ;;  %v3708_v59 = vld [vmem:[#allocation2 + $0x180] sm:$0xff]  ;;  %v3694_v2 = vld [vmem:[#allocation2 + $0x110] sm:$0xff] }
0x1127   :  { %3812 = vmatpush1.bf16.msra.mxu0 %v3692_v17  ;;  %v3711_v16 = vld [vmem:[#allocation2 + $0x198] sm:$0xff]  ;;  %v3710_v5 = vld [vmem:[#allocation2 + $0x190] sm:$0xff]  ;;  %v3697_v6 = vld [vmem:[#allocation2 + $0x128] sm:$0xff] }
0x1128   :  { %3813 = vmatprep.subr.bf16.mxu0 %v3709_v47  ;;  %v3696_v43 = vld [vmem:[#allocation2 + $0x120] sm:$0xff]  ;;  %v3713_v11 = vld [vmem:[#allocation2 + $0x1a8] sm:$0xff]  ;;  %v3699_v60 = vld [vmem:[#allocation2 + $0x138] sm:$0xff] }
0x1129   :  { %v3712_v41 = vld [vmem:[#allocation2 + $0x1a0] sm:$0xff]  ;;  %v3698_v14 = vld [vmem:[#allocation2 + $0x130] sm:$0xff]  ;;  %v3715_v40 = vld [vmem:[#allocation2 + $0x1b8] sm:$0xff] }
0x112a   :  { %v3714_v19 = vld [vmem:[#allocation2 + $0x1b0] sm:$0xff]  ;;  %v3701_v20 = vld [vmem:[#allocation2 + $0x148] sm:$0xff]  ;;  %v3700_v21 = vld [vmem:[#allocation2 + $0x140] sm:$0xff] }
0x112b   :  { %3814 = vmatpush1.bf16.msra.mxu0 %v3708_v59  ;;  %v3717_v22 = vld [vmem:[#allocation2 + $0x1c8] sm:$0xff]  ;;  %v3716_v26 = vld [vmem:[#allocation2 + $0x1c0] sm:$0xff]  ;;  %v3703_v18 = vld [vmem:[#allocation2 + $0x158] sm:$0xff] }
0x112c   :  { %3852 = vmatprep.subr.bf16.mxu0 %v3695_v7  ;;  %v3702_v25 = vld [vmem:[#allocation2 + $0x150] sm:$0xff]  ;;  %v3719_v52 = vld [vmem:[#allocation2 + $0x1d8] sm:$0xff]  ;;  %v3705_v3 = vld [vmem:[#allocation2 + $0x168] sm:$0xff] }
0x112d   :  { %v3718_v55 = vld [vmem:[#allocation2 + $0x1d0] sm:$0xff]  ;;  %v3704_v4 = vld [vmem:[#allocation2 + $0x160] sm:$0xff]  ;;  %v3721_v27 = vld [vmem:[#allocation2 + $0x1e8] sm:$0xff] }
0x112e   :  { %8998 = vmatmul.mubr.msk.bf16.vlgmr.msra.gmra.mrb[88].mxu0 %vm251_vm3, %v10408_v31  ;;  %v3720_v28 = vld [vmem:[#allocation2 + $0x1e0] sm:$0xff]  ;;  %v3707_v29 = vld [vmem:[#allocation2 + $0x178] sm:$0xff]  ;;  %v3706_v23 = vld [vmem:[#allocation2 + $0x170] sm:$0xff] }
0x112f   :  { %3853 = vmatpush1.bf16.msra.mxu0 %v3694_v2  ;;  %3884 = vmatprep.mubr.bf16.mxu0 %v9664_v44  ;;  %v3723_v1 = vld [vmem:[#allocation2 + $0x1f8] sm:$0xff]  ;;  %v3722_v13 = vld [vmem:[#allocation2 + $0x1f0] sm:$0xff]  ;;  %v4172_v12 = vld [vmem:[#allocation3 + $0x108] sm:$0xff] }
0x1130   :  { %3854 = vmatprep.subr.bf16.mxu0 %v3711_v16  ;;  %v4171_v37 = vld [vmem:[#allocation3 + $0x100] sm:$0xff]  ;;  %v4188_v51 = vld [vmem:[#allocation3 + $0x188] sm:$0xff]  ;;  %v4174_v63 = vld [vmem:[#allocation3 + $0x118] sm:$0xff] }
0x1131   :  { %v4187_v10 = vld [vmem:[#allocation3 + $0x180] sm:$0xff]  ;;  %v4190_v16 = vld [vmem:[#allocation3 + $0x198] sm:$0xff] }
0x1132   :  { %v3684_v15 = vld [vmem:[#allocation11 + $0x3] ss:$8 sm:$0xf] }
0x1133   :  { %3855 = vmatpush1.bf16.msra.mxu0 %v3710_v5  ;;  %v3685_v39 = vld [vmem:[#allocation11 + $0x3] ss:$8 sm:$0xf0] }
0x1134   :  { %3893 = vmatprep.subr.bf16.mxu0 %v3697_v6  ;;  %v10433_v46 = vor.u32 %v3685_v39, %v3684_v15  ;;  %v4191_v15 = vld [vmem:[#allocation3 + $0x1a0] sm:$0xff]  ;;  %v4178_v39 = vld [vmem:[#allocation3 + $0x138] sm:$0xff] }
0x1136   :  { %8999 = vmatmul.mubr.msk.bf16.vlgmr.msra.gmra.mrb[92].mxu0 %vm251_vm3, %v10408_v31  ;;  %v3729_v48 = vrot.slane %v10433_v46, %v9877_v8  ;;  %v3733_v33 = vrot.slane %v10433_v46, %v9907_v35  ;;  %v3741_v59 = vrot.slane %v10433_v46, %v9983_v34  ;;  %v3737_v5 = vrot.slane %v10433_v46, %v9910_v36 }
0x1137   :  { %3894 = vmatpush1.bf16.msra.mxu0 %v3696_v43  ;;  %3925 = vmatprep.mubr.bf16.mxu0 %v9664_v44 }
0x1138   :  { %3895 = vmatprep.subr.bf16.mxu0 %v3713_v11 }
0x113b   :  { %3896 = vmatpush1.bf16.msra.mxu0 %v3712_v41 }
0x113c   :  { %3934 = vmatprep.subr.bf16.mxu0 %v3699_v60 }
0x113e   :  { %9000 = vmatmul.mubr.msk.bf16.vlgmr.msra.gmra.mrb[96].mxu0 %vm251_vm3, %v10408_v31 }
0x113f   :  { %3935 = vmatpush1.bf16.msra.mxu0 %v3698_v14  ;;  %3966 = vmatprep.mubr.bf16.mxu0 %v9664_v44 }
0x1140   :  { %3936 = vmatprep.subr.bf16.mxu0 %v3715_v40 }
0x1143   :  { %3937 = vmatpush1.bf16.msra.mxu0 %v3714_v19  ;;  %v3749_v19 = vrot.slane %v10433_v46, %v9992_v56 }
0x1144   :  { %3975 = vmatprep.subr.bf16.mxu0 %v3701_v20  ;;  %v4189_v20 = vld [vmem:[#allocation3 + $0x190] sm:$0xff] }
0x1146   :  { %9001 = vmatmul.mubr.msk.bf16.vlgmr.msra.gmra.mrb[100].mxu0 %vm251_vm3, %v10408_v31 }
0x1147   :  { %3976 = vmatpush1.bf16.msra.mxu0 %v3700_v21  ;;  %4007 = vmatprep.mubr.bf16.mxu0 %v9664_v44  ;;  %v4176_v21 = vld [vmem:[#allocation3 + $0x128] sm:$0xff] }
0x1148   :  { %3977 = vmatprep.subr.bf16.mxu0 %v3717_v22 }
0x114b   :  { %3978 = vmatpush1.bf16.msra.mxu0 %v3716_v26 }
0x114c   :  { %4016 = vmatprep.subr.bf16.mxu0 %v3703_v18 }
0x114e   :  { %9002 = vmatmul.mubr.msk.bf16.vlgmr.msra.gmra.mrb[104].mxu0 %vm251_vm3, %v10408_v31 }
0x114f   :  { %4017 = vmatpush1.bf16.msra.mxu0 %v3702_v25  ;;  %4048 = vmatprep.mubr.bf16.mxu0 %v9664_v44 }
0x1150   :  { %4018 = vmatprep.subr.bf16.mxu0 %v3719_v52 }
0x1153   :  { %4019 = vmatpush1.bf16.msra.mxu0 %v3718_v55 }
0x1154   :  { %4057 = vmatprep.subr.bf16.mxu0 %v3705_v3 }
0x1156   :  { %9003 = vmatmul.mubr.msk.bf16.vlgmr.msra.gmra.mrb[108].mxu0 %vm251_vm3, %v10408_v31 }
0x1157   :  { %4058 = vmatpush1.bf16.msra.mxu0 %v3704_v4  ;;  %4089 = vmatprep.mubr.bf16.mxu0 %v9664_v44 }
0x1158   :  { %4059 = vmatprep.subr.bf16.mxu0 %v3721_v27 }
0x115b   :  { %4060 = vmatpush1.bf16.msra.mxu0 %v3720_v28  ;;  %v4175_v28 = vld [vmem:[#allocation3 + $0x120] sm:$0xff] }
0x115c   :  { %4098 = vmatprep.subr.bf16.mxu0 %v3707_v29  ;;  %v4192_v29 = vld [vmem:[#allocation3 + $0x1a8] sm:$0xff] }
0x115e   :  { %9004 = vmatmul.mubr.msk.bf16.vlgmr.msra.gmra.mrb[112].mxu0 %vm251_vm3, %v10408_v31 }
0x115f   :  { %4099 = vmatpush1.bf16.msra.mxu0 %v3706_v23  ;;  %4130 = vmatprep.mubr.bf16.mxu0 %v9664_v44 }
0x1160   :  { %4100 = vmatprep.subr.bf16.mxu0 %v3723_v1  ;;  %v3745_v1 = vrot.slane %v10433_v46, %v10013_v42 }
0x1163   :  { %4101 = vmatpush1.bf16.msra.mxu0 %v3722_v13 }
0x1164   :  { %4207 = vmatprep.subr.bf16.mxu0 %v4172_v12  ;;  %v3757_v12 = vrot.slane %v10433_v46, %v10019_v49 }
0x1166   :  { %9005 = vmatmul.mubr.msk.bf16.vlgmr.msra.gmra.mrb[116].mxu0 %vm251_vm3, %v10408_v31  ;;  %v4173_v31 = vld [vmem:[#allocation3 + $0x110] sm:$0xff] }
0x116c   :  { %4208 = vmatpush1.bf16.xpose.msra.mxu0 %v4171_v37 }
0x116d   :  { %4209 = vmatprep.subr.bf16.mxu0 %v4188_v51 }
0x1174   :  { %4210 = vmatpush1.bf16.xpose.msra.mxu0 %v4187_v10 }
0x1175   :  { %4247 = vmatprep.subr.bf16.mxu0 %v4174_v63 }
0x1201   :  { %v3845_v53 = vpop.f32.mrb[88].mxu0 }
0x1202   :  { %v3846_v24 = vadd.f32 %v3845_v53, %v3729_v48  ;;  %v3847_v57 = vpop.f32.mrb[89].mxu0 }
0x1203   :  { %v3848_v50 = vadd.f32 %v3847_v57, %v3733_v33  ;;  %v3849_v38 = vpop.f32.mrb[90].mxu0  ;;  %v3688_v57 = vld [vmem:[#allocation11 + $0x43] ss:$8 sm:$0xf] }
0x1204   :  { %v4139_v58 = vmax.f32 %v3846_v24, 0.0  ;;  %v3850_v17 = vpop.f32.mrb[91].mxu0  ;;  %v3689_v38 = vld [vmem:[#allocation11 + $0x43] ss:$8 sm:$0xf0] }
0x1205   :  { %v4140_v47 = vmax.f32 %v3848_v50, 0.0 }
0x1206   :  { %v4155_v7 = vpack.c.bf16 %v4139_v58, %v4139_v58 }
0x1207   :  { %v4156_v61 = vpack.c.bf16 %v4140_v47, %v4140_v47 }
0x1209   :  { %4239 = vmatprep.mubr.bf16.mxu0 %v4156_v61  ;;  %v3886_v2 = vpop.f32.mrb[92].mxu0  ;;  %v10449_v61 = vor.u32 %v3689_v38, %v3688_v57  ;;  %v4197_v38 = vld [vmem:[#allocation3 + $0x1d0] sm:$0xff] }
0x120a   :  { %4240 = vmatmul.mubr.bf16.vlgmr.msra.gmra.mrb[120].mxu0 %v4155_v7  ;;  %v3888_v6 = vpop.f32.mrb[93].mxu0  ;;  %v3887_v14 = vadd.f32 %v3886_v2, %v3737_v5  ;;  %v4194_v7 = vld [vmem:[#allocation3 + $0x1b8] sm:$0xff]  ;;  %v3753_v2 = vrot.slane %v10433_v46, %v10016_v45 }
0x120b   :  { %4248 = vmatpush1.bf16.xpose.msra.mxu0 %v4173_v31  ;;  %v3889_v43 = vadd.f32 %v3888_v6, %v3741_v59  ;;  %v3890_v11 = vpop.f32.mrb[94].mxu0  ;;  %v4177_v59 = vld [vmem:[#allocation3 + $0x130] sm:$0xff]  ;;  %v3765_v5 = vrot.slane %v10449_v61, %v9907_v35 }
0x120c   :  { %v3891_v41 = vpop.f32.mrb[95].mxu0  ;;  %4249 = vmatprep.subr.bf16.mxu0 %v4190_v16  ;;  %v4141_v26 = vmax.f32 %v3887_v14, 0.0  ;;  %v4180_v14 = vld [vmem:[#allocation3 + $0x148] sm:$0xff] }
0x120d   :  { %v4142_v60 = vmax.f32 %v3889_v43, 0.0 }
0x120e   :  { %v4157_v4 = vpack.c.bf16 %v4141_v26, %v4141_v26 }
0x120f   :  { %v4158_v40 = vpack.c.bf16 %v4142_v60, %v4142_v60  ;;  %v4193_v60 = vld [vmem:[#allocation3 + $0x1b0] sm:$0xff] }
0x1211   :  { %4279 = vmatprep.mubr.bf16.mxu0 %v4158_v40  ;;  %v3927_v22 = vpop.f32.mrb[96].mxu0 }
0x1212   :  { %v3929_v18 = vpop.f32.mrb[97].mxu0  ;;  %v3928_v10 = vadd.f32 %v3927_v22, %v3745_v1 }
0x1213   :  { %4250 = vmatpush1.bf16.xpose.msra.mxu0 %v4189_v20  ;;  %v3930_v25 = vadd.f32 %v3929_v18, %v3749_v19  ;;  %v3931_v52 = vpop.f32.mrb[98].mxu0  ;;  %v3785_v18 = vrot.slane %v10449_v61, %v10016_v45 }
0x1214   :  { %4287 = vmatprep.subr.bf16.mxu0 %v4176_v21  ;;  %v3932_v55 = vpop.f32.mrb[99].mxu0  ;;  %v4143_v33 = vmax.f32 %v3928_v10, 0.0  ;;  %v4179_v52 = vld [vmem:[#allocation3 + $0x140] sm:$0xff] }
0x1215   :  { %v4144_v3 = vmax.f32 %v3930_v25, 0.0  ;;  %v4196_v55 = vld [vmem:[#allocation3 + $0x1c8] sm:$0xff] }
0x1216   :  { %v4159_v17 = vpack.c.bf16 %v4143_v33, %v4143_v33  ;;  %v4181_v33 = vld [vmem:[#allocation3 + $0x150] sm:$0xff] }
0x1217   :  { %v4160_v27 = vpack.c.bf16 %v4144_v3, %v4144_v3 }
0x1219   :  { %v3968_v23 = vpop.f32.mrb[100].mxu0 }
0x121a   :  { %4280 = vmatmul.mubr.bf16.vlgmr.msra.gmra.mrb[120].mxu0 %v4157_v4  ;;  %v3970_v13 = vpop.f32.mrb[101].mxu0  ;;  %v3969_v11 = vadd.f32 %v3968_v23, %v3753_v2  ;;  %v3761_v4 = vrot.slane %v10449_v61, %v9877_v8  ;;  %v4183_v2 = vld [vmem:[#allocation3 + $0x160] sm:$0xff] }
0x121b   :  { %4288 = vmatpush1.bf16.xpose.msra.mxu0 %v4175_v28  ;;  %4319 = vmatprep.mubr.bf16.mxu0 %v4160_v27  ;;  %v3972_v37 = vpop.f32.mrb[102].mxu0  ;;  %v3971_v63 = vadd.f32 %v3970_v13, %v3757_v12 }
0x121c   :  { %4289 = vmatprep.subr.bf16.mxu0 %v4192_v29  ;;  %v3973_v51 = vpop.f32.mrb[103].mxu0  ;;  %v4145_v19 = vmax.f32 %v3969_v11, 0.0  ;;  %v3773_v29 = vrot.slane %v10449_v61, %v9983_v34  ;;  %v4195_v37 = vld [vmem:[#allocation3 + $0x1c0] sm:$0xff] }
0x121d   :  { %v4146_v24 = vmax.f32 %v3971_v63, 0.0  ;;  %v4182_v51 = vld [vmem:[#allocation3 + $0x158] sm:$0xff]  ;;  %v4199_v11 = vld [vmem:[#allocation3 + $0x1e0] sm:$0xff] }
0x121e   :  { %v4161_v26 = vpack.c.bf16 %v4145_v19, %v4145_v19 }
0x121f   :  { %v4162_v47 = vpack.c.bf16 %v4146_v24, %v4146_v24  ;;  %v3769_v24 = vrot.slane %v10449_v61, %v9910_v36 }
0x1221   :  { %v4009_v48 = vpop.f32.mrb[104].mxu0 }
0x1222   :  { %v4011_v53 = vpop.f32.mrb[105].mxu0  ;;  %v4010_v13 = vadd.f32 %v4009_v48, %v3761_v4  ;;  %v3781_v48 = vrot.slane %v10449_v61, %v9992_v56 }
0x1223   :  { %4290 = vmatpush1.bf16.xpose.msra.mxu0 %v4191_v15  ;;  %v4013_v50 = vpop.f32.mrb[106].mxu0  ;;  %v4012_v41 = vadd.f32 %v4011_v53, %v3765_v5  ;;  %v4198_v53 = vld [vmem:[#allocation3 + $0x1d8] sm:$0xff]  ;;  %v3777_v5 = vrot.slane %v10449_v61, %v10013_v42 }
0x1224   :  { %4327 = vmatprep.subr.bf16.mxu0 %v4178_v39  ;;  %v4014_v58 = vpop.f32.mrb[107].mxu0  ;;  %v4147_v10 = vmax.f32 %v4010_v13, 0.0  ;;  %v9433_v13 = vld [vmem:[#allocation8 + $0x28] sm:$0xff]  }
0x1225   :  { %v4148_v21 = vmax.f32 %v4012_v41, 0.0  ;;  %v4184_v58 = vld [vmem:[#allocation3 + $0x168] sm:$0xff]  ;;  %v4186_v41 = vld [vmem:[#allocation3 + $0x178] sm:$0xff] }
0x1226   :  { %v4163_v15 = vpack.c.bf16 %v4147_v10, %v4147_v10 }
0x1227   :  { %v4164_v25 = vpack.c.bf16 %v4148_v21, %v4148_v21  ;;  %v4185_v21 = vld [vmem:[#allocation3 + $0x170] sm:$0xff] }
0x1229   :  { %v4050_v31 = vpop.f32.mrb[108].mxu0 }
0x122a   :  { %4320 = vmatmul.mubr.bf16.vlgmr.msra.gmra.mrb[120].mxu0 %v4159_v17  ;;  %v4052_v16 = vpop.f32.mrb[109].mxu0  ;;  %v4051_v57 = vadd.f32 %v4050_v31, %v3769_v24  ;;  %v3789_v31 = vrot.slane %v10449_v61, %v10019_v49 }
0x122b   :  { %4328 = vmatpush1.bf16.xpose.msra.mxu0 %v4177_v59  ;;  %4359 = vmatprep.mubr.bf16.mxu0 %v4162_v47  ;;  %v4054_v6 = vpop.f32.mrb[110].mxu0  ;;  %v4053_v12 = vadd.f32 %v4052_v16, %v3773_v29  ;;  %v4200_v16 = vld [vmem:[#allocation3 + $0x1e8] sm:$0xff] }
0x122c   :  { %4329 = vmatprep.subr.bf16.mxu0 %v4194_v7  ;;  %v4055_v43 = vpop.f32.mrb[111].mxu0  ;;  %v4149_v17 = vmax.f32 %v4051_v57, 0.0 }
0x122d   :  { %v4150_v63 = vmax.f32 %v4053_v12, 0.0 }
0x122e   :  { %v4165_v59 = vpack.c.bf16 %v4149_v17, %v4149_v17  ;;  %v10488_v17 = vld [vmem:[%s11036_s8 + $0x10] sm:$0xff] }
0x122f   :  { %v4166_v39 = vpack.c.bf16 %v4150_v63, %v4150_v63 }
0x1231   :  { %v4091_v40 = vpop.f32.mrb[112].mxu0 }
0x1232   :  { %v4093_v20 = vpop.f32.mrb[113].mxu0  ;;  %v4092_v6 = vadd.f32 %v4091_v40, %v3777_v5 }
0x1233   :  { %4330 = vmatpush1.bf16.xpose.msra.mxu0 %v4193_v60  ;;  %v4095_v22 = vpop.f32.mrb[114].mxu0  ;;  %v4094_v50 = vadd.f32 %v4093_v20, %v3781_v48  ;;  %v4554_v48 = vrot.slane %v10354_v62, %v10019_v49 }
0x1234   :  { %4367 = vmatprep.subr.bf16.mxu0 %v4180_v14  ;;  %v4096_v46 = vpop.f32.mrb[115].mxu0  ;;  %v4151_v60 = vmax.f32 %v4092_v6, 0.0  ;;  %v4202_v22 = vld [vmem:[#allocation3 + $0x1f8] sm:$0xff] }
0x1235   :  { %v4152_v47 = vmax.f32 %v4094_v50, 0.0  ;;  %v4201_v46 = vld [vmem:[#allocation3 + $0x1f0] sm:$0xff] }
0x1236   :  { %v4167_v19 = vpack.c.bf16 %v4151_v60, %v4151_v60 }
0x1237   :  { %v4168_v7 = vpack.c.bf16 %v4152_v47, %v4152_v47  ;;  %v4567_v47 = vrot.slane %v10488_v17, %v9877_v8 }
0x1239   :  { %v4132_v3 = vpop.f32.mrb[116].mxu0 }
0x123a   :  { %4360 = vmatmul.mubr.bf16.vlgmr.msra.gmra.mrb[120].mxu0 %v4161_v26  ;;  %v10459_v27 = vadd.f32 %v4132_v3, %v3785_v18  ;;  %v4134_v28 = vpop.f32.mrb[117].mxu0  ;;  %v4206_v26 = vrot.slane %v10354_v62, %v9992_v56 }
0x123b   :  { %4368 = vmatpush1.bf16.xpose.msra.mxu0 %v4179_v52  ;;  %4399 = vmatprep.mubr.bf16.mxu0 %v4164_v25  ;;  %v4136_v23 = vpop.f32.mrb[118].mxu0  ;;  %v4135_v43 = vadd.f32 %v4134_v28, %v3789_v31 }
0x123c   :  { %4369 = vmatprep.subr.bf16.mxu0 %v4196_v55  ;;  %v4137_v1 = vpop.f32.mrb[119].mxu0  ;;  %v4153_v61 = vmax.f32 %v10459_v27, 0.0  ;;  %v9432_v27 = vld [vmem:[#allocation8 + $0x20] sm:$0xff]  }
0x123d   :  { %v4154_v14 = vmax.f32 %v4135_v43, 0.0  ;;  %9141 = vmatpush3.bf16.msra.mxu1 %v9432_v27 }
0x123e   :  { %v4169_v40 = vpack.c.bf16 %v4153_v61, %v4153_v61  ;;  %9142 = vmatprep.subr.bf16.mxu1 %v9652_v0  ;;  %v4647_v61 = vrot.slane %v10488_v17, %v9907_v35 }
0x123f   :  { %v4170_v20 = vpack.c.bf16 %v4154_v14, %v4154_v14 }
0x1241   :  { %9143 = vmatpush3.bf16.msra.mxu1 %v9433_v13 }
0x1243   :  { %4370 = vmatpush1.bf16.xpose.msra.mxu0 %v4195_v37 }
0x1244   :  { %4407 = vmatprep.subr.bf16.mxu0 %v4182_v51 }
0x124a   :  { %4400 = vmatmul.mubr.bf16.vlgmr.msra.gmra.mrb[120].mxu0 %v4163_v15 }
0x124b   :  { %4408 = vmatpush1.bf16.xpose.msra.mxu0 %v4181_v33  ;;  %4439 = vmatprep.mubr.bf16.mxu0 %v4166_v39  ;;  %v4549_v33 = vrot.slane %v10354_v62, %v10016_v45 }
0x124c   :  { %4409 = vmatprep.subr.bf16.mxu0 %v4198_v53 }
0x1253   :  { %4410 = vmatpush1.bf16.xpose.msra.mxu0 %v4197_v38 }
0x1254   :  { %4447 = vmatprep.subr.bf16.mxu0 %v4184_v58 }
0x125a   :  { %4440 = vmatmul.mubr.bf16.vlgmr.msra.gmra.mrb[120].mxu0 %v4165_v59 }
0x125b   :  { %4448 = vmatpush1.bf16.xpose.msra.mxu0 %v4183_v2  ;;  %4479 = vmatprep.mubr.bf16.mxu0 %v4168_v7 }
0x125c   :  { %4449 = vmatprep.subr.bf16.mxu0 %v4200_v16 }
0x1263   :  { %4450 = vmatpush1.bf16.xpose.msra.mxu0 %v4199_v11 }
0x1264   :  { %4487 = vmatprep.subr.bf16.mxu0 %v4186_v41 }
0x126a   :  { %4480 = vmatmul.mubr.bf16.vlgmr.msra.gmra.mrb[120].mxu0 %v4167_v19 }
0x126b   :  { %4488 = vmatpush1.bf16.xpose.msra.mxu0 %v4185_v21  ;;  %4519 = vmatprep.mubr.bf16.mxu0 %v4170_v20 }
0x126c   :  { %4489 = vmatprep.subr.bf16.mxu0 %v4202_v22 }
0x1273   :  { %4490 = vmatpush1.bf16.xpose.msra.mxu0 %v4201_v46 }
0x127a   :  { %4520 = vmatmul.mubr.bf16.vlgmr.msra.gmra.mrb[120].mxu0 %v4169_v40 }
0x134d   :  { %v4521_v18 = vpop.f32.mrb[120].mxu0 }
0x134e   :  { %v9181_v25 = vadd.f32 %v4521_v18, %v4206_v26  ;;  %v4523_v52 = vpop.f32.mrb[121].mxu0  ;;  %v4652_v18 = vrot.slane %v10488_v17, %v9910_v36 }
0x134f   :  { %v4524_v55 = vpop.f32.mrb[122].mxu0 }
0x1350   :  { %v4528_v3 = vrot.slane %v9181_v25, 6  ;;  %v4525_v4 = vpop.f32.mrb[123].mxu0 }
0x1352   :  { %v4530_v28 = vadd.f32 %v4528_v3, %v10370_v54 }
0x1354   :  { %v4531_v29 = vsel %vm2480_vm4, %v4530_v28, 0.0  ;;  %v4535_v23 = vmul.f32 %v4530_v28, %v4530_v28 }
0x1355   :  { %4532 = vadd.xlane.f32.xlu0 %v4531_v29 }
0x1356   :  { %v4536_v1 = vsel %vm2480_vm4, %v4535_v23, 0.0 }
0x1359   :  { %4537 = vadd.xlane.f32.xlu0 %v4536_v1 }
0x136f   :  { %4654 = vrot.lane.b32.xlu0 %v10209_v32, %s9646_s25 }
0x13e2   :  { %v4533_v12 = vpop.xlane.xlu0 %4532 }
0x13e3   :  { %v4534_v37 = vmul.f32 0.03125, %v4533_v12 }
0x13e5   :  { %v4540_v54 = vmul.f32 %v4534_v37, %v4534_v37  ;;  %v4542_v39 = vsub.f32 %v4530_v28, %v4534_v37 }
0x13e6   :  { %v4538_v51 = vpop.xlane.xlu0 %4537 }
0x13e7   :  { %v4539_v10 = vmul.f32 0.03125, %v4538_v51 }
0x13e9   :  { %v4541_v63 = vsub.f32 %v4539_v10, %v4540_v54  ;;  %v4676_v54 = vrot.slane %v10488_v17, %v9983_v34 }
0x13ea   :  { %v4655_v52 = vpop.permute.xlu0 %4654 }
0x13eb   :  { %v4543_v15 = vadd.f32 1e-05, %v4541_v63 }
0x13ed   :  { %9434 = vrsqrt.f32 %v4543_v15  ;;  %v4681_v15 = vrot.slane %v10488_v17, %v10013_v42 }
0x13f7   :  { %v9435_v53 = vpop.eup %9434 }
0x13f8   :  { %v4545_v24 = vmul.f32 %v9435_v53, %v4542_v39 }
0x13fa   :  { %v4550_v57 = vmul.f32 %v4549_v33, %v4545_v24 }
0x13fc   :  { %v4555_v50 = vadd.f32 %v4554_v48, %v4550_v57 }
0x13fe   :  { %v4563_v38 = vpack.c.bf16 %v4555_v50, %v4555_v50 }
0x1400   :  { %v4569_v58 = vrot.slane %v4563_v38, 1 }
0x1402   :  { %9145 = vmatmul.mubr.msk.bf16.vlgmr.msra.gmra.mrb[100].mxu1 %vm251_vm3, %v4569_v58 }
0x14d5   :  { %v4619_v59 = vpop.f32.mrb[100].mxu1 }
0x14d6   :  { %v4620_v7 = vadd.f32 %v4619_v59, %v4567_v47  ;;  %v9146_v2 = vpop.f32.mrb[101].mxu1 }
0x14d7   :  { %v4622_v16 = vpop.f32.mrb[102].mxu1 }
0x14d8   :  { %v4626_v5 = vrot.slane %v4620_v7, 6  ;;  %v9147_v62 = vpop.f32.mrb[103].mxu1 }
0x14da   :  { %v4628_v31 = vadd.f32 %v4626_v5, %v4555_v50 }
0x14dc   :  { %v4629_v6 = vsel %vm2480_vm4, %v4628_v31, 0.0  ;;  %v4633_v43 = vmul.f32 %v4628_v31, %v4628_v31 }
0x14dd   :  { %4630 = vadd.xlane.f32.xlu1 %v4629_v6 }
0x14de   :  { %v4634_v11 = vsel %vm2480_vm4, %v4633_v43, 0.0 }
0x14e1   :  { %4635 = vadd.xlane.f32.xlu1 %v4634_v11 }
0x156a   :  { %v4631_v41 = vpop.xlane.xlu1 %4630 }
0x156b   :  { %v4632_v60 = vmul.f32 0.03125, %v4631_v41 }
0x156d   :  { %v4638_v19 = vmul.f32 %v4632_v60, %v4632_v60  ;;  %v4640_v46 = vsub.f32 %v4628_v31, %v4632_v60 }
0x156e   :  { %v4636_v14 = vpop.xlane.xlu1 %4635 }
0x156f   :  { %v4637_v20 = vmul.f32 0.03125, %v4636_v14 }
0x1571   :  { %v4639_v21 = vsub.f32 %v4637_v20, %v4638_v19 }
0x1573   :  { %v4641_v22 = vadd.f32 1e-05, %v4639_v21 }
0x1575   :  { %9436 = vrsqrt.f32 %v4641_v22 }
0x157f   :  { %v9437_v40 = vpop.eup %9436 }
0x1580   :  { %v4643_v26 = vmul.f32 %v9437_v40, %v4640_v46 }
0x1582   :  { %v4648_v25 = vmul.f32 %v4647_v61, %v4643_v26 }
0x1584   :  { %v4653_v55 = vadd.f32 %v4652_v18, %v4648_v25 }
0x1586   :  { %v4657_v3 = vadd.f32 %v4655_v52, %v4653_v55 }
0x1588   :  { %v4658_v4 = vsel %vm2480_vm4, %v4657_v3, 0.0  ;;  %v4662_v28 = vmul.f32 %v4657_v3, %v4657_v3 }
0x1589   :  { %4659 = vadd.xlane.f32.xlu1 %v4658_v4 }
0x158a   :  { %v4663_v29 = vsel %vm2480_vm4, %v4662_v28, 0.0 }
0x158d   :  { %4664 = vadd.xlane.f32.xlu1 %v4663_v29 }
0x1616   :  { %v4660_v23 = vpop.xlane.xlu1 %4659 }
0x1617   :  { %v4661_v1 = vmul.f32 0.03125, %v4660_v23 }
0x1619   :  { %v4667_v13 = vmul.f32 %v4661_v1, %v4661_v1  ;;  %v4669_v10 = vsub.f32 %v4657_v3, %v4661_v1 }
0x161a   :  { %v4665_v27 = vpop.xlane.xlu1 %4664 }
0x161b   :  { %v4666_v12 = vmul.f32 0.03125, %v4665_v27 }
0x161d   :  { %v4668_v37 = vsub.f32 %v4666_v12, %v4667_v13 }
0x161f   :  { %v4670_v51 = vadd.f32 1e-05, %v4668_v37 }
0x1621   :  { %9438 = vrsqrt.f32 %v4670_v51 }
0x162b   :  { %v9439_v63 = vpop.eup %9438 }
0x162c   :  { %v4672_v39 = vmul.f32 %v9439_v63, %v4669_v10 }
0x162e   :  { %v4677_v33 = vmul.f32 %v4676_v54, %v4672_v39 }
0x1630   :  { %v10504_v53 = vadd.f32 %v4681_v15, %v4677_v33 }
0x1631   :  { %9624 = dma.done.wait [#allocation4], 4096 }
0x1632   :  { %9625 = vsyncadd [#allocation4], 4294963200 }
0x1633   :  { %9626 = dma.done.wait [#allocation4 + $0x2], 4096 }
0x1634   :  { %9627 = vsyncadd [#allocation4 + $0x2], 4294963200  ;;  %4917 = vmatprep.mubr.bf16.mxu1 %v9664_v44  ;;  %9148 = vmatprep.subr.bf16.mxu0 %v9652_v0  ;;  %4703 = sst [smem:[#allocation37]] %s9655_s21  ;;  %s4687_s1 = scalar_lea.hbm %s11039_s11, 20480  ;;  %v4765_v50 = vpack.c.bf16 %v10504_v53, %v10504_v53 }
0x1635   :  { %9152 = vmatprep.mubr.msk.bf16.mxu0 %vm9653_vm0, %v9652_v0  ;;  %4705 = sst [smem:[#allocation37 + $0x1]] %s9655_s21  ;;  %s9678_s0 = smov [#allocation36]  }
0x1636   :  { %4707 = sst [smem:[#allocation37 + $0x2]] %s9656_s5  ;;  %s4722_s22 = scalar_lea.hbm %s11040_s12, 20480  ;;  %v10542_v47 = vrot.slane %v4765_v50, 1 }
0x1637   :  { %4709 = sst [smem:[#allocation37 + $0x3]] %s9646_s25  ;;  %s9679_s29 = smov [#allocation38]  }
0x1638   :  { %4711 = sst [smem:[#allocation37 + $0x4]] %s9649_s3  ;;  %s9680_s17 = smov 32  }
0x1639   :  { %4713 = sst [smem:[#allocation37 + $0x5]] %s9657_s23 }
0x163a   :  { %4715 = sst [smem:[#allocation37 + $0x6]] %s9658_s27 }
0x163b   :  { %4717 = sst [smem:[#allocation37 + $0x7]] %s9646_s25 }
0x163c   :  { %4719 = sst [smem:[#allocation37 + $0x8]] %s9647_s26 }
0x163d   :  { %4721 = dma.general %s4687_s1, 4096, %s9928_s20, %s9666_s15, %s9678_s0, [#allocation37], %s9840_s30, 0  }
0x163e   :  { %4738 = sst [smem:[#allocation39]] %s9655_s21 }
0x163f   :  { %4740 = sst [smem:[#allocation39 + $0x1]] %s9655_s21 }
0x1640   :  { %4742 = sst [smem:[#allocation39 + $0x2]] %s9656_s5 }
0x1641   :  { %4744 = sst [smem:[#allocation39 + $0x3]] %s9646_s25 }
0x1642   :  { %4746 = sst [smem:[#allocation39 + $0x4]] %s9649_s3 }
0x1643   :  { %4748 = sst [smem:[#allocation39 + $0x5]] %s9657_s23 }
0x1644   :  { %4750 = sst [smem:[#allocation39 + $0x6]] %s9658_s27 }
0x1645   :  { %4752 = sst [smem:[#allocation39 + $0x7]] %s9646_s25 }
0x1646   :  { %4754 = sst [smem:[#allocation39 + $0x8]] %s9647_s26 }
0x1647   :  { %4756 = dma.general %s4722_s22, 4096, %s9945_s18, %s9669_s16, %s9679_s29, [#allocation39], %s9840_s30, 0  }
0x1648   :  { %v4767_v24 = vld [vmem:[#allocation2 + $0x8] sm:$0xff]  ;;  %v4766_v48 = vld [vmem:[#allocation2] sm:$0xff]  ;;  %v4769_v58 = vld [vmem:[#allocation2 + $0x18] sm:$0xff] }
0x1649   :  { %v4783_v57 = vld [vmem:[#allocation2 + $0x88] sm:$0xff]  ;;  %4885 = vmatprep.subr.bf16.mxu1 %v4767_v24  ;;  %v4782_v38 = vld [vmem:[#allocation2 + $0x80] sm:$0xff]  ;;  %v4768_v59 = vld [vmem:[#allocation2 + $0x10] sm:$0xff] }
0x164a   :  { %4886 = vmatpush1.bf16.msra.mxu1 %v4766_v48  ;;  %v4785_v7 = vld [vmem:[#allocation2 + $0x98] sm:$0xff]  ;;  %v4784_v2 = vld [vmem:[#allocation2 + $0x90] sm:$0xff]  ;;  %v4771_v16 = vld [vmem:[#allocation2 + $0x28] sm:$0xff] }
0x164b   :  { %4887 = vmatprep.subr.bf16.mxu1 %v4783_v57  ;;  %v4770_v5 = vld [vmem:[#allocation2 + $0x20] sm:$0xff]  ;;  %v4787_v62 = vld [vmem:[#allocation2 + $0xa8] sm:$0xff]  ;;  %v4773_v6 = vld [vmem:[#allocation2 + $0x38] sm:$0xff] }
0x164c   :  { %v4786_v31 = vld [vmem:[#allocation2 + $0xa0] sm:$0xff]  ;;  %v4772_v43 = vld [vmem:[#allocation2 + $0x30] sm:$0xff]  ;;  %v4789_v11 = vld [vmem:[#allocation2 + $0xb8] sm:$0xff] }
0x164d   :  { %v4788_v41 = vld [vmem:[#allocation2 + $0xb0] sm:$0xff]  ;;  %v4775_v60 = vld [vmem:[#allocation2 + $0x48] sm:$0xff]  ;;  %v4774_v14 = vld [vmem:[#allocation2 + $0x40] sm:$0xff] }
0x164e   :  { %4888 = vmatpush1.bf16.msra.mxu1 %v4782_v38  ;;  %v4791_v19 = vld [vmem:[#allocation2 + $0xc8] sm:$0xff]  ;;  %v4790_v20 = vld [vmem:[#allocation2 + $0xc0] sm:$0xff]  ;;  %v4777_v21 = vld [vmem:[#allocation2 + $0x58] sm:$0xff] }
0x164f   :  { %4926 = vmatprep.subr.bf16.mxu1 %v4769_v58  ;;  %v4776_v22 = vld [vmem:[#allocation2 + $0x50] sm:$0xff]  ;;  %v4793_v46 = vld [vmem:[#allocation2 + $0xd8] sm:$0xff]  ;;  %v4779_v40 = vld [vmem:[#allocation2 + $0x68] sm:$0xff] }
0x1650   :  { %v4792_v61 = vld [vmem:[#allocation2 + $0xd0] sm:$0xff]  ;;  %v4778_v26 = vld [vmem:[#allocation2 + $0x60] sm:$0xff]  ;;  %v4795_v18 = vld [vmem:[#allocation2 + $0xe8] sm:$0xff] }
0x1651   :  { %9014 = vmatmul.mubr.msk.bf16.vlgmr.msra.gmra.mrb[104].mxu1 %vm251_vm3, %v10542_v47  ;;  %v4794_v25 = vld [vmem:[#allocation2 + $0xe0] sm:$0xff]  ;;  %v4781_v52 = vld [vmem:[#allocation2 + $0x78] sm:$0xff]  ;;  %v4780_v55 = vld [vmem:[#allocation2 + $0x70] sm:$0xff] }
0x1652   :  { %4927 = vmatpush1.bf16.msra.mxu1 %v4768_v59  ;;  %4958 = vmatprep.mubr.bf16.mxu1 %v9664_v44  ;;  %v4797_v3 = vld [vmem:[#allocation2 + $0xf8] sm:$0xff]  ;;  %v4796_v4 = vld [vmem:[#allocation2 + $0xf0] sm:$0xff]  ;;  %v5246_v28 = vld [vmem:[#allocation3 + $0x8] sm:$0xff] }
0x1653   :  { %4928 = vmatprep.subr.bf16.mxu1 %v4785_v7  ;;  %v5245_v29 = vld [vmem:[#allocation3] sm:$0xff]  ;;  %v5262_v23 = vld [vmem:[#allocation3 + $0x88] sm:$0xff]  ;;  %v5248_v27 = vld [vmem:[#allocation3 + $0x18] sm:$0xff] }
0x1654   :  { %v5261_v1 = vld [vmem:[#allocation3 + $0x80] sm:$0xff]  ;;  %v5264_v7 = vld [vmem:[#allocation3 + $0x98] sm:$0xff] }
0x1655   :  { %v4758_v13 = vld [vmem:[#allocation11 + $0x4] ss:$8 sm:$0xf] }
0x1656   :  { %4929 = vmatpush1.bf16.msra.mxu1 %v4784_v2  ;;  %v4759_v12 = vld [vmem:[#allocation11 + $0x4] ss:$8 sm:$0xf0] }
0x1657   :  { %4967 = vmatprep.subr.bf16.mxu1 %v4771_v16  ;;  %v10567_v37 = vor.u32 %v4759_v12, %v4758_v13  ;;  %v5265_v13 = vld [vmem:[#allocation3 + $0xa0] sm:$0xff]  ;;  %v5252_v12 = vld [vmem:[#allocation3 + $0x38] sm:$0xff] }
0x1659   :  { %9015 = vmatmul.mubr.msk.bf16.vlgmr.msra.gmra.mrb[108].mxu1 %vm251_vm3, %v10542_v47  ;;  %v4803_v51 = vrot.slane %v10567_v37, %v9877_v8  ;;  %v4807_v54 = vrot.slane %v10567_v37, %v9907_v35  ;;  %v4815_v38 = vrot.slane %v10567_v37, %v9983_v34  ;;  %v4811_v2 = vrot.slane %v10567_v37, %v9910_v36 }
0x165a   :  { %4968 = vmatpush1.bf16.msra.mxu1 %v4770_v5  ;;  %4999 = vmatprep.mubr.bf16.mxu1 %v9664_v44 }
0x165b   :  { %4969 = vmatprep.subr.bf16.mxu1 %v4787_v62 }
0x165e   :  { %4970 = vmatpush1.bf16.msra.mxu1 %v4786_v31 }
0x165f   :  { %5008 = vmatprep.subr.bf16.mxu1 %v4773_v6 }
0x1661   :  { %9016 = vmatmul.mubr.msk.bf16.vlgmr.msra.gmra.mrb[112].mxu1 %vm251_vm3, %v10542_v47 }
0x1662   :  { %5009 = vmatpush1.bf16.msra.mxu1 %v4772_v43  ;;  %5040 = vmatprep.mubr.bf16.mxu1 %v9664_v44 }
0x1663   :  { %5010 = vmatprep.subr.bf16.mxu1 %v4789_v11 }
0x1666   :  { %5011 = vmatpush1.bf16.msra.mxu1 %v4788_v41  ;;  %v4823_v41 = vrot.slane %v10567_v37, %v9992_v56 }
0x1667   :  { %5049 = vmatprep.subr.bf16.mxu1 %v4775_v60  ;;  %v5263_v60 = vld [vmem:[#allocation3 + $0x90] sm:$0xff] }
0x1669   :  { %9017 = vmatmul.mubr.msk.bf16.vlgmr.msra.gmra.mrb[116].mxu1 %vm251_vm3, %v10542_v47 }
0x166a   :  { %5050 = vmatpush1.bf16.msra.mxu1 %v4774_v14  ;;  %5081 = vmatprep.mubr.bf16.mxu1 %v9664_v44  ;;  %v5250_v14 = vld [vmem:[#allocation3 + $0x28] sm:$0xff] }
0x166b   :  { %5051 = vmatprep.subr.bf16.mxu1 %v4791_v19 }
0x166e   :  { %5052 = vmatpush1.bf16.msra.mxu1 %v4790_v20 }
0x166f   :  { %5090 = vmatprep.subr.bf16.mxu1 %v4777_v21 }
0x1671   :  { %9018 = vmatmul.mubr.msk.bf16.vlgmr.msra.gmra.mrb[120].mxu1 %vm251_vm3, %v10542_v47 }
0x1672   :  { %5091 = vmatpush1.bf16.msra.mxu1 %v4776_v22  ;;  %5122 = vmatprep.mubr.bf16.mxu1 %v9664_v44 }
0x1673   :  { %5092 = vmatprep.subr.bf16.mxu1 %v4793_v46 }
0x1676   :  { %5093 = vmatpush1.bf16.msra.mxu1 %v4792_v61 }
0x1677   :  { %5131 = vmatprep.subr.bf16.mxu1 %v4779_v40 }
0x1679   :  { %9019 = vmatmul.mubr.msk.bf16.vlgmr.msra.gmra.mrb[124].mxu1 %vm251_vm3, %v10542_v47 }
0x167a   :  { %5132 = vmatpush1.bf16.msra.mxu1 %v4778_v26  ;;  %5163 = vmatprep.mubr.bf16.mxu1 %v9664_v44 }
0x167b   :  { %5133 = vmatprep.subr.bf16.mxu1 %v4795_v18 }
0x167e   :  { %5134 = vmatpush1.bf16.msra.mxu1 %v4794_v25  ;;  %v5249_v25 = vld [vmem:[#allocation3 + $0x20] sm:$0xff] }
0x167f   :  { %5172 = vmatprep.subr.bf16.mxu1 %v4781_v52  ;;  %v5266_v52 = vld [vmem:[#allocation3 + $0xa8] sm:$0xff] }
0x1681   :  { %9020 = vmatmul.mubr.msk.bf16.vlgmr.msra.gmra.mrb[128].mxu1 %vm251_vm3, %v10542_v47 }
0x1682   :  { %5173 = vmatpush1.bf16.msra.mxu1 %v4780_v55  ;;  %5204 = vmatprep.mubr.bf16.mxu1 %v9664_v44 }
0x1683   :  { %5174 = vmatprep.subr.bf16.mxu1 %v4797_v3  ;;  %v4819_v3 = vrot.slane %v10567_v37, %v10013_v42 }
0x1686   :  { %5175 = vmatpush1.bf16.msra.mxu1 %v4796_v4 }
0x1687   :  { %5281 = vmatprep.subr.bf16.mxu1 %v5246_v28  ;;  %v4831_v28 = vrot.slane %v10567_v37, %v10019_v49 }
0x1689   :  { %9021 = vmatmul.mubr.msk.bf16.vlgmr.msra.gmra.mrb[132].mxu1 %vm251_vm3, %v10542_v47  ;;  %v5247_v47 = vld [vmem:[#allocation3 + $0x10] sm:$0xff] }
0x168f   :  { %5282 = vmatpush1.bf16.xpose.msra.mxu1 %v5245_v29 }
0x1690   :  { %5283 = vmatprep.subr.bf16.mxu1 %v5262_v23 }
0x1697   :  { %5284 = vmatpush1.bf16.xpose.msra.mxu1 %v5261_v1 }
0x1698   :  { %5321 = vmatprep.subr.bf16.mxu1 %v5248_v27 }
0x1724   :  { %v4919_v10 = vpop.f32.mrb[104].mxu1 }
0x1725   :  { %v4920_v63 = vadd.f32 %v4919_v10, %v4803_v51  ;;  %v4921_v15 = vpop.f32.mrb[105].mxu1 }
0x1726   :  { %v4922_v39 = vadd.f32 %v4921_v15, %v4807_v54  ;;  %v4923_v33 = vpop.f32.mrb[106].mxu1  ;;  %v4762_v15 = vld [vmem:[#allocation11 + $0x44] ss:$8 sm:$0xf] }
0x1727   :  { %v5213_v24 = vmax.f32 %v4920_v63, 0.0  ;;  %v4924_v48 = vpop.f32.mrb[107].mxu1  ;;  %v4763_v33 = vld [vmem:[#allocation11 + $0x44] ss:$8 sm:$0xf0] }
0x1728   :  { %v5214_v57 = vmax.f32 %v4922_v39, 0.0 }
0x1729   :  { %v5229_v58 = vpack.c.bf16 %v5213_v24, %v5213_v24 }
0x172a   :  { %v5230_v50 = vpack.c.bf16 %v5214_v57, %v5214_v57 }
0x172c   :  { %5313 = vmatprep.mubr.bf16.mxu1 %v5230_v50  ;;  %v4960_v59 = vpop.f32.mrb[108].mxu1  ;;  %v10583_v50 = vor.u32 %v4763_v33, %v4762_v15  ;;  %v5271_v33 = vld [vmem:[#allocation3 + $0xd0] sm:$0xff] }
0x172d   :  { %5314 = vmatmul.mubr.bf16.vlgmr.msra.gmra.mrb[136].mxu1 %v5229_v58  ;;  %v4962_v16 = vpop.f32.mrb[109].mxu1  ;;  %v4961_v43 = vadd.f32 %v4960_v59, %v4811_v2  ;;  %v5268_v58 = vld [vmem:[#allocation3 + $0xb8] sm:$0xff]  ;;  %v4827_v59 = vrot.slane %v10567_v37, %v10016_v45 }
0x172e   :  { %5322 = vmatpush1.bf16.xpose.msra.mxu1 %v5247_v47  ;;  %v4963_v5 = vadd.f32 %v4962_v16, %v4815_v38  ;;  %v4964_v62 = vpop.f32.mrb[110].mxu1  ;;  %v5251_v38 = vld [vmem:[#allocation3 + $0x30] sm:$0xff]  ;;  %v4839_v2 = vrot.slane %v10583_v50, %v9907_v35 }
0x172f   :  { %v4965_v31 = vpop.f32.mrb[111].mxu1  ;;  %5323 = vmatprep.subr.bf16.mxu1 %v5264_v7  ;;  %v5215_v20 = vmax.f32 %v4961_v43, 0.0  ;;  %v5254_v43 = vld [vmem:[#allocation3 + $0x48] sm:$0xff] }
0x1730   :  { %v5216_v6 = vmax.f32 %v4963_v5, 0.0 }
0x1731   :  { %v5231_v26 = vpack.c.bf16 %v5215_v20, %v5215_v20 }
0x1732   :  { %v5232_v11 = vpack.c.bf16 %v5216_v6, %v5216_v6  ;;  %v5267_v6 = vld [vmem:[#allocation3 + $0xb0] sm:$0xff] }
0x1734   :  { %5353 = vmatprep.mubr.bf16.mxu1 %v5232_v11  ;;  %v5001_v19 = vpop.f32.mrb[112].mxu1 }
0x1735   :  { %v5003_v21 = vpop.f32.mrb[113].mxu1  ;;  %v5002_v1 = vadd.f32 %v5001_v19, %v4819_v3 }
0x1736   :  { %5324 = vmatpush1.bf16.xpose.msra.mxu1 %v5263_v60  ;;  %v5004_v22 = vadd.f32 %v5003_v21, %v4823_v41  ;;  %v5005_v46 = vpop.f32.mrb[114].mxu1  ;;  %v4859_v21 = vrot.slane %v10583_v50, %v10016_v45 }
0x1737   :  { %5361 = vmatprep.subr.bf16.mxu1 %v5250_v14  ;;  %v5006_v61 = vpop.f32.mrb[115].mxu1  ;;  %v5217_v54 = vmax.f32 %v5002_v1, 0.0  ;;  %v5253_v46 = vld [vmem:[#allocation3 + $0x40] sm:$0xff] }
0x1738   :  { %v5218_v40 = vmax.f32 %v5004_v22, 0.0  ;;  %v5270_v61 = vld [vmem:[#allocation3 + $0xc8] sm:$0xff] }
0x1739   :  { %v5233_v48 = vpack.c.bf16 %v5217_v54, %v5217_v54  ;;  %v5255_v54 = vld [vmem:[#allocation3 + $0x50] sm:$0xff] }
0x173a   :  { %v5234_v18 = vpack.c.bf16 %v5218_v40, %v5218_v40 }
0x173c   :  { %v5042_v55 = vpop.f32.mrb[116].mxu1 }
0x173d   :  { %5354 = vmatmul.mubr.bf16.vlgmr.msra.gmra.mrb[136].mxu1 %v5231_v26  ;;  %v5044_v4 = vpop.f32.mrb[117].mxu1  ;;  %v5043_v62 = vadd.f32 %v5042_v55, %v4827_v59  ;;  %v4835_v26 = vrot.slane %v10583_v50, %v9877_v8  ;;  %v5257_v59 = vld [vmem:[#allocation3 + $0x60] sm:$0xff] }
0x173e   :  { %5362 = vmatpush1.bf16.xpose.msra.mxu1 %v5249_v25  ;;  %5393 = vmatprep.mubr.bf16.mxu1 %v5234_v18  ;;  %v5046_v29 = vpop.f32.mrb[118].mxu1  ;;  %v5045_v27 = vadd.f32 %v5044_v4, %v4831_v28 }
0x173f   :  { %5363 = vmatprep.subr.bf16.mxu1 %v5266_v52  ;;  %v5047_v23 = vpop.f32.mrb[119].mxu1  ;;  %v5219_v41 = vmax.f32 %v5043_v62, 0.0  ;;  %v4847_v52 = vrot.slane %v10583_v50, %v9983_v34  ;;  %v5269_v29 = vld [vmem:[#allocation3 + $0xc0] sm:$0xff] }
0x1740   :  { %v5220_v63 = vmax.f32 %v5045_v27, 0.0  ;;  %v5256_v23 = vld [vmem:[#allocation3 + $0x58] sm:$0xff]  ;;  %v5273_v62 = vld [vmem:[#allocation3 + $0xe0] sm:$0xff] }
0x1741   :  { %v5235_v20 = vpack.c.bf16 %v5219_v41, %v5219_v41 }
0x1742   :  { %v5236_v57 = vpack.c.bf16 %v5220_v63, %v5220_v63  ;;  %v4843_v63 = vrot.slane %v10583_v50, %v9910_v36 }
0x1744   :  { %v5083_v51 = vpop.f32.mrb[120].mxu1 }
0x1745   :  { %v5085_v10 = vpop.f32.mrb[121].mxu1  ;;  %v5084_v4 = vadd.f32 %v5083_v51, %v4835_v26  ;;  %v4855_v51 = vrot.slane %v10583_v50, %v9992_v56 }
0x1746   :  { %5364 = vmatpush1.bf16.xpose.msra.mxu1 %v5265_v13  ;;  %v5087_v39 = vpop.f32.mrb[122].mxu1  ;;  %v5086_v31 = vadd.f32 %v5085_v10, %v4839_v2  ;;  %v5272_v10 = vld [vmem:[#allocation3 + $0xd8] sm:$0xff]  ;;  %v4851_v2 = vrot.slane %v10583_v50, %v10013_v42 }
0x1747   :  { %5401 = vmatprep.subr.bf16.mxu1 %v5252_v12  ;;  %v5088_v24 = vpop.f32.mrb[123].mxu1  ;;  %v5221_v1 = vmax.f32 %v5084_v4, 0.0  ;;  %v9441_v4 = vld [vmem:[#allocation8 + $0x38] sm:$0xff]  }
0x1748   :  { %v5222_v14 = vmax.f32 %v5086_v31, 0.0  ;;  %v5258_v24 = vld [vmem:[#allocation3 + $0x68] sm:$0xff]  ;;  %v5260_v31 = vld [vmem:[#allocation3 + $0x78] sm:$0xff] }
0x1749   :  { %v5237_v13 = vpack.c.bf16 %v5221_v1, %v5221_v1 }
0x174a   :  { %v5238_v22 = vpack.c.bf16 %v5222_v14, %v5222_v14  ;;  %v5259_v14 = vld [vmem:[#allocation3 + $0x70] sm:$0xff] }
0x174c   :  { %v5124_v47 = vpop.f32.mrb[124].mxu1 }
0x174d   :  { %5394 = vmatmul.mubr.bf16.vlgmr.msra.gmra.mrb[136].mxu1 %v5233_v48  ;;  %v5126_v7 = vpop.f32.mrb[125].mxu1  ;;  %v5125_v15 = vadd.f32 %v5124_v47, %v4843_v63  ;;  %v4863_v47 = vrot.slane %v10583_v50, %v10019_v49 }
0x174e   :  { %5402 = vmatpush1.bf16.xpose.msra.mxu1 %v5251_v38  ;;  %5433 = vmatprep.mubr.bf16.mxu1 %v5236_v57  ;;  %v5128_v16 = vpop.f32.mrb[126].mxu1  ;;  %v5127_v28 = vadd.f32 %v5126_v7, %v4847_v52  ;;  %v5274_v7 = vld [vmem:[#allocation3 + $0xe8] sm:$0xff] }
0x174f   :  { %5403 = vmatprep.subr.bf16.mxu1 %v5268_v58  ;;  %v5129_v5 = vpop.f32.mrb[127].mxu1  ;;  %v5223_v48 = vmax.f32 %v5125_v15, 0.0 }
0x1750   :  { %v5224_v27 = vmax.f32 %v5127_v28, 0.0 }
0x1751   :  { %v5239_v38 = vpack.c.bf16 %v5223_v48, %v5223_v48  ;;  %v10621_v48 = vld [vmem:[%s11036_s8 + $0x18] sm:$0xff] }
0x1752   :  { %v5240_v12 = vpack.c.bf16 %v5224_v27, %v5224_v27 }
0x1754   :  { %v5165_v11 = vpop.f32.mrb[128].mxu1 }
0x1755   :  { %v5167_v60 = vpop.f32.mrb[129].mxu1  ;;  %v5166_v16 = vadd.f32 %v5165_v11, %v4851_v2 }
0x1756   :  { %5404 = vmatpush1.bf16.xpose.msra.mxu1 %v5267_v6  ;;  %v5169_v19 = vpop.f32.mrb[130].mxu1  ;;  %v5168_v39 = vadd.f32 %v5167_v60, %v4855_v51  ;;  %v5628_v51 = vrot.slane %v10488_v17, %v10019_v49 }
0x1757   :  { %5441 = vmatprep.subr.bf16.mxu1 %v5254_v43  ;;  %v5170_v37 = vpop.f32.mrb[131].mxu1  ;;  %v5225_v6 = vmax.f32 %v5166_v16, 0.0  ;;  %v5276_v19 = vld [vmem:[#allocation3 + $0xf8] sm:$0xff] }
0x1758   :  { %v5226_v57 = vmax.f32 %v5168_v39, 0.0  ;;  %v5275_v37 = vld [vmem:[#allocation3 + $0xf0] sm:$0xff] }
0x1759   :  { %v5241_v41 = vpack.c.bf16 %v5225_v6, %v5225_v6 }
0x175a   :  { %v5242_v58 = vpack.c.bf16 %v5226_v57, %v5226_v57  ;;  %v5641_v57 = vrot.slane %v10621_v48, %v9877_v8 }
0x175c   :  { %v5206_v40 = vpop.f32.mrb[132].mxu1 }
0x175d   :  { %5434 = vmatmul.mubr.bf16.vlgmr.msra.gmra.mrb[136].mxu1 %v5235_v20  ;;  %v10593_v18 = vadd.f32 %v5206_v40, %v4859_v21  ;;  %v5208_v25 = vpop.f32.mrb[133].mxu1  ;;  %v5280_v20 = vrot.slane %v10488_v17, %v9992_v56 }
0x175e   :  { %5442 = vmatpush1.bf16.xpose.msra.mxu1 %v5253_v46  ;;  %5473 = vmatprep.mubr.bf16.mxu1 %v5238_v22  ;;  %v5210_v55 = vpop.f32.mrb[134].mxu1  ;;  %v5209_v5 = vadd.f32 %v5208_v25, %v4863_v47 }
0x175f   :  { %5443 = vmatprep.subr.bf16.mxu1 %v5270_v61  ;;  %v5211_v3 = vpop.f32.mrb[135].mxu1  ;;  %v5227_v50 = vmax.f32 %v10593_v18, 0.0  ;;  %v9440_v18 = vld [vmem:[#allocation8 + $0x30] sm:$0xff]  }
0x1760   :  { %v5228_v43 = vmax.f32 %v5209_v5, 0.0  ;;  %9149 = vmatpush3.bf16.msra.mxu0 %v9440_v18 }
0x1761   :  { %v5243_v11 = vpack.c.bf16 %v5227_v50, %v5227_v50  ;;  %9150 = vmatprep.subr.bf16.mxu0 %v9652_v0 }
0x1762   :  { %v5244_v60 = vpack.c.bf16 %v5228_v43, %v5228_v43 }
0x1764   :  { %9151 = vmatpush3.bf16.msra.mxu0 %v9441_v4 }
0x1766   :  { %5444 = vmatpush1.bf16.xpose.msra.mxu1 %v5269_v29 }
0x1767   :  { %5481 = vmatprep.subr.bf16.mxu1 %v5256_v23 }
0x176d   :  { %5474 = vmatmul.mubr.bf16.vlgmr.msra.gmra.mrb[136].mxu1 %v5237_v13 }
0x176e   :  { %5482 = vmatpush1.bf16.xpose.msra.mxu1 %v5255_v54  ;;  %5513 = vmatprep.mubr.bf16.mxu1 %v5240_v12  ;;  %v5623_v54 = vrot.slane %v10488_v17, %v10016_v45 }
0x176f   :  { %5483 = vmatprep.subr.bf16.mxu1 %v5272_v10 }
0x1776   :  { %5484 = vmatpush1.bf16.xpose.msra.mxu1 %v5271_v33 }
0x1777   :  { %5521 = vmatprep.subr.bf16.mxu1 %v5258_v24 }
0x177d   :  { %5514 = vmatmul.mubr.bf16.vlgmr.msra.gmra.mrb[136].mxu1 %v5239_v38 }
0x177e   :  { %5522 = vmatpush1.bf16.xpose.msra.mxu1 %v5257_v59  ;;  %5553 = vmatprep.mubr.bf16.mxu1 %v5242_v58 }
0x177f   :  { %5523 = vmatprep.subr.bf16.mxu1 %v5274_v7 }
0x1786   :  { %5524 = vmatpush1.bf16.xpose.msra.mxu1 %v5273_v62 }
0x1787   :  { %5561 = vmatprep.subr.bf16.mxu1 %v5260_v31 }
0x178d   :  { %5554 = vmatmul.mubr.bf16.vlgmr.msra.gmra.mrb[136].mxu1 %v5241_v41 }
0x178e   :  { %5562 = vmatpush1.bf16.xpose.msra.mxu1 %v5259_v14  ;;  %5593 = vmatprep.mubr.bf16.mxu1 %v5244_v60 }
0x178f   :  { %5563 = vmatprep.subr.bf16.mxu1 %v5276_v19 }
0x1796   :  { %5564 = vmatpush1.bf16.xpose.msra.mxu1 %v5275_v37  ;;  %v5721_v37 = vrot.slane %v10621_v48, %v9907_v35 }
0x179d   :  { %5594 = vmatmul.mubr.bf16.vlgmr.msra.gmra.mrb[136].mxu1 %v5243_v11 }
0x1870   :  { %v5595_v21 = vpop.f32.mrb[136].mxu1 }
0x1871   :  { %v9182_v22 = vadd.f32 %v5595_v21, %v5280_v20  ;;  %v5597_v46 = vpop.f32.mrb[137].mxu1  ;;  %v5726_v20 = vrot.slane %v10621_v48, %v9910_v36 }
0x1872   :  { %v5598_v61 = vpop.f32.mrb[138].mxu1 }
0x1873   :  { %v5602_v40 = vrot.slane %v9182_v22, 6  ;;  %v5599_v26 = vpop.f32.mrb[139].mxu1 }
0x1875   :  { %v5604_v25 = vadd.f32 %v5602_v40, %v10504_v53 }
0x1877   :  { %v5605_v52 = vsel %vm2480_vm4, %v5604_v25, 0.0  ;;  %v5609_v55 = vmul.f32 %v5604_v25, %v5604_v25 }
0x1878   :  { %5606 = vadd.xlane.f32.xlu0 %v5605_v52 }
0x1879   :  { %v5610_v3 = vsel %vm2480_vm4, %v5609_v55, 0.0 }
0x187c   :  { %5611 = vadd.xlane.f32.xlu0 %v5610_v3 }
0x1892   :  { %5728 = vrot.lane.b32.xlu0 %v10209_v32, %s9680_s17 }
0x1905   :  { %v5607_v28 = vpop.xlane.xlu0 %5606 }
0x1906   :  { %v5608_v29 = vmul.f32 0.03125, %v5607_v28 }
0x1908   :  { %v5614_v1 = vmul.f32 %v5608_v29, %v5608_v29  ;;  %v5616_v12 = vsub.f32 %v5604_v25, %v5608_v29 }
0x1909   :  { %v5612_v23 = vpop.xlane.xlu0 %5611 }
0x190a   :  { %v5613_v27 = vmul.f32 0.03125, %v5612_v23  ;;  %v5750_v23 = vrot.slane %v10621_v48, %v9983_v34 }
0x190c   :  { %v5615_v13 = vsub.f32 %v5613_v27, %v5614_v1 }
0x190d   :  { %v5729_v22 = vpop.permute.xlu0 %5728 }
0x190e   :  { %v5617_v53 = vadd.f32 1e-05, %v5615_v13  ;;  %v5755_v13 = vrot.slane %v10621_v48, %v10013_v42 }
0x1910   :  { %9442 = vrsqrt.f32 %v5617_v53 }
0x191a   :  { %v9443_v10 = vpop.eup %9442 }
0x191b   :  { %v5619_v63 = vmul.f32 %v9443_v10, %v5616_v12 }
0x191d   :  { %v5624_v15 = vmul.f32 %v5623_v54, %v5619_v63 }
0x191f   :  { %v5629_v39 = vadd.f32 %v5628_v51, %v5624_v15 }
0x1921   :  { %v5637_v33 = vpack.c.bf16 %v5629_v39, %v5629_v39 }
0x1923   :  { %v5643_v24 = vrot.slane %v5637_v33, 1 }
0x1925   :  { %9153 = vmatmul.mubr.msk.bf16.vlgmr.msra.gmra.mrb[124].mxu0 %vm251_vm3, %v5643_v24 }
0x19f8   :  { %v5693_v38 = vpop.f32.mrb[124].mxu0 }
0x19f9   :  { %v5694_v58 = vadd.f32 %v5693_v38, %v5641_v57  ;;  %v9154_v17 = vpop.f32.mrb[125].mxu0 }
0x19fa   :  { %v5696_v59 = vpop.f32.mrb[126].mxu0 }
0x19fb   :  { %v5700_v7 = vrot.slane %v5694_v58, 6  ;;  %v9155_v2 = vpop.f32.mrb[127].mxu0 }
0x19fd   :  { %v5702_v47 = vadd.f32 %v5700_v7, %v5629_v39 }
0x19ff   :  { %v5703_v16 = vsel %vm2480_vm4, %v5702_v47, 0.0  ;;  %v5707_v5 = vmul.f32 %v5702_v47, %v5702_v47 }
0x1a00   :  { %5704 = vadd.xlane.f32.xlu1 %v5703_v16 }
0x1a01   :  { %v5708_v32 = vsel %vm2480_vm4, %v5707_v5, 0.0 }
0x1a04   :  { %5709 = vadd.xlane.f32.xlu1 %v5708_v32 }
0x1a8d   :  { %v5705_v62 = vpop.xlane.xlu1 %5704 }
0x1a8e   :  { %v5706_v31 = vmul.f32 0.03125, %v5705_v62 }
0x1a90   :  { %v5712_v43 = vmul.f32 %v5706_v31, %v5706_v31  ;;  %v5714_v19 = vsub.f32 %v5702_v47, %v5706_v31 }
0x1a91   :  { %v5710_v6 = vpop.xlane.xlu1 %5709 }
0x1a92   :  { %v5711_v41 = vmul.f32 0.03125, %v5710_v6 }
0x1a94   :  { %v5713_v60 = vsub.f32 %v5711_v41, %v5712_v43 }
0x1a96   :  { %v5715_v14 = vadd.f32 1e-05, %v5713_v60 }
0x1a98   :  { %9444 = vrsqrt.f32 %v5715_v14 }
0x1aa2   :  { %v9445_v50 = vpop.eup %9444 }
0x1aa3   :  { %v5717_v11 = vmul.f32 %v9445_v50, %v5714_v19 }
0x1aa5   :  { %v5722_v21 = vmul.f32 %v5721_v37, %v5717_v11 }
0x1aa7   :  { %v5727_v46 = vadd.f32 %v5726_v20, %v5722_v21 }
0x1aa9   :  { %v5731_v61 = vadd.f32 %v5729_v22, %v5727_v46 }
0x1aab   :  { %v5732_v40 = vsel %vm2480_vm4, %v5731_v61, 0.0  ;;  %v5736_v26 = vmul.f32 %v5731_v61, %v5731_v61 }
0x1aac   :  { %5733 = vadd.xlane.f32.xlu1 %v5732_v40 }
0x1aad   :  { %v5737_v25 = vsel %vm2480_vm4, %v5736_v26, 0.0 }
0x1ab0   :  { %5738 = vadd.xlane.f32.xlu1 %v5737_v25 }
0x1b39   :  { %v5734_v52 = vpop.xlane.xlu1 %5733 }
0x1b3a   :  { %v5735_v55 = vmul.f32 0.03125, %v5734_v52 }
0x1b3c   :  { %v5741_v18 = vmul.f32 %v5735_v55, %v5735_v55  ;;  %v5743_v1 = vsub.f32 %v5731_v61, %v5735_v55 }
0x1b3d   :  { %v5739_v3 = vpop.xlane.xlu1 %5738 }
0x1b3e   :  { %v5740_v4 = vmul.f32 0.03125, %v5739_v3 }
0x1b40   :  { %v5742_v28 = vsub.f32 %v5740_v4, %v5741_v18 }
0x1b42   :  { %v5744_v29 = vadd.f32 1e-05, %v5742_v28 }
0x1b44   :  { %9446 = vrsqrt.f32 %v5744_v29 }
0x1b4e   :  { %v9447_v27 = vpop.eup %9446 }
0x1b4f   :  { %v5746_v53 = vmul.f32 %v9447_v27, %v5743_v1 }
0x1b51   :  { %v5751_v12 = vmul.f32 %v5750_v23, %v5746_v53 }
0x1b53   :  { %v10637_v54 = vadd.f32 %v5755_v13, %v5751_v12 }
0x1b54   :  { %9628 = dma.done.wait [#allocation4 + $0x1], 4096 }
0x1b55   :  { %9629 = vsyncadd [#allocation4 + $0x1], 4294963200 }
0x1b56   :  { %9630 = dma.done.wait [#allocation4 + $0x3], 4096 }
0x1b57   :  { %9631 = vsyncadd [#allocation4 + $0x3], 4294963200  ;;  %5991 = vmatprep.mubr.bf16.mxu0 %v9664_v44  ;;  %9156 = vmatprep.subr.bf16.mxu1 %v9652_v0  ;;  %5777 = sst [smem:[#allocation41]] %s9655_s21  ;;  %s5761_s24 = scalar_lea.hbm %s11039_s11, 24576  ;;  %v5839_v15 = vpack.c.bf16 %v10637_v54, %v10637_v54 }
0x1b58   :  { %9160 = vmatprep.mubr.msk.bf16.mxu1 %vm9653_vm0, %v9652_v0  ;;  %5779 = sst [smem:[#allocation41 + $0x1]] %s9655_s21  ;;  %s9681_s22 = smov [#allocation40]  }
0x1b59   :  { %5781 = sst [smem:[#allocation41 + $0x2]] %s9656_s5  ;;  %s5796_s4 = scalar_lea.hbm %s11040_s12, 24576  ;;  %v10675_v24 = vrot.slane %v5839_v15, 1 }
0x1b5a   :  { %5783 = sst [smem:[#allocation41 + $0x3]] %s9646_s25 }
0x1b5b   :  { %5785 = sst [smem:[#allocation41 + $0x4]] %s9649_s3 }
0x1b5c   :  { %5787 = sst [smem:[#allocation41 + $0x5]] %s9657_s23 }
0x1b5d   :  { %5789 = sst [smem:[#allocation41 + $0x6]] %s9658_s27 }
0x1b5e   :  { %5791 = sst [smem:[#allocation41 + $0x7]] %s9646_s25 }
0x1b5f   :  { %5793 = sst [smem:[#allocation41 + $0x8]] %s9647_s26 }
0x1b60   :  { %5795 = dma.general %s5761_s24, 4096, %s9834_s10, %s9659_s28, %s9681_s22, [#allocation41], %s9840_s30, 0  }
0x1b61   :  { %5812 = sst [smem:[#allocation43]] %s9655_s21  ;;  %s9682_s10 = smov [#allocation42]  }
0x1b62   :  { %5814 = sst [smem:[#allocation43 + $0x1]] %s9655_s21 }
0x1b63   :  { %5816 = sst [smem:[#allocation43 + $0x2]] %s9656_s5 }
0x1b64   :  { %5818 = sst [smem:[#allocation43 + $0x3]] %s9646_s25 }
0x1b65   :  { %5820 = sst [smem:[#allocation43 + $0x4]] %s9649_s3 }
0x1b66   :  { %5822 = sst [smem:[#allocation43 + $0x5]] %s9657_s23 }
0x1b67   :  { %5824 = sst [smem:[#allocation43 + $0x6]] %s9658_s27 }
0x1b68   :  { %5826 = sst [smem:[#allocation43 + $0x7]] %s9646_s25 }
0x1b69   :  { %5828 = sst [smem:[#allocation43 + $0x8]] %s9647_s26 }
0x1b6a   :  { %5830 = dma.general %s5796_s4, 4096, %s9855_s19, %s9662_s6, %s9682_s10, [#allocation43], %s9840_s30, 0  }
0x1b6b   :  { %v5841_v10 = vld [vmem:[#allocation2 + $0x108] sm:$0xff]  ;;  %v5840_v63 = vld [vmem:[#allocation2 + $0x100] sm:$0xff]  ;;  %v5843_v33 = vld [vmem:[#allocation2 + $0x118] sm:$0xff] }
0x1b6c   :  { %v5857_v51 = vld [vmem:[#allocation2 + $0x188] sm:$0xff]  ;;  %5959 = vmatprep.subr.bf16.mxu0 %v5841_v10  ;;  %v5856_v39 = vld [vmem:[#allocation2 + $0x180] sm:$0xff]  ;;  %v5842_v57 = vld [vmem:[#allocation2 + $0x110] sm:$0xff] }
0x1b6d   :  { %5960 = vmatpush1.bf16.msra.mxu0 %v5840_v63  ;;  %v5859_v38 = vld [vmem:[#allocation2 + $0x198] sm:$0xff]  ;;  %v5858_v58 = vld [vmem:[#allocation2 + $0x190] sm:$0xff]  ;;  %v5845_v17 = vld [vmem:[#allocation2 + $0x128] sm:$0xff] }
0x1b6e   :  { %5961 = vmatprep.subr.bf16.mxu0 %v5857_v51  ;;  %v5844_v59 = vld [vmem:[#allocation2 + $0x120] sm:$0xff]  ;;  %v5861_v7 = vld [vmem:[#allocation2 + $0x1a8] sm:$0xff]  ;;  %v5847_v47 = vld [vmem:[#allocation2 + $0x138] sm:$0xff] }
0x1b6f   :  { %v5860_v2 = vld [vmem:[#allocation2 + $0x1a0] sm:$0xff]  ;;  %v5846_v16 = vld [vmem:[#allocation2 + $0x130] sm:$0xff]  ;;  %v5863_v5 = vld [vmem:[#allocation2 + $0x1b8] sm:$0xff] }
0x1b70   :  { %v5862_v32 = vld [vmem:[#allocation2 + $0x1b0] sm:$0xff]  ;;  %v5849_v62 = vld [vmem:[#allocation2 + $0x148] sm:$0xff]  ;;  %v5848_v31 = vld [vmem:[#allocation2 + $0x140] sm:$0xff] }
0x1b71   :  { %5962 = vmatpush1.bf16.msra.mxu0 %v5856_v39  ;;  %v5865_v6 = vld [vmem:[#allocation2 + $0x1c8] sm:$0xff]  ;;  %v5864_v43 = vld [vmem:[#allocation2 + $0x1c0] sm:$0xff]  ;;  %v5851_v41 = vld [vmem:[#allocation2 + $0x158] sm:$0xff] }
0x1b72   :  { %6000 = vmatprep.subr.bf16.mxu0 %v5843_v33  ;;  %v5850_v60 = vld [vmem:[#allocation2 + $0x150] sm:$0xff]  ;;  %v5867_v14 = vld [vmem:[#allocation2 + $0x1d8] sm:$0xff]  ;;  %v5853_v37 = vld [vmem:[#allocation2 + $0x168] sm:$0xff] }
0x1b73   :  { %v5866_v19 = vld [vmem:[#allocation2 + $0x1d0] sm:$0xff]  ;;  %v5852_v50 = vld [vmem:[#allocation2 + $0x160] sm:$0xff]  ;;  %v5869_v11 = vld [vmem:[#allocation2 + $0x1e8] sm:$0xff] }
0x1b74   :  { %9030 = vmatmul.mubr.msk.bf16.vlgmr.msra.gmra.mrb[128].mxu0 %vm251_vm3, %v10675_v24  ;;  %v5868_v20 = vld [vmem:[#allocation2 + $0x1e0] sm:$0xff]  ;;  %v5855_v21 = vld [vmem:[#allocation2 + $0x178] sm:$0xff]  ;;  %v5854_v22 = vld [vmem:[#allocation2 + $0x170] sm:$0xff] }
0x1b75   :  { %6001 = vmatpush1.bf16.msra.mxu0 %v5842_v57  ;;  %6032 = vmatprep.mubr.bf16.mxu0 %v9664_v44  ;;  %v5871_v46 = vld [vmem:[#allocation2 + $0x1f8] sm:$0xff]  ;;  %v5870_v61 = vld [vmem:[#allocation2 + $0x1f0] sm:$0xff]  ;;  %v6320_v40 = vld [vmem:[#allocation3 + $0x108] sm:$0xff] }
0x1b76   :  { %6002 = vmatprep.subr.bf16.mxu0 %v5859_v38  ;;  %v6319_v26 = vld [vmem:[#allocation3 + $0x100] sm:$0xff]  ;;  %v6336_v25 = vld [vmem:[#allocation3 + $0x188] sm:$0xff]  ;;  %v6322_v55 = vld [vmem:[#allocation3 + $0x118] sm:$0xff] }
0x1b77   :  { %v6335_v52 = vld [vmem:[#allocation3 + $0x180] sm:$0xff]  ;;  %v6321_v33 = vld [vmem:[#allocation3 + $0x110] sm:$0xff]  ;;  %v6338_v57 = vld [vmem:[#allocation3 + $0x198] sm:$0xff] }
0x1b78   :  { %v5832_v3 = vld [vmem:[#allocation11 + $0x5] ss:$8 sm:$0xf] }
0x1b79   :  { %6003 = vmatpush1.bf16.msra.mxu0 %v5858_v58  ;;  %v5833_v18 = vld [vmem:[#allocation11 + $0x5] ss:$8 sm:$0xf0] }
0x1b7a   :  { %6041 = vmatprep.subr.bf16.mxu0 %v5845_v17  ;;  %v10700_v4 = vor.u32 %v5833_v18, %v5832_v3  ;;  %v6326_v3 = vld [vmem:[#allocation3 + $0x138] sm:$0xff] }
0x1b7c   :  { %9031 = vmatmul.mubr.msk.bf16.vlgmr.msra.gmra.mrb[132].mxu0 %vm251_vm3, %v10675_v24  ;;  %v5877_v28 = vrot.slane %v10700_v4, %v9877_v8  ;;  %v5881_v29 = vrot.slane %v10700_v4, %v9907_v35  ;;  %v5889_v15 = vrot.slane %v10700_v4, %v9983_v34  ;;  %v5885_v38 = vrot.slane %v10700_v4, %v9910_v36 }
0x1b7d   :  { %6042 = vmatpush1.bf16.msra.mxu0 %v5844_v59  ;;  %6073 = vmatprep.mubr.bf16.mxu0 %v9664_v44 }
0x1b7e   :  { %6043 = vmatprep.subr.bf16.mxu0 %v5861_v7 }
0x1b81   :  { %6044 = vmatpush1.bf16.msra.mxu0 %v5860_v2 }
0x1b82   :  { %6082 = vmatprep.subr.bf16.mxu0 %v5847_v47 }
0x1b84   :  { %9032 = vmatmul.mubr.msk.bf16.vlgmr.msra.gmra.mrb[136].mxu0 %vm251_vm3, %v10675_v24 }
0x1b85   :  { %6083 = vmatpush1.bf16.msra.mxu0 %v5846_v16  ;;  %6114 = vmatprep.mubr.bf16.mxu0 %v9664_v44 }
0x1b86   :  { %6084 = vmatprep.subr.bf16.mxu0 %v5863_v5  ;;  %v5897_v5 = vrot.slane %v10700_v4, %v9992_v56 }
0x1b89   :  { %6085 = vmatpush1.bf16.msra.mxu0 %v5862_v32  ;;  %v6337_v32 = vld [vmem:[#allocation3 + $0x190] sm:$0xff] }
0x1b8a   :  { %6123 = vmatprep.subr.bf16.mxu0 %v5849_v62  ;;  %v6324_v62 = vld [vmem:[#allocation3 + $0x128] sm:$0xff] }
0x1b8c   :  { %9033 = vmatmul.mubr.msk.bf16.vlgmr.msra.gmra.mrb[140].mxu0 %vm251_vm3, %v10675_v24 }
0x1b8d   :  { %6124 = vmatpush1.bf16.msra.mxu0 %v5848_v31  ;;  %6155 = vmatprep.mubr.bf16.mxu0 %v9664_v44 }
0x1b8e   :  { %6125 = vmatprep.subr.bf16.mxu0 %v5865_v6 }
0x1b91   :  { %6126 = vmatpush1.bf16.msra.mxu0 %v5864_v43 }
0x1b92   :  { %6164 = vmatprep.subr.bf16.mxu0 %v5851_v41 }
0x1b94   :  { %9034 = vmatmul.mubr.msk.bf16.vlgmr.msra.gmra.mrb[144].mxu0 %vm251_vm3, %v10675_v24 }
0x1b95   :  { %6165 = vmatpush1.bf16.msra.mxu0 %v5850_v60  ;;  %6196 = vmatprep.mubr.bf16.mxu0 %v9664_v44 }
0x1b96   :  { %6166 = vmatprep.subr.bf16.mxu0 %v5867_v14 }
0x1b99   :  { %6167 = vmatpush1.bf16.msra.mxu0 %v5866_v19 }
0x1b9a   :  { %6205 = vmatprep.subr.bf16.mxu0 %v5853_v37 }
0x1b9c   :  { %9035 = vmatmul.mubr.msk.bf16.vlgmr.msra.gmra.mrb[148].mxu0 %vm251_vm3, %v10675_v24 }
0x1b9d   :  { %6206 = vmatpush1.bf16.msra.mxu0 %v5852_v50  ;;  %6237 = vmatprep.mubr.bf16.mxu0 %v9664_v44 }
0x1b9e   :  { %6207 = vmatprep.subr.bf16.mxu0 %v5869_v11  ;;  %v6323_v11 = vld [vmem:[#allocation3 + $0x120] sm:$0xff] }
0x1ba1   :  { %6208 = vmatpush1.bf16.msra.mxu0 %v5868_v20  ;;  %v6340_v20 = vld [vmem:[#allocation3 + $0x1a8] sm:$0xff] }
0x1ba2   :  { %6246 = vmatprep.subr.bf16.mxu0 %v5855_v21 }
0x1ba4   :  { %9036 = vmatmul.mubr.msk.bf16.vlgmr.msra.gmra.mrb[152].mxu0 %vm251_vm3, %v10675_v24 }
0x1ba5   :  { %6247 = vmatpush1.bf16.msra.mxu0 %v5854_v22  ;;  %6278 = vmatprep.mubr.bf16.mxu0 %v9664_v44  ;;  %v5893_v22 = vrot.slane %v10700_v4, %v10013_v42 }
0x1ba6   :  { %6248 = vmatprep.subr.bf16.mxu0 %v5871_v46 }
0x1ba9   :  { %6249 = vmatpush1.bf16.msra.mxu0 %v5870_v61  ;;  %v5905_v61 = vrot.slane %v10700_v4, %v10019_v49 }
0x1baa   :  { %6355 = vmatprep.subr.bf16.mxu0 %v6320_v40 }
0x1bac   :  { %9037 = vmatmul.mubr.msk.bf16.vlgmr.msra.gmra.mrb[156].mxu0 %vm251_vm3, %v10675_v24 }
0x1bb2   :  { %6356 = vmatpush1.bf16.xpose.msra.mxu0 %v6319_v26 }
0x1bb3   :  { %6357 = vmatprep.subr.bf16.mxu0 %v6336_v25 }
0x1bba   :  { %6358 = vmatpush1.bf16.xpose.msra.mxu0 %v6335_v52 }
0x1bbb   :  { %6395 = vmatprep.subr.bf16.mxu0 %v6322_v55  ;;  %v6339_v55 = vld [vmem:[#allocation3 + $0x1a0] sm:$0xff] }
0x1c47   :  { %v5993_v23 = vpop.f32.mrb[128].mxu0 }
0x1c48   :  { %v5994_v1 = vadd.f32 %v5993_v23, %v5877_v28  ;;  %v5995_v27 = vpop.f32.mrb[129].mxu0 }
0x1c49   :  { %v5996_v13 = vadd.f32 %v5995_v27, %v5881_v29  ;;  %v5997_v53 = vpop.f32.mrb[130].mxu0 }
0x1c4a   :  { %v6287_v12 = vmax.f32 %v5994_v1, 0.0  ;;  %v5998_v10 = vpop.f32.mrb[131].mxu0  ;;  %v5836_v1 = vld [vmem:[#allocation11 + $0x45] ss:$8 sm:$0xf] }
0x1c4b   :  { %v6288_v63 = vmax.f32 %v5996_v13, 0.0  ;;  %v5837_v13 = vld [vmem:[#allocation11 + $0x45] ss:$8 sm:$0xf0] }
0x1c4c   :  { %v6303_v39 = vpack.c.bf16 %v6287_v12, %v6287_v12 }
0x1c4d   :  { %v6304_v51 = vpack.c.bf16 %v6288_v63, %v6288_v63  ;;  %v10716_v63 = vor.u32 %v5837_v13, %v5836_v1  ;;  %v6332_v13 = vld [vmem:[#allocation3 + $0x168] sm:$0xff] }
0x1c4f   :  { %6387 = vmatprep.mubr.bf16.mxu0 %v6304_v51  ;;  %v6034_v24 = vpop.f32.mrb[132].mxu0  ;;  %v6325_v51 = vld [vmem:[#allocation3 + $0x130] sm:$0xff] }
0x1c50   :  { %6388 = vmatmul.mubr.bf16.vlgmr.msra.gmra.mrb[160].mxu0 %v6303_v39  ;;  %v6036_v58 = vpop.f32.mrb[133].mxu0  ;;  %v6035_v47 = vadd.f32 %v6034_v24, %v5885_v38 }
0x1c51   :  { %6396 = vmatpush1.bf16.xpose.msra.mxu0 %v6321_v33  ;;  %v6037_v17 = vadd.f32 %v6036_v58, %v5889_v15  ;;  %v6038_v59 = vpop.f32.mrb[134].mxu0  ;;  %v6342_v15 = vld [vmem:[#allocation3 + $0x1b8] sm:$0xff]  ;;  %v5901_v33 = vrot.slane %v10700_v4, %v10016_v45 }
0x1c52   :  { %v6039_v7 = vpop.f32.mrb[135].mxu0  ;;  %6397 = vmatprep.subr.bf16.mxu0 %v6338_v57  ;;  %v6289_v6 = vmax.f32 %v6035_v47, 0.0  ;;  %v5913_v57 = vrot.slane %v10716_v63, %v9907_v35 }
0x1c53   :  { %v6290_v2 = vmax.f32 %v6037_v17, 0.0  ;;  %v6341_v7 = vld [vmem:[#allocation3 + $0x1b0] sm:$0xff] }
0x1c54   :  { %v6305_v37 = vpack.c.bf16 %v6289_v6, %v6289_v6  ;;  %v5933_v6 = vrot.slane %v10716_v63, %v10016_v45 }
0x1c55   :  { %v6306_v16 = vpack.c.bf16 %v6290_v2, %v6290_v2  ;;  %v6328_v2 = vld [vmem:[#allocation3 + $0x148] sm:$0xff] }
0x1c57   :  { %6427 = vmatprep.mubr.bf16.mxu0 %v6306_v16  ;;  %v6075_v31 = vpop.f32.mrb[136].mxu0 }
0x1c58   :  { %v6077_v43 = vpop.f32.mrb[137].mxu0  ;;  %v6076_v25 = vadd.f32 %v6075_v31, %v5893_v22 }
0x1c59   :  { %6398 = vmatpush1.bf16.xpose.msra.mxu0 %v6337_v32  ;;  %v6078_v41 = vadd.f32 %v6077_v43, %v5897_v5  ;;  %v6079_v60 = vpop.f32.mrb[138].mxu0 }
0x1c5a   :  { %6435 = vmatprep.subr.bf16.mxu0 %v6324_v62  ;;  %v6080_v14 = vpop.f32.mrb[139].mxu0  ;;  %v6291_v28 = vmax.f32 %v6076_v25, 0.0  ;;  %v6344_v60 = vld [vmem:[#allocation3 + $0x1c8] sm:$0xff] }
0x1c5b   :  { %v6292_v19 = vmax.f32 %v6078_v41, 0.0  ;;  %v6327_v41 = vld [vmem:[#allocation3 + $0x140] sm:$0xff] }
0x1c5c   :  { %v6307_v12 = vpack.c.bf16 %v6291_v28, %v6291_v28  ;;  %v6346_v28 = vld [vmem:[#allocation3 + $0x1d8] sm:$0xff] }
0x1c5d   :  { %v6308_v50 = vpack.c.bf16 %v6292_v19, %v6292_v19  ;;  %v5909_v19 = vrot.slane %v10716_v63, %v9877_v8 }
0x1c5f   :  { %v6116_v21 = vpop.f32.mrb[140].mxu0 }
0x1c60   :  { %6428 = vmatmul.mubr.bf16.vlgmr.msra.gmra.mrb[160].mxu0 %v6305_v37  ;;  %v6118_v46 = vpop.f32.mrb[141].mxu0  ;;  %v6117_v17 = vadd.f32 %v6116_v21, %v5901_v33  ;;  %v6348_v33 = vld [vmem:[#allocation3 + $0x1e8] sm:$0xff] }
0x1c61   :  { %6436 = vmatpush1.bf16.xpose.msra.mxu0 %v6323_v11  ;;  %6467 = vmatprep.mubr.bf16.mxu0 %v6308_v50  ;;  %v6120_v40 = vpop.f32.mrb[142].mxu0  ;;  %v6119_v52 = vadd.f32 %v6118_v46, %v5905_v61  ;;  %v5921_v11 = vrot.slane %v10716_v63, %v9983_v34  ;;  %v6343_v61 = vld [vmem:[#allocation3 + $0x1c0] sm:$0xff] }
0x1c62   :  { %6437 = vmatprep.subr.bf16.mxu0 %v6340_v20  ;;  %v6121_v26 = vpop.f32.mrb[143].mxu0  ;;  %v6293_v16 = vmax.f32 %v6117_v17, 0.0  ;;  %v6330_v40 = vld [vmem:[#allocation3 + $0x158] sm:$0xff] }
0x1c63   :  { %v6294_v23 = vmax.f32 %v6119_v52, 0.0  ;;  %v6334_v17 = vld [vmem:[#allocation3 + $0x178] sm:$0xff] }
0x1c64   :  { %v6309_v31 = vpack.c.bf16 %v6293_v16, %v6293_v16 }
0x1c65   :  { %v6310_v10 = vpack.c.bf16 %v6294_v23, %v6294_v23 }
0x1c67   :  { %v6157_v18 = vpop.f32.mrb[144].mxu0 }
0x1c68   :  { %v6159_v29 = vpop.f32.mrb[145].mxu0  ;;  %v6158_v22 = vadd.f32 %v6157_v18, %v5909_v19  ;;  %v5929_v18 = vrot.slane %v10716_v63, %v9992_v56 }
0x1c69   :  { %6438 = vmatpush1.bf16.xpose.msra.mxu0 %v6339_v55  ;;  %v6161_v27 = vpop.f32.mrb[146].mxu0  ;;  %v6160_v59 = vadd.f32 %v6159_v29, %v5913_v57  ;;  %v5917_v29 = vrot.slane %v10716_v63, %v9910_v36 }
0x1c6a   :  { %6475 = vmatprep.subr.bf16.mxu0 %v6326_v3  ;;  %v6162_v53 = vpop.f32.mrb[147].mxu0  ;;  %v6295_v26 = vmax.f32 %v6158_v22, 0.0  ;;  %v6329_v3 = vld [vmem:[#allocation3 + $0x150] sm:$0xff] }
0x1c6b   :  { %v6296_v32 = vmax.f32 %v6160_v59, 0.0  ;;  %v6345_v27 = vld [vmem:[#allocation3 + $0x1d0] sm:$0xff] }
0x1c6c   :  { %v6311_v52 = vpack.c.bf16 %v6295_v26, %v6295_v26 }
0x1c6d   :  { %v6312_v43 = vpack.c.bf16 %v6296_v32, %v6296_v32  ;;  %v6350_v32 = vld [vmem:[#allocation3 + $0x1f8] sm:$0xff] }
0x1c6f   :  { %v6198_v39 = vpop.f32.mrb[148].mxu0 }
0x1c70   :  { %6468 = vmatmul.mubr.bf16.vlgmr.msra.gmra.mrb[160].mxu0 %v6307_v12  ;;  %v6200_v24 = vpop.f32.mrb[149].mxu0  ;;  %v6199_v23 = vadd.f32 %v6198_v39, %v5917_v29  ;;  %v5937_v39 = vrot.slane %v10716_v63, %v10019_v49  ;;  %v6702_v29 = vrot.slane %v10621_v48, %v10019_v49 }
0x1c71   :  { %6476 = vmatpush1.bf16.xpose.msra.mxu0 %v6325_v51  ;;  %6507 = vmatprep.mubr.bf16.mxu0 %v6310_v10  ;;  %v6202_v38 = vpop.f32.mrb[150].mxu0  ;;  %v6201_v46 = vadd.f32 %v6200_v24, %v5921_v11  ;;  %v5925_v24 = vrot.slane %v10716_v63, %v10013_v42 }
0x1c72   :  { %6477 = vmatprep.subr.bf16.mxu0 %v6342_v15  ;;  %v6203_v58 = vpop.f32.mrb[151].mxu0  ;;  %v6297_v53 = vmax.f32 %v6199_v23, 0.0  ;;  %v6331_v15 = vld [vmem:[#allocation3 + $0x160] sm:$0xff] }
0x1c73   :  { %v6298_v25 = vmax.f32 %v6201_v46, 0.0  ;;  %v6347_v58 = vld [vmem:[#allocation3 + $0x1e0] sm:$0xff] }
0x1c74   :  { %v6313_v10 = vpack.c.bf16 %v6297_v53, %v6297_v53 }
0x1c75   :  { %v6314_v55 = vpack.c.bf16 %v6298_v25, %v6298_v25 }
0x1c77   :  { %v6239_v47 = vpop.f32.mrb[152].mxu0 }
0x1c78   :  { %v6241_v5 = vpop.f32.mrb[153].mxu0  ;;  %v6240_v57 = vadd.f32 %v6239_v47, %v5925_v24 }
0x1c79   :  { %6478 = vmatpush1.bf16.xpose.msra.mxu0 %v6341_v7  ;;  %v6243_v62 = vpop.f32.mrb[154].mxu0  ;;  %v6242_v1 = vadd.f32 %v6241_v5, %v5929_v18  ;;  %v6333_v5 = vld [vmem:[#allocation3 + $0x170] sm:$0xff] }
0x1c7a   :  { %6515 = vmatprep.subr.bf16.mxu0 %v6328_v2  ;;  %v6244_v4 = vpop.f32.mrb[155].mxu0  ;;  %v6299_v59 = vmax.f32 %v6240_v57, 0.0  ;;  %v6349_v62 = vld [vmem:[#allocation3 + $0x1f0] sm:$0xff] }
0x1c7b   :  { %v6300_v12 = vmax.f32 %v6242_v1, 0.0  ;;  %v6354_v4 = vrot.slane %v10621_v48, %v9992_v56 }
0x1c7c   :  { %v6315_v2 = vpack.c.bf16 %v6299_v59, %v6299_v59 }
0x1c7d   :  { %v6316_v51 = vpack.c.bf16 %v6300_v12, %v6300_v12 }
0x1c7f   :  { %v6280_v14 = vpop.f32.mrb[156].mxu0 }
0x1c80   :  { %6508 = vmatmul.mubr.bf16.vlgmr.msra.gmra.mrb[160].mxu0 %v6309_v31  ;;  %v10726_v37 = vadd.f32 %v6280_v14, %v5933_v6  ;;  %v6282_v50 = vpop.f32.mrb[157].mxu0 }
0x1c81   :  { %6516 = vmatpush1.bf16.xpose.msra.mxu0 %v6327_v41  ;;  %6547 = vmatprep.mubr.bf16.mxu0 %v6312_v43  ;;  %v6284_v20 = vpop.f32.mrb[158].mxu0  ;;  %v6283_v38 = vadd.f32 %v6282_v50, %v5937_v39 }
0x1c82   :  { %6517 = vmatprep.subr.bf16.mxu0 %v6344_v60  ;;  %v6285_v21 = vpop.f32.mrb[159].mxu0  ;;  %v6301_v63 = vmax.f32 %v10726_v37, 0.0  ;;  %v9448_v37 = vld [vmem:[#allocation8 + $0x40] sm:$0xff]  }
0x1c83   :  { %v6302_v7 = vmax.f32 %v6283_v38, 0.0  ;;  %9157 = vmatpush3.bf16.msra.mxu1 %v9448_v37  ;;  %v9449_v21 = vld [vmem:[#allocation8 + $0x48] sm:$0xff]  }
0x1c84   :  { %v6317_v47 = vpack.c.bf16 %v6301_v63, %v6301_v63  ;;  %9158 = vmatprep.subr.bf16.mxu1 %v9652_v0 }
0x1c85   :  { %v6318_v16 = vpack.c.bf16 %v6302_v7, %v6302_v7 }
0x1c87   :  { %9159 = vmatpush3.bf16.msra.mxu1 %v9449_v21 }
0x1c89   :  { %6518 = vmatpush1.bf16.xpose.msra.mxu0 %v6343_v61 }
0x1c8a   :  { %6555 = vmatprep.subr.bf16.mxu0 %v6330_v40 }
0x1c90   :  { %6548 = vmatmul.mubr.bf16.vlgmr.msra.gmra.mrb[160].mxu0 %v6311_v52 }
0x1c91   :  { %6556 = vmatpush1.bf16.xpose.msra.mxu0 %v6329_v3  ;;  %6587 = vmatprep.mubr.bf16.mxu0 %v6314_v55  ;;  %v6697_v55 = vrot.slane %v10621_v48, %v10016_v45 }
0x1c92   :  { %6557 = vmatprep.subr.bf16.mxu0 %v6346_v28 }
0x1c99   :  { %6558 = vmatpush1.bf16.xpose.msra.mxu0 %v6345_v27 }
0x1c9a   :  { %6595 = vmatprep.subr.bf16.mxu0 %v6332_v13  ;;  %v10753_v13 = vld [vmem:[%s11036_s8 + $0x20] sm:$0xff] }
0x1c9b   :  { %v6715_v53 = vrot.slane %v10753_v13, %v9877_v8 }
0x1ca0   :  { %6588 = vmatmul.mubr.bf16.vlgmr.msra.gmra.mrb[160].mxu0 %v6313_v10 }
0x1ca1   :  { %6596 = vmatpush1.bf16.xpose.msra.mxu0 %v6331_v15  ;;  %6627 = vmatprep.mubr.bf16.mxu0 %v6316_v51 }
0x1ca2   :  { %6597 = vmatprep.subr.bf16.mxu0 %v6348_v33 }
0x1ca9   :  { %6598 = vmatpush1.bf16.xpose.msra.mxu0 %v6347_v58 }
0x1caa   :  { %6635 = vmatprep.subr.bf16.mxu0 %v6334_v17 }
0x1cb0   :  { %6628 = vmatmul.mubr.bf16.vlgmr.msra.gmra.mrb[160].mxu0 %v6315_v2 }
0x1cb1   :  { %6636 = vmatpush1.bf16.xpose.msra.mxu0 %v6333_v5  ;;  %6667 = vmatprep.mubr.bf16.mxu0 %v6318_v16 }
0x1cb2   :  { %6637 = vmatprep.subr.bf16.mxu0 %v6350_v32 }
0x1cb9   :  { %6638 = vmatpush1.bf16.xpose.msra.mxu0 %v6349_v62  ;;  %v6795_v62 = vrot.slane %v10753_v13, %v9907_v35 }
0x1cc0   :  { %6668 = vmatmul.mubr.bf16.vlgmr.msra.gmra.mrb[160].mxu0 %v6317_v47 }
0x1d93   :  { %v6669_v31 = vpop.f32.mrb[160].mxu0 }
0x1d94   :  { %v9183_v6 = vadd.f32 %v6669_v31, %v6354_v4  ;;  %v6671_v43 = vpop.f32.mrb[161].mxu0  ;;  %v6800_v4 = vrot.slane %v10753_v13, %v9910_v36 }
0x1d95   :  { %v6672_v41 = vpop.f32.mrb[162].mxu0 }
0x1d96   :  { %v6676_v60 = vrot.slane %v9183_v6, 6  ;;  %v6673_v14 = vpop.f32.mrb[163].mxu0  ;;  %v6803_v6 = vrot.slane %v10207_v30, 6 }
0x1d98   :  { %v6678_v19 = vadd.f32 %v6676_v60, %v10637_v54 }
0x1d9a   :  { %v6679_v50 = vsel %vm2480_vm4, %v6678_v19, 0.0  ;;  %v6683_v11 = vmul.f32 %v6678_v19, %v6678_v19 }
0x1d9b   :  { %6680 = vadd.xlane.f32.xlu0 %v6679_v50 }
0x1d9c   :  { %v6684_v20 = vsel %vm2480_vm4, %v6683_v11, 0.0 }
0x1d9f   :  { %6685 = vadd.xlane.f32.xlu0 %v6684_v20 }
0x1e28   :  { %v6681_v22 = vpop.xlane.xlu0 %6680 }
0x1e29   :  { %v6682_v46 = vmul.f32 0.03125, %v6681_v22 }
0x1e2b   :  { %v6688_v40 = vmul.f32 %v6682_v46, %v6682_v46  ;;  %v6690_v52 = vsub.f32 %v6678_v19, %v6682_v46 }
0x1e2c   :  { %v6686_v61 = vpop.xlane.xlu0 %6685 }
0x1e2d   :  { %v6687_v26 = vmul.f32 0.03125, %v6686_v61  ;;  %v6824_v61 = vrot.slane %v10753_v13, %v9983_v34 }
0x1e2f   :  { %v6689_v25 = vsub.f32 %v6687_v26, %v6688_v40 }
0x1e31   :  { %v6691_v54 = vadd.f32 1e-05, %v6689_v25  ;;  %v6829_v25 = vrot.slane %v10753_v13, %v10013_v42 }
0x1e33   :  { %9450 = vrsqrt.f32 %v6691_v54 }
0x1e3d   :  { %v9451_v3 = vpop.eup %9450 }
0x1e3e   :  { %v6693_v28 = vmul.f32 %v9451_v3, %v6690_v52 }
0x1e40   :  { %v6698_v18 = vmul.f32 %v6697_v55, %v6693_v28 }
0x1e42   :  { %v6703_v23 = vadd.f32 %v6702_v29, %v6698_v18 }
0x1e44   :  { %v6711_v1 = vpack.c.bf16 %v6703_v23, %v6703_v23 }
0x1e46   :  { %v6717_v27 = vrot.slane %v6711_v1, 1 }
0x1e48   :  { %9161 = vmatmul.mubr.msk.bf16.vlgmr.msra.gmra.mrb[140].mxu1 %vm251_vm3, %v6717_v27 }
0x1f1b   :  { %v6767_v12 = vpop.f32.mrb[140].mxu1 }
0x1f1c   :  { %v6768_v10 = vadd.f32 %v6767_v12, %v6715_v53  ;;  %v9162_v51 = vpop.f32.mrb[141].mxu1 }
0x1f1d   :  { %v6770_v15 = vpop.f32.mrb[142].mxu1 }
0x1f1e   :  { %v6774_v33 = vrot.slane %v6768_v10, 6  ;;  %v9163_v48 = vpop.f32.mrb[143].mxu1 }
0x1f20   :  { %v6776_v24 = vadd.f32 %v6774_v33, %v6703_v23 }
0x1f22   :  { %v6777_v39 = vsel %vm2480_vm4, %v6776_v24, 0.0  ;;  %v6781_v57 = vmul.f32 %v6776_v24, %v6776_v24 }
0x1f23   :  { %6778 = vadd.xlane.f32.xlu1 %v6777_v39 }
0x1f24   :  { %v6782_v38 = vsel %vm2480_vm4, %v6781_v57, 0.0 }
0x1f27   :  { %6783 = vadd.xlane.f32.xlu1 %v6782_v38 }
0x1fb0   :  { %v6779_v58 = vpop.xlane.xlu1 %6778 }
0x1fb1   :  { %v6780_v17 = vmul.f32 0.03125, %v6779_v58 }
0x1fb3   :  { %v6786_v7 = vmul.f32 %v6780_v17, %v6780_v17  ;;  %v6788_v32 = vsub.f32 %v6776_v24, %v6780_v17 }
0x1fb4   :  { %v6784_v59 = vpop.xlane.xlu1 %6783 }
0x1fb5   :  { %v6785_v2 = vmul.f32 0.03125, %v6784_v59 }
0x1fb7   :  { %v6787_v16 = vsub.f32 %v6785_v2, %v6786_v7 }
0x1fb9   :  { %v6789_v5 = vadd.f32 1e-05, %v6787_v16 }
0x1fbb   :  { %9452 = vrsqrt.f32 %v6789_v5 }
0x1fc5   :  { %v9453_v63 = vpop.eup %9452 }
0x1fc6   :  { %v6791_v47 = vmul.f32 %v9453_v63, %v6788_v32 }
0x1fc8   :  { %v6796_v31 = vmul.f32 %v6795_v62, %v6791_v47 }
0x1fca   :  { %v6801_v43 = vadd.f32 %v6800_v4, %v6796_v31 }
0x1fcc   :  { %v6805_v41 = vadd.f32 %v6803_v6, %v6801_v43 }
0x1fce   :  { %v6806_v60 = vsel %vm2480_vm4, %v6805_v41, 0.0  ;;  %v6810_v14 = vmul.f32 %v6805_v41, %v6805_v41 }
0x1fcf   :  { %6807 = vadd.xlane.f32.xlu0 %v6806_v60 }
0x1fd0   :  { %v6811_v19 = vsel %vm2480_vm4, %v6810_v14, 0.0 }
0x1fd1   :  { %6812 = vadd.xlane.f32.xlu1 %v6811_v19 }
0x205c   :  { %v6808_v50 = vpop.xlane.xlu0 %6807 }
0x205d   :  { %v6809_v11 = vmul.f32 0.03125, %v6808_v50 }
0x205e   :  { %v6813_v20 = vpop.xlane.xlu1 %6812 }
0x205f   :  { %v6815_v37 = vmul.f32 %v6809_v11, %v6809_v11  ;;  %v6814_v21 = vmul.f32 0.03125, %v6813_v20  ;;  %v6817_v40 = vsub.f32 %v6805_v41, %v6809_v11 }
0x2061   :  { %v6816_v22 = vsub.f32 %v6814_v21, %v6815_v37 }
0x2063   :  { %v6818_v46 = vadd.f32 1e-05, %v6816_v22 }
0x2065   :  { %9454 = vrsqrt.f32 %v6818_v46 }
0x206f   :  { %v9455_v26 = vpop.eup %9454 }
0x2070   :  { %v6820_v54 = vmul.f32 %v9455_v26, %v6817_v40 }
0x2072   :  { %v6825_v52 = vmul.f32 %v6824_v61, %v6820_v54 }
0x2074   :  { %v10772_v55 = vadd.f32 %v6829_v25, %v6825_v52 }
0x2075   :  { %9632 = dma.done.wait [#allocation4], 4096 }
0x2076   :  { %9633 = vsyncadd [#allocation4], 4294963200 }
0x2077   :  { %9634 = dma.done.wait [#allocation4 + $0x2], 4096 }
0x2078   :  { %9635 = vsyncadd [#allocation4 + $0x2], 4294963200  ;;  %7065 = vmatprep.mubr.bf16.mxu1 %v9664_v44  ;;  %9164 = vmatprep.subr.bf16.mxu0 %v9652_v0  ;;  %6851 = sst [smem:[#allocation45]] %s9655_s21  ;;  %s6835_s0 = scalar_lea.hbm %s11039_s11, 28672  ;;  %v6913_v18 = vpack.c.bf16 %v10772_v55, %v10772_v55  ;;  %v7776_v30 = vrot.slane %v10753_v13, %v10019_v49 }
0x2079   :  { %9168 = vmatprep.mubr.msk.bf16.mxu0 %vm9653_vm0, %v9652_v0  ;;  %6853 = sst [smem:[#allocation45 + $0x1]] %s9655_s21  ;;  %s9683_s7 = smov [#allocation44]  }
0x207a   :  { %6855 = sst [smem:[#allocation45 + $0x2]] %s9656_s5  ;;  %s6870_s22 = scalar_lea.hbm %s11040_s12, 28672  ;;  %v10810_v27 = vrot.slane %v6913_v18, 1 }
0x207b   :  { %6857 = sst [smem:[#allocation45 + $0x3]] %s9646_s25 }
0x207c   :  { %6859 = sst [smem:[#allocation45 + $0x4]] %s9649_s3 }
0x207d   :  { %6861 = sst [smem:[#allocation45 + $0x5]] %s9657_s23 }
0x207e   :  { %6863 = sst [smem:[#allocation45 + $0x6]] %s9658_s27 }
0x207f   :  { %6865 = sst [smem:[#allocation45 + $0x7]] %s9646_s25 }
0x2080   :  { %6867 = sst [smem:[#allocation45 + $0x8]] %s9647_s26 }
0x2081   :  { %6869 = dma.general %s6835_s0, 4096, %s9928_s20, %s9666_s15, %s9683_s7, [#allocation45], %s9840_s30, 0  }
0x2082   :  { %6886 = sst [smem:[#allocation47]] %s9655_s21  ;;  %s9684_s20 = smov [#allocation46]  }
0x2083   :  { %6888 = sst [smem:[#allocation47 + $0x1]] %s9655_s21 }
0x2084   :  { %6890 = sst [smem:[#allocation47 + $0x2]] %s9656_s5 }
0x2085   :  { %6892 = sst [smem:[#allocation47 + $0x3]] %s9646_s25 }
0x2086   :  { %6894 = sst [smem:[#allocation47 + $0x4]] %s9649_s3 }
0x2087   :  { %6896 = sst [smem:[#allocation47 + $0x5]] %s9657_s23 }
0x2088   :  { %6898 = sst [smem:[#allocation47 + $0x6]] %s9658_s27 }
0x2089   :  { %6900 = sst [smem:[#allocation47 + $0x7]] %s9646_s25 }
0x208a   :  { %6902 = sst [smem:[#allocation47 + $0x8]] %s9647_s26 }
0x208b   :  { %6904 = dma.general %s6870_s22, 4096, %s9945_s18, %s9669_s16, %s9684_s20, [#allocation47], %s9840_s30, 0  }
0x208c   :  { %v6915_v3 = vld [vmem:[#allocation2 + $0x8] sm:$0xff]  ;;  %v6914_v28 = vld [vmem:[#allocation2] sm:$0xff]  ;;  %v6917_v1 = vld [vmem:[#allocation2 + $0x18] sm:$0xff] }
0x208d   :  { %v6931_v29 = vld [vmem:[#allocation2 + $0x88] sm:$0xff]  ;;  %7033 = vmatprep.subr.bf16.mxu1 %v6915_v3  ;;  %v6930_v23 = vld [vmem:[#allocation2 + $0x80] sm:$0xff]  ;;  %v6916_v53 = vld [vmem:[#allocation2 + $0x10] sm:$0xff] }
0x208e   :  { %7034 = vmatpush1.bf16.msra.mxu1 %v6914_v28  ;;  %v6933_v12 = vld [vmem:[#allocation2 + $0x98] sm:$0xff]  ;;  %v6932_v10 = vld [vmem:[#allocation2 + $0x90] sm:$0xff]  ;;  %v6919_v51 = vld [vmem:[#allocation2 + $0x28] sm:$0xff] }
0x208f   :  { %7035 = vmatprep.subr.bf16.mxu1 %v6931_v29  ;;  %v6918_v15 = vld [vmem:[#allocation2 + $0x20] sm:$0xff]  ;;  %v6935_v33 = vld [vmem:[#allocation2 + $0xa8] sm:$0xff]  ;;  %v6921_v24 = vld [vmem:[#allocation2 + $0x38] sm:$0xff] }
0x2090   :  { %v6934_v48 = vld [vmem:[#allocation2 + $0xa0] sm:$0xff]  ;;  %v6920_v39 = vld [vmem:[#allocation2 + $0x30] sm:$0xff]  ;;  %v6937_v57 = vld [vmem:[#allocation2 + $0xb8] sm:$0xff] }
0x2091   :  { %v6936_v38 = vld [vmem:[#allocation2 + $0xb0] sm:$0xff]  ;;  %v6923_v58 = vld [vmem:[#allocation2 + $0x48] sm:$0xff]  ;;  %v6922_v17 = vld [vmem:[#allocation2 + $0x40] sm:$0xff] }
0x2092   :  { %7036 = vmatpush1.bf16.msra.mxu1 %v6930_v23  ;;  %v6939_v59 = vld [vmem:[#allocation2 + $0xc8] sm:$0xff]  ;;  %v6938_v7 = vld [vmem:[#allocation2 + $0xc0] sm:$0xff]  ;;  %v6925_v2 = vld [vmem:[#allocation2 + $0x58] sm:$0xff] }
0x2093   :  { %7074 = vmatprep.subr.bf16.mxu1 %v6917_v1  ;;  %v6924_v16 = vld [vmem:[#allocation2 + $0x50] sm:$0xff]  ;;  %v6941_v5 = vld [vmem:[#allocation2 + $0xd8] sm:$0xff]  ;;  %v6927_v62 = vld [vmem:[#allocation2 + $0x68] sm:$0xff] }
0x2094   :  { %v6940_v32 = vld [vmem:[#allocation2 + $0xd0] sm:$0xff]  ;;  %v6926_v63 = vld [vmem:[#allocation2 + $0x60] sm:$0xff]  ;;  %v6943_v47 = vld [vmem:[#allocation2 + $0xe8] sm:$0xff] }
0x2095   :  { %9046 = vmatmul.mubr.msk.bf16.vlgmr.msra.gmra.mrb[144].mxu1 %vm251_vm3, %v10810_v27  ;;  %v6942_v4 = vld [vmem:[#allocation2 + $0xe0] sm:$0xff]  ;;  %v6929_v31 = vld [vmem:[#allocation2 + $0x78] sm:$0xff]  ;;  %v6928_v43 = vld [vmem:[#allocation2 + $0x70] sm:$0xff] }
0x2096   :  { %7075 = vmatpush1.bf16.msra.mxu1 %v6916_v53  ;;  %7106 = vmatprep.mubr.bf16.mxu1 %v9664_v44  ;;  %v6945_v41 = vld [vmem:[#allocation2 + $0xf8] sm:$0xff]  ;;  %v6944_v60 = vld [vmem:[#allocation2 + $0xf0] sm:$0xff]  ;;  %v7394_v14 = vld [vmem:[#allocation3 + $0x8] sm:$0xff] }
0x2097   :  { %7076 = vmatprep.subr.bf16.mxu1 %v6933_v12  ;;  %v7393_v19 = vld [vmem:[#allocation3] sm:$0xff]  ;;  %v7410_v50 = vld [vmem:[#allocation3 + $0x88] sm:$0xff]  ;;  %v7396_v20 = vld [vmem:[#allocation3 + $0x18] sm:$0xff] }
0x2098   :  { %v7409_v11 = vld [vmem:[#allocation3 + $0x80] sm:$0xff]  ;;  %v7412_v12 = vld [vmem:[#allocation3 + $0x98] sm:$0xff] }
0x2099   :  { %v6906_v37 = vld [vmem:[#allocation11 + $0x6] ss:$8 sm:$0xf] }
0x209a   :  { %7077 = vmatpush1.bf16.msra.mxu1 %v6932_v10  ;;  %v6907_v21 = vld [vmem:[#allocation11 + $0x6] ss:$8 sm:$0xf0] }
0x209b   :  { %7115 = vmatprep.subr.bf16.mxu1 %v6919_v51  ;;  %v10835_v22 = vor.u32 %v6907_v21, %v6906_v37  ;;  %v7413_v37 = vld [vmem:[#allocation3 + $0xa0] sm:$0xff]  ;;  %v7400_v21 = vld [vmem:[#allocation3 + $0x38] sm:$0xff] }
0x209d   :  { %9047 = vmatmul.mubr.msk.bf16.vlgmr.msra.gmra.mrb[148].mxu1 %vm251_vm3, %v10810_v27  ;;  %v6951_v46 = vrot.slane %v10835_v22, %v9877_v8  ;;  %v6955_v61 = vrot.slane %v10835_v22, %v9907_v35  ;;  %v6963_v23 = vrot.slane %v10835_v22, %v9983_v34  ;;  %v6959_v10 = vrot.slane %v10835_v22, %v9910_v36 }
0x209e   :  { %7116 = vmatpush1.bf16.msra.mxu1 %v6918_v15  ;;  %7147 = vmatprep.mubr.bf16.mxu1 %v9664_v44 }
0x209f   :  { %7117 = vmatprep.subr.bf16.mxu1 %v6935_v33 }
0x20a2   :  { %7118 = vmatpush1.bf16.msra.mxu1 %v6934_v48 }
0x20a3   :  { %7156 = vmatprep.subr.bf16.mxu1 %v6921_v24 }
0x20a5   :  { %9048 = vmatmul.mubr.msk.bf16.vlgmr.msra.gmra.mrb[152].mxu1 %vm251_vm3, %v10810_v27 }
0x20a6   :  { %7157 = vmatpush1.bf16.msra.mxu1 %v6920_v39  ;;  %7188 = vmatprep.mubr.bf16.mxu1 %v9664_v44 }
0x20a7   :  { %7158 = vmatprep.subr.bf16.mxu1 %v6937_v57 }
0x20aa   :  { %7159 = vmatpush1.bf16.msra.mxu1 %v6936_v38  ;;  %v6971_v38 = vrot.slane %v10835_v22, %v9992_v56 }
0x20ab   :  { %7197 = vmatprep.subr.bf16.mxu1 %v6923_v58  ;;  %v7411_v58 = vld [vmem:[#allocation3 + $0x90] sm:$0xff] }
0x20ad   :  { %9049 = vmatmul.mubr.msk.bf16.vlgmr.msra.gmra.mrb[156].mxu1 %vm251_vm3, %v10810_v27 }
0x20ae   :  { %7198 = vmatpush1.bf16.msra.mxu1 %v6922_v17  ;;  %7229 = vmatprep.mubr.bf16.mxu1 %v9664_v44  ;;  %v7398_v17 = vld [vmem:[#allocation3 + $0x28] sm:$0xff] }
0x20af   :  { %7199 = vmatprep.subr.bf16.mxu1 %v6939_v59 }
0x20b2   :  { %7200 = vmatpush1.bf16.msra.mxu1 %v6938_v7 }
0x20b3   :  { %7238 = vmatprep.subr.bf16.mxu1 %v6925_v2 }
0x20b5   :  { %9050 = vmatmul.mubr.msk.bf16.vlgmr.msra.gmra.mrb[160].mxu1 %vm251_vm3, %v10810_v27 }
0x20b6   :  { %7239 = vmatpush1.bf16.msra.mxu1 %v6924_v16  ;;  %7270 = vmatprep.mubr.bf16.mxu1 %v9664_v44 }
0x20b7   :  { %7240 = vmatprep.subr.bf16.mxu1 %v6941_v5 }
0x20ba   :  { %7241 = vmatpush1.bf16.msra.mxu1 %v6940_v32 }
0x20bb   :  { %7279 = vmatprep.subr.bf16.mxu1 %v6927_v62 }
0x20bd   :  { %9051 = vmatmul.mubr.msk.bf16.vlgmr.msra.gmra.mrb[164].mxu1 %vm251_vm3, %v10810_v27 }
0x20be   :  { %7280 = vmatpush1.bf16.msra.mxu1 %v6926_v63  ;;  %7311 = vmatprep.mubr.bf16.mxu1 %v9664_v44 }
0x20bf   :  { %7281 = vmatprep.subr.bf16.mxu1 %v6943_v47 }
0x20c2   :  { %7282 = vmatpush1.bf16.msra.mxu1 %v6942_v4  ;;  %v7397_v4 = vld [vmem:[#allocation3 + $0x20] sm:$0xff] }
0x20c3   :  { %7320 = vmatprep.subr.bf16.mxu1 %v6929_v31  ;;  %v7414_v31 = vld [vmem:[#allocation3 + $0xa8] sm:$0xff] }
0x20c5   :  { %9052 = vmatmul.mubr.msk.bf16.vlgmr.msra.gmra.mrb[168].mxu1 %vm251_vm3, %v10810_v27 }
0x20c6   :  { %7321 = vmatpush1.bf16.msra.mxu1 %v6928_v43  ;;  %7352 = vmatprep.mubr.bf16.mxu1 %v9664_v44 }
0x20c7   :  { %7322 = vmatprep.subr.bf16.mxu1 %v6945_v41  ;;  %v6967_v41 = vrot.slane %v10835_v22, %v10013_v42 }
0x20ca   :  { %7323 = vmatpush1.bf16.msra.mxu1 %v6944_v60 }
0x20cb   :  { %7429 = vmatprep.subr.bf16.mxu1 %v7394_v14  ;;  %v6979_v14 = vrot.slane %v10835_v22, %v10019_v49 }
0x20cd   :  { %9053 = vmatmul.mubr.msk.bf16.vlgmr.msra.gmra.mrb[172].mxu1 %vm251_vm3, %v10810_v27  ;;  %v7395_v27 = vld [vmem:[#allocation3 + $0x10] sm:$0xff] }
0x20d3   :  { %7430 = vmatpush1.bf16.xpose.msra.mxu1 %v7393_v19 }
0x20d4   :  { %7431 = vmatprep.subr.bf16.mxu1 %v7410_v50 }
0x20db   :  { %7432 = vmatpush1.bf16.xpose.msra.mxu1 %v7409_v11 }
0x20dc   :  { %7469 = vmatprep.subr.bf16.mxu1 %v7396_v20 }
0x2168   :  { %v7067_v40 = vpop.f32.mrb[144].mxu1 }
0x2169   :  { %v7068_v26 = vadd.f32 %v7067_v40, %v6951_v46  ;;  %v7069_v25 = vpop.f32.mrb[145].mxu1 }
0x216a   :  { %v7070_v54 = vadd.f32 %v7069_v25, %v6955_v61  ;;  %v7071_v52 = vpop.f32.mrb[146].mxu1  ;;  %v6910_v25 = vld [vmem:[#allocation11 + $0x46] ss:$8 sm:$0xf] }
0x216b   :  { %v7361_v3 = vmax.f32 %v7068_v26, 0.0  ;;  %v7072_v28 = vpop.f32.mrb[147].mxu1  ;;  %v6911_v52 = vld [vmem:[#allocation11 + $0x46] ss:$8 sm:$0xf0] }
0x216c   :  { %v7362_v29 = vmax.f32 %v7070_v54, 0.0 }
0x216d   :  { %v7377_v1 = vpack.c.bf16 %v7361_v3, %v7361_v3 }
0x216e   :  { %v7378_v18 = vpack.c.bf16 %v7362_v29, %v7362_v29 }
0x2170   :  { %7461 = vmatprep.mubr.bf16.mxu1 %v7378_v18  ;;  %v7108_v53 = vpop.f32.mrb[148].mxu1  ;;  %v10851_v18 = vor.u32 %v6911_v52, %v6910_v25  ;;  %v7419_v52 = vld [vmem:[#allocation3 + $0xd0] sm:$0xff] }
0x2171   :  { %7462 = vmatmul.mubr.bf16.vlgmr.msra.gmra.mrb[176].mxu1 %v7377_v1  ;;  %v7110_v51 = vpop.f32.mrb[149].mxu1  ;;  %v7109_v39 = vadd.f32 %v7108_v53, %v6959_v10  ;;  %v7416_v1 = vld [vmem:[#allocation3 + $0xb8] sm:$0xff]  ;;  %v6975_v53 = vrot.slane %v10835_v22, %v10016_v45 }
0x2172   :  { %7470 = vmatpush1.bf16.xpose.msra.mxu1 %v7395_v27  ;;  %v7111_v15 = vadd.f32 %v7110_v51, %v6963_v23  ;;  %v7112_v33 = vpop.f32.mrb[150].mxu1  ;;  %v7399_v23 = vld [vmem:[#allocation3 + $0x30] sm:$0xff]  ;;  %v6987_v10 = vrot.slane %v10851_v18, %v9907_v35 }
0x2173   :  { %v7113_v48 = vpop.f32.mrb[151].mxu1  ;;  %7471 = vmatprep.subr.bf16.mxu1 %v7412_v12  ;;  %v7363_v7 = vmax.f32 %v7109_v39, 0.0  ;;  %v7402_v39 = vld [vmem:[#allocation3 + $0x48] sm:$0xff] }
0x2174   :  { %v7364_v24 = vmax.f32 %v7111_v15, 0.0 }
0x2175   :  { %v7379_v63 = vpack.c.bf16 %v7363_v7, %v7363_v7 }
0x2176   :  { %v7380_v57 = vpack.c.bf16 %v7364_v24, %v7364_v24  ;;  %v7415_v24 = vld [vmem:[#allocation3 + $0xb0] sm:$0xff] }
0x2178   :  { %7501 = vmatprep.mubr.bf16.mxu1 %v7380_v57  ;;  %v7149_v59 = vpop.f32.mrb[152].mxu1 }
0x2179   :  { %v7151_v2 = vpop.f32.mrb[153].mxu1  ;;  %v7150_v11 = vadd.f32 %v7149_v59, %v6967_v41 }
0x217a   :  { %7472 = vmatpush1.bf16.xpose.msra.mxu1 %v7411_v58  ;;  %v7152_v16 = vadd.f32 %v7151_v2, %v6971_v38  ;;  %v7153_v5 = vpop.f32.mrb[154].mxu1  ;;  %v7007_v2 = vrot.slane %v10851_v18, %v10016_v45 }
0x217b   :  { %7509 = vmatprep.subr.bf16.mxu1 %v7398_v17  ;;  %v7154_v32 = vpop.f32.mrb[155].mxu1  ;;  %v7365_v61 = vmax.f32 %v7150_v11, 0.0  ;;  %v7401_v5 = vld [vmem:[#allocation3 + $0x40] sm:$0xff] }
0x217c   :  { %v7366_v62 = vmax.f32 %v7152_v16, 0.0  ;;  %v7418_v32 = vld [vmem:[#allocation3 + $0xc8] sm:$0xff] }
0x217d   :  { %v7381_v28 = vpack.c.bf16 %v7365_v61, %v7365_v61  ;;  %v7403_v61 = vld [vmem:[#allocation3 + $0x50] sm:$0xff] }
0x217e   :  { %v7382_v47 = vpack.c.bf16 %v7366_v62, %v7366_v62 }
0x2180   :  { %v7190_v43 = vpop.f32.mrb[156].mxu1 }
0x2181   :  { %7502 = vmatmul.mubr.bf16.vlgmr.msra.gmra.mrb[176].mxu1 %v7379_v63  ;;  %v7192_v60 = vpop.f32.mrb[157].mxu1  ;;  %v7191_v33 = vadd.f32 %v7190_v43, %v6975_v53  ;;  %v6983_v63 = vrot.slane %v10851_v18, %v9877_v8  ;;  %v7405_v53 = vld [vmem:[#allocation3 + $0x60] sm:$0xff] }
0x2182   :  { %7510 = vmatpush1.bf16.xpose.msra.mxu1 %v7397_v4  ;;  %7541 = vmatprep.mubr.bf16.mxu1 %v7382_v47  ;;  %v7194_v19 = vpop.f32.mrb[158].mxu1  ;;  %v7193_v20 = vadd.f32 %v7192_v60, %v6979_v14 }
0x2183   :  { %7511 = vmatprep.subr.bf16.mxu1 %v7414_v31  ;;  %v7195_v50 = vpop.f32.mrb[159].mxu1  ;;  %v7367_v38 = vmax.f32 %v7191_v33, 0.0  ;;  %v6995_v31 = vrot.slane %v10851_v18, %v9983_v34  ;;  %v7417_v19 = vld [vmem:[#allocation3 + $0xc0] sm:$0xff] }
0x2184   :  { %v7368_v26 = vmax.f32 %v7193_v20, 0.0  ;;  %v7404_v50 = vld [vmem:[#allocation3 + $0x58] sm:$0xff]  ;;  %v7421_v33 = vld [vmem:[#allocation3 + $0xe0] sm:$0xff] }
0x2185   :  { %v7383_v7 = vpack.c.bf16 %v7367_v38, %v7367_v38 }
0x2186   :  { %v7384_v29 = vpack.c.bf16 %v7368_v26, %v7368_v26  ;;  %v6991_v26 = vrot.slane %v10851_v18, %v9910_v36 }
0x2188   :  { %v7231_v46 = vpop.f32.mrb[160].mxu1 }
0x2189   :  { %v7233_v40 = vpop.f32.mrb[161].mxu1  ;;  %v7232_v60 = vadd.f32 %v7231_v46, %v6983_v63  ;;  %v7003_v46 = vrot.slane %v10851_v18, %v9992_v56 }
0x218a   :  { %7512 = vmatpush1.bf16.xpose.msra.mxu1 %v7413_v37  ;;  %v7235_v54 = vpop.f32.mrb[162].mxu1  ;;  %v7234_v48 = vadd.f32 %v7233_v40, %v6987_v10  ;;  %v7420_v40 = vld [vmem:[#allocation3 + $0xd8] sm:$0xff]  ;;  %v6999_v10 = vrot.slane %v10851_v18, %v10013_v42 }
0x218b   :  { %7549 = vmatprep.subr.bf16.mxu1 %v7400_v21  ;;  %v7236_v3 = vpop.f32.mrb[163].mxu1  ;;  %v7369_v11 = vmax.f32 %v7232_v60, 0.0  ;;  %v9457_v60 = vld [vmem:[#allocation8 + $0x58] sm:$0xff]  }
0x218c   :  { %v7370_v17 = vmax.f32 %v7234_v48, 0.0  ;;  %v7406_v3 = vld [vmem:[#allocation3 + $0x68] sm:$0xff]  ;;  %v7408_v48 = vld [vmem:[#allocation3 + $0x78] sm:$0xff] }
0x218d   :  { %v7385_v37 = vpack.c.bf16 %v7369_v11, %v7369_v11 }
0x218e   :  { %v7386_v16 = vpack.c.bf16 %v7370_v17, %v7370_v17  ;;  %v7407_v17 = vld [vmem:[#allocation3 + $0x70] sm:$0xff] }
0x2190   :  { %v7272_v27 = vpop.f32.mrb[164].mxu1 }
0x2191   :  { %7542 = vmatmul.mubr.bf16.vlgmr.msra.gmra.mrb[176].mxu1 %v7381_v28  ;;  %v7274_v12 = vpop.f32.mrb[165].mxu1  ;;  %v7273_v25 = vadd.f32 %v7272_v27, %v6991_v26  ;;  %v7011_v27 = vrot.slane %v10851_v18, %v10019_v49 }
0x2192   :  { %7550 = vmatpush1.bf16.xpose.msra.mxu1 %v7399_v23  ;;  %7581 = vmatprep.mubr.bf16.mxu1 %v7384_v29  ;;  %v7276_v51 = vpop.f32.mrb[166].mxu1  ;;  %v7275_v14 = vadd.f32 %v7274_v12, %v6995_v31  ;;  %v7422_v12 = vld [vmem:[#allocation3 + $0xe8] sm:$0xff] }
0x2193   :  { %7551 = vmatprep.subr.bf16.mxu1 %v7416_v1  ;;  %v7277_v15 = vpop.f32.mrb[167].mxu1  ;;  %v7371_v28 = vmax.f32 %v7273_v25, 0.0 }
0x2194   :  { %v7372_v20 = vmax.f32 %v7275_v14, 0.0 }
0x2195   :  { %v7387_v23 = vpack.c.bf16 %v7371_v28, %v7371_v28 }
0x2196   :  { %v7388_v21 = vpack.c.bf16 %v7372_v20, %v7372_v20 }
0x2198   :  { %v7313_v57 = vpop.f32.mrb[168].mxu1 }
0x2199   :  { %v7315_v58 = vpop.f32.mrb[169].mxu1  ;;  %v7314_v51 = vadd.f32 %v7313_v57, %v6999_v10 }
0x219a   :  { %7552 = vmatpush1.bf16.xpose.msra.mxu1 %v7415_v24  ;;  %v7317_v59 = vpop.f32.mrb[170].mxu1  ;;  %v7316_v54 = vadd.f32 %v7315_v58, %v7003_v46 }
0x219b   :  { %7589 = vmatprep.subr.bf16.mxu1 %v7402_v39  ;;  %v7318_v22 = vpop.f32.mrb[171].mxu1  ;;  %v7373_v24 = vmax.f32 %v7314_v51, 0.0  ;;  %v7424_v59 = vld [vmem:[#allocation3 + $0xf8] sm:$0xff] }
0x219c   :  { %v7374_v29 = vmax.f32 %v7316_v54, 0.0  ;;  %v7423_v22 = vld [vmem:[#allocation3 + $0xf0] sm:$0xff] }
0x219d   :  { %v7389_v38 = vpack.c.bf16 %v7373_v24, %v7373_v24 }
0x219e   :  { %v7390_v1 = vpack.c.bf16 %v7374_v29, %v7374_v29 }
0x21a0   :  { %v7354_v62 = vpop.f32.mrb[172].mxu1 }
0x21a1   :  { %7582 = vmatmul.mubr.bf16.vlgmr.msra.gmra.mrb[176].mxu1 %v7383_v7  ;;  %v10861_v47 = vadd.f32 %v7354_v62, %v7007_v2  ;;  %v7356_v4 = vpop.f32.mrb[173].mxu1  ;;  %v7428_v7 = vrot.slane %v10753_v13, %v9992_v56 }
0x21a2   :  { %7590 = vmatpush1.bf16.xpose.msra.mxu1 %v7401_v5  ;;  %7621 = vmatprep.mubr.bf16.mxu1 %v7386_v16  ;;  %v7358_v43 = vpop.f32.mrb[174].mxu1  ;;  %v7357_v15 = vadd.f32 %v7356_v4, %v7011_v27 }
0x21a3   :  { %7591 = vmatprep.subr.bf16.mxu1 %v7418_v32  ;;  %v7359_v41 = vpop.f32.mrb[175].mxu1  ;;  %v7375_v18 = vmax.f32 %v10861_v47, 0.0  ;;  %v9456_v47 = vld [vmem:[#allocation8 + $0x50] sm:$0xff]  }
0x21a4   :  { %v7376_v39 = vmax.f32 %v7357_v15, 0.0  ;;  %9165 = vmatpush3.bf16.msra.mxu0 %v9456_v47 }
0x21a5   :  { %v7391_v57 = vpack.c.bf16 %v7375_v18, %v7375_v18  ;;  %9166 = vmatprep.subr.bf16.mxu0 %v9652_v0 }
0x21a6   :  { %v7392_v58 = vpack.c.bf16 %v7376_v39, %v7376_v39 }
0x21a8   :  { %9167 = vmatpush3.bf16.msra.mxu0 %v9457_v60 }
0x21aa   :  { %7592 = vmatpush1.bf16.xpose.msra.mxu1 %v7417_v19 }
0x21ab   :  { %7629 = vmatprep.subr.bf16.mxu1 %v7404_v50 }
0x21b1   :  { %7622 = vmatmul.mubr.bf16.vlgmr.msra.gmra.mrb[176].mxu1 %v7385_v37 }
0x21b2   :  { %7630 = vmatpush1.bf16.xpose.msra.mxu1 %v7403_v61  ;;  %7661 = vmatprep.mubr.bf16.mxu1 %v7388_v21  ;;  %v7771_v61 = vrot.slane %v10753_v13, %v10016_v45 }
0x21b3   :  { %7631 = vmatprep.subr.bf16.mxu1 %v7420_v40 }
0x21ba   :  { %7632 = vmatpush1.bf16.xpose.msra.mxu1 %v7419_v52  ;;  %v10891_v52 = vld [vmem:[%s11036_s8 + $0x28] sm:$0xff] }
0x21bb   :  { %7669 = vmatprep.subr.bf16.mxu1 %v7406_v3  ;;  %v7789_v3 = vrot.slane %v10891_v52, %v9877_v8 }
0x21c1   :  { %7662 = vmatmul.mubr.bf16.vlgmr.msra.gmra.mrb[176].mxu1 %v7387_v23 }
0x21c2   :  { %7670 = vmatpush1.bf16.xpose.msra.mxu1 %v7405_v53  ;;  %7701 = vmatprep.mubr.bf16.mxu1 %v7390_v1 }
0x21c3   :  { %7671 = vmatprep.subr.bf16.mxu1 %v7422_v12 }
0x21ca   :  { %7672 = vmatpush1.bf16.xpose.msra.mxu1 %v7421_v33 }
0x21cb   :  { %7709 = vmatprep.subr.bf16.mxu1 %v7408_v48 }
0x21d1   :  { %7702 = vmatmul.mubr.bf16.vlgmr.msra.gmra.mrb[176].mxu1 %v7389_v38 }
0x21d2   :  { %7710 = vmatpush1.bf16.xpose.msra.mxu1 %v7407_v17  ;;  %7741 = vmatprep.mubr.bf16.mxu1 %v7392_v58 }
0x21d3   :  { %7711 = vmatprep.subr.bf16.mxu1 %v7424_v59  ;;  %v7869_v59 = vrot.slane %v10891_v52, %v9907_v35 }
0x21da   :  { %7712 = vmatpush1.bf16.xpose.msra.mxu1 %v7423_v22 }
0x21e1   :  { %7742 = vmatmul.mubr.bf16.vlgmr.msra.gmra.mrb[176].mxu1 %v7391_v57  ;;  %v7874_v57 = vrot.slane %v10891_v52, %v9910_v36 }
0x22b4   :  { %v7743_v2 = vpop.f32.mrb[176].mxu1 }
0x22b5   :  { %v9184_v16 = vadd.f32 %v7743_v2, %v7428_v7  ;;  %v7745_v5 = vpop.f32.mrb[177].mxu1 }
0x22b6   :  { %v7746_v32 = vpop.f32.mrb[178].mxu1 }
0x22b7   :  { %v7750_v62 = vrot.slane %v9184_v16, 6  ;;  %v7747_v63 = vpop.f32.mrb[179].mxu1 }
0x22b9   :  { %v7752_v4 = vadd.f32 %v7750_v62, %v10772_v55 }
0x22bb   :  { %v7753_v31 = vsel %vm2480_vm4, %v7752_v4, 0.0  ;;  %v7757_v43 = vmul.f32 %v7752_v4, %v7752_v4 }
0x22bc   :  { %7754 = vadd.xlane.f32.xlu0 %v7753_v31 }
0x22bd   :  { %v7758_v41 = vsel %vm2480_vm4, %v7757_v43, 0.0 }
0x22c0   :  { %7759 = vadd.xlane.f32.xlu0 %v7758_v41 }
0x22d6   :  { %7876 = vrot.lane.b32.xlu0 %v6803_v6, %s9675_s2 }
0x2349   :  { %v7755_v14 = vpop.xlane.xlu0 %7754 }
0x234a   :  { %v7756_v19 = vmul.f32 0.03125, %v7755_v14 }
0x234c   :  { %v7762_v50 = vmul.f32 %v7756_v19, %v7756_v19  ;;  %v7764_v21 = vsub.f32 %v7752_v4, %v7756_v19  ;;  %v7898_v19 = vrot.slane %v10891_v52, %v9983_v34 }
0x234d   :  { %v7760_v55 = vpop.xlane.xlu0 %7759 }
0x234e   :  { %v7761_v11 = vmul.f32 0.03125, %v7760_v55 }
0x2350   :  { %v7763_v20 = vsub.f32 %v7761_v11, %v7762_v50  ;;  %v7903_v11 = vrot.slane %v10891_v52, %v10013_v42 }
0x2351   :  { %v7877_v2 = vpop.permute.xlu0 %7876 }
0x2352   :  { %v7765_v37 = vadd.f32 1e-05, %v7763_v20 }
0x2354   :  { %9458 = vrsqrt.f32 %v7765_v37 }
0x235e   :  { %v9459_v40 = vpop.eup %9458 }
0x235f   :  { %v7767_v26 = vmul.f32 %v9459_v40, %v7764_v21 }
0x2361   :  { %v7772_v6 = vmul.f32 %v7771_v61, %v7767_v26 }
0x2363   :  { %v7777_v46 = vadd.f32 %v7776_v30, %v7772_v6 }
0x2365   :  { %v7785_v25 = vpack.c.bf16 %v7777_v46, %v7777_v46 }
0x2367   :  { %v7791_v54 = vrot.slane %v7785_v25, 1 }
0x2369   :  { %9169 = vmatmul.mubr.msk.bf16.vlgmr.msra.gmra.mrb[164].mxu0 %vm251_vm3, %v7791_v54 }
0x243c   :  { %v7841_v28 = vpop.f32.mrb[164].mxu0 }
0x243d   :  { %v7842_v29 = vadd.f32 %v7841_v28, %v7789_v3  ;;  %v9170_v23 = vpop.f32.mrb[165].mxu0 }
0x243e   :  { %v7844_v1 = vpop.f32.mrb[166].mxu0 }
0x243f   :  { %v7848_v53 = vrot.slane %v7842_v29, 6  ;;  %v9171_v13 = vpop.f32.mrb[167].mxu0 }
0x2441   :  { %v7850_v12 = vadd.f32 %v7848_v53, %v7777_v46 }
0x2443   :  { %v7851_v10 = vsel %vm2480_vm4, %v7850_v12, 0.0  ;;  %v7855_v27 = vmul.f32 %v7850_v12, %v7850_v12 }
0x2444   :  { %7852 = vadd.xlane.f32.xlu1 %v7851_v10 }
0x2445   :  { %v7856_v51 = vsel %vm2480_vm4, %v7855_v27, 0.0 }
0x2448   :  { %7857 = vadd.xlane.f32.xlu1 %v7856_v51 }
0x24d1   :  { %v7853_v15 = vpop.xlane.xlu1 %7852 }
0x24d2   :  { %v7854_v33 = vmul.f32 0.03125, %v7853_v15 }
0x24d4   :  { %v7860_v24 = vmul.f32 %v7854_v33, %v7854_v33  ;;  %v7862_v17 = vsub.f32 %v7850_v12, %v7854_v33 }
0x24d5   :  { %v7858_v48 = vpop.xlane.xlu1 %7857 }
0x24d6   :  { %v7859_v39 = vmul.f32 0.03125, %v7858_v48 }
0x24d8   :  { %v7861_v38 = vsub.f32 %v7859_v39, %v7860_v24 }
0x24da   :  { %v7863_v58 = vadd.f32 1e-05, %v7861_v38 }
0x24dc   :  { %9460 = vrsqrt.f32 %v7863_v58 }
0x24e6   :  { %v9461_v22 = vpop.eup %9460 }
0x24e7   :  { %v7865_v18 = vmul.f32 %v9461_v22, %v7862_v17 }
0x24e9   :  { %v7870_v7 = vmul.f32 %v7869_v59, %v7865_v18 }
0x24eb   :  { %v7875_v16 = vadd.f32 %v7874_v57, %v7870_v7 }
0x24ed   :  { %v7879_v5 = vadd.f32 %v7877_v2, %v7875_v16 }
0x24ef   :  { %v7880_v32 = vsel %vm2480_vm4, %v7879_v5, 0.0  ;;  %v7884_v62 = vmul.f32 %v7879_v5, %v7879_v5 }
0x24f0   :  { %7881 = vadd.xlane.f32.xlu1 %v7880_v32 }
0x24f1   :  { %v7885_v63 = vsel %vm2480_vm4, %v7884_v62, 0.0 }
0x24f4   :  { %7886 = vadd.xlane.f32.xlu1 %v7885_v63 }
0x257d   :  { %v7882_v4 = vpop.xlane.xlu1 %7881 }
0x257e   :  { %v7883_v31 = vmul.f32 0.03125, %v7882_v4 }
0x2580   :  { %v7889_v41 = vmul.f32 %v7883_v31, %v7883_v31  ;;  %v7891_v55 = vsub.f32 %v7879_v5, %v7883_v31 }
0x2581   :  { %v7887_v43 = vpop.xlane.xlu1 %7886 }
0x2582   :  { %v7888_v47 = vmul.f32 0.03125, %v7887_v43 }
0x2584   :  { %v7890_v60 = vsub.f32 %v7888_v47, %v7889_v41 }
0x2586   :  { %v7892_v14 = vadd.f32 1e-05, %v7890_v60 }
0x2588   :  { %9462 = vrsqrt.f32 %v7892_v14 }
0x2592   :  { %v9463_v50 = vpop.eup %9462 }
0x2593   :  { %v7894_v20 = vmul.f32 %v9463_v50, %v7891_v55 }
0x2595   :  { %v7899_v37 = vmul.f32 %v7898_v19, %v7894_v20 }
0x2597   :  { %v10907_v21 = vadd.f32 %v7903_v11, %v7899_v37 }
0x2598   :  { %9636 = dma.done.wait [#allocation4 + $0x1], 4096 }
0x2599   :  { %9637 = vsyncadd [#allocation4 + $0x1], 4294963200 }
0x259a   :  { %9638 = dma.done.wait [#allocation4 + $0x3], 4096 }
0x259b   :  { %9639 = vsyncadd [#allocation4 + $0x3], 4294963200  ;;  %8069 = vmatprep.mubr.bf16.mxu0 %v9664_v44  ;;  %9172 = vmatprep.subr.bf16.mxu1 %v9652_v0  ;;  %v7919_v61 = vld [vmem:[#allocation2 + $0x108] sm:$0xff]  ;;  %v7918_v40 = vld [vmem:[#allocation2 + $0x100] sm:$0xff]  ;;  %v7917_v30 = vpack.c.bf16 %v10907_v21, %v10907_v21 }
0x259c   :  { %9176 = vmatprep.mubr.msk.bf16.mxu1 %vm9653_vm0, %v9652_v0  ;;  %v7935_v26 = vld [vmem:[#allocation2 + $0x188] sm:$0xff]  ;;  %8037 = vmatprep.subr.bf16.mxu0 %v7919_v61  ;;  %v7934_v6 = vld [vmem:[#allocation2 + $0x180] sm:$0xff]  ;;  %v7921_v46 = vld [vmem:[#allocation2 + $0x118] sm:$0xff] }
0x259d   :  { %8038 = vmatpush1.bf16.msra.mxu0 %v7918_v40  ;;  %v10915_v25 = vrot.slane %v7917_v30, 1  ;;  %v7920_v54 = vld [vmem:[#allocation2 + $0x110] sm:$0xff]  ;;  %v7937_v3 = vld [vmem:[#allocation2 + $0x198] sm:$0xff]  ;;  %v7923_v29 = vld [vmem:[#allocation2 + $0x128] sm:$0xff] }
0x259e   :  { %8039 = vmatprep.subr.bf16.mxu0 %v7935_v26  ;;  %v7936_v28 = vld [vmem:[#allocation2 + $0x190] sm:$0xff]  ;;  %v7922_v23 = vld [vmem:[#allocation2 + $0x120] sm:$0xff]  ;;  %v7939_v1 = vld [vmem:[#allocation2 + $0x1a8] sm:$0xff] }
0x259f   :  { %v7938_v53 = vld [vmem:[#allocation2 + $0x1a0] sm:$0xff]  ;;  %v7925_v13 = vld [vmem:[#allocation2 + $0x138] sm:$0xff]  ;;  %v7924_v12 = vld [vmem:[#allocation2 + $0x130] sm:$0xff] }
0x25a0   :  { %v7941_v10 = vld [vmem:[#allocation2 + $0x1b8] sm:$0xff]  ;;  %v7940_v27 = vld [vmem:[#allocation2 + $0x1b0] sm:$0xff]  ;;  %v7927_v51 = vld [vmem:[#allocation2 + $0x148] sm:$0xff] }
0x25a1   :  { %8040 = vmatpush1.bf16.msra.mxu0 %v7934_v6  ;;  %v7926_v15 = vld [vmem:[#allocation2 + $0x140] sm:$0xff]  ;;  %v7943_v33 = vld [vmem:[#allocation2 + $0x1c8] sm:$0xff]  ;;  %v7929_v24 = vld [vmem:[#allocation2 + $0x158] sm:$0xff] }
0x25a2   :  { %8078 = vmatprep.subr.bf16.mxu0 %v7921_v46  ;;  %v7942_v48 = vld [vmem:[#allocation2 + $0x1c0] sm:$0xff]  ;;  %v7928_v39 = vld [vmem:[#allocation2 + $0x150] sm:$0xff]  ;;  %v7945_v38 = vld [vmem:[#allocation2 + $0x1d8] sm:$0xff] }
0x25a3   :  { %v7944_v58 = vld [vmem:[#allocation2 + $0x1d0] sm:$0xff]  ;;  %v7931_v17 = vld [vmem:[#allocation2 + $0x168] sm:$0xff]  ;;  %v7930_v59 = vld [vmem:[#allocation2 + $0x160] sm:$0xff] }
0x25a4   :  { %9058 = vmatmul.mubr.msk.bf16.vlgmr.msra.gmra.mrb[168].mxu0 %vm251_vm3, %v10915_v25  ;;  %v7947_v22 = vld [vmem:[#allocation2 + $0x1e8] sm:$0xff]  ;;  %v7946_v18 = vld [vmem:[#allocation2 + $0x1e0] sm:$0xff]  ;;  %v7933_v57 = vld [vmem:[#allocation2 + $0x178] sm:$0xff] }
0x25a5   :  { %8079 = vmatpush1.bf16.msra.mxu0 %v7920_v54  ;;  %8110 = vmatprep.mubr.bf16.mxu0 %v9664_v44  ;;  %v7932_v7 = vld [vmem:[#allocation2 + $0x170] sm:$0xff]  ;;  %v7949_v2 = vld [vmem:[#allocation2 + $0x1f8] sm:$0xff]  ;;  %v8398_v5 = vld [vmem:[#allocation3 + $0x108] sm:$0xff] }
0x25a6   :  { %8080 = vmatprep.subr.bf16.mxu0 %v7937_v3  ;;  %v7948_v16 = vld [vmem:[#allocation2 + $0x1f0] sm:$0xff]  ;;  %v8397_v32 = vld [vmem:[#allocation3 + $0x100] sm:$0xff]  ;;  %v8414_v62 = vld [vmem:[#allocation3 + $0x188] sm:$0xff] }
0x25a7   :  { %v8413_v63 = vld [vmem:[#allocation3 + $0x180] sm:$0xff]  ;;  %v8400_v4 = vld [vmem:[#allocation3 + $0x118] sm:$0xff]  ;;  %v8399_v30 = vld [vmem:[#allocation3 + $0x110] sm:$0xff] }
0x25a8   :  { %v7910_v31 = vld [vmem:[#allocation11 + $0x7] ss:$8 sm:$0xf] }
0x25a9   :  { %8081 = vmatpush1.bf16.msra.mxu0 %v7936_v28  ;;  %v7911_v43 = vld [vmem:[#allocation11 + $0x7] ss:$8 sm:$0xf0] }
0x25aa   :  { %8119 = vmatprep.subr.bf16.mxu0 %v7923_v29  ;;  %v10940_v41 = vor.u32 %v7911_v43, %v7910_v31  ;;  %v8416_v46 = vld [vmem:[#allocation3 + $0x198] sm:$0xff] }
0x25ac   :  { %9059 = vmatmul.mubr.msk.bf16.vlgmr.msra.gmra.mrb[172].mxu0 %vm251_vm3, %v10915_v25  ;;  %v7959_v47 = vrot.slane %v10940_v41, %v9907_v35  ;;  %v7967_v40 = vrot.slane %v10940_v41, %v9983_v34 }
0x25ad   :  { %8120 = vmatpush1.bf16.msra.mxu0 %v7922_v23  ;;  %8151 = vmatprep.mubr.bf16.mxu0 %v9664_v44 }
0x25ae   :  { %8121 = vmatprep.subr.bf16.mxu0 %v7939_v1 }
0x25b1   :  { %8122 = vmatpush1.bf16.msra.mxu0 %v7938_v53 }
0x25b2   :  { %8160 = vmatprep.subr.bf16.mxu0 %v7925_v13  ;;  %v7975_v13 = vrot.slane %v10940_v41, %v9992_v56 }
0x25b4   :  { %9060 = vmatmul.mubr.msk.bf16.vlgmr.msra.gmra.mrb[176].mxu0 %vm251_vm3, %v10915_v25 }
0x25b5   :  { %8161 = vmatpush1.bf16.msra.mxu0 %v7924_v12  ;;  %8192 = vmatprep.mubr.bf16.mxu0 %v9664_v44  ;;  %v8415_v12 = vld [vmem:[#allocation3 + $0x190] sm:$0xff] }
0x25b6   :  { %8162 = vmatprep.subr.bf16.mxu0 %v7941_v10  ;;  %v8402_v10 = vld [vmem:[#allocation3 + $0x128] sm:$0xff] }
0x25b9   :  { %8163 = vmatpush1.bf16.msra.mxu0 %v7940_v27 }
0x25ba   :  { %8201 = vmatprep.subr.bf16.mxu0 %v7927_v51 }
0x25bc   :  { %9061 = vmatmul.mubr.msk.bf16.vlgmr.msra.gmra.mrb[180].mxu0 %vm251_vm3, %v10915_v25 }
0x25bd   :  { %8202 = vmatpush1.bf16.msra.mxu0 %v7926_v15  ;;  %8233 = vmatprep.mubr.bf16.mxu0 %v9664_v44 }
0x25be   :  { %8203 = vmatprep.subr.bf16.mxu0 %v7943_v33 }
0x25c1   :  { %8204 = vmatpush1.bf16.msra.mxu0 %v7942_v48 }
0x25c2   :  { %8242 = vmatprep.subr.bf16.mxu0 %v7929_v24 }
0x25c4   :  { %9062 = vmatmul.mubr.msk.bf16.vlgmr.msra.gmra.mrb[184].mxu0 %vm251_vm3, %v10915_v25 }
0x25c5   :  { %8243 = vmatpush1.bf16.msra.mxu0 %v7928_v39  ;;  %8274 = vmatprep.mubr.bf16.mxu0 %v9664_v44 }
0x25c6   :  { %8244 = vmatprep.subr.bf16.mxu0 %v7945_v38 }
0x25c9   :  { %8245 = vmatpush1.bf16.msra.mxu0 %v7944_v58 }
0x25ca   :  { %8283 = vmatprep.subr.bf16.mxu0 %v7931_v17  ;;  %v8401_v17 = vld [vmem:[#allocation3 + $0x120] sm:$0xff] }
0x25cc   :  { %9063 = vmatmul.mubr.msk.bf16.vlgmr.msra.gmra.mrb[188].mxu0 %vm251_vm3, %v10915_v25 }
0x25cd   :  { %8284 = vmatpush1.bf16.msra.mxu0 %v7930_v59  ;;  %8315 = vmatprep.mubr.bf16.mxu0 %v9664_v44  ;;  %v8418_v59 = vld [vmem:[#allocation3 + $0x1a8] sm:$0xff] }
0x25ce   :  { %8285 = vmatprep.subr.bf16.mxu0 %v7947_v22 }
0x25d1   :  { %8286 = vmatpush1.bf16.msra.mxu0 %v7946_v18  ;;  %v7971_v18 = vrot.slane %v10940_v41, %v10013_v42 }
0x25d2   :  { %8324 = vmatprep.subr.bf16.mxu0 %v7933_v57 }
0x25d4   :  { %9064 = vmatmul.mubr.msk.bf16.vlgmr.msra.gmra.mrb[192].mxu0 %vm251_vm3, %v10915_v25 }
0x25d5   :  { %8325 = vmatpush1.bf16.msra.mxu0 %v7932_v7  ;;  %8356 = vmatprep.mubr.bf16.mxu0 %v9664_v44  ;;  %v7955_v44 = vrot.slane %v10940_v41, %v9877_v8  ;;  %v7983_v7 = vrot.slane %v10940_v41, %v10019_v49 }
0x25d6   :  { %8326 = vmatprep.subr.bf16.mxu0 %v7949_v2 }
0x25d9   :  { %8327 = vmatpush1.bf16.msra.mxu0 %v7948_v16 }
0x25da   :  { %8433 = vmatprep.subr.bf16.mxu0 %v8398_v5 }
0x25dc   :  { %9065 = vmatmul.mubr.msk.bf16.vlgmr.msra.gmra.mrb[196].mxu0 %vm251_vm3, %v10915_v25  ;;  %v7963_v25 = vrot.slane %v10940_v41, %v9910_v36 }
0x25e2   :  { %8434 = vmatpush1.bf16.xpose.msra.mxu0 %v8397_v32 }
0x25e3   :  { %8435 = vmatprep.subr.bf16.mxu0 %v8414_v62  ;;  %v8417_v62 = vld [vmem:[#allocation3 + $0x1a0] sm:$0xff] }
0x25ea   :  { %8436 = vmatpush1.bf16.xpose.msra.mxu0 %v8413_v63  ;;  %v8404_v63 = vld [vmem:[#allocation3 + $0x138] sm:$0xff] }
0x25eb   :  { %8473 = vmatprep.subr.bf16.mxu0 %v8400_v4 }
0x2677   :  { %v8071_v60 = vpop.f32.mrb[168].mxu0 }
0x2678   :  { %v8072_v14 = vadd.f32 %v8071_v60, %v7955_v44  ;;  %v8073_v19 = vpop.f32.mrb[169].mxu0 }
0x2679   :  { %v8074_v55 = vadd.f32 %v8073_v19, %v7959_v47  ;;  %v8075_v50 = vpop.f32.mrb[170].mxu0  ;;  %v7914_v47 = vld [vmem:[#allocation11 + $0x47] ss:$8 sm:$0xf] }
0x267a   :  { %v8365_v11 = vmax.f32 %v8072_v14, 0.0  ;;  %v8076_v20 = vpop.f32.mrb[171].mxu0  ;;  %v7915_v14 = vld [vmem:[#allocation11 + $0x47] ss:$8 sm:$0xf0] }
0x267b   :  { %v8366_v37 = vmax.f32 %v8074_v55, 0.0  ;;  %v8403_v20 = vld [vmem:[#allocation3 + $0x130] sm:$0xff] }
0x267c   :  { %v8381_v26 = vpack.c.bf16 %v8365_v11, %v8365_v11  ;;  %v10956_v11 = vor.u32 %v7915_v14, %v7914_v47 }
0x267d   :  { %v8382_v61 = vpack.c.bf16 %v8366_v37, %v8366_v37  ;;  %v8420_v37 = vld [vmem:[#allocation3 + $0x1b8] sm:$0xff] }
0x267f   :  { %8465 = vmatprep.mubr.bf16.mxu0 %v8382_v61  ;;  %v8112_v6 = vpop.f32.mrb[172].mxu0 }
0x2680   :  { %8466 = vmatmul.mubr.bf16.vlgmr.msra.gmra.mrb[200].mxu0 %v8381_v26  ;;  %v8114_v54 = vpop.f32.mrb[173].mxu0  ;;  %v8113_v1 = vadd.f32 %v8112_v6, %v7963_v25 }
0x2681   :  { %8474 = vmatpush1.bf16.xpose.msra.mxu0 %v8399_v30  ;;  %v8115_v3 = vadd.f32 %v8114_v54, %v7967_v40  ;;  %v8116_v28 = vpop.f32.mrb[174].mxu0  ;;  %v7979_v40 = vrot.slane %v10940_v41, %v10016_v45  ;;  %v7991_v30 = vrot.slane %v10956_v11, %v9907_v35 }
0x2682   :  { %v8117_v29 = vpop.f32.mrb[175].mxu0  ;;  %8475 = vmatprep.subr.bf16.mxu0 %v8416_v46  ;;  %v8367_v51 = vmax.f32 %v8113_v1, 0.0  ;;  %v8406_v28 = vld [vmem:[#allocation3 + $0x148] sm:$0xff] }
0x2683   :  { %v8368_v23 = vmax.f32 %v8115_v3, 0.0  ;;  %v8419_v3 = vld [vmem:[#allocation3 + $0x1b0] sm:$0xff] }
0x2684   :  { %v8383_v38 = vpack.c.bf16 %v8367_v51, %v8367_v51  ;;  %v8422_v51 = vld [vmem:[#allocation3 + $0x1c8] sm:$0xff] }
0x2685   :  { %v8384_v53 = vpack.c.bf16 %v8368_v23, %v8368_v23 }
0x2687   :  { %8505 = vmatprep.mubr.bf16.mxu0 %v8384_v53  ;;  %v8153_v27 = vpop.f32.mrb[176].mxu0 }
0x2688   :  { %v8155_v15 = vpop.f32.mrb[177].mxu0  ;;  %v8154_v5 = vadd.f32 %v8153_v27, %v7971_v18  ;;  %v8405_v27 = vld [vmem:[#allocation3 + $0x140] sm:$0xff]  ;;  %v8408_v18 = vld [vmem:[#allocation3 + $0x158] sm:$0xff] }
0x2689   :  { %8476 = vmatpush1.bf16.xpose.msra.mxu0 %v8415_v12  ;;  %v8156_v33 = vadd.f32 %v8155_v15, %v7975_v13  ;;  %v8157_v48 = vpop.f32.mrb[178].mxu0 }
0x268a   :  { %8513 = vmatprep.subr.bf16.mxu0 %v8402_v10  ;;  %v8158_v24 = vpop.f32.mrb[179].mxu0  ;;  %v8369_v31 = vmax.f32 %v8154_v5, 0.0  ;;  %v8011_v10 = vrot.slane %v10956_v11, %v10016_v45  ;;  %v8424_v5 = vld [vmem:[#allocation3 + $0x1d8] sm:$0xff] }
0x268b   :  { %v8370_v39 = vmax.f32 %v8156_v33, 0.0  ;;  %v7987_v33 = vrot.slane %v10956_v11, %v9877_v8 }
0x268c   :  { %v8385_v55 = vpack.c.bf16 %v8369_v31, %v8369_v31  ;;  %v8423_v31 = vld [vmem:[#allocation3 + $0x1d0] sm:$0xff] }
0x268d   :  { %v8386_v58 = vpack.c.bf16 %v8370_v39, %v8370_v39  ;;  %v7999_v39 = vrot.slane %v10956_v11, %v9983_v34 }
0x268f   :  { %v8194_v22 = vpop.f32.mrb[180].mxu0 }
0x2690   :  { %8506 = vmatmul.mubr.bf16.vlgmr.msra.gmra.mrb[200].mxu0 %v8383_v38  ;;  %v8196_v57 = vpop.f32.mrb[181].mxu0  ;;  %v8195_v25 = vadd.f32 %v8194_v22, %v7979_v40  ;;  %v8421_v22 = vld [vmem:[#allocation3 + $0x1c0] sm:$0xff]  ;;  %v8412_v40 = vld [vmem:[#allocation3 + $0x178] sm:$0xff] }
0x2691   :  { %8514 = vmatpush1.bf16.xpose.msra.mxu0 %v8401_v17  ;;  %8545 = vmatprep.mubr.bf16.mxu0 %v8386_v58  ;;  %v8198_v2 = vpop.f32.mrb[182].mxu0  ;;  %v8197_v32 = vadd.f32 %v8196_v57, %v7983_v7 }
0x2692   :  { %8515 = vmatprep.subr.bf16.mxu0 %v8418_v59  ;;  %v8199_v16 = vpop.f32.mrb[183].mxu0  ;;  %v8371_v23 = vmax.f32 %v8195_v25, 0.0  ;;  %v8411_v25 = vld [vmem:[#allocation3 + $0x170] sm:$0xff] }
0x2693   :  { %v8372_v44 = vmax.f32 %v8197_v32, 0.0  ;;  %v8407_v16 = vld [vmem:[#allocation3 + $0x150] sm:$0xff]  ;;  %v7995_v32 = vrot.slane %v10956_v11, %v9910_v36  ;;  %v8003_v36 = vrot.slane %v10956_v11, %v10013_v42 }
0x2694   :  { %v8387_v12 = vpack.c.bf16 %v8371_v23, %v8371_v23 }
0x2695   :  { %v8388_v50 = vpack.c.bf16 %v8372_v44, %v8372_v44 }
0x2697   :  { %v8235_v4 = vpop.f32.mrb[184].mxu0 }
0x2698   :  { %v8237_v43 = vpop.f32.mrb[185].mxu0  ;;  %v8236_v17 = vadd.f32 %v8235_v4, %v7987_v33 }
0x2699   :  { %8516 = vmatpush1.bf16.xpose.msra.mxu0 %v8417_v62  ;;  %v8239_v60 = vpop.f32.mrb[186].mxu0  ;;  %v8238_v54 = vadd.f32 %v8237_v43, %v7991_v30  ;;  %v8007_v62 = vrot.slane %v10956_v11, %v9992_v56  ;;  %v8410_v43 = vld [vmem:[#allocation3 + $0x168] sm:$0xff] }
0x269a   :  { %8553 = vmatprep.subr.bf16.mxu0 %v8404_v63  ;;  %v8240_v19 = vpop.f32.mrb[187].mxu0  ;;  %v8373_v57 = vmax.f32 %v8236_v17, 0.0 }
0x269b   :  { %v8374_v53 = vmax.f32 %v8238_v54, 0.0  ;;  %v8409_v19 = vld [vmem:[#allocation3 + $0x160] sm:$0xff]  ;;  %v8428_v54 = vld [vmem:[#allocation3 + $0x1f8] sm:$0xff] }
0x269c   :  { %v8389_v8 = vpack.c.bf16 %v8373_v57, %v8373_v57 }
0x269d   :  { %v8390_v35 = vpack.c.bf16 %v8374_v53, %v8374_v53 }
0x269f   :  { %v8276_v61 = vpop.f32.mrb[188].mxu0 }
0x26a0   :  { %8546 = vmatmul.mubr.bf16.vlgmr.msra.gmra.mrb[200].mxu0 %v8385_v55  ;;  %v8278_v26 = vpop.f32.mrb[189].mxu0  ;;  %v8277_v63 = vadd.f32 %v8276_v61, %v7995_v32  ;;  %v8426_v55 = vld [vmem:[#allocation3 + $0x1e8] sm:$0xff]  ;;  %v8425_v61 = vld [vmem:[#allocation3 + $0x1e0] sm:$0xff] }
0x26a1   :  { %8554 = vmatpush1.bf16.xpose.msra.mxu0 %v8403_v20  ;;  %8585 = vmatprep.mubr.bf16.mxu0 %v8388_v50  ;;  %v8280_v6 = vpop.f32.mrb[190].mxu0  ;;  %v8279_v59 = vadd.f32 %v8278_v26, %v7999_v39  ;;  %v8015_v50 = vrot.slane %v10956_v11, %v10019_v49 }
0x26a2   :  { %8555 = vmatprep.subr.bf16.mxu0 %v8420_v37  ;;  %v8281_v46 = vpop.f32.mrb[191].mxu0  ;;  %v8375_v44 = vmax.f32 %v8277_v63, 0.0 }
0x26a3   :  { %v8376_v7 = vmax.f32 %v8279_v59, 0.0  ;;  %v8775_v59 = vrot.slane %v10891_v52, %v10016_v45  ;;  %v9465_v45 = vld [vmem:[%s11037_s9 + $0x8] sm:$0xff]  }
0x26a4   :  { %v8391_v60 = vpack.c.bf16 %v8375_v44, %v8375_v44  ;;  %v8800_v44 = vrot.slane %v9882_v9, %v9983_v34 }
0x26a5   :  { %v8392_v2 = vpack.c.bf16 %v8376_v7, %v8376_v7 }
0x26a7   :  { %v8317_v29 = vpop.f32.mrb[192].mxu0 }
0x26a8   :  { %v8319_v1 = vpop.f32.mrb[193].mxu0  ;;  %v8318_v20 = vadd.f32 %v8317_v29, %v8003_v36  ;;  %v8432_v29 = vrot.slane %v10891_v52, %v9992_v56 }
0x26a9   :  { %8556 = vmatpush1.bf16.xpose.msra.mxu0 %v8419_v3  ;;  %v8321_v13 = vpop.f32.mrb[194].mxu0  ;;  %v8320_v4 = vadd.f32 %v8319_v1, %v8007_v62  ;;  %v8427_v3 = vld [vmem:[#allocation3 + $0x1f0] sm:$0xff] }
0x26aa   :  { %8593 = vmatprep.subr.bf16.mxu0 %v8406_v28  ;;  %v8322_v41 = vpop.f32.mrb[195].mxu0  ;;  %v8377_v26 = vmax.f32 %v8318_v20, 0.0 }
0x26ab   :  { %v8378_v47 = vmax.f32 %v8320_v4, 0.0 }
0x26ac   :  { %v8393_v6 = vpack.c.bf16 %v8377_v26, %v8377_v26 }
0x26ad   :  { %v8394_v14 = vpack.c.bf16 %v8378_v47, %v8378_v47 }
0x26af   :  { %v8358_v15 = vpop.f32.mrb[196].mxu0 }
0x26b0   :  { %8586 = vmatmul.mubr.bf16.vlgmr.msra.gmra.mrb[200].mxu0 %v8387_v12  ;;  %v10966_v48 = vadd.f32 %v8358_v15, %v8011_v10  ;;  %v8360_v24 = vpop.f32.mrb[197].mxu0 }
0x26b1   :  { %8594 = vmatpush1.bf16.xpose.msra.mxu0 %v8405_v27  ;;  %8625 = vmatprep.mubr.bf16.mxu0 %v8390_v35  ;;  %v8362_v38 = vpop.f32.mrb[198].mxu0  ;;  %v8361_v37 = vadd.f32 %v8360_v24, %v8015_v50 }
0x26b2   :  { %8595 = vmatprep.subr.bf16.mxu0 %v8422_v51  ;;  %v8363_v58 = vpop.f32.mrb[199].mxu0  ;;  %v8379_v11 = vmax.f32 %v10966_v48, 0.0 }
0x26b3   :  { %v8380_v30 = vmax.f32 %v8361_v37, 0.0 }
0x26b4   :  { %v8395_v28 = vpack.c.bf16 %v8379_v11, %v8379_v11 }
0x26b5   :  { %v8396_v46 = vpack.c.bf16 %v8380_v30, %v8380_v30 }
0x26b9   :  { %8596 = vmatpush1.bf16.xpose.msra.mxu0 %v8421_v22 }
0x26ba   :  { %8633 = vmatprep.subr.bf16.mxu0 %v8408_v18  ;;  %v8780_v18 = vrot.slane %v10891_v52, %v10019_v49 }
0x26c0   :  { %8626 = vmatmul.mubr.bf16.vlgmr.msra.gmra.mrb[200].mxu0 %v8389_v8 }
0x26c1   :  { %8634 = vmatpush1.bf16.xpose.msra.mxu0 %v8407_v16  ;;  %8665 = vmatprep.mubr.bf16.mxu0 %v8392_v2 }
0x26c2   :  { %8635 = vmatprep.subr.bf16.mxu0 %v8424_v5  ;;  %v9464_v5 = vld [vmem:[%s11037_s9] sm:$0xff]   ;;  %s9685_s9 = smov [#allocation14]  }
0x26c3   :  { %9173 = vmatpush3.bf16.msra.mxu1 %v9464_v5  ;;  %s8891_s5 = sshll.u32 %s9685_s9, 4  ;;  %s8892_s5 = int_to_ptr.vmem [resolvable:$true] %s8891_s5 }
0x26c4   :  { %9174 = vmatprep.subr.bf16.mxu1 %v9652_v0  ;;  %s9558_s30 = scalar_lea.vmem %s8892_s5, 32  ;;  %p9563_p5 = scmp.lt.s32.totalorder %s8892_s5, %s8892_s5 }
0x26c5   :  { %p9559_p4 = scmp.ne.s32.totalorder %s8892_s5, %s9558_s30  ;;  %p9564_p6 = scmp.lt.s32.totalorder %s9558_s30, %s9558_s30 }
0x26c7   :  { %9175 = vmatpush3.bf16.msra.mxu1 %v9465_v45  ;;  %p9565_p7 = por %p9564_p6, %p9563_p5 }
0x26c9   :  { %8636 = vmatpush1.bf16.xpose.msra.mxu0 %v8423_v31  ;;  %p9566_p8 = pnand %p9565_p7, %p9559_p4 }
0x26ca   :  { %8673 = vmatprep.subr.bf16.mxu0 %v8410_v43 }
0x26d0   :  { %8666 = vmatmul.mubr.bf16.vlgmr.msra.gmra.mrb[200].mxu0 %v8391_v60 }
0x26d1   :  { %8674 = vmatpush1.bf16.xpose.msra.mxu0 %v8409_v19  ;;  %8705 = vmatprep.mubr.bf16.mxu0 %v8394_v14  ;;  %v8805_v14 = vrot.slane %v9882_v9, %v10013_v42 }
0x26d2   :  { %8675 = vmatprep.subr.bf16.mxu0 %v8426_v55 }
0x26d9   :  { %8676 = vmatpush1.bf16.xpose.msra.mxu0 %v8425_v61 }
0x26da   :  { %8713 = vmatprep.subr.bf16.mxu0 %v8412_v40 }
0x26e0   :  { %8706 = vmatmul.mubr.bf16.vlgmr.msra.gmra.mrb[200].mxu0 %v8393_v6 }
0x26e1   :  { %8714 = vmatpush1.bf16.xpose.msra.mxu0 %v8411_v25  ;;  %8745 = vmatprep.mubr.bf16.mxu0 %v8396_v46 }
0x26e2   :  { %8715 = vmatprep.subr.bf16.mxu0 %v8428_v54 }
0x26e9   :  { %8716 = vmatpush1.bf16.xpose.msra.mxu0 %v8427_v3 }
0x26f0   :  { %8746 = vmatmul.mubr.bf16.vlgmr.msra.gmra.mrb[200].mxu0 %v8395_v28 }
0x27c3   :  { %v8747_v23 = vpop.f32.mrb[200].mxu0 }
0x27c4   :  { %v9185_v1 = vadd.f32 %v8747_v23, %v8432_v29  ;;  %v8749_v53 = vpop.f32.mrb[201].mxu0 }
0x27c5   :  { %v8750_v13 = vpop.f32.mrb[202].mxu0 }
0x27c6   :  { %v8754_v41 = vrot.slane %v9185_v1, 6  ;;  %v8751_v12 = vpop.f32.mrb[203].mxu0 }
0x27c8   :  { %v8756_v10 = vadd.f32 %v8754_v41, %v10907_v21 }
0x27ca   :  { %v8757_v35 = vsel %vm2480_vm4, %v8756_v10, 0.0  ;;  %v8761_v27 = vmul.f32 %v8756_v10, %v8756_v10 }
0x27cb   :  { %8758 = vadd.xlane.f32.xlu0 %v8757_v35 }
0x27cc   :  { %v8762_v51 = vsel %vm2480_vm4, %v8761_v27, 0.0 }
0x27cf   :  { %8763 = vadd.xlane.f32.xlu0 %v8762_v51 }
0x2858   :  { %v8759_v15 = vpop.xlane.xlu0 %8758 }
0x2859   :  { %v8760_v33 = vmul.f32 0.03125, %v8759_v15 }
0x285b   :  { %v8766_v24 = vmul.f32 %v8760_v33, %v8760_v33  ;;  %v8768_v17 = vsub.f32 %v8756_v10, %v8760_v33 }
0x285c   :  { %v8764_v48 = vpop.xlane.xlu0 %8763 }
0x285d   :  { %v8765_v39 = vmul.f32 0.03125, %v8764_v48 }
0x285f   :  { %v8767_v38 = vsub.f32 %v8765_v39, %v8766_v24 }
0x2861   :  { %v8769_v58 = vadd.f32 1e-05, %v8767_v38 }
0x2863   :  { %9466 = vrsqrt.f32 %v8769_v58 }
0x286d   :  { %v9467_v21 = vpop.eup %9466 }
0x286e   :  { %v8771_v22 = vmul.f32 %v9467_v21, %v8768_v17 }
0x2870   :  { %v8776_v57 = vmul.f32 %v8775_v59, %v8771_v22 }
0x2872   :  { %v8781_v7 = vadd.f32 %v8780_v18, %v8776_v57 }
0x2874   :  { %v8782_v8 = vsel %vm2480_vm4, %v8781_v7, 0.0  ;;  %v8786_v2 = vmul.f32 %v8781_v7, %v8781_v7 }
0x2875   :  { %8783 = vadd.xlane.f32.xlu1 %v8782_v8 }
0x2876   :  { %v8787_v16 = vsel %vm2480_vm4, %v8786_v2, 0.0 }
0x2879   :  { %8788 = vadd.xlane.f32.xlu1 %v8787_v16 }
0x2902   :  { %v8784_v49 = vpop.xlane.xlu1 %8783 }
0x2903   :  { %v8785_v52 = vmul.f32 0.03125, %v8784_v49 }
0x2905   :  { %v8791_v62 = vmul.f32 %v8785_v52, %v8785_v52  ;;  %v8793_v43 = vsub.f32 %v8781_v7, %v8785_v52 }
0x2906   :  { %v8789_v32 = vpop.xlane.xlu1 %8788 }
0x2907   :  { %v8790_v63 = vmul.f32 0.03125, %v8789_v32 }
0x2909   :  { %v8792_v4 = vsub.f32 %v8790_v63, %v8791_v62 }
0x290b   :  { %v8794_v31 = vadd.f32 1e-05, %v8792_v4 }
0x290d   :  { %9468 = vrsqrt.f32 %v8794_v31 }
0x2917   :  { %v9469_v47 = vpop.eup %9468 }
0x2918   :  { %v8796_v60 = vmul.f32 %v9469_v47, %v8793_v43 }
0x291a   :  { %v8801_v19 = vmul.f32 %v8800_v44, %v8796_v60 }
0x291c   :  { %v8806_v0 = vadd.f32 %v8805_v14, %v8801_v19 }
0x291e   :  { %v8811_v55 = vpack.c.bf16 %v8806_v0, %v8806_v0 }
0x2920   :  { %v8817_v36 = vrot.slane %v8811_v55, 1 }
0x2922   :  { %9177 = vmatmul.mubr.msk.bf16.vlgmr.msra.gmra.mrb[180].mxu1 %vm251_vm3, %v8817_v36 }
0x2923   :  { %9569 = shalt.err (!%p9566_p8)
}
0x2924   :  { %s9570_s15 = scalar_lea.hbm %s11042_s14, 32 }
0x2925   :  { %p9571_p9 = scmp.ne.s32.totalorder %s11042_s14, %s9570_s15  ;;  %p9574_p10 = scmp.lt.u32.totalorder %s9570_s15, %s11042_s14 }
0x2927   :  { %p9576_p11 = pnand %p9574_p10, %p9571_p9 }
0x2929   :  { %9579 = shalt.err (!%p9576_p11)
}
0x292a   :  { %8894 = dma.vmem_to_hbm [thread:$0]  %s8892_s5, 32, %s11042_s14, [#allocation15]   ;;  %v8815_v34 = vrot.slane %v9882_v9, %v9992_v56  ;;  %vm8873_vm5 = vcmask 58368  }
0x292b   :  { %s9686_s10 = smov [#allocation13]  }
0x292c   :  { %s8881_s28 = sshll.u32 %s9686_s10, 4  ;;  %s8882_s28 = int_to_ptr.vmem [resolvable:$true] %s8881_s28 }
0x292d   :  { %s9580_s19 = scalar_lea.vmem %s8882_s28, 32  ;;  %p9585_p13 = scmp.lt.s32.totalorder %s8882_s28, %s8882_s28 }
0x292e   :  { %p9581_p12 = scmp.ne.s32.totalorder %s8882_s28, %s9580_s19  ;;  %p9586_p0 = scmp.lt.s32.totalorder %s9580_s19, %s9580_s19 }
0x2930   :  { %p9587_p1 = por %p9586_p0, %p9585_p13 }
0x2932   :  { %p9588_p2 = pnand %p9587_p1, %p9581_p12 }
0x29f5   :  { %v8867_v42 = vpop.f32.mrb[180].mxu1 }
0x29f6   :  { %v8868_v50 = vadd.f32 %v8867_v42, %v8815_v34  ;;  %v9178_v20 = vpop.f32.mrb[181].mxu1 }
0x29f7   :  { %v8870_v37 = vpop.f32.mrb[182].mxu1 }
0x29f8   :  { %v9179_v61 = vpop.f32.mrb[183].mxu1  ;;  %8874 = vst.msk [vmem:[#allocation13] sm:$0x3] %vm8873_vm5, %v8868_v50 }
0x29f9   :  { %9591 = shalt.err (!%p9588_p2)
}
0x29fa   :  { %s9592_s1 = scalar_lea.hbm %s11041_s13, 32 }
0x29fb   :  { %p9593_p3 = scmp.ne.s32.totalorder %s11041_s13, %s9592_s1  ;;  %p9596_p4 = scmp.lt.u32.totalorder %s9592_s1, %s11041_s13 }
0x29fd   :  { %p9598_p5 = pnand %p9596_p4, %p9593_p3 }
0x29ff   :  { %9601 = shalt.err (!%p9598_p5)
}
0x2a00   :  { %8884 = dma.vmem_to_hbm [thread:$0]  %s8882_s28, 32, %s11041_s13, [#allocation7]  }
0x2a01   :  { %9640 = dma.done.wait [#allocation7], 32  }
0x2a02   :  { %9641 = vsyncadd [#allocation7], 4294967264 }
0x2a03   :  { %9642 = dma.done.wait [#allocation15], 32  }
0x2a04   :  { %9643 = vsyncadd [#allocation15], 4294967264 }
0x2a05   :  { %8901 = vsyncpa [#allocation6], 1 }
0x2a06   :  { %8902 = vsyncpa [#allocation9], 1 }
0x2a07   :  { %8903 = vsyncpa [#allocation12], 1 }
0x2a08   :  { %8904 = vsyncpa [#allocation7], 1 }
0x2a09   :  { %8905 = vsyncpa [#allocation15], 1 }
0x2a0a   :  { %8906 = vsyncmov [#allocation4] }
0x2a0d   :  { %s8907_s12 = vpop.sfrf %8906 }
0x2a0e   :  { %p9069_p6 = scmp.ne.s32.totalorder %s8907_s12, 0 }
0x2a10   :  { %8911 = shalt.err (%p9069_p6)  }
0x2a11   :  { %8913 = vsyncmov [#allocation4 + $0x1] }
0x2a14   :  { %s8914_s25 = vpop.sfrf %8913 }
0x2a15   :  { %p9070_p7 = scmp.ne.s32.totalorder %s8914_s25, 0 }
0x2a17   :  { %8918 = shalt.err (%p9070_p7)  }
0x2a18   :  { %8920 = vsyncmov [#allocation4 + $0x2] }
0x2a1b   :  { %s8921_s8 = vpop.sfrf %8920 }
0x2a1c   :  { %p9071_p8 = scmp.ne.s32.totalorder %s8921_s8, 0 }
0x2a1e   :  { %8925 = shalt.err (%p9071_p8)  }
0x2a1f   :  { %8927 = vsyncmov [#allocation4 + $0x3] }
0x2a22   :  { %s8928_s13 = vpop.sfrf %8927 }
0x2a23   :  { %p9072_p9 = scmp.ne.s32.totalorder %s8928_s13, 0 }
0x2a25   :  { %8932 = shalt.err (%p9072_p9)  }

</bundles_post_ra>
